<compile_context>
chip_gen: v7x
topology: tpu7x:2x2x1
jax: 0.10.0
libtpu: 0.0.40
codegen_flags: <defaults>
</compile_context>

<pallas_src>
import functools
from types import SimpleNamespace

import numpy as np
import jax
import jax.numpy as jnp
from jax.experimental import pallas as pl
from jax.experimental.pallas import tpu as pltpu

EPS = 1e-5


# ---------------------------------------------------------------------------
# Config
# ---------------------------------------------------------------------------
def make_cfg(image_size, image_channel, class_num, batch):
    K = 5
    nf = 16
    H1 = (image_size + 2 * 1 - K) // 2 + 1          # conv  s2 p1
    H2 = (H1 + 2 * 1 - K) // 2 + 1                  # conv  s2 p1
    H3 = (H2 - 1) * 2 - 2 * 1 + K + 1               # convT s2 p1 op1
    H4 = (H3 - 1) * 2 - 2 * 1 + K + 1               # convT s2 p1 op1
    lin_in = class_num * (((image_size - K) // 2 - 1) // 2 * 4 + 10) ** 2
    assert lin_in == class_num * H4 * H4, (lin_in, class_num * H4 * H4)
    pad8 = lambda n: ((n + 7) // 8) * 8
    # rows per block = (Cout * B) padded to a sublane multiple
    r1, r2, r3, r4 = (pad8(c * batch) for c in (nf, 2 * nf, nf, class_num))
    return SimpleNamespace(
        K=K, B=batch, c0=image_channel, c1=nf, c2=2 * nf, c3=nf, cn=class_num,
        H1=H1, H2=H2, H3=H3, H4=H4,
        r1=r1, r2=r2, r3=r3, r4=r4, rmax=max(r1, r2, r3, r4), lin_in=lin_in)


# ---------------------------------------------------------------------------
# Batch-free 0/1 spatial gather matrices (built once from shapes, in numpy)
#   G[t, p_in, m_out] = 1  iff input spatial p_in feeds tap t of output m_out.
# ---------------------------------------------------------------------------
def _conv_gather_np(Hin, Hout, K, stride, pad):
    G = np.zeros((K * K, Hin * Hin, Hout * Hout), np.float32)
    for kh in range(K):
        for kw in range(K):
            t = kh * K + kw
            for oh in range(Hout):
                ih = stride * oh + kh - pad
                if not 0 <= ih < Hin:
                    continue
                for ow in range(Hout):
                    iw = stride * ow + kw - pad
                    if not 0 <= iw < Hin:
                        continue
                    G[t, ih * Hin + iw, oh * Hout + ow] = 1.0
    return G


def _convT_gather_np(Hin, Hout, K, stride, pad):
    # Equivalent stride-1 conv on the zero-dilated, (K-1-pad)-padded input,
    # with spatially flipped weights (flip is baked into the weight pack).
    lo = K - 1 - pad
    G = np.zeros((K * K, Hin * Hin, Hout * Hout), np.float32)
    for kh in range(K):
        for kw in range(K):
            t = kh * K + kw
            for oh in range(Hout):
                dh = oh + kh - lo
                if dh < 0 or dh % stride != 0 or dh // stride >= Hin:
                    continue
                ih = dh // stride
                for ow in range(Hout):
                    dw = ow + kw - lo
                    if dw < 0 or dw % stride != 0 or dw // stride >= Hin:
                        continue
                    iw = dw // stride
                    G[t, ih * Hin + iw, oh * Hout + ow] = 1.0
    return G


# ---------------------------------------------------------------------------
# Fused Pallas kernel
# ---------------------------------------------------------------------------
def make_kernel(cfg):
    K, B = cfg.K, cfg.B
    KK = K * K

    def conv_taps(x, ws_ref, gg_ref, rows):
        # Channel contraction for all K*K taps at once (one f32 matmul against
        # the Kron(w_t, I_B)-stacked weights), then one small bf16 MXU dot per
        # tap against its batch-free 0/1 spatial gather matrix.
        a = jnp.dot(ws_ref[...], x, preferred_element_type=jnp.float32)
        acc = None
        for t in range(KK):
            a_t = a[t * rows:(t + 1) * rows, :].astype(jnp.bfloat16)
            contrib = jnp.dot(a_t, gg_ref[t],
                              preferred_element_type=jnp.float32)
            acc = contrib if acc is None else acc + contrib
        return acc

    def bn_relu(y, gsum_ref, g_ref, be_ref, rows, n_spatial):
        # training-mode BatchNorm over (batch, spatial) per channel; rows are
        # (channel, batch) pairs, gsum is a block-diagonal ones matrix that
        # sums + broadcasts the per-row stats within each channel group.
        # One-pass statistics; the conv bias is omitted (BN cancels it).
        gs = gsum_ref[:rows, :rows]
        inv_n = 1.0 / float(B * n_spatial)
        rsum = jnp.sum(y, axis=1, keepdims=True)
        rsq = jnp.sum(y * y, axis=1, keepdims=True)
        mean = jnp.dot(gs, rsum, preferred_element_type=jnp.float32) * inv_n
        ex2 = jnp.dot(gs, rsq, preferred_element_type=jnp.float32) * inv_n
        var = ex2 - mean * mean
        yn = (y - mean) * jax.lax.rsqrt(var + EPS)
        return jnp.maximum(yn * g_ref[...] + be_ref[...], 0.0)

    def kernel(p1_ref, w1_ref, g1_ref, be1_ref,
               ws2_ref, gg2_ref, g2_ref, be2_ref,
               ws3_ref, gg3_ref, g3_ref, be3_ref,
               ws4_ref, gg4_ref, g4_ref, be4_ref,
               gsum_ref, w1l_ref, lb1_ref, w2l_ref, lb2_ref,
               out_ref):
        # block 1: Conv(c0->c1, s2, p1) + BN + ReLU (patches precomputed)
        y1 = jnp.dot(w1_ref[...], p1_ref[...],
                     preferred_element_type=jnp.float32)
        x1 = bn_relu(y1, gsum_ref, g1_ref, be1_ref, cfg.r1, cfg.H1 * cfg.H1)
        # block 2: Conv(c1->c2, s2, p1) + BN + ReLU
        x2 = bn_relu(conv_taps(x1, ws2_ref, gg2_ref, cfg.r2),
                     gsum_ref, g2_ref, be2_ref, cfg.r2, cfg.H2 * cfg.H2)
        # block 3: ConvT(c2->c3, s2, p1, op1) + BN + ReLU
        x3 = bn_relu(conv_taps(x2, ws3_ref, gg3_ref, cfg.r3),
                     gsum_ref, g3_ref, be3_ref, cfg.r3, cfg.H3 * cfg.H3)
        # block 4: ConvT(c3->cn, s2, p1, op1) + BN + ReLU (padded channel rows
        # have zero weight/gamma/beta and stay exactly zero)
        x4 = bn_relu(conv_taps(x3, ws4_ref, gg4_ref, cfg.r4),
                     gsum_ref, g4_ref, be4_ref, cfg.r4, cfg.H4 * cfg.H4)

        # flatten (torch NCHW .view) + Linear(60) + ReLU + Linear(cn),
        # computed transposed: h1 = flat @ W1^T of shape (B, 60), so the
        # kernel writes the torch (B, cn) layout directly.
        hacc = None
        for c in range(cfg.cn):
            xc = x4[c * B:(c + 1) * B, :]                        # (B, H4*H4)
            term = jnp.dot(xc, w1l_ref[c],
                           preferred_element_type=jnp.float32)   # (B, 60)
            hacc = term if hacc is None else hacc + term
        h1 = jnp.maximum(hacc + lb1_ref[...], 0.0)
        out_ref[...] = (jnp.dot(h1, w2l_ref[...],
                                preferred_element_type=jnp.float32)
                        + lb2_ref[...])

    return kernel


# ---------------------------------------------------------------------------
# Parameter prepacking (done once, outside the per-step forward)
# ---------------------------------------------------------------------------
def prepack_params(p, cfg):
    K, B = cfg.K, cfg.B
    KK = K * K
    eyeB = np.eye(B, dtype=np.float32)

    def col_rows(v, c, rows):
        # per-channel vector -> (rows, 1) column, repeated over batch, padded
        out = np.zeros((rows, 1), np.float32)
        out[:c * B, 0] = np.repeat(np.asarray(v, np.float32), B)
        return jnp.asarray(out)

    def pack_taps(w_taps, cout, cin, r_out, r_in):
        # w_taps: (KK, cout, cin) -> (KK*r_out, r_in), Kron(w_t, I_B) per tap
        out = np.zeros((KK * r_out, r_in), np.float32)
        for t in range(KK):
            out[t * r_out:t * r_out + cout * B, :cin * B] = np.kron(
                np.asarray(w_taps[t], np.float32), eyeB)
        return jnp.asarray(out)

    # block 1: Conv weight as Kron over batch, patch order (ci, kh, kw)
    w1flat = np.asarray(p["w1"], np.float32).reshape(cfg.c1, cfg.c0 * KK)
    w1K = np.zeros((cfg.r1, cfg.c0 * KK * B), np.float32)
    w1K[:cfg.c1 * B] = np.kron(w1flat, eyeB)
    # block 2: weights tap-major, rows (kh, kw, co, b), cols (ci, b)
    w2t = np.asarray(p["w2"], np.float32).transpose(2, 3, 0, 1).reshape(
        KK, cfg.c2, cfg.c1)
    ws2 = pack_taps(w2t, cfg.c2, cfg.c1, cfg.r2, cfg.r1)
    # blocks 3/4: ConvTranspose -> equivalent stride-1 conv weight
    #   w_eq[co, ci, kh, kw] = w[ci, co, K-1-kh, K-1-kw]
    w3eq = np.flip(np.asarray(p["w3"], np.float32), (2, 3)).transpose(
        2, 3, 1, 0).reshape(KK, cfg.c3, cfg.c2)
    ws3 = pack_taps(w3eq, cfg.c3, cfg.c2, cfg.r3, cfg.r2)
    w4eq = np.flip(np.asarray(p["w4"], np.float32), (2, 3)).transpose(
        2, 3, 1, 0).reshape(KK, cfg.cn, cfg.c3)
    ws4 = pack_taps(w4eq, cfg.cn, cfg.c3, cfg.r4, cfg.r3)
    # batch-free 0/1 spatial gather stacks, stored bf16 (exact for 0/1)
    gg2 = jnp.asarray(_conv_gather_np(cfg.H1, cfg.H2, K, 2, 1), jnp.bfloat16)
    gg3 = jnp.asarray(_convT_gather_np(cfg.H2, cfg.H3, K, 2, 1), jnp.bfloat16)
    gg4 = jnp.asarray(_convT_gather_np(cfg.H3, cfg.H4, K, 2, 1), jnp.bfloat16)
    # BN channel-group sum matrix (block-diagonal ones); top-left slices are
    # used for the smaller blocks (the pattern is prefix-consistent).
    ridx = np.arange(cfg.rmax)
    gsum = jnp.asarray(
        (ridx[:, None] // B == ridx[None, :] // B).astype(np.float32))
    # MLP head: W1 regrouped per input channel (no batch tiling), transposed
    H4sq = cfg.H4 * cfg.H4
    w1l = jnp.asarray(np.asarray(p["lw1"], np.float32)
                      .reshape(60, cfg.cn, H4sq).transpose(1, 2, 0))
    lb1 = jnp.asarray(np.asarray(p["lb1"], np.float32).reshape(1, 60))
    lw2t = jnp.asarray(np.asarray(p["lw2"], np.float32).T)
    lb2 = jnp.asarray(np.asarray(p["lb2"], np.float32).reshape(1, cfg.cn))
    return (jnp.asarray(w1K),
            col_rows(p["g1"], cfg.c1, cfg.r1), col_rows(p["bn_b1"], cfg.c1, cfg.r1),
            ws2, gg2,
            col_rows(p["g2"], cfg.c2, cfg.r2), col_rows(p["bn_b2"], cfg.c2, cfg.r2),
            ws3, gg3,
            col_rows(p["g3"], cfg.c3, cfg.r3), col_rows(p["bn_b3"], cfg.c3, cfg.r3),
            ws4, gg4,
            col_rows(p["g4"], cfg.cn, cfg.r4), col_rows(p["bn_b4"], cfg.cn, cfg.r4),
            gsum, w1l, lb1, lw2t, lb2)


# ---------------------------------------------------------------------------
# im2col for block 1 in the channel/batch-folded layout (tiny XLA wrapper op)
# ---------------------------------------------------------------------------
def _patches_cb(x, cfg):
    # rows = (ci, kh, kw, b), cols = output spatial position (oh*H1 + ow)
    K, B, C, Ho = cfg.K, cfg.B, cfg.c0, cfg.H1
    xp = jnp.pad(x, ((0, 0), (0, 0), (1, 1), (1, 1)))
    cols = []
    for kh in range(K):
        for kw in range(K):
            cols.append(xp[:, :, kh:kh + 2 * Ho:2, kw:kw + 2 * Ho:2])
    cols = jnp.stack(cols, axis=0).reshape(K, K, B, C, Ho, Ho)
    return cols.transpose(3, 0, 1, 2, 4, 5).reshape(C * K * K * B, Ho * Ho)


def build_forward(cfg):
    kernel = make_kernel(cfg)
    vmem = functools.partial(pl.BlockSpec, memory_space=pltpu.MemorySpace.VMEM)
    call = pl.pallas_call(
        kernel,
        out_shape=jax.ShapeDtypeStruct((cfg.B, cfg.cn), jnp.float32),
        in_specs=[vmem() for _ in range(21)],
        out_specs=vmem(),
        compiler_params=pltpu.CompilerParams(
            vmem_limit_bytes=16 * 1024 * 1024),
    )

    @jax.jit
    def forward(x, packed):
        p1 = _patches_cb(x, cfg)              # (c0*K*K*B, H1^2)
        return call(p1, *packed)              # (B, cn) = torch layout
    return forward


# ---------------------------------------------------------------------------
# Parameters (same init as before) and pure-JAX reference (no Pallas)
# ---------------------------------------------------------------------------
def init_params(key, image_size, image_channel, class_num):
    K, nf = 5, 16
    lin_in = class_num * (((image_size - K) // 2 - 1) // 2 * 4 + 10) ** 2

    def uniform(k, shape, fan_in):
        bound = 1.0 / jnp.sqrt(jnp.float32(fan_in))
        return jax.random.uniform(k, shape, jnp.float32, -bound, bound)

    ks = jax.random.split(key, 20)
    p = {}
    p["w1"] = uniform(ks[0], (nf, image_channel, K, K), image_channel * K * K)
    p["b1"] = uniform(ks[1], (nf,), image_channel * K * K)
    p["w2"] = uniform(ks[2], (2 * nf, nf, K, K), nf * K * K)
    p["b2"] = uniform(ks[3], (2 * nf,), nf * K * K)
    p["w3"] = uniform(ks[4], (2 * nf, nf, K, K), nf * K * K)      # (Cin,Cout,K,K)
    p["b3"] = uniform(ks[5], (nf,), nf * K * K)
    p["w4"] = uniform(ks[6], (nf, class_num, K, K), class_num * K * K)
    p["b4"] = uniform(ks[7], (class_num,), class_num * K * K)
    for i, c in zip(range(1, 5), (nf, 2 * nf, nf, class_num)):
        p[f"g{i}"] = 1.0 + 0.1 * jax.random.normal(ks[7 + i], (c,), jnp.float32)
        p[f"bn_b{i}"] = 0.1 * jax.random.normal(ks[11 + i], (c,), jnp.float32)
    p["lw1"] = uniform(ks[16], (60, lin_in), lin_in)
    p["lb1"] = uniform(ks[17], (60,), lin_in)
    p["lw2"] = uniform(ks[18], (class_num, 60), 60)
    p["lb2"] = uniform(ks[19], (class_num,), 60)
    return p


def _im2col(x, K, stride, padding):
    B, C, H, W = x.shape
    xp = jnp.pad(x, ((0, 0), (0, 0), (padding, padding), (padding, padding)))
    Ho = (H + 2 * padding - K) // stride + 1
    Wo = (W + 2 * padding - K) // stride + 1
    cols = []
    for kh in range(K):
        for kw in range(K):
            cols.append(xp[:, :, kh:kh + stride * Ho:stride,
                           kw:kw + stride * Wo:stride])
    cols = jnp.stack(cols, axis=0).reshape(K, K, B, C, Ho, Wo)
    cols = cols.transpose(2, 4, 5, 3, 0, 1).reshape(B * Ho * Wo, C * K * K)
    return cols, Ho, Wo


def _conv_block_ref(x, w, b, g, beta, stride, padding):
    B = x.shape[0]
    Cout, _, K, _ = w.shape
    pat, Ho, Wo = _im2col(x, K, stride, padding)
    y = pat @ w.reshape(Cout, -1).T + b[None, :]
    m = jnp.mean(y, 0, keepdims=True)
    v = jnp.mean(jnp.square(y - m), 0, keepdims=True)
    y = (y - m) * jax.lax.rsqrt(v + EPS) * g[None, :] + beta[None, :]
    y = jnp.maximum(y, 0.0)
    return y.reshape(B, Ho, Wo, Cout).transpose(0, 3, 1, 2)


def _convT_block_ref(x, w, b, g, beta, stride, padding, output_padding):
    B, Cin, H, W = x.shape
    _, Cout, K, _ = w.shape
    Hd, Wd = (H - 1) * stride + 1, (W - 1) * stride + 1
    xd = jnp.zeros((B, Cin, Hd, Wd), x.dtype).at[:, :, ::stride, ::stride].set(x)
    lo = K - 1 - padding
    hi = lo + output_padding
    xp = jnp.pad(xd, ((0, 0), (0, 0), (lo, hi), (lo, hi)))
    w_eq = jnp.flip(w, (2, 3)).transpose(1, 0, 2, 3)
    return _conv_block_ref(xp, w_eq, b, g, beta, 1, 0)


@jax.jit
def reference_forward(x, p):
    o = _conv_block_ref(x, p["w1"], p["b1"], p["g1"], p["bn_b1"], 2, 1)
    o = _conv_block_ref(o, p["w2"], p["b2"], p["g2"], p["bn_b2"], 2, 1)
    o = _convT_block_ref(o, p["w3"], p["b3"], p["g3"], p["bn_b3"], 2, 1, 1)
    o = _convT_block_ref(o, p["w4"], p["b4"], p["g4"], p["bn_b4"], 2, 1, 1)
    flat = o.reshape(o.shape[0], -1)
    h = jnp.maximum(flat @ p["lw1"].T + p["lb1"], 0.0)
    return h @ p["lw2"].T + p["lb2"]


# ---------------------------------------------------------------------------
if __name__ == "__main__":
    image_size, image_channel, class_num, batch = 16, 4, 4, 2

    key = jax.random.PRNGKey(0)
    k_x, k_p = jax.random.split(key)
    x = jax.random.normal(k_x, (batch, image_channel, image_size, image_size),
                          jnp.float32)
    params = init_params(k_p, image_size, image_channel, class_num)

    cfg = make_cfg(image_size, image_channel, class_num, batch)
    packed = prepack_params(params, cfg)
    forward = build_forward(cfg)

    out = jax.block_until_ready(forward(x, packed))

    assert out.shape == (batch, class_num), out.shape
    assert bool(jnp.all(jnp.isfinite(out)))
    ref = jax.block_until_ready(reference_forward(x, params))
    np.testing.assert_allclose(np.asarray(out), np.asarray(ref),
                               rtol=2e-2, atol=2e-2)
    print("KERNEL_OK")
</pallas_src>

<mosaic_0001>
module attributes {stable_mosaic.version = 11 : i64} {
  func.func @kernel(%arg0: memref<200x49xf32, #tpu.memory_space<vmem>>, %arg1: memref<32x200xf32, #tpu.memory_space<vmem>>, %arg2: memref<32x1xf32, #tpu.memory_space<vmem>>, %arg3: memref<32x1xf32, #tpu.memory_space<vmem>>, %arg4: memref<1600x32xf32, #tpu.memory_space<vmem>>, %arg5: memref<25x49x9xbf16, #tpu.memory_space<vmem>>, %arg6: memref<64x1xf32, #tpu.memory_space<vmem>>, %arg7: memref<64x1xf32, #tpu.memory_space<vmem>>, %arg8: memref<800x64xf32, #tpu.memory_space<vmem>>, %arg9: memref<25x9x64xbf16, #tpu.memory_space<vmem>>, %arg10: memref<32x1xf32, #tpu.memory_space<vmem>>, %arg11: memref<32x1xf32, #tpu.memory_space<vmem>>, %arg12: memref<200x32xf32, #tpu.memory_space<vmem>>, %arg13: memref<25x64x324xbf16, #tpu.memory_space<vmem>>, %arg14: memref<8x1xf32, #tpu.memory_space<vmem>>, %arg15: memref<8x1xf32, #tpu.memory_space<vmem>>, %arg16: memref<64x64xf32, #tpu.memory_space<vmem>>, %arg17: memref<4x324x60xf32, #tpu.memory_space<vmem>>, %arg18: memref<1x60xf32, #tpu.memory_space<vmem>>, %arg19: memref<60x4xf32, #tpu.memory_space<vmem>>, %arg20: memref<1x4xf32, #tpu.memory_space<vmem>>, %arg21: memref<2x4xf32, #tpu.memory_space<vmem>>) attributes {dimension_semantics = [], scalar_prefetch = 0 : i64, scratch_operands = 0 : i64, tpu.core_type = #tpu.core_type<tc>} {
    %c0 = arith.constant 0 : index
    %c0_0 = arith.constant 0 : index
    %0 = vector.load %arg1[%c0, %c0_0] : memref<32x200xf32, #tpu.memory_space<vmem>>, vector<32x200xf32>
    %c0_1 = arith.constant 0 : index
    %c0_2 = arith.constant 0 : index
    %1 = vector.load %arg0[%c0_1, %c0_2] : memref<200x49xf32, #tpu.memory_space<vmem>>, vector<200x49xf32>
    %cst = arith.constant dense<0.000000e+00> : vector<32x49xf32>
    %2 = tpu.matmul %0, %1, %cst {dimension_numbers = #tpu.dot_dimension_numbers<[1], [0], [0], [1], [0, 0, 1, 1], [], []>} : vector<32x200xf32>, vector<200x49xf32>, vector<32x49xf32> -> vector<32x49xf32>
    %c0_3 = arith.constant 0 : index
    %c0_4 = arith.constant 0 : index
    %3 = vector.load %arg16[%c0_3, %c0_4] : memref<64x64xf32, #tpu.memory_space<vmem>>, vector<32x32xf32>
    %cst_5 = arith.constant dense<0.000000e+00> : vector<32xf32>
    %4 = vector.multi_reduction <add>, %2, %cst_5 [1] : vector<32x49xf32> to vector<32xf32>
    %5 = vector.shape_cast %4 : vector<32xf32> to vector<32x1xf32>
    %6 = arith.mulf %2, %2 : vector<32x49xf32>
    %cst_6 = arith.constant dense<0.000000e+00> : vector<32xf32>
    %7 = vector.multi_reduction <add>, %6, %cst_6 [1] : vector<32x49xf32> to vector<32xf32>
    %8 = vector.shape_cast %7 : vector<32xf32> to vector<32x1xf32>
    %cst_7 = arith.constant dense<0.000000e+00> : vector<32x1xf32>
    %9 = tpu.matmul %3, %5, %cst_7 {dimension_numbers = #tpu.dot_dimension_numbers<[1], [0], [0], [1], [0, 0, 1, 1], [], []>} : vector<32x32xf32>, vector<32x1xf32>, vector<32x1xf32> -> vector<32x1xf32>
    %cst_8 = arith.constant 0.0102040814 : f32
    %10 = vector.broadcast %cst_8 : f32 to vector<32x1xf32>
    %11 = arith.mulf %9, %10 : vector<32x1xf32>
    %cst_9 = arith.constant dense<0.000000e+00> : vector<32x1xf32>
    %12 = tpu.matmul %3, %8, %cst_9 {dimension_numbers = #tpu.dot_dimension_numbers<[1], [0], [0], [1], [0, 0, 1, 1], [], []>} : vector<32x32xf32>, vector<32x1xf32>, vector<32x1xf32> -> vector<32x1xf32>
    %cst_10 = arith.constant 0.0102040814 : f32
    %13 = vector.broadcast %cst_10 : f32 to vector<32x1xf32>
    %14 = arith.mulf %12, %13 : vector<32x1xf32>
    %15 = arith.mulf %11, %11 : vector<32x1xf32>
    %16 = arith.subf %14, %15 : vector<32x1xf32>
    %17 = vector.broadcast %11 : vector<32x1xf32> to vector<32x49xf32>
    %18 = arith.subf %2, %17 : vector<32x49xf32>
    %cst_11 = arith.constant 9.99999974E-6 : f32
    %19 = vector.broadcast %cst_11 : f32 to vector<32x1xf32>
    %20 = arith.addf %16, %19 : vector<32x1xf32>
    %21 = math.rsqrt %20 : vector<32x1xf32>
    %22 = vector.broadcast %21 : vector<32x1xf32> to vector<32x49xf32>
    %23 = arith.mulf %18, %22 : vector<32x49xf32>
    %c0_12 = arith.constant 0 : index
    %c0_13 = arith.constant 0 : index
    %24 = vector.load %arg2[%c0_12, %c0_13] : memref<32x1xf32, #tpu.memory_space<vmem>>, vector<32x1xf32>
    %25 = vector.broadcast %24 : vector<32x1xf32> to vector<32x49xf32>
    %26 = arith.mulf %23, %25 : vector<32x49xf32>
    %c0_14 = arith.constant 0 : index
    %c0_15 = arith.constant 0 : index
    %27 = vector.load %arg3[%c0_14, %c0_15] : memref<32x1xf32, #tpu.memory_space<vmem>>, vector<32x1xf32>
    %28 = vector.broadcast %27 : vector<32x1xf32> to vector<32x49xf32>
    %29 = arith.addf %26, %28 : vector<32x49xf32>
    %cst_16 = arith.constant 0.000000e+00 : f32
    %30 = vector.broadcast %cst_16 : f32 to vector<32x49xf32>
    %31 = arith.maximumf %29, %30 : vector<32x49xf32>
    %c0_17 = arith.constant 0 : index
    %c0_18 = arith.constant 0 : index
    %32 = vector.load %arg4[%c0_17, %c0_18] : memref<1600x32xf32, #tpu.memory_space<vmem>>, vector<1600x32xf32>
    %cst_19 = arith.constant dense<0.000000e+00> : vector<1600x49xf32>
    %33 = tpu.matmul %32, %31, %cst_19 {dimension_numbers = #tpu.dot_dimension_numbers<[1], [0], [0], [1], [0, 0, 1, 1], [], []>} : vector<1600x32xf32>, vector<32x49xf32>, vector<1600x49xf32> -> vector<1600x49xf32>
    %34 = vector.extract_strided_slice %33 {offsets = [0, 0], sizes = [64, 49], strides = [1, 1]} : vector<1600x49xf32> to vector<64x49xf32>
    %35 = arith.truncf %34 : vector<64x49xf32> to vector<64x49xbf16>
    %c0_20 = arith.constant 0 : index
    %c0_21 = arith.constant 0 : index
    %c0_22 = arith.constant 0 : index
    %36 = vector.load %arg5[%c0_20, %c0_21, %c0_22] : memref<25x49x9xbf16, #tpu.memory_space<vmem>>, vector<1x49x9xbf16>
    %37 = vector.shape_cast %36 : vector<1x49x9xbf16> to vector<49x9xbf16>
    %cst_23 = arith.constant dense<0.000000e+00> : vector<64x9xf32>
    %38 = tpu.matmul %35, %37, %cst_23 {dimension_numbers = #tpu.dot_dimension_numbers<[1], [0], [0], [1], [0, 0, 1, 1], [], []>} : vector<64x49xbf16>, vector<49x9xbf16>, vector<64x9xf32> -> vector<64x9xf32>
    %39 = vector.extract_strided_slice %33 {offsets = [64, 0], sizes = [64, 49], strides = [1, 1]} : vector<1600x49xf32> to vector<64x49xf32>
    %40 = arith.truncf %39 : vector<64x49xf32> to vector<64x49xbf16>
    %c1 = arith.constant 1 : index
    %c0_24 = arith.constant 0 : index
    %c0_25 = arith.constant 0 : index
    %41 = vector.load %arg5[%c1, %c0_24, %c0_25] : memref<25x49x9xbf16, #tpu.memory_space<vmem>>, vector<1x49x9xbf16>
    %42 = vector.shape_cast %41 : vector<1x49x9xbf16> to vector<49x9xbf16>
    %cst_26 = arith.constant dense<0.000000e+00> : vector<64x9xf32>
    %43 = tpu.matmul %40, %42, %cst_26 {dimension_numbers = #tpu.dot_dimension_numbers<[1], [0], [0], [1], [0, 0, 1, 1], [], []>} : vector<64x49xbf16>, vector<49x9xbf16>, vector<64x9xf32> -> vector<64x9xf32>
    %44 = arith.addf %38, %43 : vector<64x9xf32>
    %45 = vector.extract_strided_slice %33 {offsets = [128, 0], sizes = [64, 49], strides = [1, 1]} : vector<1600x49xf32> to vector<64x49xf32>
    %46 = arith.truncf %45 : vector<64x49xf32> to vector<64x49xbf16>
    %c2 = arith.constant 2 : index
    %c0_27 = arith.constant 0 : index
    %c0_28 = arith.constant 0 : index
    %47 = vector.load %arg5[%c2, %c0_27, %c0_28] : memref<25x49x9xbf16, #tpu.memory_space<vmem>>, vector<1x49x9xbf16>
    %48 = vector.shape_cast %47 : vector<1x49x9xbf16> to vector<49x9xbf16>
    %cst_29 = arith.constant dense<0.000000e+00> : vector<64x9xf32>
    %49 = tpu.matmul %46, %48, %cst_29 {dimension_numbers = #tpu.dot_dimension_numbers<[1], [0], [0], [1], [0, 0, 1, 1], [], []>} : vector<64x49xbf16>, vector<49x9xbf16>, vector<64x9xf32> -> vector<64x9xf32>
    %50 = arith.addf %44, %49 : vector<64x9xf32>
    %51 = vector.extract_strided_slice %33 {offsets = [192, 0], sizes = [64, 49], strides = [1, 1]} : vector<1600x49xf32> to vector<64x49xf32>
    %52 = arith.truncf %51 : vector<64x49xf32> to vector<64x49xbf16>
    %c3 = arith.constant 3 : index
    %c0_30 = arith.constant 0 : index
    %c0_31 = arith.constant 0 : index
    %53 = vector.load %arg5[%c3, %c0_30, %c0_31] : memref<25x49x9xbf16, #tpu.memory_space<vmem>>, vector<1x49x9xbf16>
    %54 = vector.shape_cast %53 : vector<1x49x9xbf16> to vector<49x9xbf16>
    %cst_32 = arith.constant dense<0.000000e+00> : vector<64x9xf32>
    %55 = tpu.matmul %52, %54, %cst_32 {dimension_numbers = #tpu.dot_dimension_numbers<[1], [0], [0], [1], [0, 0, 1, 1], [], []>} : vector<64x49xbf16>, vector<49x9xbf16>, vector<64x9xf32> -> vector<64x9xf32>
    %56 = arith.addf %50, %55 : vector<64x9xf32>
    %57 = vector.extract_strided_slice %33 {offsets = [256, 0], sizes = [64, 49], strides = [1, 1]} : vector<1600x49xf32> to vector<64x49xf32>
    %58 = arith.truncf %57 : vector<64x49xf32> to vector<64x49xbf16>
    %c4 = arith.constant 4 : index
    %c0_33 = arith.constant 0 : index
    %c0_34 = arith.constant 0 : index
    %59 = vector.load %arg5[%c4, %c0_33, %c0_34] : memref<25x49x9xbf16, #tpu.memory_space<vmem>>, vector<1x49x9xbf16>
    %60 = vector.shape_cast %59 : vector<1x49x9xbf16> to vector<49x9xbf16>
    %cst_35 = arith.constant dense<0.000000e+00> : vector<64x9xf32>
    %61 = tpu.matmul %58, %60, %cst_35 {dimension_numbers = #tpu.dot_dimension_numbers<[1], [0], [0], [1], [0, 0, 1, 1], [], []>} : vector<64x49xbf16>, vector<49x9xbf16>, vector<64x9xf32> -> vector<64x9xf32>
    %62 = arith.addf %56, %61 : vector<64x9xf32>
    %63 = vector.extract_strided_slice %33 {offsets = [320, 0], sizes = [64, 49], strides = [1, 1]} : vector<1600x49xf32> to vector<64x49xf32>
    %64 = arith.truncf %63 : vector<64x49xf32> to vector<64x49xbf16>
    %c5 = arith.constant 5 : index
    %c0_36 = arith.constant 0 : index
    %c0_37 = arith.constant 0 : index
    %65 = vector.load %arg5[%c5, %c0_36, %c0_37] : memref<25x49x9xbf16, #tpu.memory_space<vmem>>, vector<1x49x9xbf16>
    %66 = vector.shape_cast %65 : vector<1x49x9xbf16> to vector<49x9xbf16>
    %cst_38 = arith.constant dense<0.000000e+00> : vector<64x9xf32>
    %67 = tpu.matmul %64, %66, %cst_38 {dimension_numbers = #tpu.dot_dimension_numbers<[1], [0], [0], [1], [0, 0, 1, 1], [], []>} : vector<64x49xbf16>, vector<49x9xbf16>, vector<64x9xf32> -> vector<64x9xf32>
    %68 = arith.addf %62, %67 : vector<64x9xf32>
    %69 = vector.extract_strided_slice %33 {offsets = [384, 0], sizes = [64, 49], strides = [1, 1]} : vector<1600x49xf32> to vector<64x49xf32>
    %70 = arith.truncf %69 : vector<64x49xf32> to vector<64x49xbf16>
    %c6 = arith.constant 6 : index
    %c0_39 = arith.constant 0 : index
    %c0_40 = arith.constant 0 : index
    %71 = vector.load %arg5[%c6, %c0_39, %c0_40] : memref<25x49x9xbf16, #tpu.memory_space<vmem>>, vector<1x49x9xbf16>
    %72 = vector.shape_cast %71 : vector<1x49x9xbf16> to vector<49x9xbf16>
    %cst_41 = arith.constant dense<0.000000e+00> : vector<64x9xf32>
    %73 = tpu.matmul %70, %72, %cst_41 {dimension_numbers = #tpu.dot_dimension_numbers<[1], [0], [0], [1], [0, 0, 1, 1], [], []>} : vector<64x49xbf16>, vector<49x9xbf16>, vector<64x9xf32> -> vector<64x9xf32>
    %74 = arith.addf %68, %73 : vector<64x9xf32>
    %75 = vector.extract_strided_slice %33 {offsets = [448, 0], sizes = [64, 49], strides = [1, 1]} : vector<1600x49xf32> to vector<64x49xf32>
    %76 = arith.truncf %75 : vector<64x49xf32> to vector<64x49xbf16>
    %c7 = arith.constant 7 : index
    %c0_42 = arith.constant 0 : index
    %c0_43 = arith.constant 0 : index
    %77 = vector.load %arg5[%c7, %c0_42, %c0_43] : memref<25x49x9xbf16, #tpu.memory_space<vmem>>, vector<1x49x9xbf16>
    %78 = vector.shape_cast %77 : vector<1x49x9xbf16> to vector<49x9xbf16>
    %cst_44 = arith.constant dense<0.000000e+00> : vector<64x9xf32>
    %79 = tpu.matmul %76, %78, %cst_44 {dimension_numbers = #tpu.dot_dimension_numbers<[1], [0], [0], [1], [0, 0, 1, 1], [], []>} : vector<64x49xbf16>, vector<49x9xbf16>, vector<64x9xf32> -> vector<64x9xf32>
    %80 = arith.addf %74, %79 : vector<64x9xf32>
    %81 = vector.extract_strided_slice %33 {offsets = [512, 0], sizes = [64, 49], strides = [1, 1]} : vector<1600x49xf32> to vector<64x49xf32>
    %82 = arith.truncf %81 : vector<64x49xf32> to vector<64x49xbf16>
    %c8 = arith.constant 8 : index
    %c0_45 = arith.constant 0 : index
    %c0_46 = arith.constant 0 : index
    %83 = vector.load %arg5[%c8, %c0_45, %c0_46] : memref<25x49x9xbf16, #tpu.memory_space<vmem>>, vector<1x49x9xbf16>
    %84 = vector.shape_cast %83 : vector<1x49x9xbf16> to vector<49x9xbf16>
    %cst_47 = arith.constant dense<0.000000e+00> : vector<64x9xf32>
    %85 = tpu.matmul %82, %84, %cst_47 {dimension_numbers = #tpu.dot_dimension_numbers<[1], [0], [0], [1], [0, 0, 1, 1], [], []>} : vector<64x49xbf16>, vector<49x9xbf16>, vector<64x9xf32> -> vector<64x9xf32>
    %86 = arith.addf %80, %85 : vector<64x9xf32>
    %87 = vector.extract_strided_slice %33 {offsets = [576, 0], sizes = [64, 49], strides = [1, 1]} : vector<1600x49xf32> to vector<64x49xf32>
    %88 = arith.truncf %87 : vector<64x49xf32> to vector<64x49xbf16>
    %c9 = arith.constant 9 : index
    %c0_48 = arith.constant 0 : index
    %c0_49 = arith.constant 0 : index
    %89 = vector.load %arg5[%c9, %c0_48, %c0_49] : memref<25x49x9xbf16, #tpu.memory_space<vmem>>, vector<1x49x9xbf16>
    %90 = vector.shape_cast %89 : vector<1x49x9xbf16> to vector<49x9xbf16>
    %cst_50 = arith.constant dense<0.000000e+00> : vector<64x9xf32>
    %91 = tpu.matmul %88, %90, %cst_50 {dimension_numbers = #tpu.dot_dimension_numbers<[1], [0], [0], [1], [0, 0, 1, 1], [], []>} : vector<64x49xbf16>, vector<49x9xbf16>, vector<64x9xf32> -> vector<64x9xf32>
    %92 = arith.addf %86, %91 : vector<64x9xf32>
    %93 = vector.extract_strided_slice %33 {offsets = [640, 0], sizes = [64, 49], strides = [1, 1]} : vector<1600x49xf32> to vector<64x49xf32>
    %94 = arith.truncf %93 : vector<64x49xf32> to vector<64x49xbf16>
    %c10 = arith.constant 10 : index
    %c0_51 = arith.constant 0 : index
    %c0_52 = arith.constant 0 : index
    %95 = vector.load %arg5[%c10, %c0_51, %c0_52] : memref<25x49x9xbf16, #tpu.memory_space<vmem>>, vector<1x49x9xbf16>
    %96 = vector.shape_cast %95 : vector<1x49x9xbf16> to vector<49x9xbf16>
    %cst_53 = arith.constant dense<0.000000e+00> : vector<64x9xf32>
    %97 = tpu.matmul %94, %96, %cst_53 {dimension_numbers = #tpu.dot_dimension_numbers<[1], [0], [0], [1], [0, 0, 1, 1], [], []>} : vector<64x49xbf16>, vector<49x9xbf16>, vector<64x9xf32> -> vector<64x9xf32>
    %98 = arith.addf %92, %97 : vector<64x9xf32>
    %99 = vector.extract_strided_slice %33 {offsets = [704, 0], sizes = [64, 49], strides = [1, 1]} : vector<1600x49xf32> to vector<64x49xf32>
    %100 = arith.truncf %99 : vector<64x49xf32> to vector<64x49xbf16>
    %c11 = arith.constant 11 : index
    %c0_54 = arith.constant 0 : index
    %c0_55 = arith.constant 0 : index
    %101 = vector.load %arg5[%c11, %c0_54, %c0_55] : memref<25x49x9xbf16, #tpu.memory_space<vmem>>, vector<1x49x9xbf16>
    %102 = vector.shape_cast %101 : vector<1x49x9xbf16> to vector<49x9xbf16>
    %cst_56 = arith.constant dense<0.000000e+00> : vector<64x9xf32>
    %103 = tpu.matmul %100, %102, %cst_56 {dimension_numbers = #tpu.dot_dimension_numbers<[1], [0], [0], [1], [0, 0, 1, 1], [], []>} : vector<64x49xbf16>, vector<49x9xbf16>, vector<64x9xf32> -> vector<64x9xf32>
    %104 = arith.addf %98, %103 : vector<64x9xf32>
    %105 = vector.extract_strided_slice %33 {offsets = [768, 0], sizes = [64, 49], strides = [1, 1]} : vector<1600x49xf32> to vector<64x49xf32>
    %106 = arith.truncf %105 : vector<64x49xf32> to vector<64x49xbf16>
    %c12 = arith.constant 12 : index
    %c0_57 = arith.constant 0 : index
    %c0_58 = arith.constant 0 : index
    %107 = vector.load %arg5[%c12, %c0_57, %c0_58] : memref<25x49x9xbf16, #tpu.memory_space<vmem>>, vector<1x49x9xbf16>
    %108 = vector.shape_cast %107 : vector<1x49x9xbf16> to vector<49x9xbf16>
    %cst_59 = arith.constant dense<0.000000e+00> : vector<64x9xf32>
    %109 = tpu.matmul %106, %108, %cst_59 {dimension_numbers = #tpu.dot_dimension_numbers<[1], [0], [0], [1], [0, 0, 1, 1], [], []>} : vector<64x49xbf16>, vector<49x9xbf16>, vector<64x9xf32> -> vector<64x9xf32>
    %110 = arith.addf %104, %109 : vector<64x9xf32>
    %111 = vector.extract_strided_slice %33 {offsets = [832, 0], sizes = [64, 49], strides = [1, 1]} : vector<1600x49xf32> to vector<64x49xf32>
    %112 = arith.truncf %111 : vector<64x49xf32> to vector<64x49xbf16>
    %c13 = arith.constant 13 : index
    %c0_60 = arith.constant 0 : index
    %c0_61 = arith.constant 0 : index
    %113 = vector.load %arg5[%c13, %c0_60, %c0_61] : memref<25x49x9xbf16, #tpu.memory_space<vmem>>, vector<1x49x9xbf16>
    %114 = vector.shape_cast %113 : vector<1x49x9xbf16> to vector<49x9xbf16>
    %cst_62 = arith.constant dense<0.000000e+00> : vector<64x9xf32>
    %115 = tpu.matmul %112, %114, %cst_62 {dimension_numbers = #tpu.dot_dimension_numbers<[1], [0], [0], [1], [0, 0, 1, 1], [], []>} : vector<64x49xbf16>, vector<49x9xbf16>, vector<64x9xf32> -> vector<64x9xf32>
    %116 = arith.addf %110, %115 : vector<64x9xf32>
    %117 = vector.extract_strided_slice %33 {offsets = [896, 0], sizes = [64, 49], strides = [1, 1]} : vector<1600x49xf32> to vector<64x49xf32>
    %118 = arith.truncf %117 : vector<64x49xf32> to vector<64x49xbf16>
    %c14 = arith.constant 14 : index
    %c0_63 = arith.constant 0 : index
    %c0_64 = arith.constant 0 : index
    %119 = vector.load %arg5[%c14, %c0_63, %c0_64] : memref<25x49x9xbf16, #tpu.memory_space<vmem>>, vector<1x49x9xbf16>
    %120 = vector.shape_cast %119 : vector<1x49x9xbf16> to vector<49x9xbf16>
    %cst_65 = arith.constant dense<0.000000e+00> : vector<64x9xf32>
    %121 = tpu.matmul %118, %120, %cst_65 {dimension_numbers = #tpu.dot_dimension_numbers<[1], [0], [0], [1], [0, 0, 1, 1], [], []>} : vector<64x49xbf16>, vector<49x9xbf16>, vector<64x9xf32> -> vector<64x9xf32>
    %122 = arith.addf %116, %121 : vector<64x9xf32>
    %123 = vector.extract_strided_slice %33 {offsets = [960, 0], sizes = [64, 49], strides = [1, 1]} : vector<1600x49xf32> to vector<64x49xf32>
    %124 = arith.truncf %123 : vector<64x49xf32> to vector<64x49xbf16>
    %c15 = arith.constant 15 : index
    %c0_66 = arith.constant 0 : index
    %c0_67 = arith.constant 0 : index
    %125 = vector.load %arg5[%c15, %c0_66, %c0_67] : memref<25x49x9xbf16, #tpu.memory_space<vmem>>, vector<1x49x9xbf16>
    %126 = vector.shape_cast %125 : vector<1x49x9xbf16> to vector<49x9xbf16>
    %cst_68 = arith.constant dense<0.000000e+00> : vector<64x9xf32>
    %127 = tpu.matmul %124, %126, %cst_68 {dimension_numbers = #tpu.dot_dimension_numbers<[1], [0], [0], [1], [0, 0, 1, 1], [], []>} : vector<64x49xbf16>, vector<49x9xbf16>, vector<64x9xf32> -> vector<64x9xf32>
    %128 = arith.addf %122, %127 : vector<64x9xf32>
    %129 = vector.extract_strided_slice %33 {offsets = [1024, 0], sizes = [64, 49], strides = [1, 1]} : vector<1600x49xf32> to vector<64x49xf32>
    %130 = arith.truncf %129 : vector<64x49xf32> to vector<64x49xbf16>
    %c16 = arith.constant 16 : index
    %c0_69 = arith.constant 0 : index
    %c0_70 = arith.constant 0 : index
    %131 = vector.load %arg5[%c16, %c0_69, %c0_70] : memref<25x49x9xbf16, #tpu.memory_space<vmem>>, vector<1x49x9xbf16>
    %132 = vector.shape_cast %131 : vector<1x49x9xbf16> to vector<49x9xbf16>
    %cst_71 = arith.constant dense<0.000000e+00> : vector<64x9xf32>
    %133 = tpu.matmul %130, %132, %cst_71 {dimension_numbers = #tpu.dot_dimension_numbers<[1], [0], [0], [1], [0, 0, 1, 1], [], []>} : vector<64x49xbf16>, vector<49x9xbf16>, vector<64x9xf32> -> vector<64x9xf32>
    %134 = arith.addf %128, %133 : vector<64x9xf32>
    %135 = vector.extract_strided_slice %33 {offsets = [1088, 0], sizes = [64, 49], strides = [1, 1]} : vector<1600x49xf32> to vector<64x49xf32>
    %136 = arith.truncf %135 : vector<64x49xf32> to vector<64x49xbf16>
    %c17 = arith.constant 17 : index
    %c0_72 = arith.constant 0 : index
    %c0_73 = arith.constant 0 : index
    %137 = vector.load %arg5[%c17, %c0_72, %c0_73] : memref<25x49x9xbf16, #tpu.memory_space<vmem>>, vector<1x49x9xbf16>
    %138 = vector.shape_cast %137 : vector<1x49x9xbf16> to vector<49x9xbf16>
    %cst_74 = arith.constant dense<0.000000e+00> : vector<64x9xf32>
    %139 = tpu.matmul %136, %138, %cst_74 {dimension_numbers = #tpu.dot_dimension_numbers<[1], [0], [0], [1], [0, 0, 1, 1], [], []>} : vector<64x49xbf16>, vector<49x9xbf16>, vector<64x9xf32> -> vector<64x9xf32>
    %140 = arith.addf %134, %139 : vector<64x9xf32>
    %141 = vector.extract_strided_slice %33 {offsets = [1152, 0], sizes = [64, 49], strides = [1, 1]} : vector<1600x49xf32> to vector<64x49xf32>
    %142 = arith.truncf %141 : vector<64x49xf32> to vector<64x49xbf16>
    %c18 = arith.constant 18 : index
    %c0_75 = arith.constant 0 : index
    %c0_76 = arith.constant 0 : index
    %143 = vector.load %arg5[%c18, %c0_75, %c0_76] : memref<25x49x9xbf16, #tpu.memory_space<vmem>>, vector<1x49x9xbf16>
    %144 = vector.shape_cast %143 : vector<1x49x9xbf16> to vector<49x9xbf16>
    %cst_77 = arith.constant dense<0.000000e+00> : vector<64x9xf32>
    %145 = tpu.matmul %142, %144, %cst_77 {dimension_numbers = #tpu.dot_dimension_numbers<[1], [0], [0], [1], [0, 0, 1, 1], [], []>} : vector<64x49xbf16>, vector<49x9xbf16>, vector<64x9xf32> -> vector<64x9xf32>
    %146 = arith.addf %140, %145 : vector<64x9xf32>
    %147 = vector.extract_strided_slice %33 {offsets = [1216, 0], sizes = [64, 49], strides = [1, 1]} : vector<1600x49xf32> to vector<64x49xf32>
    %148 = arith.truncf %147 : vector<64x49xf32> to vector<64x49xbf16>
    %c19 = arith.constant 19 : index
    %c0_78 = arith.constant 0 : index
    %c0_79 = arith.constant 0 : index
    %149 = vector.load %arg5[%c19, %c0_78, %c0_79] : memref<25x49x9xbf16, #tpu.memory_space<vmem>>, vector<1x49x9xbf16>
    %150 = vector.shape_cast %149 : vector<1x49x9xbf16> to vector<49x9xbf16>
    %cst_80 = arith.constant dense<0.000000e+00> : vector<64x9xf32>
    %151 = tpu.matmul %148, %150, %cst_80 {dimension_numbers = #tpu.dot_dimension_numbers<[1], [0], [0], [1], [0, 0, 1, 1], [], []>} : vector<64x49xbf16>, vector<49x9xbf16>, vector<64x9xf32> -> vector<64x9xf32>
    %152 = arith.addf %146, %151 : vector<64x9xf32>
    %153 = vector.extract_strided_slice %33 {offsets = [1280, 0], sizes = [64, 49], strides = [1, 1]} : vector<1600x49xf32> to vector<64x49xf32>
    %154 = arith.truncf %153 : vector<64x49xf32> to vector<64x49xbf16>
    %c20 = arith.constant 20 : index
    %c0_81 = arith.constant 0 : index
    %c0_82 = arith.constant 0 : index
    %155 = vector.load %arg5[%c20, %c0_81, %c0_82] : memref<25x49x9xbf16, #tpu.memory_space<vmem>>, vector<1x49x9xbf16>
    %156 = vector.shape_cast %155 : vector<1x49x9xbf16> to vector<49x9xbf16>
    %cst_83 = arith.constant dense<0.000000e+00> : vector<64x9xf32>
    %157 = tpu.matmul %154, %156, %cst_83 {dimension_numbers = #tpu.dot_dimension_numbers<[1], [0], [0], [1], [0, 0, 1, 1], [], []>} : vector<64x49xbf16>, vector<49x9xbf16>, vector<64x9xf32> -> vector<64x9xf32>
    %158 = arith.addf %152, %157 : vector<64x9xf32>
    %159 = vector.extract_strided_slice %33 {offsets = [1344, 0], sizes = [64, 49], strides = [1, 1]} : vector<1600x49xf32> to vector<64x49xf32>
    %160 = arith.truncf %159 : vector<64x49xf32> to vector<64x49xbf16>
    %c21 = arith.constant 21 : index
    %c0_84 = arith.constant 0 : index
    %c0_85 = arith.constant 0 : index
    %161 = vector.load %arg5[%c21, %c0_84, %c0_85] : memref<25x49x9xbf16, #tpu.memory_space<vmem>>, vector<1x49x9xbf16>
    %162 = vector.shape_cast %161 : vector<1x49x9xbf16> to vector<49x9xbf16>
    %cst_86 = arith.constant dense<0.000000e+00> : vector<64x9xf32>
    %163 = tpu.matmul %160, %162, %cst_86 {dimension_numbers = #tpu.dot_dimension_numbers<[1], [0], [0], [1], [0, 0, 1, 1], [], []>} : vector<64x49xbf16>, vector<49x9xbf16>, vector<64x9xf32> -> vector<64x9xf32>
    %164 = arith.addf %158, %163 : vector<64x9xf32>
    %165 = vector.extract_strided_slice %33 {offsets = [1408, 0], sizes = [64, 49], strides = [1, 1]} : vector<1600x49xf32> to vector<64x49xf32>
    %166 = arith.truncf %165 : vector<64x49xf32> to vector<64x49xbf16>
    %c22 = arith.constant 22 : index
    %c0_87 = arith.constant 0 : index
    %c0_88 = arith.constant 0 : index
    %167 = vector.load %arg5[%c22, %c0_87, %c0_88] : memref<25x49x9xbf16, #tpu.memory_space<vmem>>, vector<1x49x9xbf16>
    %168 = vector.shape_cast %167 : vector<1x49x9xbf16> to vector<49x9xbf16>
    %cst_89 = arith.constant dense<0.000000e+00> : vector<64x9xf32>
    %169 = tpu.matmul %166, %168, %cst_89 {dimension_numbers = #tpu.dot_dimension_numbers<[1], [0], [0], [1], [0, 0, 1, 1], [], []>} : vector<64x49xbf16>, vector<49x9xbf16>, vector<64x9xf32> -> vector<64x9xf32>
    %170 = arith.addf %164, %169 : vector<64x9xf32>
    %171 = vector.extract_strided_slice %33 {offsets = [1472, 0], sizes = [64, 49], strides = [1, 1]} : vector<1600x49xf32> to vector<64x49xf32>
    %172 = arith.truncf %171 : vector<64x49xf32> to vector<64x49xbf16>
    %c23 = arith.constant 23 : index
    %c0_90 = arith.constant 0 : index
    %c0_91 = arith.constant 0 : index
    %173 = vector.load %arg5[%c23, %c0_90, %c0_91] : memref<25x49x9xbf16, #tpu.memory_space<vmem>>, vector<1x49x9xbf16>
    %174 = vector.shape_cast %173 : vector<1x49x9xbf16> to vector<49x9xbf16>
    %cst_92 = arith.constant dense<0.000000e+00> : vector<64x9xf32>
    %175 = tpu.matmul %172, %174, %cst_92 {dimension_numbers = #tpu.dot_dimension_numbers<[1], [0], [0], [1], [0, 0, 1, 1], [], []>} : vector<64x49xbf16>, vector<49x9xbf16>, vector<64x9xf32> -> vector<64x9xf32>
    %176 = arith.addf %170, %175 : vector<64x9xf32>
    %177 = vector.extract_strided_slice %33 {offsets = [1536, 0], sizes = [64, 49], strides = [1, 1]} : vector<1600x49xf32> to vector<64x49xf32>
    %178 = arith.truncf %177 : vector<64x49xf32> to vector<64x49xbf16>
    %c24 = arith.constant 24 : index
    %c0_93 = arith.constant 0 : index
    %c0_94 = arith.constant 0 : index
    %179 = vector.load %arg5[%c24, %c0_93, %c0_94] : memref<25x49x9xbf16, #tpu.memory_space<vmem>>, vector<1x49x9xbf16>
    %180 = vector.shape_cast %179 : vector<1x49x9xbf16> to vector<49x9xbf16>
    %cst_95 = arith.constant dense<0.000000e+00> : vector<64x9xf32>
    %181 = tpu.matmul %178, %180, %cst_95 {dimension_numbers = #tpu.dot_dimension_numbers<[1], [0], [0], [1], [0, 0, 1, 1], [], []>} : vector<64x49xbf16>, vector<49x9xbf16>, vector<64x9xf32> -> vector<64x9xf32>
    %182 = arith.addf %176, %181 : vector<64x9xf32>
    %c0_96 = arith.constant 0 : index
    %c0_97 = arith.constant 0 : index
    %183 = vector.load %arg16[%c0_96, %c0_97] : memref<64x64xf32, #tpu.memory_space<vmem>>, vector<64x64xf32>
    %cst_98 = arith.constant dense<0.000000e+00> : vector<64xf32>
    %184 = vector.multi_reduction <add>, %182, %cst_98 [1] : vector<64x9xf32> to vector<64xf32>
    %185 = vector.shape_cast %184 : vector<64xf32> to vector<64x1xf32>
    %186 = arith.mulf %182, %182 : vector<64x9xf32>
    %cst_99 = arith.constant dense<0.000000e+00> : vector<64xf32>
    %187 = vector.multi_reduction <add>, %186, %cst_99 [1] : vector<64x9xf32> to vector<64xf32>
    %188 = vector.shape_cast %187 : vector<64xf32> to vector<64x1xf32>
    %cst_100 = arith.constant dense<0.000000e+00> : vector<64x1xf32>
    %189 = tpu.matmul %183, %185, %cst_100 {dimension_numbers = #tpu.dot_dimension_numbers<[1], [0], [0], [1], [0, 0, 1, 1], [], []>} : vector<64x64xf32>, vector<64x1xf32>, vector<64x1xf32> -> vector<64x1xf32>
    %cst_101 = arith.constant 0.055555556 : f32
    %190 = vector.broadcast %cst_101 : f32 to vector<64x1xf32>
    %191 = arith.mulf %189, %190 : vector<64x1xf32>
    %cst_102 = arith.constant dense<0.000000e+00> : vector<64x1xf32>
    %192 = tpu.matmul %183, %188, %cst_102 {dimension_numbers = #tpu.dot_dimension_numbers<[1], [0], [0], [1], [0, 0, 1, 1], [], []>} : vector<64x64xf32>, vector<64x1xf32>, vector<64x1xf32> -> vector<64x1xf32>
    %cst_103 = arith.constant 0.055555556 : f32
    %193 = vector.broadcast %cst_103 : f32 to vector<64x1xf32>
    %194 = arith.mulf %192, %193 : vector<64x1xf32>
    %195 = arith.mulf %191, %191 : vector<64x1xf32>
    %196 = arith.subf %194, %195 : vector<64x1xf32>
    %197 = vector.broadcast %191 : vector<64x1xf32> to vector<64x9xf32>
    %198 = arith.subf %182, %197 : vector<64x9xf32>
    %cst_104 = arith.constant 9.99999974E-6 : f32
    %199 = vector.broadcast %cst_104 : f32 to vector<64x1xf32>
    %200 = arith.addf %196, %199 : vector<64x1xf32>
    %201 = math.rsqrt %200 : vector<64x1xf32>
    %202 = vector.broadcast %201 : vector<64x1xf32> to vector<64x9xf32>
    %203 = arith.mulf %198, %202 : vector<64x9xf32>
    %c0_105 = arith.constant 0 : index
    %c0_106 = arith.constant 0 : index
    %204 = vector.load %arg6[%c0_105, %c0_106] : memref<64x1xf32, #tpu.memory_space<vmem>>, vector<64x1xf32>
    %205 = vector.broadcast %204 : vector<64x1xf32> to vector<64x9xf32>
    %206 = arith.mulf %203, %205 : vector<64x9xf32>
    %c0_107 = arith.constant 0 : index
    %c0_108 = arith.constant 0 : index
    %207 = vector.load %arg7[%c0_107, %c0_108] : memref<64x1xf32, #tpu.memory_space<vmem>>, vector<64x1xf32>
    %208 = vector.broadcast %207 : vector<64x1xf32> to vector<64x9xf32>
    %209 = arith.addf %206, %208 : vector<64x9xf32>
    %cst_109 = arith.constant 0.000000e+00 : f32
    %210 = vector.broadcast %cst_109 : f32 to vector<64x9xf32>
    %211 = arith.maximumf %209, %210 : vector<64x9xf32>
    %c0_110 = arith.constant 0 : index
    %c0_111 = arith.constant 0 : index
    %212 = vector.load %arg8[%c0_110, %c0_111] : memref<800x64xf32, #tpu.memory_space<vmem>>, vector<800x64xf32>
    %cst_112 = arith.constant dense<0.000000e+00> : vector<800x9xf32>
    %213 = tpu.matmul %212, %211, %cst_112 {dimension_numbers = #tpu.dot_dimension_numbers<[1], [0], [0], [1], [0, 0, 1, 1], [], []>} : vector<800x64xf32>, vector<64x9xf32>, vector<800x9xf32> -> vector<800x9xf32>
    %214 = vector.extract_strided_slice %213 {offsets = [0, 0], sizes = [32, 9], strides = [1, 1]} : vector<800x9xf32> to vector<32x9xf32>
    %215 = arith.truncf %214 : vector<32x9xf32> to vector<32x9xbf16>
    %c0_113 = arith.constant 0 : index
    %c0_114 = arith.constant 0 : index
    %c0_115 = arith.constant 0 : index
    %216 = vector.load %arg9[%c0_113, %c0_114, %c0_115] : memref<25x9x64xbf16, #tpu.memory_space<vmem>>, vector<1x9x64xbf16>
    %217 = vector.shape_cast %216 : vector<1x9x64xbf16> to vector<9x64xbf16>
    %cst_116 = arith.constant dense<0.000000e+00> : vector<32x64xf32>
    %218 = tpu.matmul %215, %217, %cst_116 {dimension_numbers = #tpu.dot_dimension_numbers<[1], [0], [0], [1], [0, 0, 1, 1], [], []>} : vector<32x9xbf16>, vector<9x64xbf16>, vector<32x64xf32> -> vector<32x64xf32>
    %219 = vector.extract_strided_slice %213 {offsets = [32, 0], sizes = [32, 9], strides = [1, 1]} : vector<800x9xf32> to vector<32x9xf32>
    %220 = arith.truncf %219 : vector<32x9xf32> to vector<32x9xbf16>
    %c1_117 = arith.constant 1 : index
    %c0_118 = arith.constant 0 : index
    %c0_119 = arith.constant 0 : index
    %221 = vector.load %arg9[%c1_117, %c0_118, %c0_119] : memref<25x9x64xbf16, #tpu.memory_space<vmem>>, vector<1x9x64xbf16>
    %222 = vector.shape_cast %221 : vector<1x9x64xbf16> to vector<9x64xbf16>
    %cst_120 = arith.constant dense<0.000000e+00> : vector<32x64xf32>
    %223 = tpu.matmul %220, %222, %cst_120 {dimension_numbers = #tpu.dot_dimension_numbers<[1], [0], [0], [1], [0, 0, 1, 1], [], []>} : vector<32x9xbf16>, vector<9x64xbf16>, vector<32x64xf32> -> vector<32x64xf32>
    %224 = arith.addf %218, %223 : vector<32x64xf32>
    %225 = vector.extract_strided_slice %213 {offsets = [64, 0], sizes = [32, 9], strides = [1, 1]} : vector<800x9xf32> to vector<32x9xf32>
    %226 = arith.truncf %225 : vector<32x9xf32> to vector<32x9xbf16>
    %c2_121 = arith.constant 2 : index
    %c0_122 = arith.constant 0 : index
    %c0_123 = arith.constant 0 : index
    %227 = vector.load %arg9[%c2_121, %c0_122, %c0_123] : memref<25x9x64xbf16, #tpu.memory_space<vmem>>, vector<1x9x64xbf16>
    %228 = vector.shape_cast %227 : vector<1x9x64xbf16> to vector<9x64xbf16>
    %cst_124 = arith.constant dense<0.000000e+00> : vector<32x64xf32>
    %229 = tpu.matmul %226, %228, %cst_124 {dimension_numbers = #tpu.dot_dimension_numbers<[1], [0], [0], [1], [0, 0, 1, 1], [], []>} : vector<32x9xbf16>, vector<9x64xbf16>, vector<32x64xf32> -> vector<32x64xf32>
    %230 = arith.addf %224, %229 : vector<32x64xf32>
    %231 = vector.extract_strided_slice %213 {offsets = [96, 0], sizes = [32, 9], strides = [1, 1]} : vector<800x9xf32> to vector<32x9xf32>
    %232 = arith.truncf %231 : vector<32x9xf32> to vector<32x9xbf16>
    %c3_125 = arith.constant 3 : index
    %c0_126 = arith.constant 0 : index
    %c0_127 = arith.constant 0 : index
    %233 = vector.load %arg9[%c3_125, %c0_126, %c0_127] : memref<25x9x64xbf16, #tpu.memory_space<vmem>>, vector<1x9x64xbf16>
    %234 = vector.shape_cast %233 : vector<1x9x64xbf16> to vector<9x64xbf16>
    %cst_128 = arith.constant dense<0.000000e+00> : vector<32x64xf32>
    %235 = tpu.matmul %232, %234, %cst_128 {dimension_numbers = #tpu.dot_dimension_numbers<[1], [0], [0], [1], [0, 0, 1, 1], [], []>} : vector<32x9xbf16>, vector<9x64xbf16>, vector<32x64xf32> -> vector<32x64xf32>
    %236 = arith.addf %230, %235 : vector<32x64xf32>
    %237 = vector.extract_strided_slice %213 {offsets = [128, 0], sizes = [32, 9], strides = [1, 1]} : vector<800x9xf32> to vector<32x9xf32>
    %238 = arith.truncf %237 : vector<32x9xf32> to vector<32x9xbf16>
    %c4_129 = arith.constant 4 : index
    %c0_130 = arith.constant 0 : index
    %c0_131 = arith.constant 0 : index
    %239 = vector.load %arg9[%c4_129, %c0_130, %c0_131] : memref<25x9x64xbf16, #tpu.memory_space<vmem>>, vector<1x9x64xbf16>
    %240 = vector.shape_cast %239 : vector<1x9x64xbf16> to vector<9x64xbf16>
    %cst_132 = arith.constant dense<0.000000e+00> : vector<32x64xf32>
    %241 = tpu.matmul %238, %240, %cst_132 {dimension_numbers = #tpu.dot_dimension_numbers<[1], [0], [0], [1], [0, 0, 1, 1], [], []>} : vector<32x9xbf16>, vector<9x64xbf16>, vector<32x64xf32> -> vector<32x64xf32>
    %242 = arith.addf %236, %241 : vector<32x64xf32>
    %243 = vector.extract_strided_slice %213 {offsets = [160, 0], sizes = [32, 9], strides = [1, 1]} : vector<800x9xf32> to vector<32x9xf32>
    %244 = arith.truncf %243 : vector<32x9xf32> to vector<32x9xbf16>
    %c5_133 = arith.constant 5 : index
    %c0_134 = arith.constant 0 : index
    %c0_135 = arith.constant 0 : index
    %245 = vector.load %arg9[%c5_133, %c0_134, %c0_135] : memref<25x9x64xbf16, #tpu.memory_space<vmem>>, vector<1x9x64xbf16>
    %246 = vector.shape_cast %245 : vector<1x9x64xbf16> to vector<9x64xbf16>
    %cst_136 = arith.constant dense<0.000000e+00> : vector<32x64xf32>
    %247 = tpu.matmul %244, %246, %cst_136 {dimension_numbers = #tpu.dot_dimension_numbers<[1], [0], [0], [1], [0, 0, 1, 1], [], []>} : vector<32x9xbf16>, vector<9x64xbf16>, vector<32x64xf32> -> vector<32x64xf32>
    %248 = arith.addf %242, %247 : vector<32x64xf32>
    %249 = vector.extract_strided_slice %213 {offsets = [192, 0], sizes = [32, 9], strides = [1, 1]} : vector<800x9xf32> to vector<32x9xf32>
    %250 = arith.truncf %249 : vector<32x9xf32> to vector<32x9xbf16>
    %c6_137 = arith.constant 6 : index
    %c0_138 = arith.constant 0 : index
    %c0_139 = arith.constant 0 : index
    %251 = vector.load %arg9[%c6_137, %c0_138, %c0_139] : memref<25x9x64xbf16, #tpu.memory_space<vmem>>, vector<1x9x64xbf16>
    %252 = vector.shape_cast %251 : vector<1x9x64xbf16> to vector<9x64xbf16>
    %cst_140 = arith.constant dense<0.000000e+00> : vector<32x64xf32>
    %253 = tpu.matmul %250, %252, %cst_140 {dimension_numbers = #tpu.dot_dimension_numbers<[1], [0], [0], [1], [0, 0, 1, 1], [], []>} : vector<32x9xbf16>, vector<9x64xbf16>, vector<32x64xf32> -> vector<32x64xf32>
    %254 = arith.addf %248, %253 : vector<32x64xf32>
    %255 = vector.extract_strided_slice %213 {offsets = [224, 0], sizes = [32, 9], strides = [1, 1]} : vector<800x9xf32> to vector<32x9xf32>
    %256 = arith.truncf %255 : vector<32x9xf32> to vector<32x9xbf16>
    %c7_141 = arith.constant 7 : index
    %c0_142 = arith.constant 0 : index
    %c0_143 = arith.constant 0 : index
    %257 = vector.load %arg9[%c7_141, %c0_142, %c0_143] : memref<25x9x64xbf16, #tpu.memory_space<vmem>>, vector<1x9x64xbf16>
    %258 = vector.shape_cast %257 : vector<1x9x64xbf16> to vector<9x64xbf16>
    %cst_144 = arith.constant dense<0.000000e+00> : vector<32x64xf32>
    %259 = tpu.matmul %256, %258, %cst_144 {dimension_numbers = #tpu.dot_dimension_numbers<[1], [0], [0], [1], [0, 0, 1, 1], [], []>} : vector<32x9xbf16>, vector<9x64xbf16>, vector<32x64xf32> -> vector<32x64xf32>
    %260 = arith.addf %254, %259 : vector<32x64xf32>
    %261 = vector.extract_strided_slice %213 {offsets = [256, 0], sizes = [32, 9], strides = [1, 1]} : vector<800x9xf32> to vector<32x9xf32>
    %262 = arith.truncf %261 : vector<32x9xf32> to vector<32x9xbf16>
    %c8_145 = arith.constant 8 : index
    %c0_146 = arith.constant 0 : index
    %c0_147 = arith.constant 0 : index
    %263 = vector.load %arg9[%c8_145, %c0_146, %c0_147] : memref<25x9x64xbf16, #tpu.memory_space<vmem>>, vector<1x9x64xbf16>
    %264 = vector.shape_cast %263 : vector<1x9x64xbf16> to vector<9x64xbf16>
    %cst_148 = arith.constant dense<0.000000e+00> : vector<32x64xf32>
    %265 = tpu.matmul %262, %264, %cst_148 {dimension_numbers = #tpu.dot_dimension_numbers<[1], [0], [0], [1], [0, 0, 1, 1], [], []>} : vector<32x9xbf16>, vector<9x64xbf16>, vector<32x64xf32> -> vector<32x64xf32>
    %266 = arith.addf %260, %265 : vector<32x64xf32>
    %267 = vector.extract_strided_slice %213 {offsets = [288, 0], sizes = [32, 9], strides = [1, 1]} : vector<800x9xf32> to vector<32x9xf32>
    %268 = arith.truncf %267 : vector<32x9xf32> to vector<32x9xbf16>
    %c9_149 = arith.constant 9 : index
    %c0_150 = arith.constant 0 : index
    %c0_151 = arith.constant 0 : index
    %269 = vector.load %arg9[%c9_149, %c0_150, %c0_151] : memref<25x9x64xbf16, #tpu.memory_space<vmem>>, vector<1x9x64xbf16>
    %270 = vector.shape_cast %269 : vector<1x9x64xbf16> to vector<9x64xbf16>
    %cst_152 = arith.constant dense<0.000000e+00> : vector<32x64xf32>
    %271 = tpu.matmul %268, %270, %cst_152 {dimension_numbers = #tpu.dot_dimension_numbers<[1], [0], [0], [1], [0, 0, 1, 1], [], []>} : vector<32x9xbf16>, vector<9x64xbf16>, vector<32x64xf32> -> vector<32x64xf32>
    %272 = arith.addf %266, %271 : vector<32x64xf32>
    %273 = vector.extract_strided_slice %213 {offsets = [320, 0], sizes = [32, 9], strides = [1, 1]} : vector<800x9xf32> to vector<32x9xf32>
    %274 = arith.truncf %273 : vector<32x9xf32> to vector<32x9xbf16>
    %c10_153 = arith.constant 10 : index
    %c0_154 = arith.constant 0 : index
    %c0_155 = arith.constant 0 : index
    %275 = vector.load %arg9[%c10_153, %c0_154, %c0_155] : memref<25x9x64xbf16, #tpu.memory_space<vmem>>, vector<1x9x64xbf16>
    %276 = vector.shape_cast %275 : vector<1x9x64xbf16> to vector<9x64xbf16>
    %cst_156 = arith.constant dense<0.000000e+00> : vector<32x64xf32>
    %277 = tpu.matmul %274, %276, %cst_156 {dimension_numbers = #tpu.dot_dimension_numbers<[1], [0], [0], [1], [0, 0, 1, 1], [], []>} : vector<32x9xbf16>, vector<9x64xbf16>, vector<32x64xf32> -> vector<32x64xf32>
    %278 = arith.addf %272, %277 : vector<32x64xf32>
    %279 = vector.extract_strided_slice %213 {offsets = [352, 0], sizes = [32, 9], strides = [1, 1]} : vector<800x9xf32> to vector<32x9xf32>
    %280 = arith.truncf %279 : vector<32x9xf32> to vector<32x9xbf16>
    %c11_157 = arith.constant 11 : index
    %c0_158 = arith.constant 0 : index
    %c0_159 = arith.constant 0 : index
    %281 = vector.load %arg9[%c11_157, %c0_158, %c0_159] : memref<25x9x64xbf16, #tpu.memory_space<vmem>>, vector<1x9x64xbf16>
    %282 = vector.shape_cast %281 : vector<1x9x64xbf16> to vector<9x64xbf16>
    %cst_160 = arith.constant dense<0.000000e+00> : vector<32x64xf32>
    %283 = tpu.matmul %280, %282, %cst_160 {dimension_numbers = #tpu.dot_dimension_numbers<[1], [0], [0], [1], [0, 0, 1, 1], [], []>} : vector<32x9xbf16>, vector<9x64xbf16>, vector<32x64xf32> -> vector<32x64xf32>
    %284 = arith.addf %278, %283 : vector<32x64xf32>
    %285 = vector.extract_strided_slice %213 {offsets = [384, 0], sizes = [32, 9], strides = [1, 1]} : vector<800x9xf32> to vector<32x9xf32>
    %286 = arith.truncf %285 : vector<32x9xf32> to vector<32x9xbf16>
    %c12_161 = arith.constant 12 : index
    %c0_162 = arith.constant 0 : index
    %c0_163 = arith.constant 0 : index
    %287 = vector.load %arg9[%c12_161, %c0_162, %c0_163] : memref<25x9x64xbf16, #tpu.memory_space<vmem>>, vector<1x9x64xbf16>
    %288 = vector.shape_cast %287 : vector<1x9x64xbf16> to vector<9x64xbf16>
    %cst_164 = arith.constant dense<0.000000e+00> : vector<32x64xf32>
    %289 = tpu.matmul %286, %288, %cst_164 {dimension_numbers = #tpu.dot_dimension_numbers<[1], [0], [0], [1], [0, 0, 1, 1], [], []>} : vector<32x9xbf16>, vector<9x64xbf16>, vector<32x64xf32> -> vector<32x64xf32>
    %290 = arith.addf %284, %289 : vector<32x64xf32>
    %291 = vector.extract_strided_slice %213 {offsets = [416, 0], sizes = [32, 9], strides = [1, 1]} : vector<800x9xf32> to vector<32x9xf32>
    %292 = arith.truncf %291 : vector<32x9xf32> to vector<32x9xbf16>
    %c13_165 = arith.constant 13 : index
    %c0_166 = arith.constant 0 : index
    %c0_167 = arith.constant 0 : index
    %293 = vector.load %arg9[%c13_165, %c0_166, %c0_167] : memref<25x9x64xbf16, #tpu.memory_space<vmem>>, vector<1x9x64xbf16>
    %294 = vector.shape_cast %293 : vector<1x9x64xbf16> to vector<9x64xbf16>
    %cst_168 = arith.constant dense<0.000000e+00> : vector<32x64xf32>
    %295 = tpu.matmul %292, %294, %cst_168 {dimension_numbers = #tpu.dot_dimension_numbers<[1], [0], [0], [1], [0, 0, 1, 1], [], []>} : vector<32x9xbf16>, vector<9x64xbf16>, vector<32x64xf32> -> vector<32x64xf32>
    %296 = arith.addf %290, %295 : vector<32x64xf32>
    %297 = vector.extract_strided_slice %213 {offsets = [448, 0], sizes = [32, 9], strides = [1, 1]} : vector<800x9xf32> to vector<32x9xf32>
    %298 = arith.truncf %297 : vector<32x9xf32> to vector<32x9xbf16>
    %c14_169 = arith.constant 14 : index
    %c0_170 = arith.constant 0 : index
    %c0_171 = arith.constant 0 : index
    %299 = vector.load %arg9[%c14_169, %c0_170, %c0_171] : memref<25x9x64xbf16, #tpu.memory_space<vmem>>, vector<1x9x64xbf16>
    %300 = vector.shape_cast %299 : vector<1x9x64xbf16> to vector<9x64xbf16>
    %cst_172 = arith.constant dense<0.000000e+00> : vector<32x64xf32>
    %301 = tpu.matmul %298, %300, %cst_172 {dimension_numbers = #tpu.dot_dimension_numbers<[1], [0], [0], [1], [0, 0, 1, 1], [], []>} : vector<32x9xbf16>, vector<9x64xbf16>, vector<32x64xf32> -> vector<32x64xf32>
    %302 = arith.addf %296, %301 : vector<32x64xf32>
    %303 = vector.extract_strided_slice %213 {offsets = [480, 0], sizes = [32, 9], strides = [1, 1]} : vector<800x9xf32> to vector<32x9xf32>
    %304 = arith.truncf %303 : vector<32x9xf32> to vector<32x9xbf16>
    %c15_173 = arith.constant 15 : index
    %c0_174 = arith.constant 0 : index
    %c0_175 = arith.constant 0 : index
    %305 = vector.load %arg9[%c15_173, %c0_174, %c0_175] : memref<25x9x64xbf16, #tpu.memory_space<vmem>>, vector<1x9x64xbf16>
    %306 = vector.shape_cast %305 : vector<1x9x64xbf16> to vector<9x64xbf16>
    %cst_176 = arith.constant dense<0.000000e+00> : vector<32x64xf32>
    %307 = tpu.matmul %304, %306, %cst_176 {dimension_numbers = #tpu.dot_dimension_numbers<[1], [0], [0], [1], [0, 0, 1, 1], [], []>} : vector<32x9xbf16>, vector<9x64xbf16>, vector<32x64xf32> -> vector<32x64xf32>
    %308 = arith.addf %302, %307 : vector<32x64xf32>
    %309 = vector.extract_strided_slice %213 {offsets = [512, 0], sizes = [32, 9], strides = [1, 1]} : vector<800x9xf32> to vector<32x9xf32>
    %310 = arith.truncf %309 : vector<32x9xf32> to vector<32x9xbf16>
    %c16_177 = arith.constant 16 : index
    %c0_178 = arith.constant 0 : index
    %c0_179 = arith.constant 0 : index
    %311 = vector.load %arg9[%c16_177, %c0_178, %c0_179] : memref<25x9x64xbf16, #tpu.memory_space<vmem>>, vector<1x9x64xbf16>
    %312 = vector.shape_cast %311 : vector<1x9x64xbf16> to vector<9x64xbf16>
    %cst_180 = arith.constant dense<0.000000e+00> : vector<32x64xf32>
    %313 = tpu.matmul %310, %312, %cst_180 {dimension_numbers = #tpu.dot_dimension_numbers<[1], [0], [0], [1], [0, 0, 1, 1], [], []>} : vector<32x9xbf16>, vector<9x64xbf16>, vector<32x64xf32> -> vector<32x64xf32>
    %314 = arith.addf %308, %313 : vector<32x64xf32>
    %315 = vector.extract_strided_slice %213 {offsets = [544, 0], sizes = [32, 9], strides = [1, 1]} : vector<800x9xf32> to vector<32x9xf32>
    %316 = arith.truncf %315 : vector<32x9xf32> to vector<32x9xbf16>
    %c17_181 = arith.constant 17 : index
    %c0_182 = arith.constant 0 : index
    %c0_183 = arith.constant 0 : index
    %317 = vector.load %arg9[%c17_181, %c0_182, %c0_183] : memref<25x9x64xbf16, #tpu.memory_space<vmem>>, vector<1x9x64xbf16>
    %318 = vector.shape_cast %317 : vector<1x9x64xbf16> to vector<9x64xbf16>
    %cst_184 = arith.constant dense<0.000000e+00> : vector<32x64xf32>
    %319 = tpu.matmul %316, %318, %cst_184 {dimension_numbers = #tpu.dot_dimension_numbers<[1], [0], [0], [1], [0, 0, 1, 1], [], []>} : vector<32x9xbf16>, vector<9x64xbf16>, vector<32x64xf32> -> vector<32x64xf32>
    %320 = arith.addf %314, %319 : vector<32x64xf32>
    %321 = vector.extract_strided_slice %213 {offsets = [576, 0], sizes = [32, 9], strides = [1, 1]} : vector<800x9xf32> to vector<32x9xf32>
    %322 = arith.truncf %321 : vector<32x9xf32> to vector<32x9xbf16>
    %c18_185 = arith.constant 18 : index
    %c0_186 = arith.constant 0 : index
    %c0_187 = arith.constant 0 : index
    %323 = vector.load %arg9[%c18_185, %c0_186, %c0_187] : memref<25x9x64xbf16, #tpu.memory_space<vmem>>, vector<1x9x64xbf16>
    %324 = vector.shape_cast %323 : vector<1x9x64xbf16> to vector<9x64xbf16>
    %cst_188 = arith.constant dense<0.000000e+00> : vector<32x64xf32>
    %325 = tpu.matmul %322, %324, %cst_188 {dimension_numbers = #tpu.dot_dimension_numbers<[1], [0], [0], [1], [0, 0, 1, 1], [], []>} : vector<32x9xbf16>, vector<9x64xbf16>, vector<32x64xf32> -> vector<32x64xf32>
    %326 = arith.addf %320, %325 : vector<32x64xf32>
    %327 = vector.extract_strided_slice %213 {offsets = [608, 0], sizes = [32, 9], strides = [1, 1]} : vector<800x9xf32> to vector<32x9xf32>
    %328 = arith.truncf %327 : vector<32x9xf32> to vector<32x9xbf16>
    %c19_189 = arith.constant 19 : index
    %c0_190 = arith.constant 0 : index
    %c0_191 = arith.constant 0 : index
    %329 = vector.load %arg9[%c19_189, %c0_190, %c0_191] : memref<25x9x64xbf16, #tpu.memory_space<vmem>>, vector<1x9x64xbf16>
    %330 = vector.shape_cast %329 : vector<1x9x64xbf16> to vector<9x64xbf16>
    %cst_192 = arith.constant dense<0.000000e+00> : vector<32x64xf32>
    %331 = tpu.matmul %328, %330, %cst_192 {dimension_numbers = #tpu.dot_dimension_numbers<[1], [0], [0], [1], [0, 0, 1, 1], [], []>} : vector<32x9xbf16>, vector<9x64xbf16>, vector<32x64xf32> -> vector<32x64xf32>
    %332 = arith.addf %326, %331 : vector<32x64xf32>
    %333 = vector.extract_strided_slice %213 {offsets = [640, 0], sizes = [32, 9], strides = [1, 1]} : vector<800x9xf32> to vector<32x9xf32>
    %334 = arith.truncf %333 : vector<32x9xf32> to vector<32x9xbf16>
    %c20_193 = arith.constant 20 : index
    %c0_194 = arith.constant 0 : index
    %c0_195 = arith.constant 0 : index
    %335 = vector.load %arg9[%c20_193, %c0_194, %c0_195] : memref<25x9x64xbf16, #tpu.memory_space<vmem>>, vector<1x9x64xbf16>
    %336 = vector.shape_cast %335 : vector<1x9x64xbf16> to vector<9x64xbf16>
    %cst_196 = arith.constant dense<0.000000e+00> : vector<32x64xf32>
    %337 = tpu.matmul %334, %336, %cst_196 {dimension_numbers = #tpu.dot_dimension_numbers<[1], [0], [0], [1], [0, 0, 1, 1], [], []>} : vector<32x9xbf16>, vector<9x64xbf16>, vector<32x64xf32> -> vector<32x64xf32>
    %338 = arith.addf %332, %337 : vector<32x64xf32>
    %339 = vector.extract_strided_slice %213 {offsets = [672, 0], sizes = [32, 9], strides = [1, 1]} : vector<800x9xf32> to vector<32x9xf32>
    %340 = arith.truncf %339 : vector<32x9xf32> to vector<32x9xbf16>
    %c21_197 = arith.constant 21 : index
    %c0_198 = arith.constant 0 : index
    %c0_199 = arith.constant 0 : index
    %341 = vector.load %arg9[%c21_197, %c0_198, %c0_199] : memref<25x9x64xbf16, #tpu.memory_space<vmem>>, vector<1x9x64xbf16>
    %342 = vector.shape_cast %341 : vector<1x9x64xbf16> to vector<9x64xbf16>
    %cst_200 = arith.constant dense<0.000000e+00> : vector<32x64xf32>
    %343 = tpu.matmul %340, %342, %cst_200 {dimension_numbers = #tpu.dot_dimension_numbers<[1], [0], [0], [1], [0, 0, 1, 1], [], []>} : vector<32x9xbf16>, vector<9x64xbf16>, vector<32x64xf32> -> vector<32x64xf32>
    %344 = arith.addf %338, %343 : vector<32x64xf32>
    %345 = vector.extract_strided_slice %213 {offsets = [704, 0], sizes = [32, 9], strides = [1, 1]} : vector<800x9xf32> to vector<32x9xf32>
    %346 = arith.truncf %345 : vector<32x9xf32> to vector<32x9xbf16>
    %c22_201 = arith.constant 22 : index
    %c0_202 = arith.constant 0 : index
    %c0_203 = arith.constant 0 : index
    %347 = vector.load %arg9[%c22_201, %c0_202, %c0_203] : memref<25x9x64xbf16, #tpu.memory_space<vmem>>, vector<1x9x64xbf16>
    %348 = vector.shape_cast %347 : vector<1x9x64xbf16> to vector<9x64xbf16>
    %cst_204 = arith.constant dense<0.000000e+00> : vector<32x64xf32>
    %349 = tpu.matmul %346, %348, %cst_204 {dimension_numbers = #tpu.dot_dimension_numbers<[1], [0], [0], [1], [0, 0, 1, 1], [], []>} : vector<32x9xbf16>, vector<9x64xbf16>, vector<32x64xf32> -> vector<32x64xf32>
    %350 = arith.addf %344, %349 : vector<32x64xf32>
    %351 = vector.extract_strided_slice %213 {offsets = [736, 0], sizes = [32, 9], strides = [1, 1]} : vector<800x9xf32> to vector<32x9xf32>
    %352 = arith.truncf %351 : vector<32x9xf32> to vector<32x9xbf16>
    %c23_205 = arith.constant 23 : index
    %c0_206 = arith.constant 0 : index
    %c0_207 = arith.constant 0 : index
    %353 = vector.load %arg9[%c23_205, %c0_206, %c0_207] : memref<25x9x64xbf16, #tpu.memory_space<vmem>>, vector<1x9x64xbf16>
    %354 = vector.shape_cast %353 : vector<1x9x64xbf16> to vector<9x64xbf16>
    %cst_208 = arith.constant dense<0.000000e+00> : vector<32x64xf32>
    %355 = tpu.matmul %352, %354, %cst_208 {dimension_numbers = #tpu.dot_dimension_numbers<[1], [0], [0], [1], [0, 0, 1, 1], [], []>} : vector<32x9xbf16>, vector<9x64xbf16>, vector<32x64xf32> -> vector<32x64xf32>
    %356 = arith.addf %350, %355 : vector<32x64xf32>
    %357 = vector.extract_strided_slice %213 {offsets = [768, 0], sizes = [32, 9], strides = [1, 1]} : vector<800x9xf32> to vector<32x9xf32>
    %358 = arith.truncf %357 : vector<32x9xf32> to vector<32x9xbf16>
    %c24_209 = arith.constant 24 : index
    %c0_210 = arith.constant 0 : index
    %c0_211 = arith.constant 0 : index
    %359 = vector.load %arg9[%c24_209, %c0_210, %c0_211] : memref<25x9x64xbf16, #tpu.memory_space<vmem>>, vector<1x9x64xbf16>
    %360 = vector.shape_cast %359 : vector<1x9x64xbf16> to vector<9x64xbf16>
    %cst_212 = arith.constant dense<0.000000e+00> : vector<32x64xf32>
    %361 = tpu.matmul %358, %360, %cst_212 {dimension_numbers = #tpu.dot_dimension_numbers<[1], [0], [0], [1], [0, 0, 1, 1], [], []>} : vector<32x9xbf16>, vector<9x64xbf16>, vector<32x64xf32> -> vector<32x64xf32>
    %362 = arith.addf %356, %361 : vector<32x64xf32>
    %c0_213 = arith.constant 0 : index
    %c0_214 = arith.constant 0 : index
    %363 = vector.load %arg16[%c0_213, %c0_214] : memref<64x64xf32, #tpu.memory_space<vmem>>, vector<32x32xf32>
    %cst_215 = arith.constant dense<0.000000e+00> : vector<32xf32>
    %364 = vector.multi_reduction <add>, %362, %cst_215 [1] : vector<32x64xf32> to vector<32xf32>
    %365 = vector.shape_cast %364 : vector<32xf32> to vector<32x1xf32>
    %366 = arith.mulf %362, %362 : vector<32x64xf32>
    %cst_216 = arith.constant dense<0.000000e+00> : vector<32xf32>
    %367 = vector.multi_reduction <add>, %366, %cst_216 [1] : vector<32x64xf32> to vector<32xf32>
    %368 = vector.shape_cast %367 : vector<32xf32> to vector<32x1xf32>
    %cst_217 = arith.constant dense<0.000000e+00> : vector<32x1xf32>
    %369 = tpu.matmul %363, %365, %cst_217 {dimension_numbers = #tpu.dot_dimension_numbers<[1], [0], [0], [1], [0, 0, 1, 1], [], []>} : vector<32x32xf32>, vector<32x1xf32>, vector<32x1xf32> -> vector<32x1xf32>
    %cst_218 = arith.constant 7.812500e-03 : f32
    %370 = vector.broadcast %cst_218 : f32 to vector<32x1xf32>
    %371 = arith.mulf %369, %370 : vector<32x1xf32>
    %cst_219 = arith.constant dense<0.000000e+00> : vector<32x1xf32>
    %372 = tpu.matmul %363, %368, %cst_219 {dimension_numbers = #tpu.dot_dimension_numbers<[1], [0], [0], [1], [0, 0, 1, 1], [], []>} : vector<32x32xf32>, vector<32x1xf32>, vector<32x1xf32> -> vector<32x1xf32>
    %cst_220 = arith.constant 7.812500e-03 : f32
    %373 = vector.broadcast %cst_220 : f32 to vector<32x1xf32>
    %374 = arith.mulf %372, %373 : vector<32x1xf32>
    %375 = arith.mulf %371, %371 : vector<32x1xf32>
    %376 = arith.subf %374, %375 : vector<32x1xf32>
    %377 = vector.broadcast %371 : vector<32x1xf32> to vector<32x64xf32>
    %378 = arith.subf %362, %377 : vector<32x64xf32>
    %cst_221 = arith.constant 9.99999974E-6 : f32
    %379 = vector.broadcast %cst_221 : f32 to vector<32x1xf32>
    %380 = arith.addf %376, %379 : vector<32x1xf32>
    %381 = math.rsqrt %380 : vector<32x1xf32>
    %382 = vector.broadcast %381 : vector<32x1xf32> to vector<32x64xf32>
    %383 = arith.mulf %378, %382 : vector<32x64xf32>
    %c0_222 = arith.constant 0 : index
    %c0_223 = arith.constant 0 : index
    %384 = vector.load %arg10[%c0_222, %c0_223] : memref<32x1xf32, #tpu.memory_space<vmem>>, vector<32x1xf32>
    %385 = vector.broadcast %384 : vector<32x1xf32> to vector<32x64xf32>
    %386 = arith.mulf %383, %385 : vector<32x64xf32>
    %c0_224 = arith.constant 0 : index
    %c0_225 = arith.constant 0 : index
    %387 = vector.load %arg11[%c0_224, %c0_225] : memref<32x1xf32, #tpu.memory_space<vmem>>, vector<32x1xf32>
    %388 = vector.broadcast %387 : vector<32x1xf32> to vector<32x64xf32>
    %389 = arith.addf %386, %388 : vector<32x64xf32>
    %cst_226 = arith.constant 0.000000e+00 : f32
    %390 = vector.broadcast %cst_226 : f32 to vector<32x64xf32>
    %391 = arith.maximumf %389, %390 : vector<32x64xf32>
    %c0_227 = arith.constant 0 : index
    %c0_228 = arith.constant 0 : index
    %392 = vector.load %arg12[%c0_227, %c0_228] : memref<200x32xf32, #tpu.memory_space<vmem>>, vector<200x32xf32>
    %cst_229 = arith.constant dense<0.000000e+00> : vector<200x64xf32>
    %393 = tpu.matmul %392, %391, %cst_229 {dimension_numbers = #tpu.dot_dimension_numbers<[1], [0], [0], [1], [0, 0, 1, 1], [], []>} : vector<200x32xf32>, vector<32x64xf32>, vector<200x64xf32> -> vector<200x64xf32>
    %394 = vector.extract_strided_slice %393 {offsets = [0, 0], sizes = [8, 64], strides = [1, 1]} : vector<200x64xf32> to vector<8x64xf32>
    %395 = arith.truncf %394 : vector<8x64xf32> to vector<8x64xbf16>
    %c0_230 = arith.constant 0 : index
    %c0_231 = arith.constant 0 : index
    %c0_232 = arith.constant 0 : index
    %396 = vector.load %arg13[%c0_230, %c0_231, %c0_232] : memref<25x64x324xbf16, #tpu.memory_space<vmem>>, vector<1x64x324xbf16>
    %397 = vector.shape_cast %396 : vector<1x64x324xbf16> to vector<64x324xbf16>
    %cst_233 = arith.constant dense<0.000000e+00> : vector<8x324xf32>
    %398 = tpu.matmul %395, %397, %cst_233 {dimension_numbers = #tpu.dot_dimension_numbers<[1], [0], [0], [1], [0, 0, 1, 1], [], []>} : vector<8x64xbf16>, vector<64x324xbf16>, vector<8x324xf32> -> vector<8x324xf32>
    %399 = vector.extract_strided_slice %393 {offsets = [8, 0], sizes = [8, 64], strides = [1, 1]} : vector<200x64xf32> to vector<8x64xf32>
    %400 = arith.truncf %399 : vector<8x64xf32> to vector<8x64xbf16>
    %c1_234 = arith.constant 1 : index
    %c0_235 = arith.constant 0 : index
    %c0_236 = arith.constant 0 : index
    %401 = vector.load %arg13[%c1_234, %c0_235, %c0_236] : memref<25x64x324xbf16, #tpu.memory_space<vmem>>, vector<1x64x324xbf16>
    %402 = vector.shape_cast %401 : vector<1x64x324xbf16> to vector<64x324xbf16>
    %cst_237 = arith.constant dense<0.000000e+00> : vector<8x324xf32>
    %403 = tpu.matmul %400, %402, %cst_237 {dimension_numbers = #tpu.dot_dimension_numbers<[1], [0], [0], [1], [0, 0, 1, 1], [], []>} : vector<8x64xbf16>, vector<64x324xbf16>, vector<8x324xf32> -> vector<8x324xf32>
    %404 = arith.addf %398, %403 : vector<8x324xf32>
    %405 = vector.extract_strided_slice %393 {offsets = [16, 0], sizes = [8, 64], strides = [1, 1]} : vector<200x64xf32> to vector<8x64xf32>
    %406 = arith.truncf %405 : vector<8x64xf32> to vector<8x64xbf16>
    %c2_238 = arith.constant 2 : index
    %c0_239 = arith.constant 0 : index
    %c0_240 = arith.constant 0 : index
    %407 = vector.load %arg13[%c2_238, %c0_239, %c0_240] : memref<25x64x324xbf16, #tpu.memory_space<vmem>>, vector<1x64x324xbf16>
    %408 = vector.shape_cast %407 : vector<1x64x324xbf16> to vector<64x324xbf16>
    %cst_241 = arith.constant dense<0.000000e+00> : vector<8x324xf32>
    %409 = tpu.matmul %406, %408, %cst_241 {dimension_numbers = #tpu.dot_dimension_numbers<[1], [0], [0], [1], [0, 0, 1, 1], [], []>} : vector<8x64xbf16>, vector<64x324xbf16>, vector<8x324xf32> -> vector<8x324xf32>
    %410 = arith.addf %404, %409 : vector<8x324xf32>
    %411 = vector.extract_strided_slice %393 {offsets = [24, 0], sizes = [8, 64], strides = [1, 1]} : vector<200x64xf32> to vector<8x64xf32>
    %412 = arith.truncf %411 : vector<8x64xf32> to vector<8x64xbf16>
    %c3_242 = arith.constant 3 : index
    %c0_243 = arith.constant 0 : index
    %c0_244 = arith.constant 0 : index
    %413 = vector.load %arg13[%c3_242, %c0_243, %c0_244] : memref<25x64x324xbf16, #tpu.memory_space<vmem>>, vector<1x64x324xbf16>
    %414 = vector.shape_cast %413 : vector<1x64x324xbf16> to vector<64x324xbf16>
    %cst_245 = arith.constant dense<0.000000e+00> : vector<8x324xf32>
    %415 = tpu.matmul %412, %414, %cst_245 {dimension_numbers = #tpu.dot_dimension_numbers<[1], [0], [0], [1], [0, 0, 1, 1], [], []>} : vector<8x64xbf16>, vector<64x324xbf16>, vector<8x324xf32> -> vector<8x324xf32>
    %416 = arith.addf %410, %415 : vector<8x324xf32>
    %417 = vector.extract_strided_slice %393 {offsets = [32, 0], sizes = [8, 64], strides = [1, 1]} : vector<200x64xf32> to vector<8x64xf32>
    %418 = arith.truncf %417 : vector<8x64xf32> to vector<8x64xbf16>
    %c4_246 = arith.constant 4 : index
    %c0_247 = arith.constant 0 : index
    %c0_248 = arith.constant 0 : index
    %419 = vector.load %arg13[%c4_246, %c0_247, %c0_248] : memref<25x64x324xbf16, #tpu.memory_space<vmem>>, vector<1x64x324xbf16>
    %420 = vector.shape_cast %419 : vector<1x64x324xbf16> to vector<64x324xbf16>
    %cst_249 = arith.constant dense<0.000000e+00> : vector<8x324xf32>
    %421 = tpu.matmul %418, %420, %cst_249 {dimension_numbers = #tpu.dot_dimension_numbers<[1], [0], [0], [1], [0, 0, 1, 1], [], []>} : vector<8x64xbf16>, vector<64x324xbf16>, vector<8x324xf32> -> vector<8x324xf32>
    %422 = arith.addf %416, %421 : vector<8x324xf32>
    %423 = vector.extract_strided_slice %393 {offsets = [40, 0], sizes = [8, 64], strides = [1, 1]} : vector<200x64xf32> to vector<8x64xf32>
    %424 = arith.truncf %423 : vector<8x64xf32> to vector<8x64xbf16>
    %c5_250 = arith.constant 5 : index
    %c0_251 = arith.constant 0 : index
    %c0_252 = arith.constant 0 : index
    %425 = vector.load %arg13[%c5_250, %c0_251, %c0_252] : memref<25x64x324xbf16, #tpu.memory_space<vmem>>, vector<1x64x324xbf16>
    %426 = vector.shape_cast %425 : vector<1x64x324xbf16> to vector<64x324xbf16>
    %cst_253 = arith.constant dense<0.000000e+00> : vector<8x324xf32>
    %427 = tpu.matmul %424, %426, %cst_253 {dimension_numbers = #tpu.dot_dimension_numbers<[1], [0], [0], [1], [0, 0, 1, 1], [], []>} : vector<8x64xbf16>, vector<64x324xbf16>, vector<8x324xf32> -> vector<8x324xf32>
    %428 = arith.addf %422, %427 : vector<8x324xf32>
    %429 = vector.extract_strided_slice %393 {offsets = [48, 0], sizes = [8, 64], strides = [1, 1]} : vector<200x64xf32> to vector<8x64xf32>
    %430 = arith.truncf %429 : vector<8x64xf32> to vector<8x64xbf16>
    %c6_254 = arith.constant 6 : index
    %c0_255 = arith.constant 0 : index
    %c0_256 = arith.constant 0 : index
    %431 = vector.load %arg13[%c6_254, %c0_255, %c0_256] : memref<25x64x324xbf16, #tpu.memory_space<vmem>>, vector<1x64x324xbf16>
    %432 = vector.shape_cast %431 : vector<1x64x324xbf16> to vector<64x324xbf16>
    %cst_257 = arith.constant dense<0.000000e+00> : vector<8x324xf32>
    %433 = tpu.matmul %430, %432, %cst_257 {dimension_numbers = #tpu.dot_dimension_numbers<[1], [0], [0], [1], [0, 0, 1, 1], [], []>} : vector<8x64xbf16>, vector<64x324xbf16>, vector<8x324xf32> -> vector<8x324xf32>
    %434 = arith.addf %428, %433 : vector<8x324xf32>
    %435 = vector.extract_strided_slice %393 {offsets = [56, 0], sizes = [8, 64], strides = [1, 1]} : vector<200x64xf32> to vector<8x64xf32>
    %436 = arith.truncf %435 : vector<8x64xf32> to vector<8x64xbf16>
    %c7_258 = arith.constant 7 : index
    %c0_259 = arith.constant 0 : index
    %c0_260 = arith.constant 0 : index
    %437 = vector.load %arg13[%c7_258, %c0_259, %c0_260] : memref<25x64x324xbf16, #tpu.memory_space<vmem>>, vector<1x64x324xbf16>
    %438 = vector.shape_cast %437 : vector<1x64x324xbf16> to vector<64x324xbf16>
    %cst_261 = arith.constant dense<0.000000e+00> : vector<8x324xf32>
    %439 = tpu.matmul %436, %438, %cst_261 {dimension_numbers = #tpu.dot_dimension_numbers<[1], [0], [0], [1], [0, 0, 1, 1], [], []>} : vector<8x64xbf16>, vector<64x324xbf16>, vector<8x324xf32> -> vector<8x324xf32>
    %440 = arith.addf %434, %439 : vector<8x324xf32>
    %441 = vector.extract_strided_slice %393 {offsets = [64, 0], sizes = [8, 64], strides = [1, 1]} : vector<200x64xf32> to vector<8x64xf32>
    %442 = arith.truncf %441 : vector<8x64xf32> to vector<8x64xbf16>
    %c8_262 = arith.constant 8 : index
    %c0_263 = arith.constant 0 : index
    %c0_264 = arith.constant 0 : index
    %443 = vector.load %arg13[%c8_262, %c0_263, %c0_264] : memref<25x64x324xbf16, #tpu.memory_space<vmem>>, vector<1x64x324xbf16>
    %444 = vector.shape_cast %443 : vector<1x64x324xbf16> to vector<64x324xbf16>
    %cst_265 = arith.constant dense<0.000000e+00> : vector<8x324xf32>
    %445 = tpu.matmul %442, %444, %cst_265 {dimension_numbers = #tpu.dot_dimension_numbers<[1], [0], [0], [1], [0, 0, 1, 1], [], []>} : vector<8x64xbf16>, vector<64x324xbf16>, vector<8x324xf32> -> vector<8x324xf32>
    %446 = arith.addf %440, %445 : vector<8x324xf32>
    %447 = vector.extract_strided_slice %393 {offsets = [72, 0], sizes = [8, 64], strides = [1, 1]} : vector<200x64xf32> to vector<8x64xf32>
    %448 = arith.truncf %447 : vector<8x64xf32> to vector<8x64xbf16>
    %c9_266 = arith.constant 9 : index
    %c0_267 = arith.constant 0 : index
    %c0_268 = arith.constant 0 : index
    %449 = vector.load %arg13[%c9_266, %c0_267, %c0_268] : memref<25x64x324xbf16, #tpu.memory_space<vmem>>, vector<1x64x324xbf16>
    %450 = vector.shape_cast %449 : vector<1x64x324xbf16> to vector<64x324xbf16>
    %cst_269 = arith.constant dense<0.000000e+00> : vector<8x324xf32>
    %451 = tpu.matmul %448, %450, %cst_269 {dimension_numbers = #tpu.dot_dimension_numbers<[1], [0], [0], [1], [0, 0, 1, 1], [], []>} : vector<8x64xbf16>, vector<64x324xbf16>, vector<8x324xf32> -> vector<8x324xf32>
    %452 = arith.addf %446, %451 : vector<8x324xf32>
    %453 = vector.extract_strided_slice %393 {offsets = [80, 0], sizes = [8, 64], strides = [1, 1]} : vector<200x64xf32> to vector<8x64xf32>
    %454 = arith.truncf %453 : vector<8x64xf32> to vector<8x64xbf16>
    %c10_270 = arith.constant 10 : index
    %c0_271 = arith.constant 0 : index
    %c0_272 = arith.constant 0 : index
    %455 = vector.load %arg13[%c10_270, %c0_271, %c0_272] : memref<25x64x324xbf16, #tpu.memory_space<vmem>>, vector<1x64x324xbf16>
    %456 = vector.shape_cast %455 : vector<1x64x324xbf16> to vector<64x324xbf16>
    %cst_273 = arith.constant dense<0.000000e+00> : vector<8x324xf32>
    %457 = tpu.matmul %454, %456, %cst_273 {dimension_numbers = #tpu.dot_dimension_numbers<[1], [0], [0], [1], [0, 0, 1, 1], [], []>} : vector<8x64xbf16>, vector<64x324xbf16>, vector<8x324xf32> -> vector<8x324xf32>
    %458 = arith.addf %452, %457 : vector<8x324xf32>
    %459 = vector.extract_strided_slice %393 {offsets = [88, 0], sizes = [8, 64], strides = [1, 1]} : vector<200x64xf32> to vector<8x64xf32>
    %460 = arith.truncf %459 : vector<8x64xf32> to vector<8x64xbf16>
    %c11_274 = arith.constant 11 : index
    %c0_275 = arith.constant 0 : index
    %c0_276 = arith.constant 0 : index
    %461 = vector.load %arg13[%c11_274, %c0_275, %c0_276] : memref<25x64x324xbf16, #tpu.memory_space<vmem>>, vector<1x64x324xbf16>
    %462 = vector.shape_cast %461 : vector<1x64x324xbf16> to vector<64x324xbf16>
    %cst_277 = arith.constant dense<0.000000e+00> : vector<8x324xf32>
    %463 = tpu.matmul %460, %462, %cst_277 {dimension_numbers = #tpu.dot_dimension_numbers<[1], [0], [0], [1], [0, 0, 1, 1], [], []>} : vector<8x64xbf16>, vector<64x324xbf16>, vector<8x324xf32> -> vector<8x324xf32>
    %464 = arith.addf %458, %463 : vector<8x324xf32>
    %465 = vector.extract_strided_slice %393 {offsets = [96, 0], sizes = [8, 64], strides = [1, 1]} : vector<200x64xf32> to vector<8x64xf32>
    %466 = arith.truncf %465 : vector<8x64xf32> to vector<8x64xbf16>
    %c12_278 = arith.constant 12 : index
    %c0_279 = arith.constant 0 : index
    %c0_280 = arith.constant 0 : index
    %467 = vector.load %arg13[%c12_278, %c0_279, %c0_280] : memref<25x64x324xbf16, #tpu.memory_space<vmem>>, vector<1x64x324xbf16>
    %468 = vector.shape_cast %467 : vector<1x64x324xbf16> to vector<64x324xbf16>
    %cst_281 = arith.constant dense<0.000000e+00> : vector<8x324xf32>
    %469 = tpu.matmul %466, %468, %cst_281 {dimension_numbers = #tpu.dot_dimension_numbers<[1], [0], [0], [1], [0, 0, 1, 1], [], []>} : vector<8x64xbf16>, vector<64x324xbf16>, vector<8x324xf32> -> vector<8x324xf32>
    %470 = arith.addf %464, %469 : vector<8x324xf32>
    %471 = vector.extract_strided_slice %393 {offsets = [104, 0], sizes = [8, 64], strides = [1, 1]} : vector<200x64xf32> to vector<8x64xf32>
    %472 = arith.truncf %471 : vector<8x64xf32> to vector<8x64xbf16>
    %c13_282 = arith.constant 13 : index
    %c0_283 = arith.constant 0 : index
    %c0_284 = arith.constant 0 : index
    %473 = vector.load %arg13[%c13_282, %c0_283, %c0_284] : memref<25x64x324xbf16, #tpu.memory_space<vmem>>, vector<1x64x324xbf16>
    %474 = vector.shape_cast %473 : vector<1x64x324xbf16> to vector<64x324xbf16>
    %cst_285 = arith.constant dense<0.000000e+00> : vector<8x324xf32>
    %475 = tpu.matmul %472, %474, %cst_285 {dimension_numbers = #tpu.dot_dimension_numbers<[1], [0], [0], [1], [0, 0, 1, 1], [], []>} : vector<8x64xbf16>, vector<64x324xbf16>, vector<8x324xf32> -> vector<8x324xf32>
    %476 = arith.addf %470, %475 : vector<8x324xf32>
    %477 = vector.extract_strided_slice %393 {offsets = [112, 0], sizes = [8, 64], strides = [1, 1]} : vector<200x64xf32> to vector<8x64xf32>
    %478 = arith.truncf %477 : vector<8x64xf32> to vector<8x64xbf16>
    %c14_286 = arith.constant 14 : index
    %c0_287 = arith.constant 0 : index
    %c0_288 = arith.constant 0 : index
    %479 = vector.load %arg13[%c14_286, %c0_287, %c0_288] : memref<25x64x324xbf16, #tpu.memory_space<vmem>>, vector<1x64x324xbf16>
    %480 = vector.shape_cast %479 : vector<1x64x324xbf16> to vector<64x324xbf16>
    %cst_289 = arith.constant dense<0.000000e+00> : vector<8x324xf32>
    %481 = tpu.matmul %478, %480, %cst_289 {dimension_numbers = #tpu.dot_dimension_numbers<[1], [0], [0], [1], [0, 0, 1, 1], [], []>} : vector<8x64xbf16>, vector<64x324xbf16>, vector<8x324xf32> -> vector<8x324xf32>
    %482 = arith.addf %476, %481 : vector<8x324xf32>
    %483 = vector.extract_strided_slice %393 {offsets = [120, 0], sizes = [8, 64], strides = [1, 1]} : vector<200x64xf32> to vector<8x64xf32>
    %484 = arith.truncf %483 : vector<8x64xf32> to vector<8x64xbf16>
    %c15_290 = arith.constant 15 : index
    %c0_291 = arith.constant 0 : index
    %c0_292 = arith.constant 0 : index
    %485 = vector.load %arg13[%c15_290, %c0_291, %c0_292] : memref<25x64x324xbf16, #tpu.memory_space<vmem>>, vector<1x64x324xbf16>
    %486 = vector.shape_cast %485 : vector<1x64x324xbf16> to vector<64x324xbf16>
    %cst_293 = arith.constant dense<0.000000e+00> : vector<8x324xf32>
    %487 = tpu.matmul %484, %486, %cst_293 {dimension_numbers = #tpu.dot_dimension_numbers<[1], [0], [0], [1], [0, 0, 1, 1], [], []>} : vector<8x64xbf16>, vector<64x324xbf16>, vector<8x324xf32> -> vector<8x324xf32>
    %488 = arith.addf %482, %487 : vector<8x324xf32>
    %489 = vector.extract_strided_slice %393 {offsets = [128, 0], sizes = [8, 64], strides = [1, 1]} : vector<200x64xf32> to vector<8x64xf32>
    %490 = arith.truncf %489 : vector<8x64xf32> to vector<8x64xbf16>
    %c16_294 = arith.constant 16 : index
    %c0_295 = arith.constant 0 : index
    %c0_296 = arith.constant 0 : index
    %491 = vector.load %arg13[%c16_294, %c0_295, %c0_296] : memref<25x64x324xbf16, #tpu.memory_space<vmem>>, vector<1x64x324xbf16>
    %492 = vector.shape_cast %491 : vector<1x64x324xbf16> to vector<64x324xbf16>
    %cst_297 = arith.constant dense<0.000000e+00> : vector<8x324xf32>
    %493 = tpu.matmul %490, %492, %cst_297 {dimension_numbers = #tpu.dot_dimension_numbers<[1], [0], [0], [1], [0, 0, 1, 1], [], []>} : vector<8x64xbf16>, vector<64x324xbf16>, vector<8x324xf32> -> vector<8x324xf32>
    %494 = arith.addf %488, %493 : vector<8x324xf32>
    %495 = vector.extract_strided_slice %393 {offsets = [136, 0], sizes = [8, 64], strides = [1, 1]} : vector<200x64xf32> to vector<8x64xf32>
    %496 = arith.truncf %495 : vector<8x64xf32> to vector<8x64xbf16>
    %c17_298 = arith.constant 17 : index
    %c0_299 = arith.constant 0 : index
    %c0_300 = arith.constant 0 : index
    %497 = vector.load %arg13[%c17_298, %c0_299, %c0_300] : memref<25x64x324xbf16, #tpu.memory_space<vmem>>, vector<1x64x324xbf16>
    %498 = vector.shape_cast %497 : vector<1x64x324xbf16> to vector<64x324xbf16>
    %cst_301 = arith.constant dense<0.000000e+00> : vector<8x324xf32>
    %499 = tpu.matmul %496, %498, %cst_301 {dimension_numbers = #tpu.dot_dimension_numbers<[1], [0], [0], [1], [0, 0, 1, 1], [], []>} : vector<8x64xbf16>, vector<64x324xbf16>, vector<8x324xf32> -> vector<8x324xf32>
    %500 = arith.addf %494, %499 : vector<8x324xf32>
    %501 = vector.extract_strided_slice %393 {offsets = [144, 0], sizes = [8, 64], strides = [1, 1]} : vector<200x64xf32> to vector<8x64xf32>
    %502 = arith.truncf %501 : vector<8x64xf32> to vector<8x64xbf16>
    %c18_302 = arith.constant 18 : index
    %c0_303 = arith.constant 0 : index
    %c0_304 = arith.constant 0 : index
    %503 = vector.load %arg13[%c18_302, %c0_303, %c0_304] : memref<25x64x324xbf16, #tpu.memory_space<vmem>>, vector<1x64x324xbf16>
    %504 = vector.shape_cast %503 : vector<1x64x324xbf16> to vector<64x324xbf16>
    %cst_305 = arith.constant dense<0.000000e+00> : vector<8x324xf32>
    %505 = tpu.matmul %502, %504, %cst_305 {dimension_numbers = #tpu.dot_dimension_numbers<[1], [0], [0], [1], [0, 0, 1, 1], [], []>} : vector<8x64xbf16>, vector<64x324xbf16>, vector<8x324xf32> -> vector<8x324xf32>
    %506 = arith.addf %500, %505 : vector<8x324xf32>
    %507 = vector.extract_strided_slice %393 {offsets = [152, 0], sizes = [8, 64], strides = [1, 1]} : vector<200x64xf32> to vector<8x64xf32>
    %508 = arith.truncf %507 : vector<8x64xf32> to vector<8x64xbf16>
    %c19_306 = arith.constant 19 : index
    %c0_307 = arith.constant 0 : index
    %c0_308 = arith.constant 0 : index
    %509 = vector.load %arg13[%c19_306, %c0_307, %c0_308] : memref<25x64x324xbf16, #tpu.memory_space<vmem>>, vector<1x64x324xbf16>
    %510 = vector.shape_cast %509 : vector<1x64x324xbf16> to vector<64x324xbf16>
    %cst_309 = arith.constant dense<0.000000e+00> : vector<8x324xf32>
    %511 = tpu.matmul %508, %510, %cst_309 {dimension_numbers = #tpu.dot_dimension_numbers<[1], [0], [0], [1], [0, 0, 1, 1], [], []>} : vector<8x64xbf16>, vector<64x324xbf16>, vector<8x324xf32> -> vector<8x324xf32>
    %512 = arith.addf %506, %511 : vector<8x324xf32>
    %513 = vector.extract_strided_slice %393 {offsets = [160, 0], sizes = [8, 64], strides = [1, 1]} : vector<200x64xf32> to vector<8x64xf32>
    %514 = arith.truncf %513 : vector<8x64xf32> to vector<8x64xbf16>
    %c20_310 = arith.constant 20 : index
    %c0_311 = arith.constant 0 : index
    %c0_312 = arith.constant 0 : index
    %515 = vector.load %arg13[%c20_310, %c0_311, %c0_312] : memref<25x64x324xbf16, #tpu.memory_space<vmem>>, vector<1x64x324xbf16>
    %516 = vector.shape_cast %515 : vector<1x64x324xbf16> to vector<64x324xbf16>
    %cst_313 = arith.constant dense<0.000000e+00> : vector<8x324xf32>
    %517 = tpu.matmul %514, %516, %cst_313 {dimension_numbers = #tpu.dot_dimension_numbers<[1], [0], [0], [1], [0, 0, 1, 1], [], []>} : vector<8x64xbf16>, vector<64x324xbf16>, vector<8x324xf32> -> vector<8x324xf32>
    %518 = arith.addf %512, %517 : vector<8x324xf32>
    %519 = vector.extract_strided_slice %393 {offsets = [168, 0], sizes = [8, 64], strides = [1, 1]} : vector<200x64xf32> to vector<8x64xf32>
    %520 = arith.truncf %519 : vector<8x64xf32> to vector<8x64xbf16>
    %c21_314 = arith.constant 21 : index
    %c0_315 = arith.constant 0 : index
    %c0_316 = arith.constant 0 : index
    %521 = vector.load %arg13[%c21_314, %c0_315, %c0_316] : memref<25x64x324xbf16, #tpu.memory_space<vmem>>, vector<1x64x324xbf16>
    %522 = vector.shape_cast %521 : vector<1x64x324xbf16> to vector<64x324xbf16>
    %cst_317 = arith.constant dense<0.000000e+00> : vector<8x324xf32>
    %523 = tpu.matmul %520, %522, %cst_317 {dimension_numbers = #tpu.dot_dimension_numbers<[1], [0], [0], [1], [0, 0, 1, 1], [], []>} : vector<8x64xbf16>, vector<64x324xbf16>, vector<8x324xf32> -> vector<8x324xf32>
    %524 = arith.addf %518, %523 : vector<8x324xf32>
    %525 = vector.extract_strided_slice %393 {offsets = [176, 0], sizes = [8, 64], strides = [1, 1]} : vector<200x64xf32> to vector<8x64xf32>
    %526 = arith.truncf %525 : vector<8x64xf32> to vector<8x64xbf16>
    %c22_318 = arith.constant 22 : index
    %c0_319 = arith.constant 0 : index
    %c0_320 = arith.constant 0 : index
    %527 = vector.load %arg13[%c22_318, %c0_319, %c0_320] : memref<25x64x324xbf16, #tpu.memory_space<vmem>>, vector<1x64x324xbf16>
    %528 = vector.shape_cast %527 : vector<1x64x324xbf16> to vector<64x324xbf16>
    %cst_321 = arith.constant dense<0.000000e+00> : vector<8x324xf32>
    %529 = tpu.matmul %526, %528, %cst_321 {dimension_numbers = #tpu.dot_dimension_numbers<[1], [0], [0], [1], [0, 0, 1, 1], [], []>} : vector<8x64xbf16>, vector<64x324xbf16>, vector<8x324xf32> -> vector<8x324xf32>
    %530 = arith.addf %524, %529 : vector<8x324xf32>
    %531 = vector.extract_strided_slice %393 {offsets = [184, 0], sizes = [8, 64], strides = [1, 1]} : vector<200x64xf32> to vector<8x64xf32>
    %532 = arith.truncf %531 : vector<8x64xf32> to vector<8x64xbf16>
    %c23_322 = arith.constant 23 : index
    %c0_323 = arith.constant 0 : index
    %c0_324 = arith.constant 0 : index
    %533 = vector.load %arg13[%c23_322, %c0_323, %c0_324] : memref<25x64x324xbf16, #tpu.memory_space<vmem>>, vector<1x64x324xbf16>
    %534 = vector.shape_cast %533 : vector<1x64x324xbf16> to vector<64x324xbf16>
    %cst_325 = arith.constant dense<0.000000e+00> : vector<8x324xf32>
    %535 = tpu.matmul %532, %534, %cst_325 {dimension_numbers = #tpu.dot_dimension_numbers<[1], [0], [0], [1], [0, 0, 1, 1], [], []>} : vector<8x64xbf16>, vector<64x324xbf16>, vector<8x324xf32> -> vector<8x324xf32>
    %536 = arith.addf %530, %535 : vector<8x324xf32>
    %537 = vector.extract_strided_slice %393 {offsets = [192, 0], sizes = [8, 64], strides = [1, 1]} : vector<200x64xf32> to vector<8x64xf32>
    %538 = arith.truncf %537 : vector<8x64xf32> to vector<8x64xbf16>
    %c24_326 = arith.constant 24 : index
    %c0_327 = arith.constant 0 : index
    %c0_328 = arith.constant 0 : index
    %539 = vector.load %arg13[%c24_326, %c0_327, %c0_328] : memref<25x64x324xbf16, #tpu.memory_space<vmem>>, vector<1x64x324xbf16>
    %540 = vector.shape_cast %539 : vector<1x64x324xbf16> to vector<64x324xbf16>
    %cst_329 = arith.constant dense<0.000000e+00> : vector<8x324xf32>
    %541 = tpu.matmul %538, %540, %cst_329 {dimension_numbers = #tpu.dot_dimension_numbers<[1], [0], [0], [1], [0, 0, 1, 1], [], []>} : vector<8x64xbf16>, vector<64x324xbf16>, vector<8x324xf32> -> vector<8x324xf32>
    %542 = arith.addf %536, %541 : vector<8x324xf32>
    %c0_330 = arith.constant 0 : index
    %c0_331 = arith.constant 0 : index
    %543 = vector.load %arg16[%c0_330, %c0_331] : memref<64x64xf32, #tpu.memory_space<vmem>>, vector<8x8xf32>
    %cst_332 = arith.constant dense<0.000000e+00> : vector<8xf32>
    %544 = vector.multi_reduction <add>, %542, %cst_332 [1] : vector<8x324xf32> to vector<8xf32>
    %545 = vector.shape_cast %544 : vector<8xf32> to vector<8x1xf32>
    %546 = arith.mulf %542, %542 : vector<8x324xf32>
    %cst_333 = arith.constant dense<0.000000e+00> : vector<8xf32>
    %547 = vector.multi_reduction <add>, %546, %cst_333 [1] : vector<8x324xf32> to vector<8xf32>
    %548 = vector.shape_cast %547 : vector<8xf32> to vector<8x1xf32>
    %cst_334 = arith.constant dense<0.000000e+00> : vector<8x1xf32>
    %549 = tpu.matmul %543, %545, %cst_334 {dimension_numbers = #tpu.dot_dimension_numbers<[1], [0], [0], [1], [0, 0, 1, 1], [], []>} : vector<8x8xf32>, vector<8x1xf32>, vector<8x1xf32> -> vector<8x1xf32>
    %cst_335 = arith.constant 0.00154320989 : f32
    %550 = vector.broadcast %cst_335 : f32 to vector<8x1xf32>
    %551 = arith.mulf %549, %550 : vector<8x1xf32>
    %cst_336 = arith.constant dense<0.000000e+00> : vector<8x1xf32>
    %552 = tpu.matmul %543, %548, %cst_336 {dimension_numbers = #tpu.dot_dimension_numbers<[1], [0], [0], [1], [0, 0, 1, 1], [], []>} : vector<8x8xf32>, vector<8x1xf32>, vector<8x1xf32> -> vector<8x1xf32>
    %cst_337 = arith.constant 0.00154320989 : f32
    %553 = vector.broadcast %cst_337 : f32 to vector<8x1xf32>
    %554 = arith.mulf %552, %553 : vector<8x1xf32>
    %555 = arith.mulf %551, %551 : vector<8x1xf32>
    %556 = arith.subf %554, %555 : vector<8x1xf32>
    %557 = vector.broadcast %551 : vector<8x1xf32> to vector<8x324xf32>
    %558 = arith.subf %542, %557 : vector<8x324xf32>
    %cst_338 = arith.constant 9.99999974E-6 : f32
    %559 = vector.broadcast %cst_338 : f32 to vector<8x1xf32>
    %560 = arith.addf %556, %559 : vector<8x1xf32>
    %561 = math.rsqrt %560 : vector<8x1xf32>
    %562 = vector.broadcast %561 : vector<8x1xf32> to vector<8x324xf32>
    %563 = arith.mulf %558, %562 : vector<8x324xf32>
    %c0_339 = arith.constant 0 : index
    %c0_340 = arith.constant 0 : index
    %564 = vector.load %arg14[%c0_339, %c0_340] : memref<8x1xf32, #tpu.memory_space<vmem>>, vector<8x1xf32>
    %565 = vector.broadcast %564 : vector<8x1xf32> to vector<8x324xf32>
    %566 = arith.mulf %563, %565 : vector<8x324xf32>
    %c0_341 = arith.constant 0 : index
    %c0_342 = arith.constant 0 : index
    %567 = vector.load %arg15[%c0_341, %c0_342] : memref<8x1xf32, #tpu.memory_space<vmem>>, vector<8x1xf32>
    %568 = vector.broadcast %567 : vector<8x1xf32> to vector<8x324xf32>
    %569 = arith.addf %566, %568 : vector<8x324xf32>
    %cst_343 = arith.constant 0.000000e+00 : f32
    %570 = vector.broadcast %cst_343 : f32 to vector<8x324xf32>
    %571 = arith.maximumf %569, %570 : vector<8x324xf32>
    %572 = vector.extract_strided_slice %571 {offsets = [0, 0], sizes = [2, 324], strides = [1, 1]} : vector<8x324xf32> to vector<2x324xf32>
    %c0_344 = arith.constant 0 : index
    %c0_345 = arith.constant 0 : index
    %c0_346 = arith.constant 0 : index
    %573 = vector.load %arg17[%c0_344, %c0_345, %c0_346] : memref<4x324x60xf32, #tpu.memory_space<vmem>>, vector<1x324x60xf32>
    %574 = vector.shape_cast %573 : vector<1x324x60xf32> to vector<324x60xf32>
    %cst_347 = arith.constant dense<0.000000e+00> : vector<2x60xf32>
    %575 = tpu.matmul %572, %574, %cst_347 {dimension_numbers = #tpu.dot_dimension_numbers<[1], [0], [0], [1], [0, 0, 1, 1], [], []>} : vector<2x324xf32>, vector<324x60xf32>, vector<2x60xf32> -> vector<2x60xf32>
    %576 = vector.extract_strided_slice %571 {offsets = [2, 0], sizes = [2, 324], strides = [1, 1]} : vector<8x324xf32> to vector<2x324xf32>
    %c1_348 = arith.constant 1 : index
    %c0_349 = arith.constant 0 : index
    %c0_350 = arith.constant 0 : index
    %577 = vector.load %arg17[%c1_348, %c0_349, %c0_350] : memref<4x324x60xf32, #tpu.memory_space<vmem>>, vector<1x324x60xf32>
    %578 = vector.shape_cast %577 : vector<1x324x60xf32> to vector<324x60xf32>
    %cst_351 = arith.constant dense<0.000000e+00> : vector<2x60xf32>
    %579 = tpu.matmul %576, %578, %cst_351 {dimension_numbers = #tpu.dot_dimension_numbers<[1], [0], [0], [1], [0, 0, 1, 1], [], []>} : vector<2x324xf32>, vector<324x60xf32>, vector<2x60xf32> -> vector<2x60xf32>
    %580 = arith.addf %575, %579 : vector<2x60xf32>
    %581 = vector.extract_strided_slice %571 {offsets = [4, 0], sizes = [2, 324], strides = [1, 1]} : vector<8x324xf32> to vector<2x324xf32>
    %c2_352 = arith.constant 2 : index
    %c0_353 = arith.constant 0 : index
    %c0_354 = arith.constant 0 : index
    %582 = vector.load %arg17[%c2_352, %c0_353, %c0_354] : memref<4x324x60xf32, #tpu.memory_space<vmem>>, vector<1x324x60xf32>
    %583 = vector.shape_cast %582 : vector<1x324x60xf32> to vector<324x60xf32>
    %cst_355 = arith.constant dense<0.000000e+00> : vector<2x60xf32>
    %584 = tpu.matmul %581, %583, %cst_355 {dimension_numbers = #tpu.dot_dimension_numbers<[1], [0], [0], [1], [0, 0, 1, 1], [], []>} : vector<2x324xf32>, vector<324x60xf32>, vector<2x60xf32> -> vector<2x60xf32>
    %585 = arith.addf %580, %584 : vector<2x60xf32>
    %586 = vector.extract_strided_slice %571 {offsets = [6, 0], sizes = [2, 324], strides = [1, 1]} : vector<8x324xf32> to vector<2x324xf32>
    %c3_356 = arith.constant 3 : index
    %c0_357 = arith.constant 0 : index
    %c0_358 = arith.constant 0 : index
    %587 = vector.load %arg17[%c3_356, %c0_357, %c0_358] : memref<4x324x60xf32, #tpu.memory_space<vmem>>, vector<1x324x60xf32>
    %588 = vector.shape_cast %587 : vector<1x324x60xf32> to vector<324x60xf32>
    %cst_359 = arith.constant dense<0.000000e+00> : vector<2x60xf32>
    %589 = tpu.matmul %586, %588, %cst_359 {dimension_numbers = #tpu.dot_dimension_numbers<[1], [0], [0], [1], [0, 0, 1, 1], [], []>} : vector<2x324xf32>, vector<324x60xf32>, vector<2x60xf32> -> vector<2x60xf32>
    %590 = arith.addf %585, %589 : vector<2x60xf32>
    %c0_360 = arith.constant 0 : index
    %c0_361 = arith.constant 0 : index
    %591 = vector.load %arg18[%c0_360, %c0_361] : memref<1x60xf32, #tpu.memory_space<vmem>>, vector<1x60xf32>
    %592 = vector.broadcast %591 : vector<1x60xf32> to vector<2x60xf32>
    %593 = arith.addf %590, %592 : vector<2x60xf32>
    %cst_362 = arith.constant 0.000000e+00 : f32
    %594 = vector.broadcast %cst_362 : f32 to vector<2x60xf32>
    %595 = arith.maximumf %593, %594 : vector<2x60xf32>
    %c0_363 = arith.constant 0 : index
    %c0_364 = arith.constant 0 : index
    %596 = vector.load %arg19[%c0_363, %c0_364] : memref<60x4xf32, #tpu.memory_space<vmem>>, vector<60x4xf32>
    %cst_365 = arith.constant dense<0.000000e+00> : vector<2x4xf32>
    %597 = tpu.matmul %595, %596, %cst_365 {dimension_numbers = #tpu.dot_dimension_numbers<[1], [0], [0], [1], [0, 0, 1, 1], [], []>} : vector<2x60xf32>, vector<60x4xf32>, vector<2x4xf32> -> vector<2x4xf32>
    %c0_366 = arith.constant 0 : index
    %c0_367 = arith.constant 0 : index
    %598 = vector.load %arg20[%c0_366, %c0_367] : memref<1x4xf32, #tpu.memory_space<vmem>>, vector<1x4xf32>
    %599 = vector.broadcast %598 : vector<1x4xf32> to vector<2x4xf32>
    %600 = arith.addf %597, %599 : vector<2x4xf32>
    %c0_368 = arith.constant 0 : index
    %c0_369 = arith.constant 0 : index
    %601 = vector.load %arg21[%c0_368, %c0_369] : memref<2x4xf32, #tpu.memory_space<vmem>>, vector<2x4xf32>
    tpu.vector_store %arg21[%c0_368, %c0_369], %600 {strides = array<i32>} : memref<2x4xf32, #tpu.memory_space<vmem>>, vector<2x4xf32>,
    return
  }
}

</mosaic_0001>

<bundles_post_ra>
// kernel: forward.1
= control target key start
LH: loop header
LB: loop body
LE: loop exit
PB: predicated region body
PF: predicated region fallthrough
CT: control target
= control target key end

     0   :  { %s25474_s0 = inlined_call_operand.vmem [shape: f32[200,49], index: 0, kind: input, shape index: {}]   ;;  %s25475_s1 = inlined_call_operand.vmem [shape: f32[32,200], index: 1, kind: input, shape index: {}]   ;;  %s25476_s2 = inlined_call_operand.vmem [shape: f32[32,1], index: 2, kind: input, shape index: {}]   ;;  %s25477_s3 = inlined_call_operand.vmem [shape: f32[32,1], index: 3, kind: input, shape index: {}]   ;;  %s25478_s4 = inlined_call_operand.vmem [shape: f32[1600,32], index: 4, kind: input, shape index: {}]   ;;  %s25479_s5 = inlined_call_operand.vmem [shape: bf16[25,49,9], index: 5, kind: input, shape index: {}]   ;;  %s25480_s6 = inlined_call_operand.vmem [shape: f32[64,1], index: 6, kind: input, shape index: {}]   ;;  %s25481_s7 = inlined_call_operand.vmem [shape: f32[64,1], index: 7, kind: input, shape index: {}]   ;;  %s25482_s8 = inlined_call_operand.vmem [shape: f32[800,64], index: 8, kind: input, shape index: {}]   ;;  %s25483_s9 = inlined_call_operand.vmem [shape: bf16[25,9,64], index: 9, kind: input, shape index: {}]   ;;  %s25484_s10 = inlined_call_operand.vmem [shape: f32[32,1], index: 10, kind: input, shape index: {}]   ;;  %s25485_s11 = inlined_call_operand.vmem [shape: f32[32,1], index: 11, kind: input, shape index: {}]   ;;  %s25486_s12 = inlined_call_operand.vmem [shape: f32[200,32], index: 12, kind: input, shape index: {}]   ;;  %s25487_s13 = inlined_call_operand.vmem [shape: bf16[25,64,324], index: 13, kind: input, shape index: {}]   ;;  %s25488_s14 = inlined_call_operand.vmem [shape: f32[8,1], index: 14, kind: input, shape index: {}]   ;;  %s25489_s15 = inlined_call_operand.vmem [shape: f32[8,1], index: 15, kind: input, shape index: {}]   ;;  %s25490_s16 = inlined_call_operand.vmem [shape: f32[64,64], index: 16, kind: input, shape index: {}]   ;;  %s25491_s17 = inlined_call_operand.vmem [shape: f32[4,324,60], index: 17, kind: input, shape index: {}]   ;;  %s25492_s18 = inlined_call_operand.vmem [shape: f32[1,60], index: 18, kind: input, shape index: {}]   ;;  %s25493_s19 = inlined_call_operand.vmem [shape: f32[60,4], index: 19, kind: input, shape index: {}]   ;;  %s25494_s20 = inlined_call_operand.vmem [shape: f32[1,4], index: 20, kind: input, shape index: {}]   ;;  %s25495_s21 = inlined_call_operand.hbm [shape: f32[2,4], index: 21, kind: output, shape index: {}]  }
   0x1   :  { %25520 = sst [smem:[#allocation17_spill]] %s25474_s0 }
   0x2   :  { %25521 = sst [smem:[#allocation18_spill]] %s25475_s1 }
   0x3   :  { %25522 = sst [smem:[#allocation19_spill]] %s25476_s2 }
   0x4   :  { %25523 = sst [smem:[#allocation20_spill]] %s25477_s3 }
   0x5   :  { %25524 = sst [smem:[#allocation21_spill]] %s25478_s4 }
   0x6   :  { %25525 = sst [smem:[#allocation22_spill]] %s25479_s5 }
   0x7   :  { %s25526_s26 = sld [smem:[#allocation17_spill]]  ;;  %v25506_v3 = vmov 0.0|0.0   ;;  %vm103_vm0 = vcmask 588800   ;;  %s25527_s28 = sld [smem:[#allocation18_spill]]  ;;  %v25502_v40 = vmov 0.0  }
   0x8   :  { %19026 = vmatprep.subr.bf16.mxu0 %v25506_v3 }
   0xd   :  { %v78_v0 = vld [vmem:[%s25526_s26] sm:$0xff]  ;;  %v79_v1 = vld [vmem:[%s25526_s26 + $0x8] sm:$0xff]  ;;  %v80_v2 = vld [vmem:[%s25526_s26 + $0x10] sm:$0xff] }
   0xe   :  { %v19027_v4 = vpack.c.bf16 %v79_v1, %v78_v0  ;;  %v81_v5 = vld [vmem:[%s25526_s26 + $0x18] sm:$0xff]  ;;  %v82_v7 = vld [vmem:[%s25526_s26 + $0x20] sm:$0xff]  ;;  %v83_v8 = vld [vmem:[%s25526_s26 + $0x28] sm:$0xff] }
   0xf   :  { %v19030_v6 = vpack.c.bf16 %v81_v5, %v80_v2  ;;  %v19033_v9 = vpack.c.bf16 %v83_v8, %v82_v7  ;;  %v84_v10 = vld [vmem:[%s25526_s26 + $0x30] sm:$0xff]  ;;  %v85_v11 = vld [vmem:[%s25526_s26 + $0x38] sm:$0xff]  ;;  %v71_v12 = vld [vmem:[%s25527_s28 + $0x8] sm:$0xff] }
  0x10   :  { %19028 = vmatpush1.bf16.msra.mxu0 %v19027_v4  ;;  %14673 = vmatprep.mubr.msk.f32.mxu0 %vm103_vm0, %v71_v12  ;;  %v86_v13 = vld [vmem:[%s25526_s26 + $0x40] sm:$0xff]  ;;  %v87_v14 = vld [vmem:[%s25526_s26 + $0x48] sm:$0xff]  ;;  %v19036_v15 = vpack.c.bf16 %v85_v11, %v84_v10  ;;  %v88_v16 = vld [vmem:[%s25526_s26 + $0x50] sm:$0xff] }
  0x11   :  { %19029 = vmatprep.subr.bf16.mxu0 %v25506_v3  ;;  %v89_v17 = vld [vmem:[%s25526_s26 + $0x58] sm:$0xff]  ;;  %v19039_v18 = vpack.c.bf16 %v87_v14, %v86_v13  ;;  %v90_v19 = vld [vmem:[%s25526_s26 + $0x60] sm:$0xff]  ;;  %v91_v20 = vld [vmem:[%s25526_s26 + $0x68] sm:$0xff] }
  0x12   :  { %v19042_v21 = vpack.c.bf16 %v89_v17, %v88_v16  ;;  %v92_v22 = vld [vmem:[%s25526_s26 + $0x70] sm:$0xff]  ;;  %v93_v23 = vld [vmem:[%s25526_s26 + $0x78] sm:$0xff]  ;;  %v19045_v24 = vpack.c.bf16 %v91_v20, %v90_v19  ;;  %v94_v25 = vld [vmem:[%s25526_s26 + $0x80] sm:$0xff] }
  0x13   :  { %v95_v26 = vld [vmem:[%s25526_s26 + $0x88] sm:$0xff]  ;;  %v19048_v27 = vpack.c.bf16 %v93_v23, %v92_v22  ;;  %v96_v28 = vld [vmem:[%s25526_s26 + $0x90] sm:$0xff]  ;;  %v97_v29 = vld [vmem:[%s25526_s26 + $0x98] sm:$0xff] }
  0x14   :  { %19031 = vmatpush1.bf16.msra.mxu0 %v19030_v6  ;;  %v19051_v30 = vpack.c.bf16 %v95_v26, %v94_v25  ;;  %v98_v31 = vld [vmem:[%s25526_s26 + $0xa0] sm:$0xff]  ;;  %v99_v32 = vld [vmem:[%s25526_s26 + $0xa8] sm:$0xff]  ;;  %v19054_v33 = vpack.c.bf16 %v97_v29, %v96_v28  ;;  %v100_v34 = vld [vmem:[%s25526_s26 + $0xb0] sm:$0xff] }
  0x15   :  { %19032 = vmatprep.subr.bf16.mxu0 %v25506_v3  ;;  %v101_v35 = vld [vmem:[%s25526_s26 + $0xb8] sm:$0xff]  ;;  %v19057_v36 = vpack.c.bf16 %v99_v32, %v98_v31  ;;  %v102_v38 = vld [vmem:[%s25526_s26 + $0xc0] sm:$0xff]  ;;  %v72_v42 = vld [vmem:[%s25527_s28 + $0x10] sm:$0xff] }
  0x16   :  { %v19060_v37 = vpack.c.bf16 %v101_v35, %v100_v34  ;;  %v70_v39 = vld [vmem:[%s25527_s28] sm:$0xff]  ;;  %v73_v41 = vld [vmem:[%s25527_s28 + $0x18] sm:$0xff]  ;;  %v75_v43 = vld [vmem:[%s25527_s28 + $0x28] sm:$0xff] }
  0x17   :  { %v74_v44 = vld [vmem:[%s25527_s28 + $0x20] sm:$0xff]  ;;  %v77_v45 = vld [vmem:[%s25527_s28 + $0x38] sm:$0xff]  ;;  %v76_v46 = vld [vmem:[%s25527_s28 + $0x30] sm:$0xff] }
  0x18   :  { %19034 = vmatpush1.bf16.msra.mxu0 %v19033_v9 }
  0x19   :  { %19035 = vmatprep.subr.bf16.mxu0 %v25506_v3 }
  0x1c   :  { %19037 = vmatpush1.bf16.msra.mxu0 %v19036_v15 }
  0x1d   :  { %19038 = vmatprep.subr.bf16.mxu0 %v25506_v3 }
  0x20   :  { %19040 = vmatpush1.bf16.msra.mxu0 %v19039_v18 }
  0x21   :  { %19041 = vmatprep.subr.bf16.mxu0 %v25506_v3 }
  0x24   :  { %19043 = vmatpush1.bf16.msra.mxu0 %v19042_v21 }
  0x25   :  { %19044 = vmatprep.subr.bf16.mxu0 %v25506_v3 }
  0x28   :  { %19046 = vmatpush1.bf16.msra.mxu0 %v19045_v24 }
  0x29   :  { %19047 = vmatprep.subr.bf16.mxu0 %v25506_v3 }
  0x2c   :  { %19049 = vmatpush1.bf16.msra.mxu0 %v19048_v27 }
  0x2d   :  { %19050 = vmatprep.subr.bf16.mxu0 %v25506_v3 }
  0x30   :  { %19052 = vmatpush1.bf16.msra.mxu0 %v19051_v30 }
  0x31   :  { %19053 = vmatprep.subr.bf16.mxu0 %v25506_v3 }
  0x34   :  { %19055 = vmatpush1.bf16.msra.mxu0 %v19054_v33 }
  0x35   :  { %19056 = vmatprep.subr.bf16.mxu0 %v25506_v3 }
  0x38   :  { %19058 = vmatpush1.bf16.msra.mxu0 %v19057_v36 }
  0x39   :  { %19059 = vmatprep.subr.bf16.mxu0 %v25506_v3 }
  0x3c   :  { %19061 = vmatpush1.bf16.msra.mxu0 %v19060_v37 }
  0x3d   :  { %164 = vmatprep.subr.mxu0 %v25502_v40 }
  0x40   :  { %165 = vmatpush1.msra.mxu0 %v102_v38 }
  0x41   :  { %181 = vmatmul.mubr.f32.vlgmr.msra.gmra.mrb[0].mxu0 %v70_v39 }
  0x42   :  { %14674 = vmatprep.mubr.msk.f32.mxu0 %vm103_vm0, %v73_v41 }
  0x45   :  { %186 = vmatmul.mubr.f32.gmra.mrb[2].mxu0 %v72_v42 }
  0x46   :  { %14675 = vmatprep.mubr.msk.f32.mxu0 %vm103_vm0, %v75_v43 }
  0x49   :  { %191 = vmatmul.mubr.f32.gmra.mrb[4].mxu0 %v74_v44 }
  0x4a   :  { %14676 = vmatprep.mubr.msk.f32.mxu0 %vm103_vm0, %v77_v45 }
  0x4d   :  { %196 = vmatmul.mubr.f32.gmra.mrb[6].mxu0 %v76_v46 }
  0x4e   :  { %26 = vsyncpa [#allocation3], 0  ;;  %vm205_vm1 = vcmask 400384   ;;  %v201_v4 = vld [vmem:[%s25490_s16] sm:$0xff]  ;;  %vm234_vm2 = vcmask 261120   ;;  %s25528_s27 = sld [smem:[#allocation19_spill]] }
  0x4f   :  { %17402 = vmatprep.mubr.msk.f32.mxu1 %vm234_vm2, %v201_v4  ;;  %v25504_v6 = vmov 0   ;;  %s25529_s0 = sld [smem:[#allocation20_spill]]  ;;  %v202_v19 = vld [vmem:[%s25490_s16 + $0x8] sm:$0xff]  ;;  %v203_v21 = vld [vmem:[%s25490_s16 + $0x10] sm:$0xff]  ;;  %v204_v24 = vld [vmem:[%s25490_s16 + $0x18] sm:$0xff]  ;;  %s25530_s1 = sld [smem:[#allocation21_spill]] }
  0x50   :  { %19836 = vset.pattern.permute.xlu1 %v25504_v6  ;;  %19837 = vset.pattern.permute.xlu0 %v25504_v6  ;;  %vm2470_vm3 = vcmask 1040384   ;;  %vm5433_vm4 = vcmask 72704   ;;  %vm5490_vm5 = vcmask 523264   ;;  %vm6974_vm6 = vcmask 1043456   ;;  %s20431_s29 = smov [#allocation2]  }
  0x51   :  { %vm6975_vm7 = vcmask 1044480   ;;  %vm20429_vm8 = vmmov 0   ;;  %vm13589_vm9 = vcmask 556032   ;;  %vm13602_vm10 = vcmask 64512   ;;  %s14665_s26 = sshll.u32 %s20431_s29, 4  ;;  %s14666_s26 = int_to_ptr.vmem [resolvable:$true] %s14665_s26 }
  0x52   :  { %vm20430_vm11 = vmmov 1   ;;  %vm14580_vm13 = vcmask 490496   ;;  %vm14657_vm14 = vcmask 25600   ;;  %p20406_p1 = scmp.lt.s32.totalorder %s14666_s26, %s14666_s26 }
  0x53   :  { %vm19343_vm12 = vmpackc.low %vm6974_vm6, %vm20430_vm11 }
  0x54   :  { %v489_v5 = vld [vmem:[%s25528_s27] sm:$0xff]  ;;  %v490_v8 = vld [vmem:[%s25528_s27 + $0x8] sm:$0xff]  ;;  %v491_v10 = vld [vmem:[%s25528_s27 + $0x10] sm:$0xff] }
  0x55   :  { %v518_v7 = vld [vmem:[%s25529_s0 + $0x8] sm:$0xff]  ;;  %v517_v9 = vld [vmem:[%s25529_s0] sm:$0xff]  ;;  %v492_v33 = vld [vmem:[%s25528_s27 + $0x18] sm:$0xff]  ;;  %s20401_s27 = scalar_lea.vmem %s14666_s26, 32 }
  0x56   :  { %p20402_p0 = scmp.ne.s32.totalorder %s14666_s26, %s20401_s27  ;;  %p20407_p2 = scmp.lt.s32.totalorder %s20401_s27, %s20401_s27 }
  0x58   :  { %p20408_p3 = por %p20407_p2, %p20406_p1 }
  0x5a   :  { %p20409_p4 = pnand %p20408_p3, %p20402_p0 }
 0x114   :  { %v20658_v47 = vpop.f32.mrb[0].mxu0 }
 0x115   :  { %v184_v48 = vpop.f32.mrb[1].mxu0  ;;  %v206_v49 = vsel %vm205_vm1, %v20658_v47, 0.0  ;;  %v218_v53 = vmul.f32 %v20658_v47, %v20658_v47 }
 0x116   :  { %207 = vadd.xlane.f32.xlu0 %v206_v49 }
 0x117   :  { %v222_v56 = vsel %vm205_vm1, %v218_v53, 0.0 }
 0x118   :  { %v20662_v50 = vpop.f32.mrb[2].mxu0 }
 0x119   :  { %v189_v51 = vpop.f32.mrb[3].mxu0  ;;  %v209_v52 = vsel %vm205_vm1, %v20662_v50, 0.0  ;;  %v219_v63 = vmul.f32 %v20662_v50, %v20662_v50 }
 0x11a   :  { %210 = vadd.xlane.f32.xlu0 %v209_v52 }
 0x11b   :  { %v225_v0 = vsel %vm205_vm1, %v219_v63, 0.0  ;;  %v520_v63 = vld [vmem:[%s25529_s0 + $0x18] sm:$0xff] }
 0x11c   :  { %v20668_v54 = vpop.f32.mrb[4].mxu0 }
 0x11d   :  { %v194_v55 = vpop.f32.mrb[5].mxu0  ;;  %v212_v57 = vsel %vm205_vm1, %v20668_v54, 0.0  ;;  %v220_v58 = vmul.f32 %v20668_v54, %v20668_v54 }
 0x11e   :  { %223 = vadd.xlane.f32.xlu0 %v222_v56  ;;  %213 = vadd.xlane.f32.xlu1 %v212_v57 }
 0x11f   :  { %v228_v61 = vsel %vm205_vm1, %v220_v58, 0.0 }
 0x120   :  { %v20675_v59 = vpop.f32.mrb[6].mxu0 }
 0x121   :  { %v199_v60 = vpop.f32.mrb[7].mxu0  ;;  %v215_v62 = vsel %vm205_vm1, %v20675_v59, 0.0  ;;  %v221_v1 = vmul.f32 %v20675_v59, %v20675_v59 }
 0x122   :  { %229 = vadd.xlane.f32.xlu0 %v228_v61  ;;  %216 = vadd.xlane.f32.xlu1 %v215_v62 }
 0x123   :  { %v231_v2 = vsel %vm205_vm1, %v221_v1, 0.0  ;;  %v519_v1 = vld [vmem:[%s25529_s0 + $0x10] sm:$0xff]  ;;  %s25531_s0 = sld [smem:[#allocation22_spill]] }
 0x126   :  { %226 = vadd.xlane.f32.xlu1 %v225_v0 }
 0x12a   :  { %232 = vadd.xlane.f32.xlu1 %v231_v2  ;;  %v549_v2 = vld [vmem:[%s25530_s1] sm:$0xff] }
 0x12b   :  { %17430 = vmatprep.mubr.msk.f32.mxu0 %vm234_vm2, %v549_v2  ;;  %v572_v2 = vld [vmem:[%s25530_s1 + $0xb8] sm:$0xff] }
 0x138   :  { %528 = vperm.xlu0 %19837, %v518_v7  }
 0x13b   :  { %495 = vperm.xlu1 %19836, %v489_v5  }
 0x13f   :  { %500 = vperm.xlu1 %19836, %v490_v8  }
 0x143   :  { %523 = vperm.xlu1 %19836, %v517_v9  }
 0x147   :  { %505 = vperm.xlu1 %19836, %v491_v10  }
 0x1a3   :  { %v208_v11 = vpop.xlane.xlu0 %207 }
 0x1a7   :  { %v211_v12 = vpop.xlane.xlu0 %210 }
 0x1a8   :  { %v19062_v13 = vpack.c.bf16 %v211_v12, %v208_v11 }
 0x1aa   :  { %19063 = vmatprep.subr.bf16.mxu1 %v19062_v13 }
 0x1ab   :  { %19065 = vmatpush3.bf16.msra.mxu1 %v19062_v13  ;;  %v214_v14 = vpop.xlane.xlu1 %213  ;;  %v224_v17 = vpop.xlane.xlu0 %223 }
 0x1af   :  { %v217_v15 = vpop.xlane.xlu1 %216  ;;  %v230_v22 = vpop.xlane.xlu0 %229 }
 0x1b0   :  { %v19066_v16 = vpack.c.bf16 %v217_v15, %v214_v14 }
 0x1b2   :  { %19067 = vmatprep.subr.bf16.mxu1 %v19066_v16 }
 0x1b3   :  { %19069 = vmatpush3.bf16.msra.mxu1 %v19066_v16  ;;  %v227_v18 = vpop.xlane.xlu1 %226 }
 0x1b4   :  { %v19070_v20 = vpack.c.bf16 %v227_v18, %v224_v17 }
 0x1b6   :  { %17403 = vmatmul.mubr.msk.f32.vlgmr.msra.gmra.mrb[0].mxu1 %vm234_vm2, %v202_v19  ;;  %19071 = vmatprep.subr.bf16.mxu1 %v19070_v20 }
 0x1b7   :  { %19073 = vmatpush3.bf16.msra.mxu1 %v19070_v20  ;;  %v233_v23 = vpop.xlane.xlu1 %232  ;;  %17405 = vmatprep.mubr.msk.f32.mxu1 %vm234_vm2, %v203_v21  ;;  %v529_v10 = vpop.permute.xlu0 %528 }
 0x1b8   :  { %v19074_v25 = vpack.c.bf16 %v233_v23, %v230_v22 }
 0x1ba   :  { %17406 = vmatmul.mubr.msk.f32.gmra.mrb[2].mxu1 %vm234_vm2, %v204_v24  ;;  %19075 = vmatprep.subr.bf16.mxu1 %v19074_v25 }
 0x1bb   :  { %19077 = vmatpush3.bf16.msra.mxu1 %v19074_v25  ;;  %17416 = vmatprep.mubr.msk.f32.mxu1 %vm234_vm2, %v201_v4  ;;  %v496_v4 = vpop.permute.xlu1 %495 }
 0x1be   :  { %17417 = vmatmul.mubr.msk.f32.vlgmr.msra.gmra.mrb[4].mxu1 %vm234_vm2, %v202_v19 }
 0x1bf   :  { %17419 = vmatprep.mubr.msk.f32.mxu1 %vm234_vm2, %v203_v21  ;;  %v501_v5 = vpop.permute.xlu1 %500 }
 0x1c2   :  { %17420 = vmatmul.mubr.msk.f32.gmra.mrb[6].mxu1 %vm234_vm2, %v204_v24 }
 0x1c3   :  { %v524_v7 = vpop.permute.xlu1 %523 }
 0x1c7   :  { %v506_v8 = vpop.permute.xlu1 %505 }
 0x289   :  { %v17404_v26 = vpop.f32.mrb[0].mxu1 }
 0x28a   :  { %v333_v27 = vmul.f32 0.010204081, %v17404_v26  ;;  %v313_v28 = vpop.f32.mrb[1].mxu1 }
 0x28b   :  { %v332_v29 = vmul.f32 0.010204081, %v313_v28 }
 0x28c   :  { %440 = vperm.xlu1 %19836, %v333_v27   ;;  %v426_v35 = vmul.f32 %v333_v27, %v333_v27 }
 0x28d   :  { %435 = vperm.xlu0 %19837, %v332_v29   ;;  %v17407_v30 = vpop.f32.mrb[2].mxu1  ;;  %v425_v39 = vmul.f32 %v332_v29, %v332_v29 }
 0x28e   :  { %v335_v31 = vmul.f32 0.010204081, %v17407_v30  ;;  %v323_v32 = vpop.f32.mrb[3].mxu1 }
 0x28f   :  { %v334_v36 = vmul.f32 0.010204081, %v323_v32 }
 0x290   :  { %450 = vperm.xlu1 %19836, %v335_v31   ;;  %v428_v45 = vmul.f32 %v335_v31, %v335_v31 }
 0x291   :  { %v17418_v34 = vpop.f32.mrb[4].mxu1  ;;  %510 = vperm.xlu0 %19837, %v492_v33   ;;  %v427_v51 = vmul.f32 %v334_v36, %v334_v36 }
 0x292   :  { %v422_v37 = vmul.f32 0.010204081, %v17418_v34  ;;  %v402_v38 = vpop.f32.mrb[5].mxu1 }
 0x293   :  { %v421_v41 = vmul.f32 0.010204081, %v402_v38 }
 0x294   :  { %v430_v42 = vsub.f32 %v422_v37, %v426_v35  ;;  %445 = vperm.xlu1 %19836, %v334_v36  }
 0x295   :  { %v429_v43 = vsub.f32 %v421_v41, %v425_v39  ;;  %v17421_v44 = vpop.f32.mrb[6].mxu1  ;;  %v550_v39 = vld [vmem:[%s25530_s1 + $0x8] sm:$0xff]  ;;  %v551_v41 = vld [vmem:[%s25530_s1 + $0x10] sm:$0xff] }
 0x296   :  { %v458_v46 = vadd.f32 1e-05, %v430_v42  ;;  %v424_v48 = vmul.f32 0.010204081, %v17421_v44  ;;  %v412_v49 = vpop.f32.mrb[7].mxu1  ;;  %v552_v42 = vld [vmem:[%s25530_s1 + $0x18] sm:$0xff] }
 0x297   :  { %v457_v52 = vadd.f32 1e-05, %v429_v43  ;;  %v423_v53 = vmul.f32 0.010204081, %v412_v49  ;;  %v553_v43 = vld [vmem:[%s25530_s1 + $0x20] sm:$0xff]  ;;  %v554_v44 = vld [vmem:[%s25530_s1 + $0x28] sm:$0xff] }
 0x298   :  { %20363 = vrsqrt.f32 %v458_v46  ;;  %v432_v55 = vsub.f32 %v424_v48, %v428_v45  ;;  %v555_v45 = vld [vmem:[%s25530_s1 + $0x30] sm:$0xff]  ;;  %v556_v46 = vld [vmem:[%s25530_s1 + $0x38] sm:$0xff]  ;;  %v557_v48 = vld [vmem:[%s25530_s1 + $0x40] sm:$0xff] }
 0x299   :  { %v431_v56 = vsub.f32 %v423_v53, %v427_v51  ;;  %20365 = vrsqrt.f32 %v457_v52  ;;  %v558_v49 = vld [vmem:[%s25530_s1 + $0x48] sm:$0xff]  ;;  %v559_v51 = vld [vmem:[%s25530_s1 + $0x50] sm:$0xff]  ;;  %v560_v52 = vld [vmem:[%s25530_s1 + $0x58] sm:$0xff] }
 0x29a   :  { %v460_v57 = vadd.f32 1e-05, %v432_v55  ;;  %v561_v53 = vld [vmem:[%s25530_s1 + $0x60] sm:$0xff]  ;;  %v562_v55 = vld [vmem:[%s25530_s1 + $0x68] sm:$0xff] }
 0x29b   :  { %v459_v58 = vadd.f32 1e-05, %v431_v56  ;;  %v563_v56 = vld [vmem:[%s25530_s1 + $0x70] sm:$0xff] }
 0x29c   :  { %20367 = vrsqrt.f32 %v460_v57  ;;  %v564_v57 = vld [vmem:[%s25530_s1 + $0x78] sm:$0xff] }
 0x29d   :  { %20369 = vrsqrt.f32 %v459_v58  ;;  %v565_v58 = vld [vmem:[%s25530_s1 + $0x80] sm:$0xff] }
 0x2a2   :  { %v20364_v60 = vpop.eup %20363 }
 0x2a3   :  { %472 = vperm.xlu1 %19836, %v20364_v60   ;;  %v20366_v61 = vpop.eup %20365  ;;  %v566_v60 = vld [vmem:[%s25530_s1 + $0x88] sm:$0xff] }
 0x2a6   :  { %v20368_v62 = vpop.eup %20367 }
 0x2a7   :  { %467 = vperm.xlu1 %19836, %v20366_v61   ;;  %482 = vperm.xlu0 %19837, %v20368_v62   ;;  %v20370_v0 = vpop.eup %20369  ;;  %v567_v61 = vld [vmem:[%s25530_s1 + $0x90] sm:$0xff]  ;;  %v568_v62 = vld [vmem:[%s25530_s1 + $0x98] sm:$0xff] }
 0x2ab   :  { %538 = vperm.xlu0 %19837, %v520_v63   ;;  %477 = vperm.xlu1 %19836, %v20370_v0   ;;  %v569_v63 = vld [vmem:[%s25530_s1 + $0xa0] sm:$0xff]  ;;  %v570_v0 = vld [vmem:[%s25530_s1 + $0xa8] sm:$0xff] }
 0x2af   :  { %533 = vperm.xlu1 %19836, %v519_v1   ;;  %v571_v1 = vld [vmem:[%s25530_s1 + $0xb0] sm:$0xff] }
 0x30b   :  { %v441_v9 = vpop.permute.xlu1 %440 }
 0x30c   :  { %v436_v12 = vpop.permute.xlu0 %435  ;;  %v454_v14 = vsub.f32 %v20662_v50, %v441_v9  ;;  %v577_v9 = vld [vmem:[%s25530_s1 + $0xe0] sm:$0xff] }
 0x30d   :  { %v453_v18 = vsub.f32 %v20658_v47, %v436_v12  ;;  %v580_v12 = vld [vmem:[%s25530_s1 + $0xf8] sm:$0xff] }
 0x30f   :  { %v451_v11 = vpop.permute.xlu1 %450 }
 0x310   :  { %v511_v15 = vpop.permute.xlu0 %510  ;;  %v456_v19 = vsub.f32 %v20675_v59, %v451_v11  ;;  %v579_v11 = vld [vmem:[%s25530_s1 + $0xf0] sm:$0xff] }
 0x313   :  { %v446_v13 = vpop.permute.xlu1 %445 }
 0x314   :  { %v455_v25 = vsub.f32 %v20668_v54, %v446_v13  ;;  %v581_v13 = vld [vmem:[%s25530_s1 + $0x100] sm:$0xff] }
 0x322   :  { %v473_v16 = vpop.permute.xlu1 %472 }
 0x323   :  { %v486_v17 = vmul.f32 %v473_v16, %v454_v14  ;;  %v582_v14 = vld [vmem:[%s25530_s1 + $0x108] sm:$0xff]  ;;  %v19838_v16 = vld [vmem:[%s25531_s0 + $0x1c] sm:$0xff]  }
 0x325   :  { %v514_v20 = vmul.f32 %v501_v5, %v486_v17  ;;  %v574_v5 = vld [vmem:[%s25530_s1 + $0xc8] sm:$0xff]  ;;  %v584_v17 = vld [vmem:[%s25530_s1 + $0x118] sm:$0xff] }
 0x326   :  { %v483_v21 = vpop.permute.xlu0 %482  ;;  %v468_v22 = vpop.permute.xlu1 %467 }
 0x327   :  { %v488_v23 = vmul.f32 %v483_v21, %v456_v19  ;;  %v485_v24 = vmul.f32 %v468_v22, %v453_v18  ;;  %v542_v26 = vadd.f32 %v529_v10, %v514_v20  ;;  %v578_v10 = vld [vmem:[%s25530_s1 + $0xe8] sm:$0xff]  ;;  %v585_v18 = vld [vmem:[%s25530_s1 + $0x120] sm:$0xff]  ;;  %v587_v20 = vld [vmem:[%s25530_s1 + $0x130] sm:$0xff] }
 0x328   :  { %v586_v19 = vld [vmem:[%s25530_s1 + $0x128] sm:$0xff]  ;;  %v588_v21 = vld [vmem:[%s25530_s1 + $0x138] sm:$0xff]  ;;  %v589_v22 = vld [vmem:[%s25530_s1 + $0x140] sm:$0xff] }
 0x329   :  { %v513_v27 = vmul.f32 %v496_v4, %v485_v24  ;;  %v516_v28 = vmul.f32 %v511_v15, %v488_v23  ;;  %v546_v32 = vmax.f32 %v542_v26, 0.0  ;;  %v573_v4 = vld [vmem:[%s25530_s1 + $0xc0] sm:$0xff]  ;;  %v583_v15 = vld [vmem:[%s25530_s1 + $0x110] sm:$0xff]  ;;  %v590_v23 = vld [vmem:[%s25530_s1 + $0x148] sm:$0xff] }
 0x32a   :  { %v539_v29 = vpop.permute.xlu0 %538  ;;  %v478_v30 = vpop.permute.xlu1 %477  ;;  %v591_v24 = vld [vmem:[%s25530_s1 + $0x150] sm:$0xff]  ;;  %v593_v26 = vld [vmem:[%s25530_s1 + $0x160] sm:$0xff] }
 0x32b   :  { %v541_v50 = vadd.f32 %v524_v7, %v513_v27  ;;  %v487_v31 = vmul.f32 %v478_v30, %v455_v25  ;;  %v544_v34 = vadd.f32 %v539_v29, %v516_v28  ;;  %v575_v7 = vld [vmem:[%s25530_s1 + $0xd0] sm:$0xff]  ;;  %v592_v25 = vld [vmem:[%s25530_s1 + $0x158] sm:$0xff]  ;;  %v594_v27 = vld [vmem:[%s25530_s1 + $0x168] sm:$0xff] }
 0x32c   :  { %v595_v28 = vld [vmem:[%s25530_s1 + $0x170] sm:$0xff]  ;;  %v596_v29 = vld [vmem:[%s25530_s1 + $0x178] sm:$0xff]  ;;  %v597_v30 = vld [vmem:[%s25530_s1 + $0x180] sm:$0xff] }
 0x32d   :  { %v545_v33 = vmax.f32 %v541_v50, 0.0  ;;  %v515_v47 = vmul.f32 %v506_v8, %v487_v31  ;;  %v548_v37 = vmax.f32 %v544_v34, 0.0  ;;  %v576_v8 = vld [vmem:[%s25530_s1 + $0xd8] sm:$0xff]  ;;  %v598_v50 = vld [vmem:[%s25530_s1 + $0x188] sm:$0xff]  ;;  %v599_v31 = vld [vmem:[%s25530_s1 + $0x190] sm:$0xff] }
 0x32e   :  { %v534_v35 = vpop.permute.xlu1 %533  ;;  %v19839_v34 = vld [vmem:[%s25531_s0 + $0x24] sm:$0xff]  }
 0x32f   :  { %v19078_v59 = vpack.c.bf16 %v546_v32, %v545_v33  ;;  %v543_v36 = vadd.f32 %v534_v35, %v515_v47  ;;  %v600_v32 = vld [vmem:[%s25530_s1 + $0x198] sm:$0xff]  ;;  %v601_v33 = vld [vmem:[%s25530_s1 + $0x1a0] sm:$0xff]  ;;  %v602_v47 = vld [vmem:[%s25530_s1 + $0x1a8] sm:$0xff] }
 0x330   :  { %v603_v35 = vld [vmem:[%s25530_s1 + $0x1b0] sm:$0xff] }
 0x331   :  { %v547_v38 = vmax.f32 %v543_v36, 0.0  ;;  %19079 = vmatprep.subr.bf16.mxu0 %v19078_v59  ;;  %19345 = vmatprep.subr.bf16.mxu1 %v19078_v59  ;;  %v19841_v36 = vld [vmem:[%s25531_s0 + $0x34] ss:$0 sps:$4 sm:$0x11]  }
 0x332   :  { %19081 = vmatpush3.bf16.msra.mxu0 %v19078_v59  ;;  %19347 = vmatpush3.bf16.msra.mxu1 %v19078_v59  ;;  %v19840_v59 = vld [vmem:[%s25531_s0 + $0x2c] sm:$0xff]  }
 0x333   :  { %v19082_v54 = vpack.c.bf16 %v548_v37, %v547_v38  ;;  %v604_v37 = vld [vmem:[%s25530_s1 + $0x1b8] sm:$0xff]  ;;  %v20972_v38 = vsel %vm2470_vm3, 65535, %v25504_v6 }
 0x335   :  { %19083 = vmatprep.subr.bf16.mxu0 %v19082_v54  ;;  %19346 = vmatprep.subr.bf16.mxu1 %v19082_v54 }
 0x336   :  { %19085 = vmatpush3.bf16.msra.mxu0 %v19082_v54  ;;  %19348 = vmatpush3.bf16.msra.mxu1 %v19082_v54  ;;  %v605_v54 = vld [vmem:[%s25530_s1 + $0x1c0] sm:$0xff] }
 0x337   :  { %17730 = vmatprep.subr.bf16.mxu0 %v19838_v16 }
 0x339   :  { %17431 = vmatmul.mubr.msk.f32.vlgmr.msra.gmra.mrb[8].mxu0 %vm234_vm2, %v550_v39  ;;  %v2474_v39 = vand.u32 %v19841_v36, %v20972_v38  ;;  %v639_v36 = vld [vmem:[%s25530_s1 + $0x2d0] sm:$0xff] }
 0x33a   :  { %17433 = vmatprep.mubr.msk.f32.mxu0 %vm234_vm2, %v551_v41  ;;  %17731 = vmatpush3.bf16.msra.mxu0 %v19838_v16  ;;  %v606_v41 = vld [vmem:[%s25530_s1 + $0x1c8] sm:$0xff]  ;;  %v679_v16 = vld [vmem:[%s25530_s1 + $0x410] sm:$0xff] }
 0x33b   :  { %17732 = vmatprep.subr.bf16.mxu0 %v19839_v34 }
 0x33d   :  { %17434 = vmatmul.mubr.msk.f32.gmra.mrb[10].mxu0 %vm234_vm2, %v552_v42  ;;  %v607_v42 = vld [vmem:[%s25530_s1 + $0x1d0] sm:$0xff] }
 0x33e   :  { %17436 = vmatprep.mubr.msk.f32.mxu0 %vm234_vm2, %v553_v43  ;;  %17733 = vmatpush3.bf16.msra.mxu0 %v19839_v34  ;;  %v20989_v43 = vld [vmem:[%s25531_s0] sm:$0xff]  }
 0x33f   :  { %17734 = vmatprep.subr.bf16.mxu0 %v19840_v59  ;;  %v637_v34 = vld [vmem:[%s25530_s1 + $0x2c0] sm:$0xff] }
 0x341   :  { %17437 = vmatmul.mubr.msk.f32.gmra.mrb[12].mxu0 %vm234_vm2, %v554_v44  ;;  %v608_v44 = vld [vmem:[%s25530_s1 + $0x1d8] sm:$0xff] }
 0x342   :  { %17439 = vmatprep.mubr.msk.f32.mxu0 %vm234_vm2, %v555_v45  ;;  %17735 = vmatpush3.bf16.msra.mxu0 %v19840_v59  ;;  %v609_v45 = vld [vmem:[%s25530_s1 + $0x1e0] sm:$0xff]  ;;  %v638_v59 = vld [vmem:[%s25530_s1 + $0x2c8] sm:$0xff] }
 0x343   :  { %17736 = vmatprep.subr.bf16.mxu0 %v2474_v39 }
 0x345   :  { %17440 = vmatmul.mubr.msk.f32.gmra.mrb[14].mxu0 %vm234_vm2, %v556_v46  ;;  %v610_v46 = vld [vmem:[%s25530_s1 + $0x1e8] sm:$0xff] }
 0x346   :  { %17442 = vmatprep.mubr.msk.f32.mxu0 %vm234_vm2, %v557_v48  ;;  %17737 = vmatpush3.bf16.msra.mxu0 %v2474_v39  ;;  %v611_v48 = vld [vmem:[%s25530_s1 + $0x1f0] sm:$0xff]  ;;  %v640_v39 = vld [vmem:[%s25530_s1 + $0x2d8] sm:$0xff] }
 0x347   :  { %17746 = vmatprep.subr.bf16.mxu0 %v20989_v43 }
 0x349   :  { %17443 = vmatmul.mubr.msk.f32.gmra.mrb[16].mxu0 %vm234_vm2, %v558_v49  ;;  %v612_v49 = vld [vmem:[%s25530_s1 + $0x1f8] sm:$0xff] }
 0x34a   :  { %17445 = vmatprep.mubr.msk.f32.mxu0 %vm234_vm2, %v559_v51  ;;  %v613_v51 = vld [vmem:[%s25530_s1 + $0x200] sm:$0xff] }
 0x34d   :  { %17446 = vmatmul.mubr.msk.f32.gmra.mrb[18].mxu0 %vm234_vm2, %v560_v52  ;;  %v614_v52 = vld [vmem:[%s25530_s1 + $0x208] sm:$0xff] }
 0x34e   :  { %17448 = vmatprep.mubr.msk.f32.mxu0 %vm234_vm2, %v561_v53  ;;  %v615_v53 = vld [vmem:[%s25530_s1 + $0x210] sm:$0xff] }
 0x351   :  { %17449 = vmatmul.mubr.msk.f32.gmra.mrb[20].mxu0 %vm234_vm2, %v562_v55  ;;  %v616_v55 = vld [vmem:[%s25530_s1 + $0x218] sm:$0xff] }
 0x352   :  { %17451 = vmatprep.mubr.msk.f32.mxu0 %vm234_vm2, %v563_v56  ;;  %v617_v56 = vld [vmem:[%s25530_s1 + $0x220] sm:$0xff] }
 0x355   :  { %17452 = vmatmul.mubr.msk.f32.gmra.mrb[22].mxu0 %vm234_vm2, %v564_v57  ;;  %v669_v57 = vld [vmem:[%s25530_s1 + $0x3c0] sm:$0xff] }
 0x356   :  { %17454 = vmatprep.mubr.msk.f32.mxu0 %vm234_vm2, %v565_v58  ;;  %17610 = vmatprep.mubr.msk.f32.mxu1 %vm234_vm2, %v669_v57  ;;  %v670_v58 = vld [vmem:[%s25530_s1 + $0x3c8] sm:$0xff]  ;;  %v647_v57 = vld [vmem:[%s25530_s1 + $0x310] sm:$0xff] }
 0x357   :  { %17611 = vmatmul.mubr.msk.f32.vlgmr.msra.gmra.mrb[8].mxu1 %vm234_vm2, %v670_v58  ;;  %v699_v58 = vld [vmem:[%s25530_s1 + $0x4b0] sm:$0xff] }
 0x359   :  { %17455 = vmatmul.mubr.msk.f32.gmra.mrb[24].mxu0 %vm234_vm2, %v566_v60  ;;  %v618_v60 = vld [vmem:[%s25530_s1 + $0x228] sm:$0xff] }
 0x35a   :  { %17457 = vmatprep.mubr.msk.f32.mxu0 %vm234_vm2, %v567_v61  ;;  %v619_v61 = vld [vmem:[%s25530_s1 + $0x230] sm:$0xff] }
 0x35d   :  { %17458 = vmatmul.mubr.msk.f32.gmra.mrb[26].mxu0 %vm234_vm2, %v568_v62  ;;  %v671_v62 = vld [vmem:[%s25530_s1 + $0x3d0] sm:$0xff] }
 0x35e   :  { %17460 = vmatprep.mubr.msk.f32.mxu0 %vm234_vm2, %v569_v63  ;;  %17613 = vmatprep.mubr.msk.f32.mxu1 %vm234_vm2, %v671_v62  ;;  %v672_v63 = vld [vmem:[%s25530_s1 + $0x3d8] sm:$0xff]  ;;  %v649_v62 = vld [vmem:[%s25530_s1 + $0x320] sm:$0xff] }
 0x35f   :  { %17614 = vmatmul.mubr.msk.f32.gmra.mrb[10].mxu1 %vm234_vm2, %v672_v63  ;;  %v701_v63 = vld [vmem:[%s25530_s1 + $0x4c0] sm:$0xff] }
 0x361   :  { %17461 = vmatmul.mubr.msk.f32.gmra.mrb[28].mxu0 %vm234_vm2, %v570_v0  ;;  %v620_v0 = vld [vmem:[%s25530_s1 + $0x238] sm:$0xff] }
 0x362   :  { %17463 = vmatprep.mubr.msk.f32.mxu0 %vm234_vm2, %v571_v1  ;;  %v621_v1 = vld [vmem:[%s25530_s1 + $0x240] sm:$0xff] }
 0x365   :  { %17464 = vmatmul.mubr.msk.f32.gmra.mrb[30].mxu0 %vm234_vm2, %v572_v2  ;;  %v673_v2 = vld [vmem:[%s25530_s1 + $0x3e0] sm:$0xff] }
 0x366   :  { %17466 = vmatprep.mubr.msk.f32.mxu0 %vm234_vm2, %v573_v4  ;;  %17616 = vmatprep.mubr.msk.f32.mxu1 %vm234_vm2, %v673_v2  ;;  %v674_v4 = vld [vmem:[%s25530_s1 + $0x3e8] sm:$0xff]  ;;  %v651_v2 = vld [vmem:[%s25530_s1 + $0x330] sm:$0xff] }
 0x367   :  { %17617 = vmatmul.mubr.msk.f32.gmra.mrb[12].mxu1 %vm234_vm2, %v674_v4  ;;  %v703_v4 = vld [vmem:[%s25530_s1 + $0x4d0] sm:$0xff] }
 0x369   :  { %17467 = vmatmul.mubr.msk.f32.gmra.mrb[32].mxu0 %vm234_vm2, %v574_v5  ;;  %v622_v5 = vld [vmem:[%s25530_s1 + $0x248] sm:$0xff] }
 0x36a   :  { %17469 = vmatprep.mubr.msk.f32.mxu0 %vm234_vm2, %v575_v7  ;;  %v623_v7 = vld [vmem:[%s25530_s1 + $0x250] sm:$0xff] }
 0x36d   :  { %17470 = vmatmul.mubr.msk.f32.gmra.mrb[34].mxu0 %vm234_vm2, %v576_v8  ;;  %v675_v8 = vld [vmem:[%s25530_s1 + $0x3f0] sm:$0xff] }
 0x36e   :  { %17472 = vmatprep.mubr.msk.f32.mxu0 %vm234_vm2, %v577_v9  ;;  %17619 = vmatprep.mubr.msk.f32.mxu1 %vm234_vm2, %v675_v8  ;;  %v676_v9 = vld [vmem:[%s25530_s1 + $0x3f8] sm:$0xff]  ;;  %v653_v8 = vld [vmem:[%s25530_s1 + $0x340] sm:$0xff] }
 0x36f   :  { %17620 = vmatmul.mubr.msk.f32.gmra.mrb[14].mxu1 %vm234_vm2, %v676_v9  ;;  %v705_v9 = vld [vmem:[%s25530_s1 + $0x4e0] sm:$0xff] }
 0x371   :  { %17473 = vmatmul.mubr.msk.f32.gmra.mrb[36].mxu0 %vm234_vm2, %v578_v10  ;;  %v624_v10 = vld [vmem:[%s25530_s1 + $0x258] sm:$0xff] }
 0x372   :  { %17475 = vmatprep.mubr.msk.f32.mxu0 %vm234_vm2, %v579_v11  ;;  %v625_v11 = vld [vmem:[%s25530_s1 + $0x260] sm:$0xff] }
 0x375   :  { %17476 = vmatmul.mubr.msk.f32.gmra.mrb[38].mxu0 %vm234_vm2, %v580_v12  ;;  %v677_v12 = vld [vmem:[%s25530_s1 + $0x400] sm:$0xff] }
 0x376   :  { %17478 = vmatprep.mubr.msk.f32.mxu0 %vm234_vm2, %v581_v13  ;;  %17622 = vmatprep.mubr.msk.f32.mxu1 %vm234_vm2, %v677_v12  ;;  %v678_v13 = vld [vmem:[%s25530_s1 + $0x408] sm:$0xff]  ;;  %v655_v12 = vld [vmem:[%s25530_s1 + $0x350] sm:$0xff] }
 0x377   :  { %17623 = vmatmul.mubr.msk.f32.gmra.mrb[16].mxu1 %vm234_vm2, %v678_v13  ;;  %v707_v13 = vld [vmem:[%s25530_s1 + $0x4f0] sm:$0xff] }
 0x378   :  { %17625 = vmatprep.mubr.msk.f32.mxu1 %vm234_vm2, %v679_v16  ;;  %v657_v16 = vld [vmem:[%s25530_s1 + $0x360] sm:$0xff] }
 0x379   :  { %17479 = vmatmul.mubr.msk.f32.gmra.mrb[40].mxu0 %vm234_vm2, %v582_v14  ;;  %v626_v14 = vld [vmem:[%s25530_s1 + $0x268] sm:$0xff] }
 0x37a   :  { %17481 = vmatprep.mubr.msk.f32.mxu0 %vm234_vm2, %v583_v15  ;;  %v627_v15 = vld [vmem:[%s25530_s1 + $0x270] sm:$0xff] }
 0x37d   :  { %17482 = vmatmul.mubr.msk.f32.gmra.mrb[42].mxu0 %vm234_vm2, %v584_v17  ;;  %v680_v17 = vld [vmem:[%s25530_s1 + $0x418] sm:$0xff] }
 0x37e   :  { %17484 = vmatprep.mubr.msk.f32.mxu0 %vm234_vm2, %v585_v18  ;;  %17626 = vmatmul.mubr.msk.f32.gmra.mrb[18].mxu1 %vm234_vm2, %v680_v17  ;;  %v628_v18 = vld [vmem:[%s25530_s1 + $0x278] sm:$0xff]  ;;  %v709_v17 = vld [vmem:[%s25530_s1 + $0x500] sm:$0xff] }
 0x381   :  { %17485 = vmatmul.mubr.msk.f32.gmra.mrb[44].mxu0 %vm234_vm2, %v586_v19  ;;  %v629_v19 = vld [vmem:[%s25530_s1 + $0x280] sm:$0xff] }
 0x382   :  { %17487 = vmatprep.mubr.msk.f32.mxu0 %vm234_vm2, %v587_v20  ;;  %v681_v20 = vld [vmem:[%s25530_s1 + $0x420] sm:$0xff] }
 0x383   :  { %17628 = vmatprep.mubr.msk.f32.mxu1 %vm234_vm2, %v681_v20 }
 0x385   :  { %17488 = vmatmul.mubr.msk.f32.gmra.mrb[46].mxu0 %vm234_vm2, %v588_v21  ;;  %v682_v21 = vld [vmem:[%s25530_s1 + $0x428] sm:$0xff] }
 0x386   :  { %17490 = vmatprep.mubr.msk.f32.mxu0 %vm234_vm2, %v589_v22  ;;  %17629 = vmatmul.mubr.msk.f32.gmra.mrb[20].mxu1 %vm234_vm2, %v682_v21  ;;  %v630_v22 = vld [vmem:[%s25530_s1 + $0x288] sm:$0xff] }
 0x389   :  { %17491 = vmatmul.mubr.msk.f32.gmra.mrb[48].mxu0 %vm234_vm2, %v590_v23  ;;  %v631_v23 = vld [vmem:[%s25530_s1 + $0x290] sm:$0xff] }
 0x38a   :  { %17493 = vmatprep.mubr.msk.f32.mxu0 %vm234_vm2, %v591_v24  ;;  %v683_v24 = vld [vmem:[%s25530_s1 + $0x430] sm:$0xff] }
 0x38b   :  { %17631 = vmatprep.mubr.msk.f32.mxu1 %vm234_vm2, %v683_v24  ;;  %v711_v24 = vld [vmem:[%s25530_s1 + $0x510] sm:$0xff] }
 0x38d   :  { %17494 = vmatmul.mubr.msk.f32.gmra.mrb[50].mxu0 %vm234_vm2, %v592_v25  ;;  %v684_v25 = vld [vmem:[%s25530_s1 + $0x438] sm:$0xff] }
 0x38e   :  { %17496 = vmatprep.mubr.msk.f32.mxu0 %vm234_vm2, %v593_v26  ;;  %17632 = vmatmul.mubr.msk.f32.gmra.mrb[22].mxu1 %vm234_vm2, %v684_v25  ;;  %v632_v26 = vld [vmem:[%s25530_s1 + $0x298] sm:$0xff] }
 0x391   :  { %17497 = vmatmul.mubr.msk.f32.gmra.mrb[52].mxu0 %vm234_vm2, %v594_v27  ;;  %v633_v27 = vld [vmem:[%s25530_s1 + $0x2a0] sm:$0xff] }
 0x392   :  { %17499 = vmatprep.mubr.msk.f32.mxu0 %vm234_vm2, %v595_v28  ;;  %v685_v28 = vld [vmem:[%s25530_s1 + $0x440] sm:$0xff] }
 0x393   :  { %17634 = vmatprep.mubr.msk.f32.mxu1 %vm234_vm2, %v685_v28 }
 0x395   :  { %17500 = vmatmul.mubr.msk.f32.gmra.mrb[54].mxu0 %vm234_vm2, %v596_v29  ;;  %v686_v29 = vld [vmem:[%s25530_s1 + $0x448] sm:$0xff] }
 0x396   :  { %17502 = vmatprep.mubr.msk.f32.mxu0 %vm234_vm2, %v597_v30  ;;  %17635 = vmatmul.mubr.msk.f32.gmra.mrb[24].mxu1 %vm234_vm2, %v686_v29  ;;  %v634_v30 = vld [vmem:[%s25530_s1 + $0x2a8] sm:$0xff]  ;;  %v660_v29 = vld [vmem:[%s25530_s1 + $0x378] sm:$0xff] }
 0x399   :  { %17503 = vmatmul.mubr.msk.f32.gmra.mrb[56].mxu0 %vm234_vm2, %v598_v50  ;;  %v635_v50 = vld [vmem:[%s25530_s1 + $0x2b0] sm:$0xff] }
 0x39a   :  { %17505 = vmatprep.mubr.msk.f32.mxu0 %vm234_vm2, %v599_v31  ;;  %v687_v31 = vld [vmem:[%s25530_s1 + $0x450] sm:$0xff] }
 0x39b   :  { %17637 = vmatprep.mubr.msk.f32.mxu1 %vm234_vm2, %v687_v31 }
 0x39d   :  { %17506 = vmatmul.mubr.msk.f32.gmra.mrb[58].mxu0 %vm234_vm2, %v600_v32  ;;  %v688_v32 = vld [vmem:[%s25530_s1 + $0x458] sm:$0xff] }
 0x39e   :  { %17508 = vmatprep.mubr.msk.f32.mxu0 %vm234_vm2, %v601_v33  ;;  %17638 = vmatmul.mubr.msk.f32.gmra.mrb[26].mxu1 %vm234_vm2, %v688_v32  ;;  %v636_v33 = vld [vmem:[%s25530_s1 + $0x2b8] sm:$0xff]  ;;  %v714_v32 = vld [vmem:[%s25530_s1 + $0x528] sm:$0xff] }
 0x3a1   :  { %17509 = vmatmul.mubr.msk.f32.gmra.mrb[60].mxu0 %vm234_vm2, %v602_v47  ;;  %v689_v47 = vld [vmem:[%s25530_s1 + $0x460] sm:$0xff] }
 0x3a2   :  { %17511 = vmatprep.mubr.msk.f32.mxu0 %vm234_vm2, %v603_v35  ;;  %17640 = vmatprep.mubr.msk.f32.mxu1 %vm234_vm2, %v689_v47  ;;  %v690_v35 = vld [vmem:[%s25530_s1 + $0x468] sm:$0xff] }
 0x3a3   :  { %17641 = vmatmul.mubr.msk.f32.gmra.mrb[28].mxu1 %vm234_vm2, %v690_v35  ;;  %v662_v47 = vld [vmem:[%s25530_s1 + $0x388] sm:$0xff]  ;;  %v663_v35 = vld [vmem:[%s25530_s1 + $0x390] sm:$0xff] }
 0x3a5   :  { %17512 = vmatmul.mubr.msk.f32.gmra.mrb[62].mxu0 %vm234_vm2, %v604_v37  ;;  %v691_v37 = vld [vmem:[%s25530_s1 + $0x470] sm:$0xff] }
 0x3a6   :  { %17514 = vmatprep.mubr.msk.f32.mxu0 %vm234_vm2, %v605_v54  ;;  %17643 = vmatprep.mubr.msk.f32.mxu1 %vm234_vm2, %v691_v37  ;;  %v692_v54 = vld [vmem:[%s25530_s1 + $0x478] sm:$0xff] }
 0x3a7   :  { %17644 = vmatmul.mubr.msk.f32.gmra.mrb[30].mxu1 %vm234_vm2, %v692_v54  ;;  %v716_v37 = vld [vmem:[%s25530_s1 + $0x538] sm:$0xff] }
 0x3a9   :  { %17515 = vmatmul.mubr.msk.f32.gmra.mrb[64].mxu0 %vm234_vm2, %v606_v41  ;;  %v641_v41 = vld [vmem:[%s25530_s1 + $0x2e0] sm:$0xff] }
 0x3aa   :  { %17517 = vmatprep.mubr.msk.f32.mxu0 %vm234_vm2, %v607_v42  ;;  %v693_v42 = vld [vmem:[%s25530_s1 + $0x480] sm:$0xff] }
 0x3ab   :  { %17646 = vmatprep.mubr.msk.f32.mxu1 %vm234_vm2, %v693_v42  ;;  %v665_v42 = vld [vmem:[%s25530_s1 + $0x3a0] sm:$0xff] }
 0x3ad   :  { %17518 = vmatmul.mubr.msk.f32.gmra.mrb[66].mxu0 %vm234_vm2, %v608_v44  ;;  %v694_v44 = vld [vmem:[%s25530_s1 + $0x488] sm:$0xff] }
 0x3ae   :  { %17520 = vmatprep.mubr.msk.f32.mxu0 %vm234_vm2, %v609_v45  ;;  %17647 = vmatmul.mubr.msk.f32.gmra.mrb[32].mxu1 %vm234_vm2, %v694_v44  ;;  %v642_v45 = vld [vmem:[%s25530_s1 + $0x2e8] sm:$0xff]  ;;  %v717_v44 = vld [vmem:[%s25530_s1 + $0x540] sm:$0xff] }
 0x3b1   :  { %17521 = vmatmul.mubr.msk.f32.gmra.mrb[68].mxu0 %vm234_vm2, %v610_v46  ;;  %v643_v46 = vld [vmem:[%s25530_s1 + $0x2f0] sm:$0xff] }
 0x3b2   :  { %17523 = vmatprep.mubr.msk.f32.mxu0 %vm234_vm2, %v611_v48  ;;  %v695_v48 = vld [vmem:[%s25530_s1 + $0x490] sm:$0xff] }
 0x3b3   :  { %17649 = vmatprep.mubr.msk.f32.mxu1 %vm234_vm2, %v695_v48 }
 0x3b5   :  { %17524 = vmatmul.mubr.msk.f32.gmra.mrb[70].mxu0 %vm234_vm2, %v612_v49  ;;  %v696_v49 = vld [vmem:[%s25530_s1 + $0x498] sm:$0xff] }
 0x3b6   :  { %17526 = vmatprep.mubr.msk.f32.mxu0 %vm234_vm2, %v613_v51  ;;  %17650 = vmatmul.mubr.msk.f32.gmra.mrb[34].mxu1 %vm234_vm2, %v696_v49  ;;  %v644_v51 = vld [vmem:[%s25530_s1 + $0x2f8] sm:$0xff] }
 0x3b9   :  { %17527 = vmatmul.mubr.msk.f32.gmra.mrb[72].mxu0 %vm234_vm2, %v614_v52  ;;  %v645_v52 = vld [vmem:[%s25530_s1 + $0x300] sm:$0xff] }
 0x3ba   :  { %17529 = vmatprep.mubr.msk.f32.mxu0 %vm234_vm2, %v615_v53  ;;  %v697_v53 = vld [vmem:[%s25530_s1 + $0x4a0] sm:$0xff] }
 0x3bb   :  { %17652 = vmatprep.mubr.msk.f32.mxu1 %vm234_vm2, %v697_v53  ;;  %v719_v53 = vld [vmem:[%s25530_s1 + $0x550] sm:$0xff] }
 0x3bd   :  { %17530 = vmatmul.mubr.msk.f32.gmra.mrb[74].mxu0 %vm234_vm2, %v616_v55  ;;  %v698_v55 = vld [vmem:[%s25530_s1 + $0x4a8] sm:$0xff] }
 0x3be   :  { %17532 = vmatprep.mubr.msk.f32.mxu0 %vm234_vm2, %v617_v56  ;;  %17653 = vmatmul.mubr.msk.f32.gmra.mrb[36].mxu1 %vm234_vm2, %v698_v55  ;;  %v646_v56 = vld [vmem:[%s25530_s1 + $0x308] sm:$0xff] }
 0x3bf   :  { %17655 = vmatprep.mubr.msk.f32.mxu1 %vm234_vm2, %v699_v58 }
 0x3c1   :  { %17533 = vmatmul.mubr.msk.f32.gmra.mrb[76].mxu0 %vm234_vm2, %v618_v60  ;;  %v700_v60 = vld [vmem:[%s25530_s1 + $0x4b8] sm:$0xff] }
 0x3c2   :  { %17535 = vmatprep.mubr.msk.f32.mxu0 %vm234_vm2, %v619_v61  ;;  %17656 = vmatmul.mubr.msk.f32.gmra.mrb[38].mxu1 %vm234_vm2, %v700_v60  ;;  %v648_v61 = vld [vmem:[%s25530_s1 + $0x318] sm:$0xff] }
 0x3c3   :  { %17658 = vmatprep.mubr.msk.f32.mxu1 %vm234_vm2, %v701_v63  ;;  %v668_v60 = vld [vmem:[%s25530_s1 + $0x3b8] sm:$0xff]  ;;  %v722_v63 = vld [vmem:[%s25530_s1 + $0x568] sm:$0xff] }
 0x3c5   :  { %17536 = vmatmul.mubr.msk.f32.gmra.mrb[78].mxu0 %vm234_vm2, %v620_v0  ;;  %v702_v0 = vld [vmem:[%s25530_s1 + $0x4c8] sm:$0xff] }
 0x3c6   :  { %17538 = vmatprep.mubr.msk.f32.mxu0 %vm234_vm2, %v621_v1  ;;  %17659 = vmatmul.mubr.msk.f32.gmra.mrb[40].mxu1 %vm234_vm2, %v702_v0  ;;  %v650_v1 = vld [vmem:[%s25530_s1 + $0x328] sm:$0xff] }
 0x3c7   :  { %17661 = vmatprep.mubr.msk.f32.mxu1 %vm234_vm2, %v703_v4  ;;  %v723_v4 = vld [vmem:[%s25530_s1 + $0x570] sm:$0xff] }
 0x3c9   :  { %17539 = vmatmul.mubr.msk.f32.gmra.mrb[80].mxu0 %vm234_vm2, %v622_v5  ;;  %v704_v5 = vld [vmem:[%s25530_s1 + $0x4d8] sm:$0xff] }
 0x3ca   :  { %17541 = vmatprep.mubr.msk.f32.mxu0 %vm234_vm2, %v623_v7  ;;  %17662 = vmatmul.mubr.msk.f32.gmra.mrb[42].mxu1 %vm234_vm2, %v704_v5  ;;  %v652_v7 = vld [vmem:[%s25530_s1 + $0x338] sm:$0xff] }
 0x3cb   :  { %17664 = vmatprep.mubr.msk.f32.mxu1 %vm234_vm2, %v705_v9 }
 0x3cd   :  { %17542 = vmatmul.mubr.msk.f32.gmra.mrb[82].mxu0 %vm234_vm2, %v624_v10  ;;  %v706_v10 = vld [vmem:[%s25530_s1 + $0x4e8] sm:$0xff] }
 0x3ce   :  { %17544 = vmatprep.mubr.msk.f32.mxu0 %vm234_vm2, %v625_v11  ;;  %17665 = vmatmul.mubr.msk.f32.gmra.mrb[44].mxu1 %vm234_vm2, %v706_v10  ;;  %v654_v11 = vld [vmem:[%s25530_s1 + $0x348] sm:$0xff]  ;;  %v19844_v10 = vld [vmem:[%s25531_s0 + $0x10] sm:$0xff]  }
 0x3cf   :  { %17667 = vmatprep.mubr.msk.f32.mxu1 %vm234_vm2, %v707_v13 }
 0x3d1   :  { %17545 = vmatmul.mubr.msk.f32.gmra.mrb[84].mxu0 %vm234_vm2, %v626_v14  ;;  %v708_v14 = vld [vmem:[%s25530_s1 + $0x4f8] sm:$0xff] }
 0x3d2   :  { %17547 = vmatprep.mubr.msk.f32.mxu0 %vm234_vm2, %v627_v15  ;;  %17668 = vmatmul.mubr.msk.f32.gmra.mrb[46].mxu1 %vm234_vm2, %v708_v14  ;;  %v656_v15 = vld [vmem:[%s25530_s1 + $0x358] sm:$0xff] }
 0x3d3   :  { %17670 = vmatprep.mubr.msk.f32.mxu1 %vm234_vm2, %v709_v17  ;;  %v727_v17 = vld [vmem:[%s25530_s1 + $0x590] sm:$0xff] }
 0x3d5   :  { %17548 = vmatmul.mubr.msk.f32.gmra.mrb[86].mxu0 %vm234_vm2, %v628_v18 }
 0x3d6   :  { %17550 = vmatprep.mubr.msk.f32.mxu0 %vm234_vm2, %v629_v19  ;;  %v710_v19 = vld [vmem:[%s25530_s1 + $0x508] sm:$0xff] }
 0x3d7   :  { %17671 = vmatmul.mubr.msk.f32.gmra.mrb[48].mxu1 %vm234_vm2, %v710_v19 }
 0x3d8   :  { %17673 = vmatprep.mubr.msk.f32.mxu1 %vm234_vm2, %v711_v24 }
 0x3d9   :  { %17551 = vmatmul.mubr.msk.f32.gmra.mrb[88].mxu0 %vm234_vm2, %v630_v22  ;;  %v658_v22 = vld [vmem:[%s25530_s1 + $0x368] sm:$0xff] }
 0x3da   :  { %17553 = vmatprep.mubr.msk.f32.mxu0 %vm234_vm2, %v631_v23  ;;  %v659_v23 = vld [vmem:[%s25530_s1 + $0x370] sm:$0xff] }
 0x3dd   :  { %17554 = vmatmul.mubr.msk.f32.gmra.mrb[90].mxu0 %vm234_vm2, %v632_v26  ;;  %v712_v26 = vld [vmem:[%s25530_s1 + $0x518] sm:$0xff] }
 0x3de   :  { %17556 = vmatprep.mubr.msk.f32.mxu0 %vm234_vm2, %v633_v27  ;;  %17674 = vmatmul.mubr.msk.f32.gmra.mrb[50].mxu1 %vm234_vm2, %v712_v26  ;;  %v19846_v26 = vld [vmem:[%s25531_s0 + $0x38] sm:$0xff]  }
 0x3e1   :  { %17557 = vmatmul.mubr.msk.f32.gmra.mrb[92].mxu0 %vm234_vm2, %v634_v30  ;;  %v661_v30 = vld [vmem:[%s25530_s1 + $0x380] sm:$0xff] }
 0x3e2   :  { %17559 = vmatprep.mubr.msk.f32.mxu0 %vm234_vm2, %v635_v50  ;;  %v713_v50 = vld [vmem:[%s25530_s1 + $0x520] sm:$0xff] }
 0x3e3   :  { %17676 = vmatprep.mubr.msk.f32.mxu1 %vm234_vm2, %v713_v50  ;;  %v730_v50 = vld [vmem:[%s25530_s1 + $0x5a8] sm:$0xff] }
 0x3e4   :  { %17677 = vmatmul.mubr.msk.f32.gmra.mrb[52].mxu1 %vm234_vm2, %v714_v32  ;;  %v731_v32 = vld [vmem:[%s25530_s1 + $0x5b0] sm:$0xff] }
 0x3e5   :  { %17560 = vmatmul.mubr.msk.f32.gmra.mrb[94].mxu0 %vm234_vm2, %v636_v33 }
 0x3e6   :  { %17562 = vmatprep.mubr.msk.f32.mxu0 %vm234_vm2, %v637_v34 }
 0x3e9   :  { %17563 = vmatmul.mubr.msk.f32.gmra.mrb[96].mxu0 %vm234_vm2, %v638_v59  ;;  %v715_v59 = vld [vmem:[%s25530_s1 + $0x530] sm:$0xff] }
 0x3ea   :  { %17565 = vmatprep.mubr.msk.f32.mxu0 %vm234_vm2, %v639_v36  ;;  %17679 = vmatprep.mubr.msk.f32.mxu1 %vm234_vm2, %v715_v59 }
 0x3eb   :  { %17680 = vmatmul.mubr.msk.f32.gmra.mrb[54].mxu1 %vm234_vm2, %v716_v37 }
 0x3ec   :  { %17682 = vmatprep.mubr.msk.f32.mxu1 %vm234_vm2, %v717_v44  ;;  %v735_v44 = vld [vmem:[%s25530_s1 + $0x5d0] sm:$0xff] }
 0x3ed   :  { %17566 = vmatmul.mubr.msk.f32.gmra.mrb[98].mxu0 %vm234_vm2, %v640_v39 }
 0x3ee   :  { %17568 = vmatprep.mubr.msk.f32.mxu0 %vm234_vm2, %v641_v41  ;;  %v664_v41 = vld [vmem:[%s25530_s1 + $0x398] sm:$0xff] }
 0x3f1   :  { %17569 = vmatmul.mubr.msk.f32.gmra.mrb[100].mxu0 %vm234_vm2, %v642_v45 }
 0x3f2   :  { %17571 = vmatprep.mubr.msk.f32.mxu0 %vm234_vm2, %v643_v46  ;;  %v718_v46 = vld [vmem:[%s25530_s1 + $0x548] sm:$0xff] }
 0x3f3   :  { %17683 = vmatmul.mubr.msk.f32.gmra.mrb[56].mxu1 %vm234_vm2, %v718_v46  ;;  %v736_v46 = vld [vmem:[%s25530_s1 + $0x5d8] sm:$0xff] }
 0x3f4   :  { %17685 = vmatprep.mubr.msk.f32.mxu1 %vm234_vm2, %v719_v53 }
 0x3f5   :  { %17572 = vmatmul.mubr.msk.f32.gmra.mrb[102].mxu0 %vm234_vm2, %v644_v51  ;;  %v666_v51 = vld [vmem:[%s25530_s1 + $0x3a8] sm:$0xff] }
 0x3f6   :  { %17574 = vmatprep.mubr.msk.f32.mxu0 %vm234_vm2, %v645_v52  ;;  %v667_v52 = vld [vmem:[%s25530_s1 + $0x3b0] sm:$0xff] }
 0x3f9   :  { %17575 = vmatmul.mubr.msk.f32.gmra.mrb[104].mxu0 %vm234_vm2, %v646_v56  ;;  %v720_v56 = vld [vmem:[%s25530_s1 + $0x558] sm:$0xff] }
 0x3fa   :  { %17577 = vmatprep.mubr.msk.f32.mxu0 %vm234_vm2, %v647_v57  ;;  %17686 = vmatmul.mubr.msk.f32.gmra.mrb[58].mxu1 %vm234_vm2, %v720_v56  ;;  %v739_v56 = vld [vmem:[%s25530_s1 + $0x5f0] sm:$0xff] }
 0x3fd   :  { %17578 = vmatmul.mubr.msk.f32.gmra.mrb[106].mxu0 %vm234_vm2, %v648_v61  ;;  %v721_v61 = vld [vmem:[%s25530_s1 + $0x560] sm:$0xff] }
 0x3fe   :  { %17580 = vmatprep.mubr.msk.f32.mxu0 %vm234_vm2, %v649_v62  ;;  %17688 = vmatprep.mubr.msk.f32.mxu1 %vm234_vm2, %v721_v61 }
 0x3ff   :  { %17689 = vmatmul.mubr.msk.f32.gmra.mrb[60].mxu1 %vm234_vm2, %v722_v63  ;;  %v19853_v63 = vld [vmem:[%s25531_s0 + $0x6c] ss:$0 sps:$4 sm:$0x11]  }
 0x400   :  { %17691 = vmatprep.mubr.msk.f32.mxu1 %vm234_vm2, %v723_v4 }
 0x401   :  { %17581 = vmatmul.mubr.msk.f32.gmra.mrb[108].mxu0 %vm234_vm2, %v650_v1 }
 0x402   :  { %17583 = vmatprep.mubr.msk.f32.mxu0 %vm234_vm2, %v651_v2  ;;  %v19843_v2 = vld [vmem:[%s25531_s0 + $0x8] sm:$0xff]  }
 0x405   :  { %17584 = vmatmul.mubr.msk.f32.gmra.mrb[110].mxu0 %vm234_vm2, %v652_v7  ;;  %v724_v7 = vld [vmem:[%s25530_s1 + $0x578] sm:$0xff] }
 0x406   :  { %17586 = vmatprep.mubr.msk.f32.mxu0 %vm234_vm2, %v653_v8  ;;  %17692 = vmatmul.mubr.msk.f32.gmra.mrb[62].mxu1 %vm234_vm2, %v724_v7  ;;  %v2809_v7 = vand.u32 %v19853_v63, %v20972_v38 }
 0x409   :  { %17587 = vmatmul.mubr.msk.f32.gmra.mrb[112].mxu0 %vm234_vm2, %v654_v11  ;;  %v19845_v11 = vld [vmem:[%s25531_s0 + $0x18] ss:$0 sps:$4 sm:$0x11]  }
 0x40a   :  { %17589 = vmatprep.mubr.msk.f32.mxu0 %vm234_vm2, %v655_v12  ;;  %v725_v12 = vld [vmem:[%s25530_s1 + $0x580] sm:$0xff] }
 0x40b   :  { %17694 = vmatprep.mubr.msk.f32.mxu1 %vm234_vm2, %v725_v12 }
 0x40c   :  { %v21355_v18 = vpop.f32.mrb[8].mxu0 }
 0x40d   :  { %v21361_v20 = vpop.f32.mrb[9].mxu0  ;;  %17590 = vmatmul.mubr.msk.f32.gmra.mrb[114].mxu0 %vm234_vm2, %v656_v15 }
 0x40e   :  { %v2414_v21 = vpack.c.bf16 %v21355_v18, %v21361_v20  ;;  %17592 = vmatprep.mubr.msk.f32.mxu0 %vm234_vm2, %v657_v16  ;;  %v2575_v16 = vand.u32 %v19845_v11, %v20972_v38 }
 0x410   :  { %v21377_v25 = vpop.f32.mrb[10].mxu0 }
 0x411   :  { %v21383_v27 = vpop.f32.mrb[11].mxu0  ;;  %17593 = vmatmul.mubr.msk.f32.gmra.mrb[116].mxu0 %vm234_vm2, %v658_v22  ;;  %v728_v22 = vld [vmem:[%s25530_s1 + $0x598] sm:$0xff] }
 0x412   :  { %v2415_v28 = vpack.c.bf16 %v21377_v25, %v21383_v27  ;;  %17595 = vmatprep.mubr.msk.f32.mxu0 %vm234_vm2, %v659_v23  ;;  %v19849_v25 = vld [vmem:[%s25531_s0 + $0x50] ss:$0 sps:$4 sm:$0x11]   ;;  %v733_v27 = vld [vmem:[%s25530_s1 + $0x5c0] sm:$0xff] }
 0x414   :  { %v21399_v31 = vpop.f32.mrb[12].mxu0 }
 0x415   :  { %v21405_v33 = vpop.f32.mrb[13].mxu0  ;;  %17596 = vmatmul.mubr.msk.f32.gmra.mrb[118].mxu0 %vm234_vm2, %v660_v29  ;;  %v729_v29 = vld [vmem:[%s25530_s1 + $0x5a0] sm:$0xff] }
 0x416   :  { %v2416_v34 = vpack.c.bf16 %v21399_v31, %v21405_v33  ;;  %17598 = vmatprep.mubr.msk.f32.mxu0 %vm234_vm2, %v661_v30  ;;  %v734_v31 = vld [vmem:[%s25530_s1 + $0x5c8] sm:$0xff] }
 0x418   :  { %v21421_v36 = vpop.f32.mrb[14].mxu0 }
 0x419   :  { %v21427_v54 = vpop.f32.mrb[15].mxu0  ;;  %17599 = vmatmul.mubr.msk.f32.gmra.mrb[120].mxu0 %vm234_vm2, %v662_v47 }
 0x41a   :  { %v2417_v39 = vpack.c.bf16 %v21421_v36, %v21427_v54  ;;  %17601 = vmatprep.mubr.msk.f32.mxu0 %vm234_vm2, %v663_v35  ;;  %v732_v35 = vld [vmem:[%s25530_s1 + $0x5b8] sm:$0xff]  ;;  %v738_v54 = vld [vmem:[%s25530_s1 + $0x5e8] sm:$0xff] }
 0x41c   :  { %v17444_v45 = vpop.f32.mrb[16].mxu0 }
 0x41d   :  { %v1455_v48 = vpop.f32.mrb[17].mxu0  ;;  %17602 = vmatmul.mubr.msk.f32.gmra.mrb[122].mxu0 %vm234_vm2, %v664_v41  ;;  %v19848_v41 = vld [vmem:[%s25531_s0 + $0x48] sm:$0xff]  }
 0x41e   :  { %v2425_v49 = vpack.c.bf16 %v17444_v45, %v1455_v48  ;;  %17604 = vmatprep.mubr.msk.f32.mxu0 %vm234_vm2, %v665_v42  ;;  %v2688_v42 = vand.u32 %v19849_v25, %v20972_v38 }
 0x420   :  { %v17447_v55 = vpop.f32.mrb[18].mxu0 }
 0x421   :  { %v1465_v57 = vpop.f32.mrb[19].mxu0  ;;  %17605 = vmatmul.mubr.msk.f32.gmra.mrb[124].mxu0 %vm234_vm2, %v666_v51  ;;  %v19850_v51 = vld [vmem:[%s25531_s0 + $0x54] sm:$0xff]  }
 0x422   :  { %v2426_v58 = vpack.c.bf16 %v17447_v55, %v1465_v57  ;;  %17607 = vmatprep.mubr.msk.f32.mxu0 %vm234_vm2, %v667_v52  ;;  %v737_v52 = vld [vmem:[%s25530_s1 + $0x5e0] sm:$0xff] }
 0x423   :  { %v19851_v55 = vld [vmem:[%s25531_s0 + $0x5c] sm:$0xff]  }
 0x424   :  { %v17450_v62 = vpop.f32.mrb[20].mxu0 }
 0x425   :  { %v1475_v0 = vpop.f32.mrb[21].mxu0  ;;  %17608 = vmatmul.mubr.msk.f32.gmra.mrb[126].mxu0 %vm234_vm2, %v668_v60 }
 0x426   :  { %v2427_v1 = vpack.c.bf16 %v17450_v62, %v1475_v0  ;;  %17738 = vmatprep.mubr.msk.bf16.mxu0 %vm205_vm1, %v2425_v49  ;;  %v19852_v62 = vld [vmem:[%s25531_s0 + $0x64] sm:$0xff]  }
 0x427   :  { %v741_v0 = vld [vmem:[%s25530_s1 + $0x600] sm:$0xff] }
 0x428   :  { %v17453_v5 = vpop.f32.mrb[22].mxu0 }
 0x429   :  { %v1485_v8 = vpop.f32.mrb[23].mxu0  ;;  %17739 = vmatmul.mubr.msk.bf16.vlgmr.msra.gmra.mrb[128].mxu0 %vm205_vm1, %v2426_v58  ;;  %v740_v58 = vld [vmem:[%s25530_s1 + $0x5f8] sm:$0xff] }
 0x42a   :  { %v2428_v9 = vpack.c.bf16 %v17453_v5, %v1485_v8  ;;  %17742 = vmatprep.mubr.msk.bf16.mxu0 %vm205_vm1, %v2427_v1  ;;  %17747 = vmatpush3.bf16.msra.mxu0 %v20989_v43  ;;  %v726_v43 = vld [vmem:[%s25530_s1 + $0x588] sm:$0xff]  ;;  %v743_v8 = vld [vmem:[%s25530_s1 + $0x610] sm:$0xff] }
 0x42b   :  { %17748 = vmatprep.subr.bf16.mxu0 %v19843_v2  ;;  %17695 = vmatmul.mubr.msk.f32.gmra.mrb[64].mxu1 %vm234_vm2, %v726_v43  ;;  %v745_v43 = vld [vmem:[%s25530_s1 + $0x620] sm:$0xff] }
 0x42c   :  { %v21502_v13 = vpop.f32.mrb[24].mxu0  ;;  %17697 = vmatprep.mubr.msk.f32.mxu1 %vm234_vm2, %v727_v17 }
 0x42d   :  { %v1495_v14 = vpop.f32.mrb[25].mxu0 }
 0x42e   :  { %v2642_v15 = vpack.c.bf16 %v21502_v13, %v1495_v14  ;;  %17749 = vmatpush3.bf16.msra.mxu0 %v19843_v2  ;;  %v742_v2 = vld [vmem:[%s25530_s1 + $0x608] sm:$0xff]  ;;  %v19854_v13 = vld [vmem:[%s25531_s0 + $0x70] sm:$0xff]  }
 0x42f   :  { %17750 = vmatprep.subr.bf16.mxu0 %v19844_v10  ;;  %17698 = vmatmul.mubr.msk.f32.gmra.mrb[66].mxu1 %vm234_vm2, %v728_v22  ;;  %v747_v22 = vld [vmem:[%s25530_s1 + $0x630] sm:$0xff] }
 0x430   :  { %v21514_v19 = vpop.f32.mrb[26].mxu0  ;;  %17700 = vmatprep.mubr.msk.f32.mxu1 %vm234_vm2, %v729_v29 }
 0x431   :  { %v21520_v23 = vpop.f32.mrb[27].mxu0  ;;  %17743 = vmatmul.mubr.msk.bf16.gmra.mrb[132].mxu0 %vm205_vm1, %v2428_v9 }
 0x432   :  { %v2643_v24 = vpack.c.bf16 %v21514_v19, %v21520_v23  ;;  %17751 = vmatpush3.bf16.msra.mxu0 %v19844_v10  ;;  %17754 = vmatprep.mubr.msk.bf16.mxu0 %vm205_vm1, %v2414_v21  ;;  %v19847_v21 = vld [vmem:[%s25531_s0 + $0x40] sm:$0xff]   ;;  %v744_v10 = vld [vmem:[%s25530_s1 + $0x618] sm:$0xff] }
 0x433   :  { %17752 = vmatprep.subr.bf16.mxu0 %v2575_v16  ;;  %17701 = vmatmul.mubr.msk.f32.gmra.mrb[68].mxu1 %vm234_vm2, %v730_v50  ;;  %v19855_v19 = vld [vmem:[%s25531_s0 + $0x78] sm:$0xff]   ;;  %v19857_v50 = vld [vmem:[%s25531_s0 + $0x88] ss:$0 sps:$4 sm:$0x11]  }
 0x434   :  { %v21536_v30 = vpop.f32.mrb[28].mxu0  ;;  %17703 = vmatprep.mubr.msk.f32.mxu1 %vm234_vm2, %v731_v32  ;;  %v2930_v32 = vand.u32 %v19857_v50, %v20972_v38 }
 0x435   :  { %v1515_v18 = vpop.f32.mrb[29].mxu0 }
 0x436   :  { %v2644_v20 = vpack.c.bf16 %v21536_v30, %v1515_v18  ;;  %17753 = vmatpush3.bf16.msra.mxu0 %v2575_v16  ;;  %v19856_v30 = vld [vmem:[%s25531_s0 + $0x80] sm:$0xff]  }
 0x437   :  { %17762 = vmatprep.subr.bf16.mxu0 %v19846_v26  ;;  %17704 = vmatmul.mubr.msk.f32.gmra.mrb[70].mxu1 %vm234_vm2, %v732_v35 }
 0x438   :  { %v21550_v47 = vpop.f32.mrb[30].mxu0  ;;  %17706 = vmatprep.mubr.msk.f32.mxu1 %vm234_vm2, %v733_v27 }
 0x439   :  { %v21556_v59 = vpop.f32.mrb[31].mxu0  ;;  %17755 = vmatmul.mubr.msk.bf16.vlgmr.msra.gmra.mrb[128].mxu0 %vm205_vm1, %v2415_v28 }
 0x43a   :  { %v2645_v37 = vpack.c.bf16 %v21550_v47, %v21556_v59  ;;  %17758 = vmatprep.mubr.msk.bf16.mxu0 %vm205_vm1, %v2416_v34  ;;  %17763 = vmatpush3.bf16.msra.mxu0 %v19846_v26 }
 0x43b   :  { %17764 = vmatprep.subr.bf16.mxu0 %v19847_v21  ;;  %17707 = vmatmul.mubr.msk.f32.gmra.mrb[72].mxu1 %vm234_vm2, %v734_v31 }
 0x43c   :  { %v21578_v28 = vpop.f32.mrb[32].mxu0  ;;  %17709 = vmatprep.mubr.msk.f32.mxu1 %vm234_vm2, %v735_v44  ;;  %v19861_v44 = vld [vmem:[%s25531_s0 + $0xa4] ss:$0 sps:$4 sm:$0x11]  }
 0x43d   :  { %v1535_v33 = vpop.f32.mrb[33].mxu0 }
 0x43e   :  { %v2763_v34 = vpack.c.bf16 %v21578_v28, %v1535_v33  ;;  %17765 = vmatpush3.bf16.msra.mxu0 %v19847_v21  ;;  %v19859_v28 = vld [vmem:[%s25531_s0 + $0x94] sm:$0xff]  }
 0x43f   :  { %17766 = vmatprep.subr.bf16.mxu0 %v19848_v41  ;;  %17710 = vmatmul.mubr.msk.f32.gmra.mrb[74].mxu1 %vm234_vm2, %v736_v46 }
 0x440   :  { %v21590_v45 = vpop.f32.mrb[34].mxu0  ;;  %17712 = vmatprep.mubr.msk.f32.mxu1 %vm234_vm2, %v737_v52 }
 0x441   :  { %v21596_v48 = vpop.f32.mrb[35].mxu0  ;;  %17759 = vmatmul.mubr.msk.bf16.gmra.mrb[132].mxu0 %vm205_vm1, %v2417_v39 }
 0x442   :  { %v2764_v49 = vpack.c.bf16 %v21590_v45, %v21596_v48  ;;  %17767 = vmatpush3.bf16.msra.mxu0 %v19848_v41  ;;  %17770 = vmatprep.mubr.msk.bf16.mxu0 %vm205_vm1, %v2642_v15  ;;  %v746_v15 = vld [vmem:[%s25530_s1 + $0x628] sm:$0xff] }
 0x443   :  { %17768 = vmatprep.subr.bf16.mxu0 %v2688_v42  ;;  %17713 = vmatmul.mubr.msk.f32.gmra.mrb[76].mxu1 %vm234_vm2, %v738_v54  ;;  %v19862_v54 = vld [vmem:[%s25531_s0 + $0xa8] sm:$0xff]  }
 0x444   :  { %v21612_v36 = vpop.f32.mrb[36].mxu0  ;;  %17715 = vmatprep.mubr.msk.f32.mxu1 %vm234_vm2, %v739_v56  ;;  %v19863_v56 = vld [vmem:[%s25531_s0 + $0xb0] sm:$0xff]  }
 0x445   :  { %v1555_v39 = vpop.f32.mrb[37].mxu0 }
 0x446   :  { %v2765_v53 = vpack.c.bf16 %v21612_v36, %v1555_v39  ;;  %17769 = vmatpush3.bf16.msra.mxu0 %v2688_v42  ;;  %v19860_v42 = vld [vmem:[%s25531_s0 + $0x9c] sm:$0xff]  }
 0x447   :  { %17778 = vmatprep.subr.bf16.mxu0 %v19850_v51  ;;  %17716 = vmatmul.mubr.msk.f32.gmra.mrb[78].mxu1 %vm234_vm2, %v740_v58 }
 0x448   :  { %v21626_v57 = vpop.f32.mrb[38].mxu0  ;;  %17718 = vmatprep.mubr.msk.f32.mxu1 %vm234_vm2, %v741_v0 }
 0x449   :  { %v21632_v60 = vpop.f32.mrb[39].mxu0  ;;  %17771 = vmatmul.mubr.msk.bf16.vlgmr.msra.gmra.mrb[128].mxu0 %vm205_vm1, %v2643_v24  ;;  %v748_v24 = vld [vmem:[%s25530_s1 + $0x638] sm:$0xff] }
 0x44a   :  { %v2766_v61 = vpack.c.bf16 %v21626_v57, %v21632_v60  ;;  %17774 = vmatprep.mubr.msk.bf16.mxu0 %vm205_vm1, %v2644_v20  ;;  %17779 = vmatpush3.bf16.msra.mxu0 %v19850_v51 }
 0x44b   :  { %17780 = vmatprep.subr.bf16.mxu0 %v19851_v55  ;;  %17719 = vmatmul.mubr.msk.f32.gmra.mrb[80].mxu1 %vm234_vm2, %v742_v2 }
 0x44c   :  { %v17480_v1 = vpop.f32.mrb[40].mxu0  ;;  %17721 = vmatprep.mubr.msk.f32.mxu1 %vm234_vm2, %v743_v8  ;;  %v19866_v8 = vld [vmem:[%s25531_s0 + $0xc4] sm:$0xff]  }
 0x44d   :  { %v1575_v4 = vpop.f32.mrb[41].mxu0 }
 0x44e   :  { %v2884_v5 = vpack.c.bf16 %v17480_v1, %v1575_v4  ;;  %17781 = vmatpush3.bf16.msra.mxu0 %v19851_v55 }
 0x44f   :  { %17782 = vmatprep.subr.bf16.mxu0 %v19852_v62  ;;  %17722 = vmatmul.mubr.msk.f32.gmra.mrb[82].mxu1 %vm234_vm2, %v744_v10 }
 0x450   :  { %v17483_v9 = vpop.f32.mrb[42].mxu0  ;;  %17724 = vmatprep.mubr.msk.f32.mxu1 %vm234_vm2, %v745_v43 }
 0x451   :  { %v1585_v11 = vpop.f32.mrb[43].mxu0  ;;  %17775 = vmatmul.mubr.msk.bf16.gmra.mrb[132].mxu0 %vm205_vm1, %v2645_v37  ;;  %v19858_v37 = vld [vmem:[%s25531_s0 + $0x8c] sm:$0xff]  }
 0x452   :  { %v2885_v12 = vpack.c.bf16 %v17483_v9, %v1585_v11  ;;  %17783 = vmatpush3.bf16.msra.mxu0 %v19852_v62  ;;  %17786 = vmatprep.mubr.msk.bf16.mxu0 %vm205_vm1, %v2763_v34  ;;  %v19865_v62 = vld [vmem:[%s25531_s0 + $0xc0] ss:$0 sps:$4 sm:$0x11]  }
 0x453   :  { %17784 = vmatprep.subr.bf16.mxu0 %v2809_v7  ;;  %17725 = vmatmul.mubr.msk.f32.gmra.mrb[84].mxu1 %vm234_vm2, %v746_v15  ;;  %v3172_v2 = vand.u32 %v19865_v62, %v20972_v38  ;;  %v19868_v15 = vld [vmem:[%s25531_s0 + $0xd4] sm:$0xff]  }
 0x454   :  { %v17486_v14 = vpop.f32.mrb[44].mxu0  ;;  %17727 = vmatprep.mubr.msk.f32.mxu1 %vm234_vm2, %v747_v22 }
 0x455   :  { %v1595_v16 = vpop.f32.mrb[45].mxu0 }
 0x456   :  { %v2886_v17 = vpack.c.bf16 %v17486_v14, %v1595_v16  ;;  %17785 = vmatpush3.bf16.msra.mxu0 %v2809_v7  ;;  %v19869_v16 = vld [vmem:[%s25531_s0 + $0xdc] ss:$0 sps:$4 sm:$0x11]  }
 0x457   :  { %17794 = vmatprep.subr.bf16.mxu0 %v19854_v13  ;;  %17728 = vmatmul.mubr.msk.f32.gmra.mrb[86].mxu1 %vm234_vm2, %v748_v24 }
 0x458   :  { %v17489_v23 = vpop.f32.mrb[46].mxu0 }
 0x459   :  { %v1605_v26 = vpop.f32.mrb[47].mxu0  ;;  %17787 = vmatmul.mubr.msk.bf16.vlgmr.msra.gmra.mrb[128].mxu0 %vm205_vm1, %v2764_v49  ;;  %v3051_v49 = vand.u32 %v19861_v44, %v20972_v38  ;;  %v19873_v44 = vld [vmem:[%s25531_s0 + $0xf8] ss:$0 sps:$4 sm:$0x11]  }
 0x45a   :  { %v2887_v29 = vpack.c.bf16 %v17489_v23, %v1605_v26  ;;  %17790 = vmatprep.mubr.msk.bf16.mxu0 %vm205_vm1, %v2765_v53  ;;  %17795 = vmatpush3.bf16.msra.mxu0 %v19854_v13  ;;  %v3293_v23 = vand.u32 %v19869_v16, %v20972_v38  ;;  %v21757_v26 = vpop.f32.mrb[8].mxu1 }
 0x45b   :  { %17796 = vmatprep.subr.bf16.mxu0 %v19855_v19 }
 0x45c   :  { %v17492_v18 = vpop.f32.mrb[48].mxu0 }
 0x45d   :  { %v1615_v20 = vpop.f32.mrb[49].mxu0 }
 0x45e   :  { %v3005_v21 = vpack.c.bf16 %v17492_v18, %v1615_v20  ;;  %17797 = vmatpush3.bf16.msra.mxu0 %v19855_v19  ;;  %v19870_v20 = vld [vmem:[%s25531_s0 + $0xe0] sm:$0xff]  }
 0x45f   :  { %17798 = vmatprep.subr.bf16.mxu0 %v19856_v30 }
 0x460   :  { %v17495_v47 = vpop.f32.mrb[50].mxu0 }
 0x461   :  { %v1625_v35 = vpop.f32.mrb[51].mxu0  ;;  %17791 = vmatmul.mubr.msk.bf16.gmra.mrb[132].mxu0 %vm205_vm1, %v2766_v61  ;;  %v19864_v61 = vld [vmem:[%s25531_s0 + $0xb8] sm:$0xff]  }
 0x462   :  { %v3006_v59 = vpack.c.bf16 %v17495_v47, %v1625_v35  ;;  %17799 = vmatpush3.bf16.msra.mxu0 %v19856_v30  ;;  %17802 = vmatprep.mubr.msk.bf16.mxu0 %vm205_vm1, %v2884_v5  ;;  %v21762_v30 = vpop.f32.mrb[9].mxu1 }
 0x463   :  { %17800 = vmatprep.subr.bf16.mxu0 %v2930_v32 }
 0x464   :  { %v17498_v41 = vpop.f32.mrb[52].mxu0 }
 0x465   :  { %v1635_v25 = vpop.f32.mrb[53].mxu0 }
 0x466   :  { %v3007_v27 = vpack.c.bf16 %v17498_v41, %v1635_v25  ;;  %17801 = vmatpush3.bf16.msra.mxu0 %v2930_v32  ;;  %v21772_v32 = vpop.f32.mrb[10].mxu1  ;;  %v19871_v41 = vld [vmem:[%s25531_s0 + $0xe8] sm:$0xff]  }
 0x467   :  { %17810 = vmatprep.subr.bf16.mxu0 %v19858_v37  ;;  %v21774_v35 = vpop.f32.mrb[11].mxu1 }
 0x468   :  { %v17501_v31 = vpop.f32.mrb[54].mxu0 }
 0x469   :  { %v1645_v33 = vpop.f32.mrb[55].mxu0  ;;  %17803 = vmatmul.mubr.msk.bf16.vlgmr.msra.gmra.mrb[128].mxu0 %vm205_vm1, %v2885_v12  ;;  %v19867_v12 = vld [vmem:[%s25531_s0 + $0xcc] sm:$0xff]  }
 0x46a   :  { %v3008_v34 = vpack.c.bf16 %v17501_v31, %v1645_v33  ;;  %17806 = vmatprep.mubr.msk.bf16.mxu0 %vm205_vm1, %v2886_v17  ;;  %17811 = vmatpush3.bf16.msra.mxu0 %v19858_v37 }
 0x46b   :  { %17812 = vmatprep.subr.bf16.mxu0 %v19859_v28 }
 0x46c   :  { %v17504_v45 = vpop.f32.mrb[56].mxu0 }
 0x46d   :  { %v1655_v46 = vpop.f32.mrb[57].mxu0 }
 0x46e   :  { %v3126_v48 = vpack.c.bf16 %v17504_v45, %v1655_v46  ;;  %17813 = vmatpush3.bf16.msra.mxu0 %v19859_v28 }
 0x46f   :  { %17814 = vmatprep.subr.bf16.mxu0 %v19860_v42 }
 0x470   :  { %v17507_v51 = vpop.f32.mrb[58].mxu0 }
 0x471   :  { %v1665_v52 = vpop.f32.mrb[59].mxu0  ;;  %17807 = vmatmul.mubr.msk.bf16.gmra.mrb[132].mxu0 %vm205_vm1, %v2887_v29 }
 0x472   :  { %v3127_v36 = vpack.c.bf16 %v17507_v51, %v1665_v52  ;;  %17815 = vmatpush3.bf16.msra.mxu0 %v19860_v42  ;;  %17818 = vmatprep.mubr.msk.bf16.mxu0 %vm205_vm1, %v3005_v21  ;;  %v19872_v42 = vld [vmem:[%s25531_s0 + $0xf0] sm:$0xff]  }
 0x473   :  { %17816 = vmatprep.subr.bf16.mxu0 %v3051_v49 }
 0x474   :  { %v17510_v39 = vpop.f32.mrb[60].mxu0 }
 0x475   :  { %v1675_v53 = vpop.f32.mrb[61].mxu0 }
 0x476   :  { %v3128_v55 = vpack.c.bf16 %v17510_v39, %v1675_v53  ;;  %17817 = vmatpush3.bf16.msra.mxu0 %v3051_v49 }
 0x477   :  { %17826 = vmatprep.subr.bf16.mxu0 %v19862_v54 }
 0x478   :  { %v17513_v57 = vpop.f32.mrb[62].mxu0 }
 0x479   :  { %v1685_v58 = vpop.f32.mrb[63].mxu0  ;;  %17819 = vmatmul.mubr.msk.bf16.vlgmr.msra.gmra.mrb[128].mxu0 %vm205_vm1, %v3006_v59 }
 0x47a   :  { %v3129_v60 = vpack.c.bf16 %v17513_v57, %v1685_v58  ;;  %17822 = vmatprep.mubr.msk.bf16.mxu0 %vm205_vm1, %v3007_v27  ;;  %17827 = vmatpush3.bf16.msra.mxu0 %v19862_v54  ;;  %v21783_v27 = vpop.f32.mrb[12].mxu1  ;;  %v19874_v58 = vld [vmem:[%s25531_s0 + $0xfc] sm:$0xff]  }
 0x47b   :  { %17828 = vmatprep.subr.bf16.mxu0 %v19863_v56  ;;  %v21788_v31 = vpop.f32.mrb[13].mxu1 }
 0x47c   :  { %v17516_v63 = vpop.f32.mrb[64].mxu0  ;;  %v21801_v46 = vpop.f32.mrb[14].mxu1 }
 0x47d   :  { %v1695_v0 = vpop.f32.mrb[65].mxu0  ;;  %v21803_v49 = vpop.f32.mrb[15].mxu1 }
 0x47e   :  { %v3247_v1 = vpack.c.bf16 %v17516_v63, %v1695_v0  ;;  %17829 = vmatpush3.bf16.msra.mxu0 %v19863_v56  ;;  %v21810_v39 = vpop.f32.mrb[16].mxu1 }
 0x47f   :  { %17830 = vmatprep.subr.bf16.mxu0 %v19864_v61 }
 0x480   :  { %v17519_v4 = vpop.f32.mrb[66].mxu0 }
 0x481   :  { %v1705_v5 = vpop.f32.mrb[67].mxu0  ;;  %17823 = vmatmul.mubr.msk.bf16.gmra.mrb[132].mxu0 %vm205_vm1, %v3008_v34 }
 0x482   :  { %v3248_v7 = vpack.c.bf16 %v17519_v4, %v1705_v5  ;;  %17831 = vmatpush3.bf16.msra.mxu0 %v19864_v61  ;;  %17834 = vmatprep.mubr.msk.bf16.mxu0 %vm205_vm1, %v3126_v48 }
 0x483   :  { %17832 = vmatprep.subr.bf16.mxu0 %v3172_v2 }
 0x484   :  { %v17522_v9 = vpop.f32.mrb[68].mxu0 }
 0x485   :  { %v1715_v10 = vpop.f32.mrb[69].mxu0 }
 0x486   :  { %v3249_v11 = vpack.c.bf16 %v17522_v9, %v1715_v10  ;;  %17833 = vmatpush3.bf16.msra.mxu0 %v3172_v2  ;;  %v19875_v2 = vld [vmem:[%s25531_s0 + $0x104] sm:$0xff]  }
 0x487   :  { %17842 = vmatprep.subr.bf16.mxu0 %v19866_v8 }
 0x488   :  { %v17525_v13 = vpop.f32.mrb[70].mxu0 }
 0x489   :  { %v1725_v43 = vpop.f32.mrb[71].mxu0  ;;  %17835 = vmatmul.mubr.msk.bf16.vlgmr.msra.gmra.mrb[128].mxu0 %vm205_vm1, %v3127_v36  ;;  %v3414_v36 = vand.u32 %v19873_v44, %v20972_v38 }
 0x48a   :  { %v3250_v14 = vpack.c.bf16 %v17525_v13, %v1725_v43  ;;  %17838 = vmatprep.mubr.msk.bf16.mxu0 %vm205_vm1, %v3128_v55  ;;  %17843 = vmatpush3.bf16.msra.mxu0 %v19866_v8  ;;  %v21815_v55 = vpop.f32.mrb[17].mxu1 }
 0x48b   :  { %17844 = vmatprep.subr.bf16.mxu0 %v19867_v12  ;;  %v21825_v61 = vpop.f32.mrb[18].mxu1 }
 0x48c   :  { %v17528_v17 = vpop.f32.mrb[72].mxu0  ;;  %v21827_v63 = vpop.f32.mrb[19].mxu1 }
 0x48d   :  { %v1735_v19 = vpop.f32.mrb[73].mxu0  ;;  %v21836_v5 = vpop.f32.mrb[20].mxu1 }
 0x48e   :  { %v3368_v22 = vpack.c.bf16 %v17528_v17, %v1735_v19  ;;  %17845 = vmatpush3.bf16.msra.mxu0 %v19867_v12  ;;  %v21841_v8 = vpop.f32.mrb[21].mxu1  ;;  %v19877_v12 = vld [vmem:[%s25531_s0 + $0x114] ss:$0 sps:$4 sm:$0x11]  }
 0x48f   :  { %17846 = vmatprep.subr.bf16.mxu0 %v19868_v15  ;;  %v21854_v43 = vpop.f32.mrb[22].mxu1  ;;  %v3535_v19 = vand.u32 %v19877_v12, %v20972_v38 }
 0x490   :  { %v21755_v24 = vpop.f32.mrb[74].mxu0 }
 0x491   :  { %v21759_v29 = vpop.f32.mrb[75].mxu0  ;;  %17839 = vmatmul.mubr.msk.bf16.gmra.mrb[132].mxu0 %vm205_vm1, %v3129_v60 }
 0x492   :  { %v3369_v50 = vpack.c.bf16 %v21755_v24, %v21759_v29  ;;  %17847 = vmatpush3.bf16.msra.mxu0 %v19868_v15  ;;  %17850 = vmatprep.mubr.msk.bf16.mxu0 %vm205_vm1, %v3247_v1  ;;  %v21856_v15 = vpop.f32.mrb[23].mxu1 }
 0x493   :  { %17848 = vmatprep.subr.bf16.mxu0 %v3293_v23 }
 0x494   :  { %v17534_v21 = vpop.f32.mrb[76].mxu0 }
 0x495   :  { %v1755_v47 = vpop.f32.mrb[77].mxu0 }
 0x496   :  { %v3370_v59 = vpack.c.bf16 %v17534_v21, %v1755_v47  ;;  %17849 = vmatpush3.bf16.msra.mxu0 %v3293_v23  ;;  %v21863_v23 = vpop.f32.mrb[24].mxu1  ;;  %v19878_v21 = vld [vmem:[%s25531_s0 + $0x118] sm:$0xff]  }
 0x497   :  { %17858 = vmatprep.subr.bf16.mxu0 %v19870_v20  ;;  %v21868_v29 = vpop.f32.mrb[25].mxu1 }
 0x498   :  { %v21781_v25 = vpop.f32.mrb[78].mxu0 }
 0x499   :  { %v21785_v28 = vpop.f32.mrb[79].mxu0  ;;  %17851 = vmatmul.mubr.msk.bf16.vlgmr.msra.gmra.mrb[128].mxu0 %vm205_vm1, %v3248_v7 }
 0x49a   :  { %v3371_v33 = vpack.c.bf16 %v21781_v25, %v21785_v28  ;;  %17854 = vmatprep.mubr.msk.bf16.mxu0 %vm205_vm1, %v3249_v11  ;;  %17859 = vmatpush3.bf16.msra.mxu0 %v19870_v20  ;;  %v19876_v11 = vld [vmem:[%s25531_s0 + $0x10c] sm:$0xff]  }
 0x49b   :  { %17860 = vmatprep.subr.bf16.mxu0 %v19871_v41 }
 0x49c   :  { %v17540_v45 = vpop.f32.mrb[80].mxu0 }
 0x49d   :  { %v1775_v48 = vpop.f32.mrb[81].mxu0 }
 0x49e   :  { %v3489_v51 = vpack.c.bf16 %v17540_v45, %v1775_v48  ;;  %17861 = vmatpush3.bf16.msra.mxu0 %v19871_v41 }
 0x49f   :  { %17862 = vmatprep.subr.bf16.mxu0 %v19872_v42 }
 0x4a0   :  { %v21808_v54 = vpop.f32.mrb[82].mxu0 }
 0x4a1   :  { %v21812_v53 = vpop.f32.mrb[83].mxu0  ;;  %17855 = vmatmul.mubr.msk.bf16.gmra.mrb[132].mxu0 %vm205_vm1, %v3250_v14 }
 0x4a2   :  { %v3490_v56 = vpack.c.bf16 %v21808_v54, %v21812_v53  ;;  %17863 = vmatpush3.bf16.msra.mxu0 %v19872_v42  ;;  %17866 = vmatprep.mubr.msk.bf16.mxu0 %vm205_vm1, %v3368_v22  ;;  %v19879_v42 = vld [vmem:[%s25531_s0 + $0x120] sm:$0xff]   ;;  %v19880_v53 = vld [vmem:[%s25531_s0 + $0x128] sm:$0xff]  }
 0x4a3   :  { %17864 = vmatprep.subr.bf16.mxu0 %v3414_v36 }
 0x4a4   :  { %v17546_v60 = vpop.f32.mrb[84].mxu0 }
 0x4a5   :  { %v1795_v62 = vpop.f32.mrb[85].mxu0 }
 0x4a6   :  { %v3491_v0 = vpack.c.bf16 %v17546_v60, %v1795_v62  ;;  %17865 = vmatpush3.bf16.msra.mxu0 %v3414_v36 }
 0x4a7   :  { %17874 = vmatprep.subr.bf16.mxu0 %v19874_v58 }
 0x4a8   :  { %v21834_v4 = vpop.f32.mrb[86].mxu0 }
 0x4a9   :  { %v21838_v7 = vpop.f32.mrb[87].mxu0  ;;  %17867 = vmatmul.mubr.msk.bf16.vlgmr.msra.gmra.mrb[128].mxu0 %vm205_vm1, %v3369_v50 }
 0x4aa   :  { %v3492_v9 = vpack.c.bf16 %v21834_v4, %v21838_v7  ;;  %17870 = vmatprep.mubr.msk.bf16.mxu0 %vm205_vm1, %v3370_v59  ;;  %17875 = vmatpush3.bf16.msra.mxu0 %v19874_v58  ;;  %v21878_v59 = vpop.f32.mrb[26].mxu1 }
 0x4ab   :  { %17876 = vmatprep.subr.bf16.mxu0 %v19875_v2  ;;  %v21880_v25 = vpop.f32.mrb[27].mxu1 }
 0x4ac   :  { %v17552_v13 = vpop.f32.mrb[88].mxu0  ;;  %v21889_v45 = vpop.f32.mrb[28].mxu1 }
 0x4ad   :  { %v1815_v14 = vpop.f32.mrb[89].mxu0 }
 0x4ae   :  { %v3610_v16 = vpack.c.bf16 %v17552_v13, %v1815_v14  ;;  %17877 = vmatpush3.bf16.msra.mxu0 %v19875_v2 }
 0x4af   :  { %17878 = vmatprep.subr.bf16.mxu0 %v19876_v11 }
 0x4b0   :  { %v21861_v22 = vpop.f32.mrb[90].mxu0 }
 0x4b1   :  { %v21865_v24 = vpop.f32.mrb[91].mxu0  ;;  %17871 = vmatmul.mubr.msk.bf16.gmra.mrb[132].mxu0 %vm205_vm1, %v3371_v33 }
 0x4b2   :  { %v3611_v50 = vpack.c.bf16 %v21861_v22, %v21865_v24  ;;  %17879 = vmatpush3.bf16.msra.mxu0 %v19876_v11  ;;  %17882 = vmatprep.mubr.msk.bf16.mxu0 %vm205_vm1, %v3489_v51  ;;  %v21894_v51 = vpop.f32.mrb[29].mxu1  ;;  %v19882_v24 = vld [vmem:[%s25531_s0 + $0x134] sm:$0xff]  }
 0x4b3   :  { %17880 = vmatprep.subr.bf16.mxu0 %v3535_v19  ;;  %v21907_v60 = vpop.f32.mrb[30].mxu1 }
 0x4b4   :  { %v17558_v47 = vpop.f32.mrb[92].mxu0  ;;  %v21909_v2 = vpop.f32.mrb[31].mxu1 }
 0x4b5   :  { %v1835_v41 = vpop.f32.mrb[93].mxu0  ;;  %v21916_v12 = vpop.f32.mrb[32].mxu1 }
 0x4b6   :  { %v3612_v28 = vpack.c.bf16 %v17558_v47, %v1835_v41  ;;  %17881 = vmatpush3.bf16.msra.mxu0 %v3535_v19  ;;  %v21921_v14 = vpop.f32.mrb[33].mxu1 }
 0x4b7   :  { %17890 = vmatprep.subr.bf16.mxu0 %v19878_v21  ;;  %v21931_v47 = vpop.f32.mrb[34].mxu1 }
 0x4b8   :  { %v21887_v44 = vpop.f32.mrb[94].mxu0  ;;  %v21933_v41 = vpop.f32.mrb[35].mxu1 }
 0x4b9   :  { %v21891_v48 = vpop.f32.mrb[95].mxu0  ;;  %17883 = vmatmul.mubr.msk.bf16.vlgmr.msra.gmra.mrb[128].mxu0 %vm205_vm1, %v3490_v56  ;;  %v19881_v56 = vld [vmem:[%s25531_s0 + $0x130] ss:$0 sps:$4 sm:$0x11]  }
 0x4ba   :  { %v3613_v36 = vpack.c.bf16 %v21887_v44, %v21891_v48  ;;  %17886 = vmatprep.mubr.msk.bf16.mxu0 %vm205_vm1, %v3491_v0  ;;  %17891 = vmatpush3.bf16.msra.mxu0 %v19878_v21  ;;  %v3656_v7 = vand.u32 %v19881_v56, %v20972_v38 }
 0x4bb   :  { %17892 = vmatprep.subr.bf16.mxu0 %v19879_v42 }
 0x4bc   :  { %v17564_v58 = vpop.f32.mrb[96].mxu0 }
 0x4bd   :  { %v1855_v62 = vpop.f32.mrb[97].mxu0 }
 0x4be   :  { %v3731_v0 = vpack.c.bf16 %v17564_v58, %v1855_v62  ;;  %17893 = vmatpush3.bf16.msra.mxu0 %v19879_v42 }
 0x4bf   :  { %17894 = vmatprep.subr.bf16.mxu0 %v19880_v53 }
 0x4c0   :  { %v21914_v11 = vpop.f32.mrb[98].mxu0 }
 0x4c1   :  { %v21918_v13 = vpop.f32.mrb[99].mxu0  ;;  %17887 = vmatmul.mubr.msk.bf16.gmra.mrb[132].mxu0 %vm205_vm1, %v3492_v9 }
 0x4c2   :  { %v3732_v19 = vpack.c.bf16 %v21914_v11, %v21918_v13  ;;  %17895 = vmatpush3.bf16.msra.mxu0 %v19880_v53  ;;  %17898 = vmatprep.mubr.msk.bf16.mxu0 %vm205_vm1, %v3610_v16  ;;  %v19883_v16 = vld [vmem:[%s25531_s0 + $0x13c] sm:$0xff]   ;;  %v21942_v53 = vpop.f32.mrb[36].mxu1  ;;  %v19884_v11 = vld [vmem:[%s25531_s0 + $0x144] sm:$0xff]  }
 0x4c3   :  { %17896 = vmatprep.subr.bf16.mxu0 %v3656_v7  ;;  %v21947_v58 = vpop.f32.mrb[37].mxu1 }
 0x4c4   :  { %v17570_v21 = vpop.f32.mrb[100].mxu0 }
 0x4c5   :  { %v1875_v9 = vpop.f32.mrb[101].mxu0 }
 0x4c6   :  { %v3733_v42 = vpack.c.bf16 %v17570_v21, %v1875_v9  ;;  %17897 = vmatpush3.bf16.msra.mxu0 %v3656_v7  ;;  %v21960_v21 = vpop.f32.mrb[38].mxu1 }
 0x4c7   :  { %17906 = vmatprep.subr.bf16.mxu0 %v19882_v24 }
 0x4c8   :  { %v21940_v48 = vpop.f32.mrb[102].mxu0 }
 0x4c9   :  { %v21944_v56 = vpop.f32.mrb[103].mxu0  ;;  %17899 = vmatmul.mubr.msk.bf16.vlgmr.msra.gmra.mrb[128].mxu0 %vm205_vm1, %v3611_v50  ;;  %v19885_v50 = vld [vmem:[%s25531_s0 + $0x14c] ss:$0 sps:$4 sm:$0x11]  }
 0x4ca   :  { %v3734_v62 = vpack.c.bf16 %v21940_v48, %v21944_v56  ;;  %17902 = vmatprep.mubr.msk.bf16.mxu0 %vm205_vm1, %v3612_v28  ;;  %17907 = vmatpush3.bf16.msra.mxu0 %v19882_v24  ;;  %v21962_v48 = vpop.f32.mrb[39].mxu1  ;;  %v3777_v56 = vand.u32 %v19885_v50, %v20972_v38  ;;  %v19886_v50 = vld [vmem:[%s25531_s0 + $0x150] sm:$0xff]  }
 0x4cb   :  { %17908 = vmatprep.subr.bf16.mxu0 %v19883_v16  ;;  %v21969_v6 = vpop.f32.mrb[40].mxu1 }
 0x4cc   :  { %v17576_v13 = vpop.f32.mrb[104].mxu0  ;;  %v21974_v7 = vpop.f32.mrb[41].mxu1 }
 0x4cd   :  { %v1895_v9 = vpop.f32.mrb[105].mxu0  ;;  %v21984_v24 = vpop.f32.mrb[42].mxu1 }
 0x4ce   :  { %v3852_v28 = vpack.c.bf16 %v17576_v13, %v1895_v9  ;;  %17909 = vmatpush3.bf16.msra.mxu0 %v19883_v16  ;;  %v21986_v44 = vpop.f32.mrb[43].mxu1 }
 0x4cf   :  { %17910 = vmatprep.subr.bf16.mxu0 %v19884_v11 }
 0x4d0   :  { %v21967_v40 = vpop.f32.mrb[106].mxu0 }
 0x4d1   :  { %v21971_v3 = vpop.f32.mrb[107].mxu0  ;;  %17903 = vmatmul.mubr.msk.bf16.gmra.mrb[132].mxu0 %vm205_vm1, %v3613_v36 }
 0x4d2   :  { %v3853_v13 = vpack.c.bf16 %v21967_v40, %v21971_v3  ;;  %17911 = vmatpush3.bf16.msra.mxu0 %v19884_v11  ;;  %17914 = vmatprep.mubr.msk.bf16.mxu0 %vm205_vm1, %v3731_v0  ;;  %v19887_v40 = vld [vmem:[%s25531_s0 + $0x158] sm:$0xff]   ;;  %v21995_v11 = vpop.f32.mrb[44].mxu1 }
 0x4d3   :  { %17912 = vmatprep.subr.bf16.mxu0 %v3777_v56  ;;  %v22000_v4 = vpop.f32.mrb[45].mxu1 }
 0x4d4   :  { %v17582_v9 = vpop.f32.mrb[108].mxu0  ;;  %v22013_v54 = vpop.f32.mrb[46].mxu1 }
 0x4d5   :  { %v1915_v36 = vpop.f32.mrb[109].mxu0 }
 0x4d6   :  { %v3854_v22 = vpack.c.bf16 %v17582_v9, %v1915_v36  ;;  %17913 = vmatpush3.bf16.msra.mxu0 %v3777_v56  ;;  %v19888_v36 = vld [vmem:[%s25531_s0 + $0x160] sm:$0xff]  }
 0x4d7   :  { %17922 = vmatprep.subr.bf16.mxu0 %v19886_v50 }
 0x4d8   :  { %v21993_v0 = vpop.f32.mrb[110].mxu0 }
 0x4d9   :  { %v21997_v16 = vpop.f32.mrb[111].mxu0  ;;  %17915 = vmatmul.mubr.msk.bf16.vlgmr.msra.gmra.mrb[128].mxu0 %vm205_vm1, %v3732_v19  ;;  %v19889_v19 = vld [vmem:[%s25531_s0 + $0x168] ss:$0 sps:$4 sm:$0x11]  }
 0x4da   :  { %v3855_v56 = vpack.c.bf16 %v21993_v0, %v21997_v16  ;;  %17918 = vmatprep.mubr.msk.bf16.mxu0 %vm205_vm1, %v3733_v42  ;;  %17923 = vmatpush3.bf16.msra.mxu0 %v19886_v50  ;;  %v22015_v16 = vpop.f32.mrb[47].mxu1  ;;  %v3898_v0 = vand.u32 %v19889_v19, %v20972_v38 }
 0x4db   :  { %17924 = vmatprep.subr.bf16.mxu0 %v19887_v40  ;;  %v22022_v20 = vpop.f32.mrb[48].mxu1 }
 0x4dc   :  { %v17588_v3 = vpop.f32.mrb[112].mxu0  ;;  %v22027_v10 = vpop.f32.mrb[49].mxu1 }
 0x4dd   :  { %v1935_v33 = vpop.f32.mrb[113].mxu0  ;;  %v22037_v50 = vpop.f32.mrb[50].mxu1 }
 0x4de   :  { %v3973_v42 = vpack.c.bf16 %v17588_v3, %v1935_v33  ;;  %17925 = vmatpush3.bf16.msra.mxu0 %v19887_v40  ;;  %v19890_v40 = vld [vmem:[%s25531_s0 + $0x16c] sm:$0xff]   ;;  %v22039_v1 = vpop.f32.mrb[51].mxu1 }
 0x4df   :  { %17926 = vmatprep.subr.bf16.mxu0 %v19888_v36  ;;  %25532 = vst [vmem:[#allocation5_spill] sm:$0xff] %v22039_v1 }
 0x4e0   :  { %v22020_v9 = vpop.f32.mrb[114].mxu0 }
 0x4e1   :  { %v22024_v17 = vpop.f32.mrb[115].mxu0  ;;  %17919 = vmatmul.mubr.msk.bf16.gmra.mrb[132].mxu0 %vm205_vm1, %v3734_v62 }
 0x4e2   :  { %v3974_v33 = vpack.c.bf16 %v22020_v9, %v22024_v17  ;;  %17927 = vmatpush3.bf16.msra.mxu0 %v19888_v36  ;;  %17930 = vmatprep.mubr.msk.bf16.mxu0 %vm205_vm1, %v3852_v28  ;;  %v19891_v28 = vld [vmem:[%s25531_s0 + $0x174] sm:$0xff]   ;;  %v22046_v36 = vpop.f32.mrb[52].mxu1 }
 0x4e3   :  { %17928 = vmatprep.subr.bf16.mxu0 %v3898_v0  ;;  %25533 = vst [vmem:[#allocation6_spill] sm:$0xff] %v22046_v36  ;;  %v22049_v52 = vpop.f32.mrb[53].mxu1 }
 0x4e4   :  { %v17594_v19 = vpop.f32.mrb[116].mxu0  ;;  %25534 = vst [vmem:[#allocation7_spill] sm:$0xff] %v22049_v52 }
 0x4e5   :  { %v1955_v62 = vpop.f32.mrb[117].mxu0 }
 0x4e6   :  { %v3975_v57 = vpack.c.bf16 %v17594_v19, %v1955_v62  ;;  %17929 = vmatpush3.bf16.msra.mxu0 %v3898_v0  ;;  %v19892_v19 = vld [vmem:[%s25531_s0 + $0x17c] sm:$0xff]   ;;  %v19893_v62 = vld [vmem:[%s25531_s0 + $0x184] ss:$0 sps:$4 sm:$0x11]  }
 0x4e7   :  { %17938 = vmatprep.subr.bf16.mxu0 %v19890_v40 }
 0x4e8   :  { %v17597_v9 = vpop.f32.mrb[118].mxu0 }
 0x4e9   :  { %v1965_v3 = vpop.f32.mrb[119].mxu0  ;;  %17931 = vmatmul.mubr.msk.bf16.vlgmr.msra.gmra.mrb[128].mxu0 %vm205_vm1, %v3853_v13  ;;  %v22060_v13 = vpop.f32.mrb[54].mxu1 }
 0x4ea   :  { %v3976_v34 = vpack.c.bf16 %v17597_v9, %v1965_v3  ;;  %17934 = vmatprep.mubr.msk.bf16.mxu0 %vm205_vm1, %v3854_v22  ;;  %17939 = vmatpush3.bf16.msra.mxu0 %v19890_v40  ;;  %v22062_v3 = vpop.f32.mrb[55].mxu1  ;;  %v4019_v9 = vand.u32 %v19893_v62, %v20972_v38 }
 0x4eb   :  { %17940 = vmatprep.subr.bf16.mxu0 %v19891_v28  ;;  %25535 = vst [vmem:[#allocation8_spill] sm:$0xff] %v22062_v3  ;;  %v22067_v18 = vpop.f32.mrb[56].mxu1 }
 0x4ec   :  { %v17600_v17 = vpop.f32.mrb[120].mxu0  ;;  %25536 = vst [vmem:[#allocation9_spill] sm:$0xff] %v22067_v18  ;;  %v22070_v36 = vpop.f32.mrb[57].mxu1 }
 0x4ed   :  { %v1975_v37 = vpop.f32.mrb[121].mxu0  ;;  %25537 = vst [vmem:[#allocation10_spill] sm:$0xff] %v22070_v36  ;;  %v22078_v62 = vpop.f32.mrb[58].mxu1 }
 0x4ee   :  { %v4094_v22 = vpack.c.bf16 %v17600_v17, %v1975_v37  ;;  %17941 = vmatpush3.bf16.msra.mxu0 %v19891_v28  ;;  %v19894_v17 = vld [vmem:[%s25531_s0 + $0x188] sm:$0xff]   ;;  %v22080_v3 = vpop.f32.mrb[59].mxu1 }
 0x4ef   :  { %17942 = vmatprep.subr.bf16.mxu0 %v19892_v19 }
 0x4f0   :  { %v17603_v0 = vpop.f32.mrb[122].mxu0 }
 0x4f1   :  { %v1985_v52 = vpop.f32.mrb[123].mxu0  ;;  %17935 = vmatmul.mubr.msk.bf16.gmra.mrb[132].mxu0 %vm205_vm1, %v3855_v56 }
 0x4f2   :  { %v4095_v1 = vpack.c.bf16 %v17603_v0, %v1985_v52  ;;  %17943 = vmatpush3.bf16.msra.mxu0 %v19892_v19  ;;  %17946 = vmatprep.mubr.msk.bf16.mxu0 %vm205_vm1, %v3973_v42  ;;  %v19895_v42 = vld [vmem:[%s25531_s0 + $0x190] sm:$0xff]   ;;  %v22087_v19 = vpop.f32.mrb[60].mxu1 }
 0x4f3   :  { %17944 = vmatprep.subr.bf16.mxu0 %v4019_v9  ;;  %v22090_v36 = vpop.f32.mrb[61].mxu1 }
 0x4f4   :  { %v17606_v28 = vpop.f32.mrb[124].mxu0  ;;  %v22101_v52 = vpop.f32.mrb[62].mxu1 }
 0x4f5   :  { %v1995_v40 = vpop.f32.mrb[125].mxu0 }
 0x4f6   :  { %v4096_v56 = vpack.c.bf16 %v17606_v28, %v1995_v40  ;;  %17945 = vmatpush3.bf16.msra.mxu0 %v4019_v9  ;;  %v19896_v9 = vld [vmem:[%s25531_s0 + $0x198] sm:$0xff]   ;;  %v19897_v28 = vld [vmem:[%s25531_s0 + $0x1a0] ss:$0 sps:$4 sm:$0x11]  }
 0x4f7   :  { %17954 = vmatprep.subr.bf16.mxu0 %v19894_v17 }
 0x4f8   :  { %v17609_v0 = vpop.f32.mrb[126].mxu0 }
 0x4f9   :  { %v2005_v37 = vpop.f32.mrb[127].mxu0  ;;  %17947 = vmatmul.mubr.msk.bf16.vlgmr.msra.gmra.mrb[128].mxu0 %vm205_vm1, %v3974_v33  ;;  %v22103_v33 = vpop.f32.mrb[63].mxu1 }
 0x4fa   :  { %v4097_v18 = vpack.c.bf16 %v17609_v0, %v2005_v37  ;;  %17950 = vmatprep.mubr.msk.bf16.mxu0 %vm205_vm1, %v3975_v57  ;;  %17955 = vmatpush3.bf16.msra.mxu0 %v19894_v17  ;;  %v4140_v37 = vand.u32 %v19897_v28, %v20972_v38 }
 0x4fb   :  { %17956 = vmatprep.subr.bf16.mxu0 %v19895_v42 }
 0x4fe   :  { %17957 = vmatpush3.bf16.msra.mxu0 %v19895_v42  ;;  %v22108_v17 = vpop.f32.mrb[64].mxu1  ;;  %v19898_v42 = vld [vmem:[%s25531_s0 + $0x1a4] sm:$0xff]  }
 0x4ff   :  { %17958 = vmatprep.subr.bf16.mxu0 %v19896_v9  ;;  %v22111_v0 = vpop.f32.mrb[65].mxu1 }
 0x501   :  { %17951 = vmatmul.mubr.msk.bf16.gmra.mrb[132].mxu0 %vm205_vm1, %v3976_v34  ;;  %v19900_v34 = vld [vmem:[%s25531_s0 + $0x1b4] sm:$0xff]  }
 0x502   :  { %17959 = vmatpush3.bf16.msra.mxu0 %v19896_v9  ;;  %17962 = vmatprep.mubr.msk.bf16.mxu0 %vm205_vm1, %v4094_v22  ;;  %v22119_v57 = vpop.f32.mrb[66].mxu1  ;;  %v19899_v22 = vld [vmem:[%s25531_s0 + $0x1ac] sm:$0xff]  }
 0x503   :  { %17960 = vmatprep.subr.bf16.mxu0 %v4140_v37  ;;  %25538 = vst [vmem:[#allocation11_spill] sm:$0xff] %v22119_v57  ;;  %v22121_v28 = vpop.f32.mrb[67].mxu1 }
 0x504   :  { %25539 = vst [vmem:[#allocation12_spill] sm:$0xff] %v22121_v28  ;;  %v19901_v28 = vld [vmem:[%s25531_s0 + $0x1bc] ss:$0 sps:$4 sm:$0x11]  }
 0x506   :  { %17961 = vmatpush3.bf16.msra.mxu0 %v4140_v37  ;;  %v22128_v9 = vpop.f32.mrb[68].mxu1 }
 0x507   :  { %17970 = vmatprep.subr.bf16.mxu0 %v19898_v42  ;;  %25540 = vst [vmem:[#allocation13_spill] sm:$0xff] %v22128_v9  ;;  %v22131_v40 = vpop.f32.mrb[69].mxu1  ;;  %v25543_v9 = vpack.c.bf16 %v21757_v26, %v21762_v30  ;;  %v19903_v26 = vld [vmem:[%s25531_s0 + $0x1c8] sm:$0xff]  }
 0x508   :  { %25541 = vst [vmem:[#allocation14_spill] sm:$0xff] %v22131_v40 }
 0x509   :  { %17963 = vmatmul.mubr.msk.bf16.vlgmr.msra.gmra.mrb[128].mxu0 %vm205_vm1, %v4095_v1 }
 0x50a   :  { %17966 = vmatprep.mubr.msk.bf16.mxu0 %vm205_vm1, %v4096_v56  ;;  %17971 = vmatpush3.bf16.msra.mxu0 %v19898_v42  ;;  %v22142_v57 = vpop.f32.mrb[70].mxu1  ;;  %v4261_v42 = vand.u32 %v19901_v28, %v20972_v38  ;;  %v19902_v28 = vld [vmem:[%s25531_s0 + $0x1c0] sm:$0xff]  }
 0x50b   :  { %17972 = vmatprep.subr.bf16.mxu0 %v19899_v22  ;;  %v22144_v1 = vpop.f32.mrb[71].mxu1 }
 0x50c   :  { %25542 = vst [vmem:[#allocation15_spill] sm:$0xff] %v22144_v1 }
 0x50e   :  { %17973 = vmatpush3.bf16.msra.mxu0 %v19899_v22  ;;  %v22149_v37 = vpop.f32.mrb[72].mxu1  ;;  %v19904_v22 = vld [vmem:[%s25531_s0 + $0x1d0] sm:$0xff]  }
 0x50f   :  { %17974 = vmatprep.subr.bf16.mxu0 %v19900_v34  ;;  %v22152_v40 = vpop.f32.mrb[73].mxu1 }
 0x511   :  { %17967 = vmatmul.mubr.msk.bf16.gmra.mrb[132].mxu0 %vm205_vm1, %v4097_v18 }
 0x512   :  { %17975 = vmatpush3.bf16.msra.mxu0 %v19900_v34  ;;  %17978 = vmatprep.mubr.msk.bf16.mxu0 %vm205_vm1, %v25543_v9  ;;  %v22163_v56 = vpop.f32.mrb[74].mxu1  ;;  %v25544_v34 = vpack.c.bf16 %v21772_v32, %v21774_v35  ;;  %v19905_v32 = vld [vmem:[%s25531_s0 + $0x1d8] ss:$0 sps:$4 sm:$0x11]  }
 0x513   :  { %17976 = vmatprep.subr.bf16.mxu0 %v4261_v42  ;;  %v22165_v1 = vpop.f32.mrb[75].mxu1 }
 0x516   :  { %17977 = vmatpush3.bf16.msra.mxu0 %v4261_v42  ;;  %v22172_v30 = vpop.f32.mrb[76].mxu1  ;;  %v25546_v42 = vpack.c.bf16 %v21783_v27, %v21788_v31  ;;  %v4382_v31 = vand.u32 %v19905_v32, %v20972_v38  ;;  %v19906_v32 = vld [vmem:[%s25531_s0 + $0x1dc] sm:$0xff]  }
 0x517   :  { %17986 = vmatprep.subr.bf16.mxu0 %v19902_v28  ;;  %v22178_v9 = vpop.f32.mrb[77].mxu1 }
 0x518   :  { %25545 = vst [vmem:[#allocation16_spill] sm:$0xff] %v22178_v9  ;;  %v25548_v9 = vpack.c.bf16 %v21810_v39, %v21815_v55  ;;  %v19907_v39 = vld [vmem:[%s25531_s0 + $0x1e4] sm:$0xff]  }
 0x519   :  { %17979 = vmatmul.mubr.msk.bf16.vlgmr.msra.gmra.mrb[128].mxu0 %vm205_vm1, %v25544_v34 }
 0x51a   :  { %17987 = vmatpush3.bf16.msra.mxu0 %v19902_v28  ;;  %17982 = vmatprep.mubr.msk.bf16.mxu0 %vm205_vm1, %v25546_v42  ;;  %v22192_v35 = vpop.f32.mrb[78].mxu1  ;;  %v25547_v42 = vpack.c.bf16 %v21801_v46, %v21803_v49  ;;  %v19908_v49 = vld [vmem:[%s25531_s0 + $0x1ec] sm:$0xff]  }
 0x51b   :  { %17988 = vmatprep.subr.bf16.mxu0 %v19903_v26  ;;  %v22194_v28 = vpop.f32.mrb[79].mxu1 }
 0x51e   :  { %17989 = vmatpush3.bf16.msra.mxu0 %v19903_v26  ;;  %v22199_v34 = vpop.f32.mrb[80].mxu1 }
 0x51f   :  { %17990 = vmatprep.subr.bf16.mxu0 %v19904_v22  ;;  %v22205_v18 = vpop.f32.mrb[81].mxu1 }
 0x520   :  { %v5304_v26 = vpack.c.bf16 %v22199_v34, %v22205_v18 }
 0x521   :  { %17983 = vmatmul.mubr.msk.bf16.gmra.mrb[132].mxu0 %vm205_vm1, %v25547_v42 }
 0x522   :  { %17991 = vmatpush3.bf16.msra.mxu0 %v19904_v22  ;;  %17994 = vmatprep.mubr.msk.bf16.mxu0 %vm205_vm1, %v25548_v9  ;;  %v22216_v27 = vpop.f32.mrb[82].mxu1  ;;  %v25549_v22 = vpack.c.bf16 %v21825_v61, %v21827_v63  ;;  %v19909_v61 = vld [vmem:[%s25531_s0 + $0x1f4] ss:$0 sps:$4 sm:$0x11]  }
 0x523   :  { %17992 = vmatprep.subr.bf16.mxu0 %v4382_v31  ;;  %v22218_v46 = vpop.f32.mrb[83].mxu1 }
 0x526   :  { %17993 = vmatpush3.bf16.msra.mxu0 %v4382_v31  ;;  %v22225_v55 = vpop.f32.mrb[84].mxu1  ;;  %v25550_v31 = vpack.c.bf16 %v21836_v5, %v21841_v8  ;;  %v4503_v8 = vand.u32 %v19909_v61, %v20972_v38  ;;  %v19911_v61 = vld [vmem:[%s25531_s0 + $0x200] sm:$0xff]  }
 0x527   :  { %18002 = vmatprep.subr.bf16.mxu0 %v19906_v32  ;;  %v22231_v9 = vpop.f32.mrb[85].mxu1 }
 0x528   :  { %v5306_v42 = vpack.c.bf16 %v22225_v55, %v22231_v9 }
 0x529   :  { %17995 = vmatmul.mubr.msk.bf16.vlgmr.msra.gmra.mrb[128].mxu0 %vm205_vm1, %v25549_v22  ;;  %v25551_v22 = vpack.c.bf16 %v21854_v43, %v21856_v15  ;;  %v25553_v43 = vpack.c.bf16 %v21878_v59, %v21880_v25  ;;  %v25554_v15 = vpack.c.bf16 %v21889_v45, %v21894_v51  ;;  %v25555_v25 = vpack.c.bf16 %v21907_v60, %v21909_v2  ;;  %v19914_v51 = vld [vmem:[%s25531_s0 + $0x214] sm:$0xff]  }
 0x52a   :  { %18003 = vmatpush3.bf16.msra.mxu0 %v19906_v32  ;;  %17998 = vmatprep.mubr.msk.bf16.mxu0 %vm205_vm1, %v25550_v31  ;;  %v22245_v63 = vpop.f32.mrb[86].mxu1  ;;  %v25552_v31 = vpack.c.bf16 %v21863_v23, %v21868_v29  ;;  %v19912_v23 = vld [vmem:[%s25531_s0 + $0x208] sm:$0xff]   ;;  %v19913_v29 = vld [vmem:[%s25531_s0 + $0x210] ss:$0 sps:$4 sm:$0x11]   ;;  %v25556_v45 = vpack.c.bf16 %v21916_v12, %v21921_v14  ;;  %v25557_v60 = vpack.c.bf16 %v21931_v47, %v21933_v41 }
 0x52b   :  { %18004 = vmatprep.subr.bf16.mxu0 %v19907_v39  ;;  %v22247_v32 = vpop.f32.mrb[87].mxu1  ;;  %v4624_v59 = vand.u32 %v19913_v29, %v20972_v38  ;;  %v25558_v2 = vpack.c.bf16 %v21942_v53, %v21947_v58  ;;  %v19916_v12 = vld [vmem:[%s25531_s0 + $0x224] sm:$0xff]   ;;  %v19917_v14 = vld [vmem:[%s25531_s0 + $0x22c] ss:$0 sps:$4 sm:$0x11]   ;;  %v25559_v41 = vpack.c.bf16 %v21960_v21, %v21962_v48  ;;  %v25560_v53 = vpack.c.bf16 %v21969_v6, %v21974_v7  ;;  %v19918_v58 = vld [vmem:[%s25531_s0 + $0x230] sm:$0xff]  }
 0x52c   :  { %v5307_v5 = vpack.c.bf16 %v22245_v63, %v22247_v32  ;;  %v4745_v47 = vand.u32 %v19917_v14, %v20972_v38  ;;  %v25561_v21 = vpack.c.bf16 %v21984_v24, %v21986_v44  ;;  %v25562_v6 = vpack.c.bf16 %v21995_v11, %v22000_v4  ;;  %v19920_v7 = vld [vmem:[%s25531_s0 + $0x240] sm:$0xff]   ;;  %v19921_v48 = vld [vmem:[%s25531_s0 + $0x248] ss:$0 sps:$4 sm:$0x11]   ;;  %v19922_v11 = vld [vmem:[%s25531_s0 + $0x24c] sm:$0xff]  }
 0x52d   :  { %v4866_v44 = vand.u32 %v19921_v48, %v20972_v38  ;;  %v25563_v24 = vpack.c.bf16 %v22013_v54, %v22015_v16  ;;  %v25564_v4 = vpack.c.bf16 %v22022_v20, %v22027_v10  ;;  %v25565_v54 = vld [vmem:[#allocation5_spill] sm:$0xff]  ;;  %v25567_v10 = vld [vmem:[#allocation6_spill] sm:$0xff]  ;;  %v25568_v20 = vld [vmem:[#allocation7_spill] sm:$0xff] }
 0x52e   :  { %18005 = vmatpush3.bf16.msra.mxu0 %v19907_v39  ;;  %v19910_v39 = vld [vmem:[%s25531_s0 + $0x1f8] sm:$0xff]   ;;  %v25566_v16 = vpack.c.bf16 %v22037_v50, %v25565_v54  ;;  %v25573_v29 = vld [vmem:[#allocation10_spill] sm:$0xff] }
 0x52f   :  { %18006 = vmatprep.subr.bf16.mxu0 %v19908_v49  ;;  %v19936_v48 = vld [vmem:[%s25531_s0 + $0x2b0] sm:$0xff]  }
 0x531   :  { %17999 = vmatmul.mubr.msk.bf16.gmra.mrb[132].mxu0 %vm205_vm1, %v25551_v22  ;;  %v19923_v22 = vld [vmem:[%s25531_s0 + $0x254] sm:$0xff]  }
 0x532   :  { %18007 = vmatpush3.bf16.msra.mxu0 %v19908_v49  ;;  %18010 = vmatprep.mubr.msk.bf16.mxu0 %vm205_vm1, %v25552_v31  ;;  %v19915_v49 = vld [vmem:[%s25531_s0 + $0x21c] sm:$0xff]   ;;  %v25569_v31 = vpack.c.bf16 %v25567_v10, %v25568_v20 }
 0x533   :  { %18008 = vmatprep.subr.bf16.mxu0 %v4503_v8 }
 0x536   :  { %18009 = vmatpush3.bf16.msra.mxu0 %v4503_v8  ;;  %v19919_v8 = vld [vmem:[%s25531_s0 + $0x238] sm:$0xff]  }
 0x537   :  { %18018 = vmatprep.subr.bf16.mxu0 %v19910_v39 }
 0x539   :  { %18011 = vmatmul.mubr.msk.bf16.vlgmr.msra.gmra.mrb[128].mxu0 %vm205_vm1, %v25553_v43  ;;  %v25570_v43 = vld [vmem:[#allocation8_spill] sm:$0xff] }
 0x53a   :  { %18019 = vmatpush3.bf16.msra.mxu0 %v19910_v39  ;;  %18014 = vmatprep.mubr.msk.bf16.mxu0 %vm205_vm1, %v25554_v15  ;;  %v19924_v39 = vld [vmem:[%s25531_s0 + $0x25c] sm:$0xff]   ;;  %v25571_v15 = vpack.c.bf16 %v22060_v13, %v25570_v43  ;;  %v25575_v13 = vpack.c.bf16 %v22078_v62, %v22080_v3  ;;  %v25577_v62 = vpack.c.bf16 %v22101_v52, %v22103_v33  ;;  %v25579_v52 = vld [vmem:[#allocation11_spill] sm:$0xff] }
 0x53b   :  { %18020 = vmatprep.subr.bf16.mxu0 %v19911_v61  ;;  %v25580_v33 = vld [vmem:[#allocation12_spill] sm:$0xff] }
 0x53e   :  { %18021 = vmatpush3.bf16.msra.mxu0 %v19911_v61  ;;  %v19925_v61 = vld [vmem:[%s25531_s0 + $0x264] ss:$0 sps:$4 sm:$0x11]  }
 0x53f   :  { %18022 = vmatprep.subr.bf16.mxu0 %v19912_v23  ;;  %v4987_v50 = vand.u32 %v19925_v61, %v20972_v38 }
 0x541   :  { %18015 = vmatmul.mubr.msk.bf16.gmra.mrb[132].mxu0 %vm205_vm1, %v25555_v25  ;;  %v19926_v25 = vld [vmem:[%s25531_s0 + $0x268] sm:$0xff]  }
 0x542   :  { %18023 = vmatpush3.bf16.msra.mxu0 %v19912_v23  ;;  %18026 = vmatprep.mubr.msk.bf16.mxu0 %vm205_vm1, %v25556_v45  ;;  %v25572_v23 = vld [vmem:[#allocation9_spill] sm:$0xff]  ;;  %v19927_v45 = vld [vmem:[%s25531_s0 + $0x270] sm:$0xff]  }
 0x543   :  { %18024 = vmatprep.subr.bf16.mxu0 %v4624_v59 }
 0x546   :  { %18025 = vmatpush3.bf16.msra.mxu0 %v4624_v59  ;;  %v25574_v59 = vpack.c.bf16 %v25572_v23, %v25573_v29 }
 0x547   :  { %18034 = vmatprep.subr.bf16.mxu0 %v19914_v51 }
 0x549   :  { %18027 = vmatmul.mubr.msk.bf16.vlgmr.msra.gmra.mrb[128].mxu0 %vm205_vm1, %v25557_v60  ;;  %v19929_v60 = vld [vmem:[%s25531_s0 + $0x280] ss:$0 sps:$4 sm:$0x11]  }
 0x54a   :  { %18035 = vmatpush3.bf16.msra.mxu0 %v19914_v51  ;;  %18030 = vmatprep.mubr.msk.bf16.mxu0 %vm205_vm1, %v25558_v2  ;;  %v25576_v51 = vpack.c.bf16 %v22087_v19, %v22090_v36  ;;  %v5108_v3 = vand.u32 %v19929_v60, %v20972_v38  ;;  %v25578_v36 = vpack.c.bf16 %v22108_v17, %v22111_v0  ;;  %v19930_v19 = vld [vmem:[%s25531_s0 + $0x284] sm:$0xff]   ;;  %v19931_v2 = vld [vmem:[%s25531_s0 + $0x28c] sm:$0xff]  }
 0x54b   :  { %18036 = vmatprep.subr.bf16.mxu0 %v19915_v49  ;;  %v25582_v17 = vld [vmem:[#allocation13_spill] sm:$0xff]  ;;  %v25583_v0 = vld [vmem:[#allocation14_spill] sm:$0xff] }
 0x54c   :  { %v25584_v14 = vpack.c.bf16 %v25582_v17, %v25583_v0  ;;  %v5871_v60 = vld [vmem:[%s25480_s6 + $0x10] sm:$0xff]  ;;  %v5930_v17 = vld [vmem:[%s25481_s7 + $0x28] sm:$0xff]  ;;  %v5876_v0 = vld [vmem:[%s25480_s6 + $0x38] sm:$0xff] }
 0x54e   :  { %18037 = vmatpush3.bf16.msra.mxu0 %v19915_v49  ;;  %v19928_v49 = vld [vmem:[%s25531_s0 + $0x278] sm:$0xff]  }
 0x54f   :  { %18038 = vmatprep.subr.bf16.mxu0 %v19916_v12 }
 0x551   :  { %18031 = vmatmul.mubr.msk.bf16.gmra.mrb[132].mxu0 %vm205_vm1, %v25559_v41  ;;  %v19933_v41 = vld [vmem:[%s25531_s0 + $0x29c] ss:$0 sps:$4 sm:$0x11]  }
 0x552   :  { %18039 = vmatpush3.bf16.msra.mxu0 %v19916_v12  ;;  %18042 = vmatprep.mubr.msk.bf16.mxu0 %vm205_vm1, %v25560_v53  ;;  %v25581_v12 = vpack.c.bf16 %v25579_v52, %v25580_v33  ;;  %v5229_v53 = vand.u32 %v19933_v41, %v20972_v38  ;;  %v5929_v52 = vld [vmem:[%s25481_s7 + $0x20] sm:$0xff]  ;;  %v5874_v33 = vld [vmem:[%s25480_s6 + $0x28] sm:$0xff] }
 0x553   :  { %18040 = vmatprep.subr.bf16.mxu0 %v4745_v47 }
 0x556   :  { %18041 = vmatpush3.bf16.msra.mxu0 %v4745_v47  ;;  %v19932_v47 = vld [vmem:[%s25531_s0 + $0x294] sm:$0xff]  }
 0x557   :  { %18050 = vmatprep.subr.bf16.mxu0 %v19918_v58 }
 0x559   :  { %18043 = vmatmul.mubr.msk.bf16.vlgmr.msra.gmra.mrb[128].mxu0 %vm205_vm1, %v25561_v21  ;;  %v25587_v21 = vpack.c.bf16 %v22149_v37, %v22152_v40  ;;  %v25589_v40 = vld [vmem:[#allocation16_spill] sm:$0xff] }
 0x55a   :  { %18051 = vmatpush3.bf16.msra.mxu0 %v19918_v58  ;;  %18046 = vmatprep.mubr.msk.bf16.mxu0 %vm205_vm1, %v25562_v6  ;;  %v25585_v58 = vld [vmem:[#allocation15_spill] sm:$0xff]  ;;  %v19934_v6 = vld [vmem:[%s25531_s0 + $0x2a0] sm:$0xff]   ;;  %v25590_v37 = vpack.c.bf16 %v22172_v30, %v25589_v40  ;;  %v25592_v30 = vpack.c.bf16 %v22216_v27, %v22218_v46 }
 0x55b   :  { %18052 = vmatprep.subr.bf16.mxu0 %v19919_v8 }
 0x55e   :  { %18053 = vmatpush3.bf16.msra.mxu0 %v19919_v8  ;;  %v25586_v8 = vpack.c.bf16 %v22142_v57, %v25585_v58  ;;  %v25588_v57 = vpack.c.bf16 %v22163_v56, %v22165_v1  ;;  %v25591_v56 = vpack.c.bf16 %v22192_v35, %v22194_v28 }
 0x55f   :  { %18054 = vmatprep.subr.bf16.mxu0 %v19920_v7 }
 0x561   :  { %18047 = vmatmul.mubr.msk.bf16.gmra.mrb[132].mxu0 %vm205_vm1, %v25563_v24 }
 0x562   :  { %18055 = vmatpush3.bf16.msra.mxu0 %v19920_v7  ;;  %18058 = vmatprep.mubr.msk.bf16.mxu0 %vm205_vm1, %v25564_v4  ;;  %v19935_v7 = vld [vmem:[%s25531_s0 + $0x2a8] sm:$0xff]  }
 0x563   :  { %18056 = vmatprep.subr.bf16.mxu0 %v4866_v44 }
 0x566   :  { %18057 = vmatpush3.bf16.msra.mxu0 %v4866_v44  ;;  %v19937_v44 = vld [vmem:[%s25531_s0 + $0x2b8] ss:$0 sps:$4 sm:$0x11]  }
 0x567   :  { %18066 = vmatprep.subr.bf16.mxu0 %v19922_v11  ;;  %v5350_v1 = vand.u32 %v19937_v44, %v20972_v38 }
 0x569   :  { %18059 = vmatmul.mubr.msk.bf16.vlgmr.msra.gmra.mrb[128].mxu0 %vm205_vm1, %v25566_v16 }
 0x56a   :  { %18067 = vmatpush3.bf16.msra.mxu0 %v19922_v11  ;;  %18062 = vmatprep.mubr.msk.bf16.mxu0 %vm205_vm1, %v25569_v31 }
 0x56b   :  { %18068 = vmatprep.subr.bf16.mxu0 %v19923_v22 }
 0x56e   :  { %18069 = vmatpush3.bf16.msra.mxu0 %v19923_v22 }
 0x56f   :  { %18070 = vmatprep.subr.bf16.mxu0 %v19924_v39 }
 0x571   :  { %18063 = vmatmul.mubr.msk.bf16.gmra.mrb[132].mxu0 %vm205_vm1, %v25571_v15 }
 0x572   :  { %18071 = vmatpush3.bf16.msra.mxu0 %v19924_v39  ;;  %18074 = vmatprep.mubr.msk.bf16.mxu0 %vm205_vm1, %v25574_v59 }
 0x573   :  { %18072 = vmatprep.subr.bf16.mxu0 %v4987_v50 }
 0x576   :  { %18073 = vmatpush3.bf16.msra.mxu0 %v4987_v50 }
 0x577   :  { %18082 = vmatprep.subr.bf16.mxu0 %v19926_v25 }
 0x579   :  { %18075 = vmatmul.mubr.msk.bf16.vlgmr.msra.gmra.mrb[128].mxu0 %vm205_vm1, %v25575_v13  ;;  %v5869_v13 = vld [vmem:[%s25480_s6] sm:$0xff] }
 0x57a   :  { %18083 = vmatpush3.bf16.msra.mxu0 %v19926_v25  ;;  %18078 = vmatprep.mubr.msk.bf16.mxu0 %vm205_vm1, %v25576_v51  ;;  %v5925_v51 = vld [vmem:[%s25481_s7] sm:$0xff] }
 0x57b   :  { %18084 = vmatprep.subr.bf16.mxu0 %v19927_v45 }
 0x57e   :  { %18085 = vmatpush3.bf16.msra.mxu0 %v19927_v45  ;;  %v22534_v45 = vld [vmem:[%s25490_s16] sm:$0xff] }
 0x57f   :  { %18086 = vmatprep.subr.bf16.mxu0 %v19928_v49  ;;  %18146 = vmatprep.mubr.msk.f32.mxu1 %vm5490_vm5, %v22534_v45 }
 0x581   :  { %18079 = vmatmul.mubr.msk.bf16.gmra.mrb[132].mxu0 %vm205_vm1, %v25577_v62  ;;  %v5927_v62 = vld [vmem:[%s25481_s7 + $0x10] sm:$0xff] }
 0x582   :  { %18087 = vmatpush3.bf16.msra.mxu0 %v19928_v49  ;;  %18090 = vmatprep.mubr.msk.bf16.mxu0 %vm205_vm1, %v25578_v36  ;;  %v5870_v49 = vld [vmem:[%s25480_s6 + $0x8] sm:$0xff]  ;;  %v5872_v36 = vld [vmem:[%s25480_s6 + $0x18] sm:$0xff] }
 0x583   :  { %18088 = vmatprep.subr.bf16.mxu0 %v5108_v3 }
 0x586   :  { %18089 = vmatpush3.bf16.msra.mxu0 %v5108_v3  ;;  %v5926_v3 = vld [vmem:[%s25481_s7 + $0x8] sm:$0xff] }
 0x587   :  { %18098 = vmatprep.subr.bf16.mxu0 %v19930_v19 }
 0x589   :  { %18091 = vmatmul.mubr.msk.bf16.vlgmr.msra.gmra.mrb[128].mxu0 %vm205_vm1, %v25581_v12  ;;  %v5875_v12 = vld [vmem:[%s25480_s6 + $0x30] sm:$0xff] }
 0x58a   :  { %18099 = vmatpush3.bf16.msra.mxu0 %v19930_v19  ;;  %18094 = vmatprep.mubr.msk.bf16.mxu0 %vm205_vm1, %v25584_v14  ;;  %v5873_v19 = vld [vmem:[%s25480_s6 + $0x20] sm:$0xff] }
 0x58b   :  { %18100 = vmatprep.subr.bf16.mxu0 %v19931_v2 }
 0x58e   :  { %18101 = vmatpush3.bf16.msra.mxu0 %v19931_v2  ;;  %v5928_v2 = vld [vmem:[%s25481_s7 + $0x18] sm:$0xff] }
 0x58f   :  { %18102 = vmatprep.subr.bf16.mxu0 %v19932_v47 }
 0x591   :  { %18095 = vmatmul.mubr.msk.bf16.gmra.mrb[132].mxu0 %vm205_vm1, %v25586_v8 }
 0x592   :  { %18103 = vmatpush3.bf16.msra.mxu0 %v19932_v47  ;;  %18106 = vmatprep.mubr.msk.bf16.mxu0 %vm205_vm1, %v25587_v21 }
 0x593   :  { %18104 = vmatprep.subr.bf16.mxu0 %v5229_v53 }
 0x596   :  { %18105 = vmatpush3.bf16.msra.mxu0 %v5229_v53 }
 0x597   :  { %18114 = vmatprep.subr.bf16.mxu0 %v19934_v6 }
 0x599   :  { %18107 = vmatmul.mubr.msk.bf16.vlgmr.msra.gmra.mrb[128].mxu0 %vm205_vm1, %v25588_v57 }
 0x59a   :  { %18115 = vmatpush3.bf16.msra.mxu0 %v19934_v6  ;;  %18110 = vmatprep.mubr.msk.bf16.mxu0 %vm205_vm1, %v25590_v37 }
 0x59b   :  { %18116 = vmatprep.subr.bf16.mxu0 %v19935_v7 }
 0x59e   :  { %18117 = vmatpush3.bf16.msra.mxu0 %v19935_v7 }
 0x59f   :  { %18118 = vmatprep.subr.bf16.mxu0 %v19936_v48 }
 0x5a1   :  { %18111 = vmatmul.mubr.msk.bf16.gmra.mrb[132].mxu0 %vm205_vm1, %v25591_v56 }
 0x5a2   :  { %18119 = vmatpush3.bf16.msra.mxu0 %v19936_v48  ;;  %18122 = vmatprep.mubr.msk.bf16.mxu0 %vm205_vm1, %v5304_v26 }
 0x5a3   :  { %18120 = vmatprep.subr.bf16.mxu0 %v5350_v1 }
 0x5a6   :  { %18121 = vmatpush3.bf16.msra.mxu0 %v5350_v1  ;;  %v5426_v1 = vld [vmem:[%s25490_s16 + $0x8] sm:$0xff] }
 0x5a9   :  { %18123 = vmatmul.mubr.msk.bf16.vlgmr.msra.gmra.mrb[128].mxu0 %vm205_vm1, %v25592_v30  ;;  %v5427_v30 = vld [vmem:[%s25490_s16 + $0x10] sm:$0xff] }
 0x5aa   :  { %18126 = vmatprep.mubr.msk.bf16.mxu0 %vm205_vm1, %v5306_v42 }
 0x5b1   :  { %18127 = vmatmul.mubr.msk.bf16.gmra.mrb[132].mxu0 %vm205_vm1, %v5307_v5 }
 0x67c   :  { %v22475_v38 = vpop.f32.mrb[128].mxu0 }
 0x67d   :  { %v22477_v18 = vpop.f32.mrb[129].mxu0  ;;  %v5440_v55 = vsel %vm5433_vm4, %v22475_v38, 0.0  ;;  %v5460_v10 = vmul.f32 %v22475_v38, %v22475_v38 }
 0x67e   :  { %v22479_v35 = vpop.f32.mrb[130].mxu0  ;;  %v5434_v28 = vsel %vm5433_vm4, %v22477_v18, 0.0  ;;  %v5458_v11 = vmul.f32 %v22477_v18, %v22477_v18 }
 0x67f   :  { %5435 = vadd.xlane.f32.xlu1 %v5434_v28  ;;  %v22483_v27 = vpop.f32.mrb[131].mxu0  ;;  %v5443_v26 = vsel %vm5433_vm4, %v22479_v35, 0.0  ;;  %v5461_v20 = vmul.f32 %v22479_v35, %v22479_v35  ;;  %v5472_v31 = vsel %vm5433_vm4, %v5460_v10, 0.0  ;;  %v5432_v10 = vld [vmem:[%s25490_s16 + $0x38] sm:$0xff] }
 0x680   :  { %v5437_v34 = vsel %vm5433_vm4, %v22483_v27, 0.0  ;;  %v5459_v22 = vmul.f32 %v22483_v27, %v22483_v27  ;;  %v5466_v54 = vsel %vm5433_vm4, %v5458_v11, 0.0 }
 0x681   :  { %5438 = vadd.xlane.f32.xlu0 %v5437_v34  ;;  %v5475_v39 = vsel %vm5433_vm4, %v5461_v20, 0.0 }
 0x682   :  { %v5469_v16 = vsel %vm5433_vm4, %v5459_v22, 0.0  ;;  %v5431_v22 = vld [vmem:[%s25490_s16 + $0x30] sm:$0xff] }
 0x683   :  { %5444 = vadd.xlane.f32.xlu1 %v5443_v26  ;;  %v5428_v26 = vld [vmem:[%s25490_s16 + $0x18] sm:$0xff] }
 0x684   :  { %v22489_v46 = vpop.f32.mrb[132].mxu0 }
 0x685   :  { %5441 = vadd.xlane.f32.xlu0 %v5440_v55  ;;  %v22493_v9 = vpop.f32.mrb[133].mxu0  ;;  %v5452_v24 = vsel %vm5433_vm4, %v22489_v46, 0.0  ;;  %v5464_v23 = vmul.f32 %v22489_v46, %v22489_v46 }
 0x686   :  { %v22495_v42 = vpop.f32.mrb[134].mxu0  ;;  %v5446_v32 = vsel %vm5433_vm4, %v22493_v9, 0.0  ;;  %v5462_v61 = vmul.f32 %v22493_v9, %v22493_v9 }
 0x687   :  { %v22497_v63 = vpop.f32.mrb[135].mxu0  ;;  %v5455_v4 = vsel %vm5433_vm4, %v22495_v42, 0.0  ;;  %v5465_v29 = vmul.f32 %v22495_v42, %v22495_v42  ;;  %v5484_v59 = vsel %vm5433_vm4, %v5464_v23, 0.0 }
 0x688   :  { %v5449_v5 = vsel %vm5433_vm4, %v22497_v63, 0.0  ;;  %v5463_v50 = vmul.f32 %v22497_v63, %v22497_v63  ;;  %v5478_v43 = vsel %vm5433_vm4, %v5462_v61, 0.0 }
 0x689   :  { %5447 = vadd.xlane.f32.xlu0 %v5446_v32  ;;  %5450 = vadd.xlane.f32.xlu1 %v5449_v5  ;;  %v5487_v25 = vsel %vm5433_vm4, %v5465_v29, 0.0  ;;  %v5429_v32 = vld [vmem:[%s25490_s16 + $0x20] sm:$0xff] }
 0x68a   :  { %v5481_v15 = vsel %vm5433_vm4, %v5463_v50, 0.0 }
 0x68d   :  { %5453 = vadd.xlane.f32.xlu0 %v5452_v24  ;;  %5456 = vadd.xlane.f32.xlu1 %v5455_v4  ;;  %v5430_v4 = vld [vmem:[%s25490_s16 + $0x28] sm:$0xff] }
 0x691   :  { %5467 = vadd.xlane.f32.xlu0 %v5466_v54  ;;  %5470 = vadd.xlane.f32.xlu1 %v5469_v16 }
 0x695   :  { %5473 = vadd.xlane.f32.xlu0 %v5472_v31  ;;  %5476 = vadd.xlane.f32.xlu1 %v5475_v39 }
 0x699   :  { %5479 = vadd.xlane.f32.xlu0 %v5478_v43  ;;  %5482 = vadd.xlane.f32.xlu1 %v5481_v15 }
 0x69d   :  { %5485 = vadd.xlane.f32.xlu0 %v5484_v59  ;;  %5488 = vadd.xlane.f32.xlu1 %v5487_v25 }
 0x6ae   :  { %5879 = vperm.xlu1 %19836, %v5869_v13  }
 0x6b2   :  { %5935 = vperm.xlu1 %19836, %v5925_v51  }
 0x6b3   :  { %5884 = vperm.xlu0 %19837, %v5870_v49  }
 0x6b6   :  { %5889 = vperm.xlu1 %19836, %v5871_v60  }
 0x6b7   :  { %5940 = vperm.xlu0 %19837, %v5926_v3  }
 0x6ba   :  { %5945 = vperm.xlu1 %19836, %v5927_v62  }
 0x6bb   :  { %5894 = vperm.xlu0 %19837, %v5872_v36  }
 0x6be   :  { %5899 = vperm.xlu1 %19836, %v5873_v19  }
 0x6bf   :  { %5950 = vperm.xlu0 %19837, %v5928_v2  }
 0x6c2   :  { %5955 = vperm.xlu1 %19836, %v5929_v52  }
 0x6c3   :  { %5904 = vperm.xlu0 %19837, %v5874_v33  }
 0x6c6   :  { %5909 = vperm.xlu1 %19836, %v5875_v12  }
 0x6c7   :  { %5960 = vperm.xlu0 %19837, %v5930_v17  }
 0x6cb   :  { %5914 = vperm.xlu0 %19837, %v5876_v0  }
 0x70c   :  { %v5436_v14 = vpop.xlane.xlu1 %5435 }
 0x70e   :  { %v5439_v47 = vpop.xlane.xlu0 %5438 }
 0x70f   :  { %v19086_v41 = vpack.c.bf16 %v5439_v47, %v5436_v14 }
 0x710   :  { %v5445_v53 = vpop.xlane.xlu1 %5444 }
 0x711   :  { %19087 = vmatprep.subr.bf16.mxu1 %v19086_v41 }
 0x712   :  { %19089 = vmatpush3.bf16.msra.mxu1 %v19086_v41  ;;  %v5442_v58 = vpop.xlane.xlu0 %5441 }
 0x713   :  { %v19090_v8 = vpack.c.bf16 %v5445_v53, %v5442_v58 }
 0x715   :  { %19091 = vmatprep.subr.bf16.mxu1 %v19090_v8 }
 0x716   :  { %19093 = vmatpush3.bf16.msra.mxu1 %v19090_v8  ;;  %v5448_v21 = vpop.xlane.xlu0 %5447  ;;  %v5451_v6 = vpop.xlane.xlu1 %5450 }
 0x717   :  { %v19094_v7 = vpack.c.bf16 %v5451_v6, %v5448_v21 }
 0x719   :  { %19095 = vmatprep.subr.bf16.mxu1 %v19094_v7 }
 0x71a   :  { %v5454_v57 = vpop.xlane.xlu0 %5453  ;;  %19097 = vmatpush3.bf16.msra.mxu1 %v19094_v7  ;;  %v5457_v40 = vpop.xlane.xlu1 %5456 }
 0x71b   :  { %v19098_v37 = vpack.c.bf16 %v5457_v40, %v5454_v57 }
 0x71d   :  { %19099 = vmatprep.subr.bf16.mxu1 %v19098_v37 }
 0x71e   :  { %v5468_v48 = vpop.xlane.xlu0 %5467  ;;  %19101 = vmatpush3.bf16.msra.mxu1 %v19098_v37  ;;  %v5471_v44 = vpop.xlane.xlu1 %5470 }
 0x71f   :  { %v19102_v56 = vpack.c.bf16 %v5471_v44, %v5468_v48 }
 0x721   :  { %18147 = vmatmul.mubr.msk.f32.vlgmr.msra.gmra.mrb[88].mxu1 %vm5490_vm5, %v5426_v1  ;;  %19103 = vmatprep.subr.bf16.mxu1 %v19102_v56 }
 0x722   :  { %v5474_v28 = vpop.xlane.xlu0 %5473  ;;  %19105 = vmatpush3.bf16.msra.mxu1 %v19102_v56  ;;  %v5477_v34 = vpop.xlane.xlu1 %5476  ;;  %18149 = vmatprep.mubr.msk.f32.mxu1 %vm5490_vm5, %v5427_v30 }
 0x723   :  { %v19106_v55 = vpack.c.bf16 %v5477_v34, %v5474_v28 }
 0x725   :  { %18150 = vmatmul.mubr.msk.f32.gmra.mrb[90].mxu1 %vm5490_vm5, %v5428_v26  ;;  %19107 = vmatprep.subr.bf16.mxu1 %v19106_v55 }
 0x726   :  { %v5480_v5 = vpop.xlane.xlu0 %5479  ;;  %19109 = vmatpush3.bf16.msra.mxu1 %v19106_v55  ;;  %v5483_v24 = vpop.xlane.xlu1 %5482  ;;  %18152 = vmatprep.mubr.msk.f32.mxu1 %vm5490_vm5, %v5429_v32 }
 0x727   :  { %v19110_v11 = vpack.c.bf16 %v5483_v24, %v5480_v5 }
 0x729   :  { %18153 = vmatmul.mubr.msk.f32.gmra.mrb[92].mxu1 %vm5490_vm5, %v5430_v4  ;;  %19111 = vmatprep.subr.bf16.mxu1 %v19110_v11 }
 0x72a   :  { %v5486_v54 = vpop.xlane.xlu0 %5485  ;;  %19113 = vmatpush3.bf16.msra.mxu1 %v19110_v11  ;;  %v5489_v16 = vpop.xlane.xlu1 %5488  ;;  %18155 = vmatprep.mubr.msk.f32.mxu1 %vm5490_vm5, %v5431_v22 }
 0x72b   :  { %v19114_v20 = vpack.c.bf16 %v5489_v16, %v5486_v54 }
 0x72d   :  { %18156 = vmatmul.mubr.msk.f32.gmra.mrb[94].mxu1 %vm5490_vm5, %v5432_v10  ;;  %19115 = vmatprep.subr.bf16.mxu1 %v19114_v20 }
 0x72e   :  { %19117 = vmatpush3.bf16.msra.mxu1 %v19114_v20  ;;  %18174 = vmatprep.mubr.msk.f32.mxu1 %vm5490_vm5, %v22534_v45 }
 0x731   :  { %18175 = vmatmul.mubr.msk.f32.vlgmr.msra.gmra.mrb[96].mxu1 %vm5490_vm5, %v5426_v1 }
 0x732   :  { %18177 = vmatprep.mubr.msk.f32.mxu1 %vm5490_vm5, %v5427_v30 }
 0x735   :  { %18178 = vmatmul.mubr.msk.f32.gmra.mrb[98].mxu1 %vm5490_vm5, %v5428_v26 }
 0x736   :  { %18180 = vmatprep.mubr.msk.f32.mxu1 %vm5490_vm5, %v5429_v32 }
 0x739   :  { %18181 = vmatmul.mubr.msk.f32.gmra.mrb[100].mxu1 %vm5490_vm5, %v5430_v4 }
 0x73a   :  { %18183 = vmatprep.mubr.msk.f32.mxu1 %vm5490_vm5, %v5431_v22 }
 0x73d   :  { %18184 = vmatmul.mubr.msk.f32.gmra.mrb[102].mxu1 %vm5490_vm5, %v5432_v10 }
 0x7f4   :  { %v18148_v31 = vpop.f32.mrb[88].mxu1 }
 0x7f5   :  { %v5621_v39 = vmul.f32 0.055555556, %v18148_v31  ;;  %v5581_v61 = vpop.f32.mrb[89].mxu1 }
 0x7f6   :  { %v5620_v50 = vmul.f32 0.055555556, %v5581_v61 }
 0x7f7   :  { %5764 = vperm.xlu1 %19836, %v5621_v39   ;;  %v5742_v36 = vmul.f32 %v5621_v39, %v5621_v39 }
 0x7f8   :  { %5759 = vperm.xlu0 %19837, %v5620_v50   ;;  %v18151_v43 = vpop.f32.mrb[90].mxu1  ;;  %v5741_v52 = vmul.f32 %v5620_v50, %v5620_v50 }
 0x7f9   :  { %v5623_v15 = vmul.f32 0.055555556, %v18151_v43  ;;  %v5591_v23 = vpop.f32.mrb[91].mxu1 }
 0x7fa   :  { %v5622_v29 = vmul.f32 0.055555556, %v5591_v23 }
 0x7fb   :  { %v5744_v14 = vmul.f32 %v5623_v15, %v5623_v15 }
 0x7fc   :  { %5774 = vperm.xlu0 %19837, %v5623_v15   ;;  %5769 = vperm.xlu1 %19836, %v5622_v29   ;;  %v18154_v59 = vpop.f32.mrb[92].mxu1  ;;  %v5743_v58 = vmul.f32 %v5622_v29, %v5622_v29 }
 0x7fd   :  { %v5625_v25 = vmul.f32 0.055555556, %v18154_v59  ;;  %v5601_v45 = vpop.f32.mrb[93].mxu1  ;;  %v5932_v59 = vld [vmem:[%s25481_s7 + $0x38] sm:$0xff] }
 0x7fe   :  { %v5624_v13 = vmul.f32 0.055555556, %v5601_v45  ;;  %v5989_v45 = vld [vmem:[%s25482_s8] sm:$0xff] }
 0x7ff   :  { %v5746_v40 = vmul.f32 %v5625_v25, %v5625_v25  ;;  %18202 = vmatprep.mubr.msk.f32.mxu1 %vm5490_vm5, %v5989_v45 }
 0x800   :  { %5784 = vperm.xlu0 %19837, %v5625_v25   ;;  %5779 = vperm.xlu1 %19836, %v5624_v13   ;;  %v18157_v51 = vpop.f32.mrb[94].mxu1  ;;  %v5745_v1 = vmul.f32 %v5624_v13, %v5624_v13  ;;  %v5931_v25 = vld [vmem:[%s25481_s7 + $0x30] sm:$0xff]  ;;  %v5885_v13 = vpop.permute.xlu0 %5884 }
 0x801   :  { %v5627_v49 = vmul.f32 0.055555556, %v18157_v51  ;;  %v5611_v60 = vpop.f32.mrb[95].mxu1  ;;  %v5880_v51 = vpop.permute.xlu1 %5879 }
 0x802   :  { %v5626_v3 = vmul.f32 0.055555556, %v5611_v60 }
 0x803   :  { %v5748_v55 = vmul.f32 %v5627_v49, %v5627_v49 }
 0x804   :  { %5794 = vperm.xlu0 %19837, %v5627_v49   ;;  %5789 = vperm.xlu1 %19836, %v5626_v3   ;;  %v18176_v62 = vpop.f32.mrb[96].mxu1  ;;  %v5747_v4 = vmul.f32 %v5626_v3, %v5626_v3  ;;  %v5941_v49 = vpop.permute.xlu0 %5940 }
 0x805   :  { %v5734_v19 = vmul.f32 0.055555556, %v18176_v62  ;;  %v5694_v2 = vpop.f32.mrb[97].mxu1  ;;  %v5936_v60 = vpop.permute.xlu1 %5935 }
 0x806   :  { %v5733_v33 = vmul.f32 0.055555556, %v5694_v2 }
 0x807   :  { %v5750_v12 = vsub.f32 %v5734_v19, %v5742_v36 }
 0x808   :  { %v5749_v17 = vsub.f32 %v5733_v33, %v5741_v52  ;;  %v18179_v0 = vpop.f32.mrb[98].mxu1  ;;  %v5895_v3 = vpop.permute.xlu0 %5894 }
 0x809   :  { %v5806_v47 = vadd.f32 1e-05, %v5750_v12  ;;  %v5736_v41 = vmul.f32 0.055555556, %v18179_v0  ;;  %v5704_v53 = vpop.f32.mrb[99].mxu1  ;;  %v5890_v62 = vpop.permute.xlu1 %5889 }
 0x80a   :  { %v5805_v8 = vadd.f32 1e-05, %v5749_v17  ;;  %v5735_v21 = vmul.f32 0.055555556, %v5704_v53 }
 0x80b   :  { %20371 = vrsqrt.f32 %v5806_v47  ;;  %v5752_v6 = vsub.f32 %v5736_v41, %v5744_v14 }
 0x80c   :  { %20373 = vrsqrt.f32 %v5805_v8  ;;  %v5751_v7 = vsub.f32 %v5735_v21, %v5743_v58  ;;  %v18182_v57 = vpop.f32.mrb[100].mxu1  ;;  %v5951_v36 = vpop.permute.xlu0 %5950 }
 0x80d   :  { %v5808_v37 = vadd.f32 1e-05, %v5752_v6  ;;  %v5738_v48 = vmul.f32 0.055555556, %v18182_v57  ;;  %v5714_v44 = vpop.f32.mrb[101].mxu1  ;;  %v5946_v19 = vpop.permute.xlu1 %5945 }
 0x80e   :  { %v5807_v56 = vadd.f32 1e-05, %v5751_v7  ;;  %v5737_v30 = vmul.f32 0.055555556, %v5714_v44 }
 0x80f   :  { %20375 = vrsqrt.f32 %v5808_v37  ;;  %v5754_v28 = vsub.f32 %v5738_v48, %v5746_v40 }
 0x810   :  { %20377 = vrsqrt.f32 %v5807_v56  ;;  %v5753_v34 = vsub.f32 %v5737_v30, %v5745_v1  ;;  %v18185_v26 = vpop.f32.mrb[102].mxu1  ;;  %v5905_v2 = vpop.permute.xlu0 %5904 }
 0x811   :  { %v5810_v32 = vadd.f32 1e-05, %v5754_v28  ;;  %v5740_v5 = vmul.f32 0.055555556, %v18185_v26  ;;  %v5724_v24 = vpop.f32.mrb[103].mxu1  ;;  %v5900_v52 = vpop.permute.xlu1 %5899 }
 0x812   :  { %v5809_v11 = vadd.f32 1e-05, %v5753_v34  ;;  %v5739_v22 = vmul.f32 0.055555556, %v5724_v24 }
 0x813   :  { %20379 = vrsqrt.f32 %v5810_v32  ;;  %v5756_v54 = vsub.f32 %v5740_v5, %v5748_v55 }
 0x814   :  { %20381 = vrsqrt.f32 %v5809_v11  ;;  %v5755_v16 = vsub.f32 %v5739_v22, %v5747_v4  ;;  %v5961_v33 = vpop.permute.xlu0 %5960 }
 0x815   :  { %v20372_v10 = vpop.eup %20371  ;;  %v5812_v20 = vadd.f32 1e-05, %v5756_v54  ;;  %v5956_v12 = vpop.permute.xlu1 %5955 }
 0x816   :  { %v20374_v31 = vpop.eup %20373  ;;  %v5811_v39 = vadd.f32 1e-05, %v5755_v16  ;;  %5828 = vperm.xlu0 %19837, %v20372_v10  }
 0x817   :  { %20383 = vrsqrt.f32 %v5812_v20  ;;  %5823 = vperm.xlu1 %19836, %v20374_v31  }
 0x818   :  { %20385 = vrsqrt.f32 %v5811_v39  ;;  %v5915_v17 = vpop.permute.xlu0 %5914 }
 0x819   :  { %v20376_v61 = vpop.eup %20375  ;;  %v5910_v0 = vpop.permute.xlu1 %5909 }
 0x81a   :  { %v20378_v50 = vpop.eup %20377  ;;  %5838 = vperm.xlu0 %19837, %v20376_v61  }
 0x81b   :  { %5833 = vperm.xlu1 %19836, %v20378_v50  }
 0x81d   :  { %v20380_v43 = vpop.eup %20379 }
 0x81e   :  { %v20382_v15 = vpop.eup %20381  ;;  %5848 = vperm.xlu0 %19837, %v20380_v43  }
 0x81f   :  { %5843 = vperm.xlu1 %19836, %v20382_v15  }
 0x821   :  { %v20384_v23 = vpop.eup %20383 }
 0x822   :  { %v20386_v29 = vpop.eup %20385  ;;  %5858 = vperm.xlu0 %19837, %v20384_v23  }
 0x823   :  { %5853 = vperm.xlu1 %19836, %v20386_v29  }
 0x826   :  { %5970 = vperm.xlu0 %19837, %v5932_v59  }
 0x827   :  { %5965 = vperm.xlu1 %19836, %v5931_v25  }
 0x876   :  { %v5765_v47 = vpop.permute.xlu1 %5764 }
 0x877   :  { %v5760_v14 = vpop.permute.xlu0 %5759  ;;  %v5798_v7 = vsub.f32 %v22483_v27, %v5765_v47  ;;  %v5993_v47 = vld [vmem:[%s25482_s8 + $0x20] sm:$0xff] }
 0x878   :  { %v5797_v57 = vsub.f32 %v22477_v18, %v5760_v14 }
 0x87b   :  { %v5775_v41 = vpop.permute.xlu0 %5774  ;;  %v5770_v53 = vpop.permute.xlu1 %5769 }
 0x87c   :  { %v5800_v1 = vsub.f32 %v22479_v35, %v5775_v41  ;;  %v5799_v30 = vsub.f32 %v22475_v38, %v5770_v53  ;;  %v5994_v41 = vld [vmem:[%s25482_s8 + $0x28] sm:$0xff]  ;;  %v5995_v53 = vld [vmem:[%s25482_s8 + $0x30] sm:$0xff] }
 0x87f   :  { %v5785_v58 = vpop.permute.xlu0 %5784  ;;  %v5780_v8 = vpop.permute.xlu1 %5779 }
 0x880   :  { %v5802_v27 = vsub.f32 %v22497_v63, %v5785_v58  ;;  %v5801_v11 = vsub.f32 %v22493_v9, %v5780_v8  ;;  %v5996_v58 = vld [vmem:[%s25482_s8 + $0x38] sm:$0xff]  ;;  %v5997_v8 = vld [vmem:[%s25482_s8 + $0x40] sm:$0xff] }
 0x883   :  { %v5795_v21 = vpop.permute.xlu0 %5794  ;;  %v5790_v6 = vpop.permute.xlu1 %5789 }
 0x884   :  { %v5804_v61 = vsub.f32 %v22495_v42, %v5795_v21  ;;  %v5803_v15 = vsub.f32 %v22489_v46, %v5790_v6  ;;  %v5998_v21 = vld [vmem:[%s25482_s8 + $0x48] sm:$0xff]  ;;  %v5999_v6 = vld [vmem:[%s25482_s8 + $0x50] sm:$0xff] }
 0x895   :  { %v5829_v40 = vpop.permute.xlu0 %5828 }
 0x896   :  { %v5862_v37 = vmul.f32 %v5829_v40, %v5798_v7  ;;  %v5824_v48 = vpop.permute.xlu1 %5823  ;;  %v6000_v7 = vld [vmem:[%s25482_s8 + $0x58] sm:$0xff]  ;;  %v6002_v40 = vld [vmem:[%s25482_s8 + $0x68] sm:$0xff] }
 0x897   :  { %v5861_v44 = vmul.f32 %v5824_v48, %v5797_v57  ;;  %v6001_v57 = vld [vmem:[%s25482_s8 + $0x60] sm:$0xff]  ;;  %v6004_v48 = vld [vmem:[%s25482_s8 + $0x78] sm:$0xff] }
 0x898   :  { %v5918_v56 = vmul.f32 %v5885_v13, %v5862_v37  ;;  %v6003_v37 = vld [vmem:[%s25482_s8 + $0x70] sm:$0xff] }
 0x899   :  { %v5917_v28 = vmul.f32 %v5880_v51, %v5861_v44  ;;  %v5839_v34 = vpop.permute.xlu0 %5838  ;;  %v6005_v44 = vld [vmem:[%s25482_s8 + $0x80] sm:$0xff] }
 0x89a   :  { %v5974_v26 = vadd.f32 %v5941_v49, %v5918_v56  ;;  %v5864_v55 = vmul.f32 %v5839_v34, %v5800_v1  ;;  %v5834_v32 = vpop.permute.xlu1 %5833  ;;  %v6006_v1 = vld [vmem:[%s25482_s8 + $0x88] sm:$0xff]  ;;  %v6007_v56 = vld [vmem:[%s25482_s8 + $0x90] sm:$0xff] }
 0x89b   :  { %v5973_v5 = vadd.f32 %v5936_v60, %v5917_v28  ;;  %v5863_v24 = vmul.f32 %v5834_v32, %v5799_v30  ;;  %v6008_v30 = vld [vmem:[%s25482_s8 + $0x98] sm:$0xff]  ;;  %v6009_v28 = vld [vmem:[%s25482_s8 + $0xa0] sm:$0xff]  ;;  %v6010_v34 = vld [vmem:[%s25482_s8 + $0xa8] sm:$0xff] }
 0x89c   :  { %v5982_v4 = vmax.f32 %v5974_v26, 0.0  ;;  %v5920_v18 = vmul.f32 %v5895_v3, %v5864_v55  ;;  %v6011_v26 = vld [vmem:[%s25482_s8 + $0xb0] sm:$0xff]  ;;  %v6012_v55 = vld [vmem:[%s25482_s8 + $0xb8] sm:$0xff]  ;;  %v6013_v32 = vld [vmem:[%s25482_s8 + $0xc0] sm:$0xff] }
 0x89d   :  { %v5981_v22 = vmax.f32 %v5973_v5, 0.0  ;;  %v5919_v54 = vmul.f32 %v5890_v62, %v5863_v24  ;;  %v5849_v16 = vpop.permute.xlu0 %5848  ;;  %v6014_v5 = vld [vmem:[%s25482_s8 + $0xc8] sm:$0xff]  ;;  %v6015_v24 = vld [vmem:[%s25482_s8 + $0xd0] sm:$0xff] }
 0x89e   :  { %v5976_v35 = vadd.f32 %v5951_v36, %v5920_v18  ;;  %v5866_v10 = vmul.f32 %v5849_v16, %v5802_v27  ;;  %v5844_v20 = vpop.permute.xlu1 %5843  ;;  %v6016_v27 = vld [vmem:[%s25482_s8 + $0xd8] sm:$0xff]  ;;  %v6018_v18 = vld [vmem:[%s25482_s8 + $0xe8] sm:$0xff] }
 0x89f   :  { %v5975_v38 = vadd.f32 %v5946_v19, %v5919_v54  ;;  %v5865_v31 = vmul.f32 %v5844_v20, %v5801_v11  ;;  %v19118_v39 = vpack.c.bf16 %v5982_v4, %v5981_v22  ;;  %v6017_v4 = vld [vmem:[%s25482_s8 + $0xe0] sm:$0xff]  ;;  %v6019_v11 = vld [vmem:[%s25482_s8 + $0xf0] sm:$0xff]  ;;  %v6020_v22 = vld [vmem:[%s25482_s8 + $0xf8] sm:$0xff] }
 0x8a0   :  { %v5984_v50 = vmax.f32 %v5976_v35, 0.0  ;;  %v5922_v43 = vmul.f32 %v5905_v2, %v5866_v10  ;;  %v6021_v54 = vld [vmem:[%s25482_s8 + $0x100] sm:$0xff]  ;;  %v6022_v16 = vld [vmem:[%s25482_s8 + $0x108] sm:$0xff]  ;;  %v6023_v35 = vld [vmem:[%s25482_s8 + $0x110] sm:$0xff] }
 0x8a1   :  { %v5983_v63 = vmax.f32 %v5975_v38, 0.0  ;;  %v5921_v23 = vmul.f32 %v5900_v52, %v5865_v31  ;;  %v5859_v29 = vpop.permute.xlu0 %5858  ;;  %19119 = vmatprep.subr.bf16.mxu1 %v19118_v39  ;;  %v6024_v10 = vld [vmem:[%s25482_s8 + $0x118] sm:$0xff]  ;;  %v6025_v20 = vld [vmem:[%s25482_s8 + $0x120] sm:$0xff]  ;;  %v6026_v38 = vld [vmem:[%s25482_s8 + $0x128] sm:$0xff] }
 0x8a2   :  { %v5978_v9 = vadd.f32 %v5961_v33, %v5922_v43  ;;  %v5868_v59 = vmul.f32 %v5859_v29, %v5804_v61  ;;  %19121 = vmatpush3.bf16.msra.mxu1 %v19118_v39  ;;  %v5854_v25 = vpop.permute.xlu1 %5853  ;;  %v6027_v31 = vld [vmem:[%s25482_s8 + $0x130] sm:$0xff]  ;;  %v6028_v39 = vld [vmem:[%s25482_s8 + $0x138] sm:$0xff]  ;;  %v6029_v61 = vld [vmem:[%s25482_s8 + $0x140] sm:$0xff] }
 0x8a3   :  { %v5977_v45 = vadd.f32 %v5956_v12, %v5921_v23  ;;  %v5867_v13 = vmul.f32 %v5854_v25, %v5803_v15  ;;  %v19122_v51 = vpack.c.bf16 %v5984_v50, %v5983_v63  ;;  %v5990_v12 = vld [vmem:[%s25482_s8 + $0x8] sm:$0xff]  ;;  %v6031_v43 = vld [vmem:[%s25482_s8 + $0x150] sm:$0xff]  ;;  %v6032_v15 = vld [vmem:[%s25482_s8 + $0x158] sm:$0xff] }
 0x8a4   :  { %v5986_v49 = vmax.f32 %v5978_v9, 0.0  ;;  %v5924_v60 = vmul.f32 %v5915_v17, %v5868_v59  ;;  %v5991_v17 = vld [vmem:[%s25482_s8 + $0x10] sm:$0xff]  ;;  %v6030_v50 = vld [vmem:[%s25482_s8 + $0x148] sm:$0xff]  ;;  %v6033_v63 = vld [vmem:[%s25482_s8 + $0x160] sm:$0xff] }
 0x8a5   :  { %v5985_v3 = vmax.f32 %v5977_v45, 0.0  ;;  %v5971_v62 = vpop.permute.xlu0 %5970  ;;  %19123 = vmatprep.subr.bf16.mxu1 %v19122_v51  ;;  %v5923_v42 = vmul.f32 %v5910_v0, %v5867_v13  ;;  %v5992_v0 = vld [vmem:[%s25482_s8 + $0x18] sm:$0xff]  ;;  %v6034_v23 = vld [vmem:[%s25482_s8 + $0x168] sm:$0xff]  ;;  %v6035_v29 = vld [vmem:[%s25482_s8 + $0x170] sm:$0xff]  ;;  %v20428_v45 = vmov 65535  }
 0x8a6   :  { %v5980_v36 = vadd.f32 %v5971_v62, %v5924_v60  ;;  %19125 = vmatpush3.bf16.msra.mxu1 %v19122_v51  ;;  %v5966_v46 = vpop.permute.xlu1 %5965  ;;  %v6036_v9 = vld [vmem:[%s25482_s8 + $0x178] sm:$0xff]  ;;  %v6037_v59 = vld [vmem:[%s25482_s8 + $0x180] sm:$0xff]  ;;  %v19938_v25 = vld [vmem:[%s25483_s9 + $0x8] sm:$0x1f]   ;;  %v6976_v13 = vsel %vm6974_vm6, 4294967295, %v20428_v45 }
 0x8a7   :  { %v5979_v19 = vadd.f32 %v5966_v46, %v5923_v42  ;;  %v19126_v2 = vpack.c.bf16 %v5986_v49, %v5985_v3  ;;  %v22830_v51 = vsel %vm6975_vm7, %v6976_v13, 0  ;;  %v6038_v49 = vld [vmem:[%s25482_s8 + $0x188] sm:$0xff]  ;;  %v6039_v3 = vld [vmem:[%s25482_s8 + $0x190] sm:$0xff]  ;;  %v6040_v62 = vld [vmem:[%s25482_s8 + $0x198] sm:$0xff] }
 0x8a8   :  { %v5988_v52 = vmax.f32 %v5980_v36, 0.0  ;;  %v6979_v60 = vand.u32 %v19938_v25, %v22830_v51  ;;  %v6041_v42 = vld [vmem:[%s25482_s8 + $0x1a0] sm:$0xff]  ;;  %v6042_v46 = vld [vmem:[%s25482_s8 + $0x1a8] sm:$0xff] }
 0x8a9   :  { %v5987_v14 = vmax.f32 %v5979_v19, 0.0  ;;  %19127 = vmatprep.subr.bf16.mxu1 %v19126_v2  ;;  %v19939_v36 = vld [vmem:[%s25483_s9] sm:$0x1f]   ;;  %v6043_v19 = vld [vmem:[%s25482_s8 + $0x1b0] sm:$0xff] }
 0x8aa   :  { %19129 = vmatpush3.bf16.msra.mxu1 %v19126_v2  ;;  %18352 = vmatprep.subr.bf16.mxu0 %v6979_v60  ;;  %v22860_v2 = vand.u32 %v19939_v36, %v22830_v51 }
 0x8ab   :  { %v19130_v33 = vpack.c.bf16 %v5988_v52, %v5987_v14  ;;  %18353 = vmatpush3.bf16.msra.mxu0 %v6979_v60  ;;  %v6044_v52 = vld [vmem:[%s25482_s8 + $0x1b8] sm:$0xff]  ;;  %v6045_v14 = vld [vmem:[%s25482_s8 + $0x1c0] sm:$0xff]  ;;  %v19940_v60 = vld [vmem:[%s25483_s9 + $0x10] sm:$0x1f]  }
 0x8ac   :  { %18358 = vmatprep.subr.bf16.mxu0 %v22860_v2  ;;  %v7110_v36 = vand.u32 %v19940_v60, %v22830_v51 }
 0x8ad   :  { %19131 = vmatprep.subr.bf16.mxu1 %v19130_v33 }
 0x8ae   :  { %19133 = vmatpush3.bf16.msra.mxu1 %v19130_v33  ;;  %v6046_v33 = vld [vmem:[%s25482_s8 + $0x1c8] sm:$0xff] }
 0x8b1   :  { %18203 = vmatmul.mubr.msk.f32.vlgmr.msra.gmra.mrb[104].mxu1 %vm5490_vm5, %v5990_v12  ;;  %v6047_v12 = vld [vmem:[%s25482_s8 + $0x1d0] sm:$0xff] }
 0x8b2   :  { %18205 = vmatprep.mubr.msk.f32.mxu1 %vm5490_vm5, %v5991_v17  ;;  %v6048_v17 = vld [vmem:[%s25482_s8 + $0x1d8] sm:$0xff] }
 0x8b5   :  { %18206 = vmatmul.mubr.msk.f32.gmra.mrb[106].mxu1 %vm5490_vm5, %v5992_v0  ;;  %v6049_v0 = vld [vmem:[%s25482_s8 + $0x1e0] sm:$0xff] }
 0x8b6   :  { %18208 = vmatprep.mubr.msk.f32.mxu1 %vm5490_vm5, %v5993_v47  ;;  %v6050_v47 = vld [vmem:[%s25482_s8 + $0x1e8] sm:$0xff] }
 0x8b9   :  { %18209 = vmatmul.mubr.msk.f32.gmra.mrb[108].mxu1 %vm5490_vm5, %v5994_v41  ;;  %v6051_v41 = vld [vmem:[%s25482_s8 + $0x1f0] sm:$0xff] }
 0x8ba   :  { %18211 = vmatprep.mubr.msk.f32.mxu1 %vm5490_vm5, %v5995_v53  ;;  %v6052_v53 = vld [vmem:[%s25482_s8 + $0x1f8] sm:$0xff] }
 0x8bd   :  { %18212 = vmatmul.mubr.msk.f32.gmra.mrb[110].mxu1 %vm5490_vm5, %v5996_v58  ;;  %v6053_v58 = vld [vmem:[%s25482_s8 + $0x200] sm:$0xff] }
 0x8be   :  { %18214 = vmatprep.mubr.msk.f32.mxu1 %vm5490_vm5, %v5997_v8  ;;  %v6054_v8 = vld [vmem:[%s25482_s8 + $0x208] sm:$0xff] }
 0x8c1   :  { %18215 = vmatmul.mubr.msk.f32.gmra.mrb[112].mxu1 %vm5490_vm5, %v5998_v21  ;;  %v6055_v21 = vld [vmem:[%s25482_s8 + $0x210] sm:$0xff] }
 0x8c2   :  { %18217 = vmatprep.mubr.msk.f32.mxu1 %vm5490_vm5, %v5999_v6  ;;  %v6056_v6 = vld [vmem:[%s25482_s8 + $0x218] sm:$0xff] }
 0x8c5   :  { %18218 = vmatmul.mubr.msk.f32.gmra.mrb[114].mxu1 %vm5490_vm5, %v6000_v7  ;;  %v6057_v7 = vld [vmem:[%s25482_s8 + $0x220] sm:$0xff] }
 0x8c6   :  { %18220 = vmatprep.mubr.msk.f32.mxu1 %vm5490_vm5, %v6001_v57  ;;  %v6058_v57 = vld [vmem:[%s25482_s8 + $0x228] sm:$0xff] }
 0x8c9   :  { %18221 = vmatmul.mubr.msk.f32.gmra.mrb[116].mxu1 %vm5490_vm5, %v6002_v40  ;;  %v6059_v40 = vld [vmem:[%s25482_s8 + $0x230] sm:$0xff] }
 0x8ca   :  { %18223 = vmatprep.mubr.msk.f32.mxu1 %vm5490_vm5, %v6003_v37  ;;  %v6060_v37 = vld [vmem:[%s25482_s8 + $0x238] sm:$0xff] }
 0x8cd   :  { %18224 = vmatmul.mubr.msk.f32.gmra.mrb[118].mxu1 %vm5490_vm5, %v6004_v48  ;;  %v6061_v48 = vld [vmem:[%s25482_s8 + $0x240] sm:$0xff] }
 0x8ce   :  { %18226 = vmatprep.mubr.msk.f32.mxu1 %vm5490_vm5, %v6005_v44  ;;  %v6062_v44 = vld [vmem:[%s25482_s8 + $0x248] sm:$0xff] }
 0x8d1   :  { %18227 = vmatmul.mubr.msk.f32.gmra.mrb[120].mxu1 %vm5490_vm5, %v6006_v1  ;;  %v6063_v1 = vld [vmem:[%s25482_s8 + $0x250] sm:$0xff] }
 0x8d2   :  { %18229 = vmatprep.mubr.msk.f32.mxu1 %vm5490_vm5, %v6007_v56  ;;  %v6064_v56 = vld [vmem:[%s25482_s8 + $0x258] sm:$0xff] }
 0x8d5   :  { %18230 = vmatmul.mubr.msk.f32.gmra.mrb[122].mxu1 %vm5490_vm5, %v6008_v30  ;;  %v6065_v30 = vld [vmem:[%s25482_s8 + $0x260] sm:$0xff] }
 0x8d6   :  { %18232 = vmatprep.mubr.msk.f32.mxu1 %vm5490_vm5, %v6009_v28  ;;  %v6066_v28 = vld [vmem:[%s25482_s8 + $0x268] sm:$0xff] }
 0x8d9   :  { %18233 = vmatmul.mubr.msk.f32.gmra.mrb[124].mxu1 %vm5490_vm5, %v6010_v34  ;;  %v6067_v34 = vld [vmem:[%s25482_s8 + $0x270] sm:$0xff] }
 0x8da   :  { %18235 = vmatprep.mubr.msk.f32.mxu1 %vm5490_vm5, %v6011_v26  ;;  %v6068_v26 = vld [vmem:[%s25482_s8 + $0x278] sm:$0xff] }
 0x8dd   :  { %18236 = vmatmul.mubr.msk.f32.gmra.mrb[126].mxu1 %vm5490_vm5, %v6012_v55  ;;  %v6069_v55 = vld [vmem:[%s25482_s8 + $0x280] sm:$0xff] }
 0x8de   :  { %18238 = vmatprep.mubr.msk.f32.mxu1 %vm5490_vm5, %v6013_v32  ;;  %v6070_v32 = vld [vmem:[%s25482_s8 + $0x288] sm:$0xff] }
 0x8e1   :  { %18239 = vmatmul.mubr.msk.f32.gmra.mrb[128].mxu1 %vm5490_vm5, %v6014_v5  ;;  %v6071_v5 = vld [vmem:[%s25482_s8 + $0x290] sm:$0xff] }
 0x8e2   :  { %18241 = vmatprep.mubr.msk.f32.mxu1 %vm5490_vm5, %v6015_v24  ;;  %v6072_v24 = vld [vmem:[%s25482_s8 + $0x298] sm:$0xff] }
 0x8e5   :  { %18242 = vmatmul.mubr.msk.f32.gmra.mrb[130].mxu1 %vm5490_vm5, %v6016_v27  ;;  %v6073_v27 = vld [vmem:[%s25482_s8 + $0x2a0] sm:$0xff] }
 0x8e6   :  { %18244 = vmatprep.mubr.msk.f32.mxu1 %vm5490_vm5, %v6017_v4  ;;  %v6074_v4 = vld [vmem:[%s25482_s8 + $0x2a8] sm:$0xff] }
 0x8e9   :  { %18245 = vmatmul.mubr.msk.f32.gmra.mrb[132].mxu1 %vm5490_vm5, %v6018_v18  ;;  %v6075_v18 = vld [vmem:[%s25482_s8 + $0x2b0] sm:$0xff] }
 0x8ea   :  { %18247 = vmatprep.mubr.msk.f32.mxu1 %vm5490_vm5, %v6019_v11  ;;  %v6076_v11 = vld [vmem:[%s25482_s8 + $0x2b8] sm:$0xff] }
 0x8ed   :  { %18248 = vmatmul.mubr.msk.f32.gmra.mrb[134].mxu1 %vm5490_vm5, %v6020_v22  ;;  %v6077_v22 = vld [vmem:[%s25482_s8 + $0x2c0] sm:$0xff] }
 0x8ee   :  { %18250 = vmatprep.mubr.msk.f32.mxu1 %vm5490_vm5, %v6021_v54  ;;  %v6078_v54 = vld [vmem:[%s25482_s8 + $0x2c8] sm:$0xff] }
 0x8f1   :  { %18251 = vmatmul.mubr.msk.f32.gmra.mrb[136].mxu1 %vm5490_vm5, %v6022_v16  ;;  %v6079_v16 = vld [vmem:[%s25482_s8 + $0x2d0] sm:$0xff] }
 0x8f2   :  { %18253 = vmatprep.mubr.msk.f32.mxu1 %vm5490_vm5, %v6023_v35  ;;  %v6080_v35 = vld [vmem:[%s25482_s8 + $0x2d8] sm:$0xff] }
 0x8f5   :  { %18254 = vmatmul.mubr.msk.f32.gmra.mrb[138].mxu1 %vm5490_vm5, %v6024_v10  ;;  %v6081_v10 = vld [vmem:[%s25482_s8 + $0x2e0] sm:$0xff] }
 0x8f6   :  { %18256 = vmatprep.mubr.msk.f32.mxu1 %vm5490_vm5, %v6025_v20  ;;  %v6082_v20 = vld [vmem:[%s25482_s8 + $0x2e8] sm:$0xff] }
 0x8f9   :  { %18257 = vmatmul.mubr.msk.f32.gmra.mrb[140].mxu1 %vm5490_vm5, %v6026_v38  ;;  %v6083_v38 = vld [vmem:[%s25482_s8 + $0x2f0] sm:$0xff] }
 0x8fa   :  { %18259 = vmatprep.mubr.msk.f32.mxu1 %vm5490_vm5, %v6027_v31  ;;  %v6084_v31 = vld [vmem:[%s25482_s8 + $0x2f8] sm:$0xff] }
 0x8fd   :  { %18260 = vmatmul.mubr.msk.f32.gmra.mrb[142].mxu1 %vm5490_vm5, %v6028_v39  ;;  %v6085_v39 = vld [vmem:[%s25482_s8 + $0x300] sm:$0xff] }
 0x8fe   :  { %18262 = vmatprep.mubr.msk.f32.mxu1 %vm5490_vm5, %v6029_v61  ;;  %v6086_v61 = vld [vmem:[%s25482_s8 + $0x308] sm:$0xff] }
 0x901   :  { %18263 = vmatmul.mubr.msk.f32.gmra.mrb[144].mxu1 %vm5490_vm5, %v6030_v50  ;;  %v6087_v50 = vld [vmem:[%s25482_s8 + $0x310] sm:$0xff] }
 0x902   :  { %18265 = vmatprep.mubr.msk.f32.mxu1 %vm5490_vm5, %v6031_v43  ;;  %v6088_v43 = vld [vmem:[%s25482_s8 + $0x318] sm:$0xff] }
 0x905   :  { %18266 = vmatmul.mubr.msk.f32.gmra.mrb[146].mxu1 %vm5490_vm5, %v6032_v15  ;;  %v23048_v15 = vld [vmem:[%s25490_s16] sm:$0xff] }
 0x906   :  { %18268 = vmatprep.mubr.msk.f32.mxu1 %vm5490_vm5, %v6033_v63 }
 0x909   :  { %18269 = vmatmul.mubr.msk.f32.gmra.mrb[148].mxu1 %vm5490_vm5, %v6034_v23 }
 0x90a   :  { %18271 = vmatprep.mubr.msk.f32.mxu1 %vm5490_vm5, %v6035_v29 }
 0x90d   :  { %18272 = vmatmul.mubr.msk.f32.gmra.mrb[150].mxu1 %vm5490_vm5, %v6036_v9 }
 0x90e   :  { %18274 = vmatprep.mubr.msk.f32.mxu1 %vm5490_vm5, %v6037_v59 }
 0x911   :  { %18275 = vmatmul.mubr.msk.f32.gmra.mrb[152].mxu1 %vm5490_vm5, %v6038_v49 }
 0x912   :  { %18277 = vmatprep.mubr.msk.f32.mxu1 %vm5490_vm5, %v6039_v3 }
 0x915   :  { %18278 = vmatmul.mubr.msk.f32.gmra.mrb[154].mxu1 %vm5490_vm5, %v6040_v62 }
 0x916   :  { %18280 = vmatprep.mubr.msk.f32.mxu1 %vm5490_vm5, %v6041_v42 }
 0x919   :  { %18281 = vmatmul.mubr.msk.f32.gmra.mrb[156].mxu1 %vm5490_vm5, %v6042_v46 }
 0x91a   :  { %18283 = vmatprep.mubr.msk.f32.mxu1 %vm5490_vm5, %v6043_v19 }
 0x91d   :  { %18284 = vmatmul.mubr.msk.f32.gmra.mrb[158].mxu1 %vm5490_vm5, %v6044_v52 }
 0x91e   :  { %18286 = vmatprep.mubr.msk.f32.mxu1 %vm5490_vm5, %v6045_v14 }
 0x921   :  { %18287 = vmatmul.mubr.msk.f32.gmra.mrb[160].mxu1 %vm5490_vm5, %v6046_v33 }
 0x922   :  { %18289 = vmatprep.mubr.msk.f32.mxu1 %vm5490_vm5, %v6047_v12 }
 0x925   :  { %18290 = vmatmul.mubr.msk.f32.gmra.mrb[162].mxu1 %vm5490_vm5, %v6048_v17  ;;  %v19941_v17 = vld [vmem:[%s25483_s9 + $0x18] sm:$0x1f]  }
 0x926   :  { %18292 = vmatprep.mubr.msk.f32.mxu1 %vm5490_vm5, %v6049_v0 }
 0x929   :  { %18293 = vmatmul.mubr.msk.f32.gmra.mrb[164].mxu1 %vm5490_vm5, %v6050_v47 }
 0x92a   :  { %18295 = vmatprep.mubr.msk.f32.mxu1 %vm5490_vm5, %v6051_v41 }
 0x92d   :  { %18296 = vmatmul.mubr.msk.f32.gmra.mrb[166].mxu1 %vm5490_vm5, %v6052_v53  ;;  %v7182_v53 = vand.u32 %v19941_v17, %v22830_v51 }
 0x92e   :  { %18298 = vmatprep.mubr.msk.f32.mxu1 %vm5490_vm5, %v6053_v58 }
 0x931   :  { %18299 = vmatmul.mubr.msk.f32.gmra.mrb[168].mxu1 %vm5490_vm5, %v6054_v8 }
 0x932   :  { %18301 = vmatprep.mubr.msk.f32.mxu1 %vm5490_vm5, %v6055_v21 }
 0x935   :  { %18302 = vmatmul.mubr.msk.f32.gmra.mrb[170].mxu1 %vm5490_vm5, %v6056_v6 }
 0x936   :  { %18304 = vmatprep.mubr.msk.f32.mxu1 %vm5490_vm5, %v6057_v7 }
 0x939   :  { %18305 = vmatmul.mubr.msk.f32.gmra.mrb[172].mxu1 %vm5490_vm5, %v6058_v57  ;;  %v19942_v57 = vld [vmem:[%s25483_s9 + $0x20] sm:$0x1f]  }
 0x93a   :  { %18307 = vmatprep.mubr.msk.f32.mxu1 %vm5490_vm5, %v6059_v40 }
 0x93d   :  { %18308 = vmatmul.mubr.msk.f32.gmra.mrb[174].mxu1 %vm5490_vm5, %v6060_v37 }
 0x93e   :  { %18310 = vmatprep.mubr.msk.f32.mxu1 %vm5490_vm5, %v6061_v48 }
 0x941   :  { %18311 = vmatmul.mubr.msk.f32.gmra.mrb[176].mxu1 %vm5490_vm5, %v6062_v44  ;;  %v7254_v44 = vand.u32 %v19942_v57, %v22830_v51 }
 0x942   :  { %18313 = vmatprep.mubr.msk.f32.mxu1 %vm5490_vm5, %v6063_v1 }
 0x945   :  { %18314 = vmatmul.mubr.msk.f32.gmra.mrb[178].mxu1 %vm5490_vm5, %v6064_v56 }
 0x946   :  { %18316 = vmatprep.mubr.msk.f32.mxu1 %vm5490_vm5, %v6065_v30 }
 0x949   :  { %18317 = vmatmul.mubr.msk.f32.gmra.mrb[180].mxu1 %vm5490_vm5, %v6066_v28 }
 0x94a   :  { %18319 = vmatprep.mubr.msk.f32.mxu1 %vm5490_vm5, %v6067_v34 }
 0x94d   :  { %18320 = vmatmul.mubr.msk.f32.gmra.mrb[182].mxu1 %vm5490_vm5, %v6068_v26 }
 0x94e   :  { %18322 = vmatprep.mubr.msk.f32.mxu1 %vm5490_vm5, %v6069_v55  ;;  %v19943_v55 = vld [vmem:[%s25483_s9 + $0x28] sm:$0x1f]  }
 0x951   :  { %18323 = vmatmul.mubr.msk.f32.gmra.mrb[184].mxu1 %vm5490_vm5, %v6070_v32 }
 0x952   :  { %18325 = vmatprep.mubr.msk.f32.mxu1 %vm5490_vm5, %v6071_v5 }
 0x955   :  { %18326 = vmatmul.mubr.msk.f32.gmra.mrb[186].mxu1 %vm5490_vm5, %v6072_v24  ;;  %v7326_v24 = vand.u32 %v19943_v55, %v22830_v51 }
 0x956   :  { %18328 = vmatprep.mubr.msk.f32.mxu1 %vm5490_vm5, %v6073_v27 }
 0x959   :  { %18329 = vmatmul.mubr.msk.f32.gmra.mrb[188].mxu1 %vm5490_vm5, %v6074_v4 }
 0x95a   :  { %18331 = vmatprep.mubr.msk.f32.mxu1 %vm5490_vm5, %v6075_v18 }
 0x95d   :  { %18332 = vmatmul.mubr.msk.f32.gmra.mrb[190].mxu1 %vm5490_vm5, %v6076_v11 }
 0x95e   :  { %18334 = vmatprep.mubr.msk.f32.mxu1 %vm5490_vm5, %v6077_v22 }
 0x961   :  { %18335 = vmatmul.mubr.msk.f32.gmra.mrb[192].mxu1 %vm5490_vm5, %v6078_v54 }
 0x962   :  { %18337 = vmatprep.mubr.msk.f32.mxu1 %vm5490_vm5, %v6079_v16  ;;  %v19944_v16 = vld [vmem:[%s25483_s9 + $0x30] sm:$0x1f]  }
 0x965   :  { %18338 = vmatmul.mubr.msk.f32.gmra.mrb[194].mxu1 %vm5490_vm5, %v6080_v35 }
 0x966   :  { %18340 = vmatprep.mubr.msk.f32.mxu1 %vm5490_vm5, %v6081_v10 }
 0x969   :  { %18341 = vmatmul.mubr.msk.f32.gmra.mrb[196].mxu1 %vm5490_vm5, %v6082_v20 }
 0x96a   :  { %18343 = vmatprep.mubr.msk.f32.mxu1 %vm5490_vm5, %v6083_v38  ;;  %v7398_v38 = vand.u32 %v19944_v16, %v22830_v51 }
 0x96d   :  { %18344 = vmatmul.mubr.msk.f32.gmra.mrb[198].mxu1 %vm5490_vm5, %v6084_v31 }
 0x96e   :  { %18346 = vmatprep.mubr.msk.f32.mxu1 %vm5490_vm5, %v6085_v39 }
 0x971   :  { %18347 = vmatmul.mubr.msk.f32.gmra.mrb[200].mxu1 %vm5490_vm5, %v6086_v61 }
 0x972   :  { %18349 = vmatprep.mubr.msk.f32.mxu1 %vm5490_vm5, %v6087_v50 }
 0x975   :  { %18350 = vmatmul.mubr.msk.f32.gmra.mrb[202].mxu1 %vm5490_vm5, %v6088_v43 }
 0x976   :  { %18510 = vmatprep.mubr.msk.f32.mxu1 %vm234_vm2, %v23048_v15 }
 0x984   :  { %v18204_v63 = vpop.f32.mrb[104].mxu1 }
 0x985   :  { %v6455_v23 = vpop.f32.mrb[105].mxu1 }
 0x986   :  { %v6954_v29 = vpack.c.bf16 %v18204_v63, %v6455_v23  ;;  %v19945_v23 = vld [vmem:[%s25483_s9 + $0x38] sm:$0x1f]  }
 0x988   :  { %v18207_v9 = vpop.f32.mrb[106].mxu1 }
 0x989   :  { %v6465_v59 = vpop.f32.mrb[107].mxu1 }
 0x98a   :  { %v6955_v25 = vpack.c.bf16 %v18207_v9, %v6465_v59 }
 0x98c   :  { %v18210_v45 = vpop.f32.mrb[108].mxu1 }
 0x98d   :  { %v6475_v13 = vpop.f32.mrb[109].mxu1 }
 0x98e   :  { %v6958_v49 = vpack.c.bf16 %v18210_v45, %v6475_v13 }
 0x990   :  { %v18213_v3 = vpop.f32.mrb[110].mxu1  ;;  %18354 = vmatprep.mubr.msk.bf16.mxu0 %vm5433_vm4, %v6958_v49 }
 0x991   :  { %v6485_v62 = vpop.f32.mrb[111].mxu1 }
 0x992   :  { %v6959_v42 = vpack.c.bf16 %v18213_v3, %v6485_v62 }
 0x994   :  { %18355 = vmatmul.mubr.msk.bf16.vlgmr.msra.gmra.mrb[136].mxu0 %vm5433_vm4, %v6959_v42  ;;  %v18216_v46 = vpop.f32.mrb[112].mxu1  ;;  %v19946_v42 = vld [vmem:[%s25483_s9 + $0x40] sm:$0x1f]  }
 0x995   :  { %18360 = vmatprep.mubr.msk.bf16.mxu0 %vm5433_vm4, %v6954_v29  ;;  %18359 = vmatpush3.bf16.msra.mxu0 %v22860_v2  ;;  %v6495_v19 = vpop.f32.mrb[113].mxu1 }
 0x996   :  { %v7093_v52 = vpack.c.bf16 %v18216_v46, %v6495_v19  ;;  %18364 = vmatprep.subr.bf16.mxu0 %v7110_v36 }
 0x998   :  { %v18219_v14 = vpop.f32.mrb[114].mxu1 }
 0x999   :  { %v6505_v33 = vpop.f32.mrb[115].mxu1 }
 0x99a   :  { %v7094_v12 = vpack.c.bf16 %v18219_v14, %v6505_v33 }
 0x99c   :  { %v18222_v0 = vpop.f32.mrb[116].mxu1 }
 0x99d   :  { %v6515_v47 = vpop.f32.mrb[117].mxu1 }
 0x99e   :  { %v7165_v41 = vpack.c.bf16 %v18222_v0, %v6515_v47 }
 0x9a0   :  { %18361 = vmatmul.mubr.msk.bf16.vlgmr.msra.gmra.mrb[136].mxu0 %vm5433_vm4, %v6955_v25  ;;  %v18225_v58 = vpop.f32.mrb[118].mxu1  ;;  %v7470_v25 = vand.u32 %v19945_v23, %v22830_v51 }
 0x9a1   :  { %18366 = vmatprep.mubr.msk.bf16.mxu0 %vm5433_vm4, %v7093_v52  ;;  %18365 = vmatpush3.bf16.msra.mxu0 %v7110_v36  ;;  %v6525_v2 = vpop.f32.mrb[119].mxu1  ;;  %v7542_v52 = vand.u32 %v19946_v42, %v22830_v51 }
 0x9a2   :  { %v7166_v8 = vpack.c.bf16 %v18225_v58, %v6525_v2  ;;  %18370 = vmatprep.subr.bf16.mxu0 %v7182_v53 }
 0x9a4   :  { %v18228_v21 = vpop.f32.mrb[120].mxu1 }
 0x9a5   :  { %v6535_v6 = vpop.f32.mrb[121].mxu1 }
 0x9a6   :  { %v7237_v7 = vpack.c.bf16 %v18228_v21, %v6535_v6 }
 0x9a8   :  { %v18231_v40 = vpop.f32.mrb[122].mxu1 }
 0x9a9   :  { %v6545_v37 = vpop.f32.mrb[123].mxu1 }
 0x9aa   :  { %v7238_v48 = vpack.c.bf16 %v18231_v40, %v6545_v37 }
 0x9ac   :  { %18367 = vmatmul.mubr.msk.bf16.vlgmr.msra.gmra.mrb[136].mxu0 %vm5433_vm4, %v7094_v12  ;;  %v18234_v1 = vpop.f32.mrb[124].mxu1 }
 0x9ad   :  { %18372 = vmatprep.mubr.msk.bf16.mxu0 %vm5433_vm4, %v7165_v41  ;;  %18371 = vmatpush3.bf16.msra.mxu0 %v7182_v53  ;;  %v6555_v56 = vpop.f32.mrb[125].mxu1  ;;  %v19947_v41 = vld [vmem:[%s25483_s9 + $0x48] sm:$0x1f]  }
 0x9ae   :  { %18376 = vmatprep.subr.bf16.mxu0 %v7254_v44  ;;  %v7309_v30 = vpack.c.bf16 %v18234_v1, %v6555_v56 }
 0x9b0   :  { %v18237_v28 = vpop.f32.mrb[126].mxu1 }
 0x9b1   :  { %v6565_v34 = vpop.f32.mrb[127].mxu1 }
 0x9b2   :  { %v7310_v26 = vpack.c.bf16 %v18237_v28, %v6565_v34 }
 0x9b4   :  { %v18240_v32 = vpop.f32.mrb[128].mxu1 }
 0x9b5   :  { %v6575_v5 = vpop.f32.mrb[129].mxu1 }
 0x9b6   :  { %v7381_v27 = vpack.c.bf16 %v18240_v32, %v6575_v5 }
 0x9b8   :  { %18373 = vmatmul.mubr.msk.bf16.vlgmr.msra.gmra.mrb[136].mxu0 %vm5433_vm4, %v7166_v8  ;;  %v18243_v4 = vpop.f32.mrb[130].mxu1  ;;  %v7614_v8 = vand.u32 %v19947_v41, %v22830_v51 }
 0x9b9   :  { %18378 = vmatprep.mubr.msk.bf16.mxu0 %vm5433_vm4, %v7237_v7  ;;  %18377 = vmatpush3.bf16.msra.mxu0 %v7254_v44  ;;  %v6585_v18 = vpop.f32.mrb[131].mxu1 }
 0x9ba   :  { %18382 = vmatprep.subr.bf16.mxu0 %v7326_v24  ;;  %v7382_v11 = vpack.c.bf16 %v18243_v4, %v6585_v18 }
 0x9bc   :  { %v18246_v22 = vpop.f32.mrb[132].mxu1 }
 0x9bd   :  { %v6595_v54 = vpop.f32.mrb[133].mxu1 }
 0x9be   :  { %v7453_v35 = vpack.c.bf16 %v18246_v22, %v6595_v54 }
 0x9c0   :  { %v18249_v10 = vpop.f32.mrb[134].mxu1 }
 0x9c1   :  { %v6605_v20 = vpop.f32.mrb[135].mxu1 }
 0x9c2   :  { %v7454_v31 = vpack.c.bf16 %v18249_v10, %v6605_v20 }
 0x9c4   :  { %18379 = vmatmul.mubr.msk.bf16.vlgmr.msra.gmra.mrb[136].mxu0 %vm5433_vm4, %v7238_v48  ;;  %v18252_v39 = vpop.f32.mrb[136].mxu1  ;;  %v19948_v48 = vld [vmem:[%s25483_s9 + $0x50] sm:$0x1f]  }
 0x9c5   :  { %18384 = vmatprep.mubr.msk.bf16.mxu0 %vm5433_vm4, %v7309_v30  ;;  %18383 = vmatpush3.bf16.msra.mxu0 %v7326_v24  ;;  %v6615_v61 = vpop.f32.mrb[137].mxu1  ;;  %v7686_v30 = vand.u32 %v19948_v48, %v22830_v51  ;;  %v19949_v24 = vld [vmem:[%s25483_s9 + $0x58] sm:$0x1f]  }
 0x9c6   :  { %18388 = vmatprep.subr.bf16.mxu0 %v7398_v38  ;;  %v7525_v50 = vpack.c.bf16 %v18252_v39, %v6615_v61 }
 0x9c8   :  { %v18255_v43 = vpop.f32.mrb[138].mxu1 }
 0x9c9   :  { %v6625_v63 = vpop.f32.mrb[139].mxu1 }
 0x9ca   :  { %v7526_v29 = vpack.c.bf16 %v18255_v43, %v6625_v63 }
 0x9cc   :  { %v18258_v9 = vpop.f32.mrb[140].mxu1 }
 0x9cd   :  { %v6635_v59 = vpop.f32.mrb[141].mxu1 }
 0x9ce   :  { %v7597_v45 = vpack.c.bf16 %v18258_v9, %v6635_v59 }
 0x9d0   :  { %18385 = vmatmul.mubr.msk.bf16.vlgmr.msra.gmra.mrb[136].mxu0 %vm5433_vm4, %v7310_v26  ;;  %v18261_v13 = vpop.f32.mrb[142].mxu1 }
 0x9d1   :  { %18390 = vmatprep.mubr.msk.bf16.mxu0 %vm5433_vm4, %v7381_v27  ;;  %18389 = vmatpush3.bf16.msra.mxu0 %v7398_v38  ;;  %v6645_v49 = vpop.f32.mrb[143].mxu1  ;;  %v19950_v38 = vld [vmem:[%s25483_s9 + $0x60] sm:$0x1f]  }
 0x9d2   :  { %18394 = vmatprep.subr.bf16.mxu0 %v7470_v25  ;;  %v7598_v60 = vpack.c.bf16 %v18261_v13, %v6645_v49 }
 0x9d4   :  { %v18264_v3 = vpop.f32.mrb[144].mxu1 }
 0x9d5   :  { %v6655_v62 = vpop.f32.mrb[145].mxu1 }
 0x9d6   :  { %v7669_v36 = vpack.c.bf16 %v18264_v3, %v6655_v62 }
 0x9d8   :  { %v23093_v46 = vpop.f32.mrb[146].mxu1 }
 0x9d9   :  { %v23095_v19 = vpop.f32.mrb[147].mxu1 }
 0x9da   :  { %v7670_v14 = vpack.c.bf16 %v23093_v46, %v23095_v19 }
 0x9dc   :  { %18391 = vmatmul.mubr.msk.bf16.vlgmr.msra.gmra.mrb[136].mxu0 %vm5433_vm4, %v7382_v11  ;;  %v18270_v33 = vpop.f32.mrb[148].mxu1  ;;  %v7758_v11 = vand.u32 %v19949_v24, %v22830_v51 }
 0x9dd   :  { %18396 = vmatprep.mubr.msk.bf16.mxu0 %vm5433_vm4, %v7453_v35  ;;  %18395 = vmatpush3.bf16.msra.mxu0 %v7470_v25  ;;  %v6675_v12 = vpop.f32.mrb[149].mxu1  ;;  %v19951_v25 = vld [vmem:[%s25483_s9 + $0x68] sm:$0x1f]  }
 0x9de   :  { %18400 = vmatprep.subr.bf16.mxu0 %v7542_v52  ;;  %v7741_v17 = vpack.c.bf16 %v18270_v33, %v6675_v12 }
 0x9e0   :  { %v23102_v0 = vpop.f32.mrb[150].mxu1 }
 0x9e1   :  { %v23104_v47 = vpop.f32.mrb[151].mxu1 }
 0x9e2   :  { %v7742_v53 = vpack.c.bf16 %v23102_v0, %v23104_v47 }
 0x9e4   :  { %v23111_v58 = vpop.f32.mrb[152].mxu1 }
 0x9e5   :  { %v23113_v2 = vpop.f32.mrb[153].mxu1 }
 0x9e6   :  { %v7813_v21 = vpack.c.bf16 %v23111_v58, %v23113_v2 }
 0x9e8   :  { %18397 = vmatmul.mubr.msk.bf16.vlgmr.msra.gmra.mrb[136].mxu0 %vm5433_vm4, %v7454_v31  ;;  %v23119_v6 = vpop.f32.mrb[154].mxu1 }
 0x9e9   :  { %18402 = vmatprep.mubr.msk.bf16.mxu0 %vm5433_vm4, %v7525_v50  ;;  %18401 = vmatpush3.bf16.msra.mxu0 %v7542_v52  ;;  %v23122_v7 = vpop.f32.mrb[155].mxu1  ;;  %v7830_v50 = vand.u32 %v19950_v38, %v22830_v51  ;;  %v19952_v52 = vld [vmem:[%s25483_s9 + $0x70] sm:$0x1f]  }
 0x9ea   :  { %18406 = vmatprep.subr.bf16.mxu0 %v7614_v8  ;;  %v7814_v57 = vpack.c.bf16 %v23119_v6, %v23122_v7 }
 0x9ec   :  { %v23126_v40 = vpop.f32.mrb[156].mxu1 }
 0x9ed   :  { %v23128_v37 = vpop.f32.mrb[157].mxu1 }
 0x9ee   :  { %v7885_v44 = vpack.c.bf16 %v23126_v40, %v23128_v37 }
 0x9f0   :  { %v23135_v1 = vpop.f32.mrb[158].mxu1 }
 0x9f1   :  { %v23137_v56 = vpop.f32.mrb[159].mxu1 }
 0x9f2   :  { %v7886_v28 = vpack.c.bf16 %v23135_v1, %v23137_v56  ;;  %v19954_v1 = vld [vmem:[%s25483_s9 + $0x80] sm:$0x1f]  }
 0x9f4   :  { %18403 = vmatmul.mubr.msk.bf16.vlgmr.msra.gmra.mrb[136].mxu0 %vm5433_vm4, %v7526_v29  ;;  %v23143_v34 = vpop.f32.mrb[160].mxu1 }
 0x9f5   :  { %18408 = vmatprep.mubr.msk.bf16.mxu0 %vm5433_vm4, %v7597_v45  ;;  %18407 = vmatpush3.bf16.msra.mxu0 %v7614_v8  ;;  %v23146_v26 = vpop.f32.mrb[161].mxu1  ;;  %v19953_v8 = vld [vmem:[%s25483_s9 + $0x78] sm:$0x1f]  }
 0x9f6   :  { %18412 = vmatprep.subr.bf16.mxu0 %v7686_v30  ;;  %v7957_v55 = vpack.c.bf16 %v23143_v34, %v23146_v26  ;;  %v8118_v26 = vand.u32 %v19954_v1, %v22830_v51 }
 0x9f8   :  { %v23150_v32 = vpop.f32.mrb[162].mxu1 }
 0x9f9   :  { %v23152_v5 = vpop.f32.mrb[163].mxu1 }
 0x9fa   :  { %v7958_v27 = vpack.c.bf16 %v23150_v32, %v23152_v5 }
 0x9fc   :  { %v23159_v4 = vpop.f32.mrb[164].mxu1 }
 0x9fd   :  { %v23161_v18 = vpop.f32.mrb[165].mxu1 }
 0x9fe   :  { %v8029_v22 = vpack.c.bf16 %v23159_v4, %v23161_v18 }
 0xa00   :  { %18409 = vmatmul.mubr.msk.bf16.vlgmr.msra.gmra.mrb[136].mxu0 %vm5433_vm4, %v7598_v60  ;;  %v23167_v54 = vpop.f32.mrb[166].mxu1  ;;  %v7902_v60 = vand.u32 %v19951_v25, %v22830_v51 }
 0xa01   :  { %18414 = vmatprep.mubr.msk.bf16.mxu0 %vm5433_vm4, %v7669_v36  ;;  %18413 = vmatpush3.bf16.msra.mxu0 %v7686_v30  ;;  %v23170_v16 = vpop.f32.mrb[167].mxu1 }
 0xa02   :  { %18418 = vmatprep.subr.bf16.mxu0 %v7758_v11  ;;  %v8030_v35 = vpack.c.bf16 %v23167_v54, %v23170_v16  ;;  %v19957_v54 = vld [vmem:[%s25483_s9 + $0x98] sm:$0x1f]  }
 0xa03   :  { %v8334_v16 = vand.u32 %v19957_v54, %v22830_v51 }
 0xa04   :  { %v23174_v10 = vpop.f32.mrb[168].mxu1 }
 0xa05   :  { %v23176_v20 = vpop.f32.mrb[169].mxu1 }
 0xa06   :  { %v8101_v31 = vpack.c.bf16 %v23174_v10, %v23176_v20  ;;  %v19959_v20 = vld [vmem:[%s25483_s9 + $0xa8] sm:$0x1f]  }
 0xa08   :  { %v23183_v39 = vpop.f32.mrb[170].mxu1 }
 0xa09   :  { %v23185_v61 = vpop.f32.mrb[171].mxu1 }
 0xa0a   :  { %v8102_v43 = vpack.c.bf16 %v23183_v39, %v23185_v61  ;;  %v19960_v39 = vld [vmem:[%s25483_s9 + $0xb0] sm:$0x1f]  }
 0xa0b   :  { %v8550_v61 = vand.u32 %v19960_v39, %v22830_v51 }
 0xa0c   :  { %18415 = vmatmul.mubr.msk.bf16.vlgmr.msra.gmra.mrb[136].mxu0 %vm5433_vm4, %v7670_v14  ;;  %v23191_v63 = vpop.f32.mrb[172].mxu1 }
 0xa0d   :  { %18420 = vmatprep.mubr.msk.bf16.mxu0 %vm5433_vm4, %v7741_v17  ;;  %18419 = vmatpush3.bf16.msra.mxu0 %v7758_v11  ;;  %v23194_v23 = vpop.f32.mrb[173].mxu1  ;;  %v7974_v17 = vand.u32 %v19952_v52, %v22830_v51  ;;  %v19955_v52 = vld [vmem:[%s25483_s9 + $0x88] sm:$0x1f]  }
 0xa0e   :  { %18424 = vmatprep.subr.bf16.mxu0 %v7830_v50  ;;  %v8173_v29 = vpack.c.bf16 %v23191_v63, %v23194_v23  ;;  %v19962_v23 = vld [vmem:[%s25483_s9 + $0xc0] sm:$0x1f]  }
 0xa10   :  { %v23198_v9 = vpop.f32.mrb[174].mxu1 }
 0xa11   :  { %v23200_v59 = vpop.f32.mrb[175].mxu1 }
 0xa12   :  { %v8174_v45 = vpack.c.bf16 %v23198_v9, %v23200_v59  ;;  %v25593_v9 = vmov 0.0|0.0  }
 0xa14   :  { %v23207_v13 = vpop.f32.mrb[176].mxu1 }
 0xa15   :  { %v23209_v49 = vpop.f32.mrb[177].mxu1 }
 0xa16   :  { %v8245_v3 = vpack.c.bf16 %v23207_v13, %v23209_v49 }
 0xa18   :  { %18421 = vmatmul.mubr.msk.bf16.vlgmr.msra.gmra.mrb[136].mxu0 %vm5433_vm4, %v7742_v53  ;;  %v23218_v62 = vpop.f32.mrb[178].mxu1 }
 0xa19   :  { %18426 = vmatprep.mubr.msk.bf16.mxu0 %vm5433_vm4, %v7813_v21  ;;  %18425 = vmatpush3.bf16.msra.mxu0 %v7830_v50  ;;  %v23224_v42 = vpop.f32.mrb[179].mxu1 }
 0xa1a   :  { %18430 = vmatprep.subr.bf16.mxu0 %v7902_v60  ;;  %v8246_v36 = vpack.c.bf16 %v23218_v62, %v23224_v42 }
 0xa1c   :  { %v23228_v46 = vpop.f32.mrb[180].mxu1 }
 0xa1d   :  { %v23230_v19 = vpop.f32.mrb[181].mxu1 }
 0xa1e   :  { %v8317_v14 = vpack.c.bf16 %v23228_v46, %v23230_v19 }
 0xa20   :  { %v23237_v33 = vpop.f32.mrb[182].mxu1 }
 0xa21   :  { %v23239_v12 = vpop.f32.mrb[183].mxu1 }
 0xa22   :  { %v8318_v0 = vpack.c.bf16 %v23237_v33, %v23239_v12 }
 0xa24   :  { %18427 = vmatmul.mubr.msk.bf16.vlgmr.msra.gmra.mrb[136].mxu0 %vm5433_vm4, %v7814_v57  ;;  %v23248_v47 = vpop.f32.mrb[184].mxu1  ;;  %v8046_v57 = vand.u32 %v19953_v8, %v22830_v51 }
 0xa25   :  { %18432 = vmatprep.mubr.msk.bf16.mxu0 %vm5433_vm4, %v7885_v44  ;;  %18431 = vmatpush3.bf16.msra.mxu0 %v7902_v60  ;;  %v23254_v41 = vpop.f32.mrb[185].mxu1 }
 0xa26   :  { %18436 = vmatprep.subr.bf16.mxu0 %v7974_v17  ;;  %v8389_v53 = vpack.c.bf16 %v23248_v47, %v23254_v41  ;;  %v9019_v41 = vld [vmem:[%s25484_s10] sm:$0xff] }
 0xa28   :  { %v23258_v58 = vpop.f32.mrb[186].mxu1 }
 0xa29   :  { %v23260_v2 = vpop.f32.mrb[187].mxu1 }
 0xa2a   :  { %v8390_v21 = vpack.c.bf16 %v23258_v58, %v23260_v2  ;;  %v9020_v58 = vld [vmem:[%s25484_s10 + $0x8] sm:$0xff]  ;;  %v9021_v2 = vld [vmem:[%s25484_s10 + $0x10] sm:$0xff] }
 0xa2c   :  { %v23267_v6 = vpop.f32.mrb[188].mxu1 }
 0xa2d   :  { %v23269_v7 = vpop.f32.mrb[189].mxu1 }
 0xa2e   :  { %v8461_v40 = vpack.c.bf16 %v23267_v6, %v23269_v7  ;;  %v9022_v6 = vld [vmem:[%s25484_s10 + $0x18] sm:$0xff] }
 0xa30   :  { %18433 = vmatmul.mubr.msk.bf16.vlgmr.msra.gmra.mrb[136].mxu0 %vm5433_vm4, %v7886_v28  ;;  %v23278_v37 = vpop.f32.mrb[190].mxu1 }
 0xa31   :  { %18438 = vmatprep.mubr.msk.bf16.mxu0 %vm5433_vm4, %v7957_v55  ;;  %18437 = vmatpush3.bf16.msra.mxu0 %v7974_v17  ;;  %v23284_v48 = vpop.f32.mrb[191].mxu1 }
 0xa32   :  { %18442 = vmatprep.subr.bf16.mxu0 %v8046_v57  ;;  %v8462_v44 = vpack.c.bf16 %v23278_v37, %v23284_v48 }
 0xa34   :  { %v23288_v30 = vpop.f32.mrb[192].mxu1 }
 0xa35   :  { %v23290_v24 = vpop.f32.mrb[193].mxu1 }
 0xa36   :  { %v8533_v56 = vpack.c.bf16 %v23288_v30, %v23290_v24 }
 0xa38   :  { %v23297_v28 = vpop.f32.mrb[194].mxu1 }
 0xa39   :  { %v23299_v34 = vpop.f32.mrb[195].mxu1 }
 0xa3a   :  { %v8534_v55 = vpack.c.bf16 %v23297_v28, %v23299_v34  ;;  %v20398_v34 = vld [vmem:[%s25490_s16 + $0x8] sm:$0xff] }
 0xa3c   :  { %18439 = vmatmul.mubr.msk.bf16.vlgmr.msra.gmra.mrb[136].mxu0 %vm5433_vm4, %v7958_v27  ;;  %v18342_v11 = vpop.f32.mrb[196].mxu1  ;;  %v8190_v27 = vand.u32 %v19955_v52, %v22830_v51 }
 0xa3d   :  { %18444 = vmatprep.mubr.msk.bf16.mxu0 %vm5433_vm4, %v8029_v22  ;;  %18443 = vmatpush3.bf16.msra.mxu0 %v8046_v57  ;;  %v6915_v38 = vpop.f32.mrb[197].mxu1  ;;  %v19956_v57 = vld [vmem:[%s25483_s9 + $0x90] sm:$0x1f]  }
 0xa3e   :  { %18448 = vmatprep.subr.bf16.mxu0 %v8118_v26  ;;  %v8605_v50 = vpack.c.bf16 %v18342_v11, %v6915_v38  ;;  %v8262_v30 = vand.u32 %v19956_v57, %v22830_v51  ;;  %v20399_v11 = vld [vmem:[%s25490_s16 + $0x10] sm:$0xff] }
 0xa40   :  { %v18345_v25 = vpop.f32.mrb[198].mxu1 }
 0xa41   :  { %v6925_v60 = vpop.f32.mrb[199].mxu1 }
 0xa42   :  { %v8606_v17 = vpack.c.bf16 %v18345_v25, %v6925_v60  ;;  %v25594_v25 = vmov 0  }
 0xa44   :  { %v18348_v32 = vpop.f32.mrb[200].mxu1 }
 0xa45   :  { %v6935_v5 = vpop.f32.mrb[201].mxu1 }
 0xa46   :  { %v8677_v8 = vpack.c.bf16 %v18348_v32, %v6935_v5 }
 0xa48   :  { %18445 = vmatmul.mubr.msk.bf16.vlgmr.msra.gmra.mrb[136].mxu0 %vm5433_vm4, %v8030_v35  ;;  %v18351_v4 = vpop.f32.mrb[202].mxu1  ;;  %v19958_v35 = vld [vmem:[%s25483_s9 + $0xa0] sm:$0x1f]  }
 0xa49   :  { %18450 = vmatprep.mubr.msk.bf16.mxu0 %vm5433_vm4, %v8101_v31  ;;  %18449 = vmatpush3.bf16.msra.mxu0 %v8118_v26  ;;  %v6945_v18 = vpop.f32.mrb[203].mxu1  ;;  %v8406_v10 = vand.u32 %v19958_v35, %v22830_v51  ;;  %v8478_v31 = vand.u32 %v19959_v20, %v22830_v51 }
 0xa4a   :  { %18454 = vmatprep.subr.bf16.mxu0 %v8190_v27  ;;  %v8678_v22 = vpack.c.bf16 %v18351_v4, %v6945_v18 }
 0xa54   :  { %18451 = vmatmul.mubr.msk.bf16.vlgmr.msra.gmra.mrb[136].mxu0 %vm5433_vm4, %v8102_v43  ;;  %v19961_v43 = vld [vmem:[%s25483_s9 + $0xb8] sm:$0x1f]  }
 0xa55   :  { %18456 = vmatprep.mubr.msk.bf16.mxu0 %vm5433_vm4, %v8173_v29  ;;  %18455 = vmatpush3.bf16.msra.mxu0 %v8190_v27  ;;  %v8622_v63 = vand.u32 %v19961_v43, %v22830_v51  ;;  %v8694_v29 = vand.u32 %v19962_v23, %v22830_v51 }
 0xa56   :  { %18460 = vmatprep.subr.bf16.mxu0 %v8262_v30 }
 0xa60   :  { %18457 = vmatmul.mubr.msk.bf16.vlgmr.msra.gmra.mrb[136].mxu0 %vm5433_vm4, %v8174_v45 }
 0xa61   :  { %18462 = vmatprep.mubr.msk.bf16.mxu0 %vm5433_vm4, %v8245_v3  ;;  %18461 = vmatpush3.bf16.msra.mxu0 %v8262_v30 }
 0xa62   :  { %18466 = vmatprep.subr.bf16.mxu0 %v8334_v16 }
 0xa6c   :  { %18463 = vmatmul.mubr.msk.bf16.vlgmr.msra.gmra.mrb[136].mxu0 %vm5433_vm4, %v8246_v36 }
 0xa6d   :  { %18468 = vmatprep.mubr.msk.bf16.mxu0 %vm5433_vm4, %v8317_v14  ;;  %18467 = vmatpush3.bf16.msra.mxu0 %v8334_v16 }
 0xa6e   :  { %18472 = vmatprep.subr.bf16.mxu0 %v8406_v10 }
 0xa78   :  { %18469 = vmatmul.mubr.msk.bf16.vlgmr.msra.gmra.mrb[136].mxu0 %vm5433_vm4, %v8318_v0 }
 0xa79   :  { %18474 = vmatprep.mubr.msk.bf16.mxu0 %vm5433_vm4, %v8389_v53  ;;  %18473 = vmatpush3.bf16.msra.mxu0 %v8406_v10  ;;  %v9047_v53 = vld [vmem:[%s25485_s11] sm:$0xff] }
 0xa7a   :  { %18478 = vmatprep.subr.bf16.mxu0 %v8478_v31 }
 0xa84   :  { %18475 = vmatmul.mubr.msk.bf16.vlgmr.msra.gmra.mrb[136].mxu0 %vm5433_vm4, %v8390_v21  ;;  %v9048_v21 = vld [vmem:[%s25485_s11 + $0x8] sm:$0xff] }
 0xa85   :  { %18480 = vmatprep.mubr.msk.bf16.mxu0 %vm5433_vm4, %v8461_v40  ;;  %18479 = vmatpush3.bf16.msra.mxu0 %v8478_v31 }
 0xa86   :  { %18484 = vmatprep.subr.bf16.mxu0 %v8550_v61 }
 0xa90   :  { %18481 = vmatmul.mubr.msk.bf16.vlgmr.msra.gmra.mrb[136].mxu0 %vm5433_vm4, %v8462_v44 }
 0xa91   :  { %18486 = vmatprep.mubr.msk.bf16.mxu0 %vm5433_vm4, %v8533_v56  ;;  %18485 = vmatpush3.bf16.msra.mxu0 %v8550_v61 }
 0xa92   :  { %18490 = vmatprep.subr.bf16.mxu0 %v8622_v63 }
 0xa9c   :  { %18487 = vmatmul.mubr.msk.bf16.vlgmr.msra.gmra.mrb[136].mxu0 %vm5433_vm4, %v8534_v55 }
 0xa9d   :  { %18492 = vmatprep.mubr.msk.bf16.mxu0 %vm5433_vm4, %v8605_v50  ;;  %18491 = vmatpush3.bf16.msra.mxu0 %v8622_v63  ;;  %v20400_v50 = vld [vmem:[%s25490_s16 + $0x18] sm:$0xff] }
 0xa9e   :  { %18496 = vmatprep.subr.bf16.mxu0 %v8694_v29 }
 0xaa8   :  { %18493 = vmatmul.mubr.msk.bf16.vlgmr.msra.gmra.mrb[136].mxu0 %vm5433_vm4, %v8606_v17 }
 0xaa9   :  { %18498 = vmatprep.mubr.msk.bf16.mxu0 %vm5433_vm4, %v8677_v8  ;;  %18497 = vmatpush3.bf16.msra.mxu0 %v8694_v29 }
 0xaaa   :  { %19150 = vmatprep.subr.bf16.mxu0 %v25593_v9 }
 0xab4   :  { %18499 = vmatmul.mubr.msk.bf16.vlgmr.msra.gmra.mrb[136].mxu0 %vm5433_vm4, %v8678_v22 }
 0xb87   :  { %v23403_v59 = vpop.f32.mrb[136].mxu0 }
 0xb88   :  { %v23405_v45 = vpop.f32.mrb[137].mxu0  ;;  %v8755_v36 = vsel %vm5490_vm5, %v23403_v59, 0.0  ;;  %v8763_v12 = vmul.f32 %v23403_v59, %v23403_v59 }
 0xb89   :  { %v23407_v51 = vpop.f32.mrb[138].mxu0  ;;  %v8749_v13 = vsel %vm5490_vm5, %v23405_v45, 0.0  ;;  %v8761_v46 = vmul.f32 %v23405_v45, %v23405_v45 }
 0xb8a   :  { %8750 = vadd.xlane.f32.xlu1 %v8749_v13  ;;  %v23411_v49 = vpop.f32.mrb[139].mxu0  ;;  %v8758_v62 = vsel %vm5490_vm5, %v23407_v51, 0.0  ;;  %v8764_v14 = vmul.f32 %v23407_v51, %v23407_v51  ;;  %v8771_v47 = vsel %vm5490_vm5, %v8763_v12, 0.0  ;;  %v25595_v12 = vmov 0.0  }
 0xb8b   :  { %v8752_v3 = vsel %vm5490_vm5, %v23411_v49, 0.0  ;;  %v8762_v42 = vmul.f32 %v23411_v49, %v23411_v49  ;;  %v8765_v33 = vsel %vm5490_vm5, %v8761_v46, 0.0  ;;  %18538 = vmatprep.mubr.msk.f32.mxu0 %vm20429_vm8, %v25595_v12 }
 0xb8c   :  { %8753 = vadd.xlane.f32.xlu0 %v8752_v3  ;;  %v8774_v0 = vsel %vm5490_vm5, %v8764_v14, 0.0  ;;  %v9050_v14 = vld [vmem:[%s25485_s11 + $0x18] sm:$0xff] }
 0xb8d   :  { %v8768_v19 = vsel %vm5490_vm5, %v8762_v42, 0.0 }
 0xb8e   :  { %8759 = vadd.xlane.f32.xlu1 %v8758_v62 }
 0xb90   :  { %8756 = vadd.xlane.f32.xlu0 %v8755_v36 }
 0xb92   :  { %8769 = vadd.xlane.f32.xlu1 %v8768_v19 }
 0xb94   :  { %8766 = vadd.xlane.f32.xlu0 %v8765_v33  ;;  %v9049_v33 = vld [vmem:[%s25485_s11 + $0x10] sm:$0xff] }
 0xb96   :  { %8775 = vadd.xlane.f32.xlu1 %v8774_v0  ;;  %v19963_v0 = vld [vmem:[%s25487_s13 + $0x60] ss:$12 sps:$4 sm:$0xff]  }
 0xb98   :  { %8772 = vadd.xlane.f32.xlu0 %v8771_v47  ;;  %v19965_v47 = vld [vmem:[%s25487_s13 + $0x64] ss:$12 sps:$4 sm:$0xff]  }
 0xba7   :  { %9025 = vperm.xlu1 %19836, %v9019_v41   ;;  %v19968_v41 = vld [vmem:[%s25487_s13 + $0x7c] ss:$12 sps:$4 sm:$0xff]  }
 0xbab   :  { %9053 = vperm.xlu1 %19836, %v9047_v53   ;;  %v19966_v53 = vld [vmem:[%s25487_s13 + $0x78] ss:$12 sps:$4 sm:$0xff]  }
 0xbae   :  { %9030 = vperm.xlu0 %19837, %v9020_v58   ;;  %v19971_v58 = vld [vmem:[%s25487_s13 + $0x94] ss:$12 sps:$4 sm:$0xff]  }
 0xbaf   :  { %9035 = vperm.xlu1 %19836, %v9021_v2   ;;  %v19969_v2 = vld [vmem:[%s25487_s13 + $0x90] ss:$12 sps:$4 sm:$0xff]  }
 0xbb2   :  { %9058 = vperm.xlu0 %19837, %v9048_v21  }
 0xbb6   :  { %9040 = vperm.xlu0 %19837, %v9022_v6  }
 0xc17   :  { %v8751_v7 = vpop.xlane.xlu1 %8750 }
 0xc19   :  { %v8754_v40 = vpop.xlane.xlu0 %8753 }
 0xc1a   :  { %v19134_v37 = vpack.c.bf16 %v8754_v40, %v8751_v7 }
 0xc1b   :  { %v8760_v48 = vpop.xlane.xlu1 %8759 }
 0xc1c   :  { %19135 = vmatprep.subr.bf16.mxu1 %v19134_v37 }
 0xc1d   :  { %19137 = vmatpush3.bf16.msra.mxu1 %v19134_v37  ;;  %v8757_v44 = vpop.xlane.xlu0 %8756 }
 0xc1e   :  { %v19138_v24 = vpack.c.bf16 %v8760_v48, %v8757_v44 }
 0xc1f   :  { %v8770_v1 = vpop.xlane.xlu1 %8769 }
 0xc20   :  { %19139 = vmatprep.subr.bf16.mxu1 %v19138_v24 }
 0xc21   :  { %19141 = vmatpush3.bf16.msra.mxu1 %v19138_v24  ;;  %v8767_v56 = vpop.xlane.xlu0 %8766 }
 0xc22   :  { %v19142_v28 = vpack.c.bf16 %v8770_v1, %v8767_v56 }
 0xc23   :  { %v8776_v26 = vpop.xlane.xlu1 %8775 }
 0xc24   :  { %18511 = vmatmul.mubr.msk.f32.vlgmr.msra.gmra.mrb[204].mxu1 %vm234_vm2, %v20398_v34  ;;  %19143 = vmatprep.subr.bf16.mxu1 %v19142_v28 }
 0xc25   :  { %19145 = vmatpush3.bf16.msra.mxu1 %v19142_v28  ;;  %v8773_v55 = vpop.xlane.xlu0 %8772  ;;  %18513 = vmatprep.mubr.msk.f32.mxu1 %vm234_vm2, %v20399_v11 }
 0xc26   :  { %v19146_v38 = vpack.c.bf16 %v8776_v26, %v8773_v55 }
 0xc27   :  { %v9026_v6 = vpop.permute.xlu1 %9025 }
 0xc28   :  { %18514 = vmatmul.mubr.msk.f32.gmra.mrb[206].mxu1 %vm234_vm2, %v20400_v50  ;;  %19147 = vmatprep.subr.bf16.mxu1 %v19146_v38 }
 0xc29   :  { %19149 = vmatpush3.bf16.msra.mxu1 %v19146_v38  ;;  %18524 = vmatprep.mubr.msk.f32.mxu1 %vm234_vm2, %v23048_v15 }
 0xc2a   :  { %9471 = vmatprep.subr.bf16.mxu1 %v19965_v47 }
 0xc2b   :  { %v9054_v40 = vpop.permute.xlu1 %9053 }
 0xc2c   :  { %18525 = vmatmul.mubr.msk.f32.vlgmr.msra.gmra.mrb[208].mxu1 %vm234_vm2, %v20398_v34 }
 0xc2d   :  { %18527 = vmatprep.mubr.msk.f32.mxu1 %vm234_vm2, %v20399_v11  ;;  %9472 = vmatpush1.bf16.msra.mxu1 %v19963_v0  ;;  %v9031_v21 = vpop.permute.xlu0 %9030 }
 0xc2e   :  { %9473 = vmatprep.subr.bf16.mxu1 %v19968_v41  ;;  %v19976_v41 = vld [vmem:[%s25487_s13 + $0x80] ss:$12 sps:$4 sm:$0xff]  }
 0xc2f   :  { %v9036_v48 = vpop.permute.xlu1 %9035 }
 0xc30   :  { %18528 = vmatmul.mubr.msk.f32.gmra.mrb[210].mxu1 %vm234_vm2, %v20400_v50 }
 0xc31   :  { %9503 = vmatprep.mubr.bf16.mxu1 %v25594_v25  ;;  %9474 = vmatpush1.bf16.msra.mxu1 %v19966_v53  ;;  %v9059_v7 = vpop.permute.xlu0 %9058 }
 0xc32   :  { %9475 = vmatprep.subr.bf16.mxu1 %v19971_v58 }
 0xc35   :  { %9476 = vmatpush1.bf16.msra.mxu1 %v19969_v2  ;;  %v9041_v37 = vpop.permute.xlu0 %9040  ;;  %v19977_v2 = vld [vmem:[%s25487_s13 + $0x98] ss:$12 sps:$4 sm:$0xff]  }
 0xcf7   :  { %v18512_v60 = vpop.f32.mrb[204].mxu1 }
 0xcf8   :  { %v8863_v52 = vmul.f32 0.0078125, %v18512_v60  ;;  %v8843_v17 = vpop.f32.mrb[205].mxu1 }
 0xcf9   :  { %v8862_v32 = vmul.f32 0.0078125, %v8843_v17 }
 0xcfa   :  { %8970 = vperm.xlu1 %19836, %v8863_v52   ;;  %v8956_v18 = vmul.f32 %v8863_v52, %v8863_v52 }
 0xcfb   :  { %8965 = vperm.xlu0 %19837, %v8862_v32   ;;  %v18515_v5 = vpop.f32.mrb[206].mxu1  ;;  %v8955_v30 = vmul.f32 %v8862_v32, %v8862_v32 }
 0xcfc   :  { %v8865_v27 = vmul.f32 0.0078125, %v18515_v5  ;;  %v8853_v8 = vpop.f32.mrb[207].mxu1 }
 0xcfd   :  { %v8864_v4 = vmul.f32 0.0078125, %v8853_v8 }
 0xcfe   :  { %v8958_v20 = vmul.f32 %v8865_v27, %v8865_v27 }
 0xcff   :  { %8980 = vperm.xlu0 %19837, %v8865_v27   ;;  %8975 = vperm.xlu1 %19836, %v8864_v4   ;;  %v18526_v15 = vpop.f32.mrb[208].mxu1  ;;  %v8957_v43 = vmul.f32 %v8864_v4, %v8864_v4 }
 0xd00   :  { %v8952_v22 = vmul.f32 0.0078125, %v18526_v15  ;;  %v8932_v57 = vpop.f32.mrb[209].mxu1 }
 0xd01   :  { %v8951_v54 = vmul.f32 0.0078125, %v8932_v57 }
 0xd02   :  { %v8960_v16 = vsub.f32 %v8952_v22, %v8956_v18 }
 0xd03   :  { %v8959_v35 = vsub.f32 %v8951_v54, %v8955_v30  ;;  %v18529_v10 = vpop.f32.mrb[210].mxu1 }
 0xd04   :  { %v8988_v31 = vadd.f32 1e-05, %v8960_v16  ;;  %v8954_v39 = vmul.f32 0.0078125, %v18529_v10  ;;  %v8942_v61 = vpop.f32.mrb[211].mxu1 }
 0xd05   :  { %v8987_v63 = vadd.f32 1e-05, %v8959_v35  ;;  %v8953_v23 = vmul.f32 0.0078125, %v8942_v61  ;;  %v9082_v61 = vld [vmem:[%s25486_s12 + $0x18] sm:$0xff] }
 0xd06   :  { %20387 = vrsqrt.f32 %v8988_v31  ;;  %v8962_v29 = vsub.f32 %v8954_v39, %v8958_v20  ;;  %v9079_v20 = vld [vmem:[%s25486_s12] sm:$0xff]  ;;  %v9080_v31 = vld [vmem:[%s25486_s12 + $0x8] sm:$0xff]  ;;  %v9081_v39 = vld [vmem:[%s25486_s12 + $0x10] sm:$0xff] }
 0xd07   :  { %20389 = vrsqrt.f32 %v8987_v63  ;;  %v8961_v13 = vsub.f32 %v8953_v23, %v8957_v43  ;;  %v9083_v43 = vld [vmem:[%s25486_s12 + $0x20] sm:$0xff]  ;;  %v9084_v63 = vld [vmem:[%s25486_s12 + $0x28] sm:$0xff]  ;;  %v9085_v23 = vld [vmem:[%s25486_s12 + $0x30] sm:$0xff] }
 0xd08   :  { %v8990_v3 = vadd.f32 1e-05, %v8962_v29  ;;  %v19974_v29 = vld [vmem:[%s25487_s13 + $0xac] ss:$12 sps:$4 sm:$0xff]  }
 0xd09   :  { %v8989_v62 = vadd.f32 1e-05, %v8961_v13  ;;  %v19972_v13 = vld [vmem:[%s25487_s13 + $0xa8] ss:$12 sps:$4 sm:$0xff]   ;;  %9477 = vmatprep.subr.bf16.mxu1 %v19974_v29 }
 0xd0a   :  { %20391 = vrsqrt.f32 %v8990_v3  ;;  %9478 = vmatpush1.bf16.msra.mxu1 %v19972_v13  ;;  %v9086_v3 = vld [vmem:[%s25486_s12 + $0x38] sm:$0xff]  ;;  %v20020_v29 = vld [vmem:[%s25487_s13 + $0x168] ss:$12 sps:$4 sm:$0xff]  }
 0xd0b   :  { %20393 = vrsqrt.f32 %v8989_v62  ;;  %18613 = vmatprep.subr.bf16.mxu1 %v25595_v12  ;;  %v9087_v62 = vld [vmem:[%s25486_s12 + $0x40] sm:$0xff] }
 0xd10   :  { %v20388_v42 = vpop.eup %20387 }
 0xd11   :  { %v20390_v36 = vpop.eup %20389  ;;  %9002 = vperm.xlu0 %19837, %v20388_v42   ;;  %v9088_v42 = vld [vmem:[%s25486_s12 + $0x48] sm:$0xff] }
 0xd12   :  { %8997 = vperm.xlu1 %19836, %v20390_v36   ;;  %v9089_v36 = vld [vmem:[%s25486_s12 + $0x50] sm:$0xff] }
 0xd14   :  { %v20392_v46 = vpop.eup %20391 }
 0xd15   :  { %v20394_v19 = vpop.eup %20393  ;;  %9012 = vperm.xlu0 %19837, %v20392_v46  }
 0xd16   :  { %9007 = vperm.xlu1 %19836, %v20394_v19  }
 0xd19   :  { %9068 = vperm.xlu0 %19837, %v9050_v14  }
 0xd1a   :  { %9063 = vperm.xlu1 %19836, %v9049_v33   ;;  %v19975_v33 = vld [vmem:[%s25487_s13 + $0x68] ss:$12 sps:$4 sm:$0xff]  }
 0xd79   :  { %v8971_v24 = vpop.permute.xlu1 %8970 }
 0xd7a   :  { %v8966_v44 = vpop.permute.xlu0 %8965  ;;  %v8984_v28 = vsub.f32 %v23411_v49, %v8971_v24  ;;  %v19979_v24 = vld [vmem:[%s25487_s13] ss:$12 sps:$4 sm:$0xff]  }
 0xd7b   :  { %v8983_v34 = vsub.f32 %v23405_v45, %v8966_v44 }
 0xd7e   :  { %v8981_v1 = vpop.permute.xlu0 %8980  ;;  %v8976_v56 = vpop.permute.xlu1 %8975 }
 0xd7f   :  { %v8986_v50 = vsub.f32 %v23407_v51, %v8981_v1  ;;  %v8985_v52 = vsub.f32 %v23403_v59, %v8976_v56  ;;  %v19984_v1 = vld [vmem:[%s25487_s13 + $0x1c] ss:$12 sps:$4 sm:$0xff]   ;;  %v19982_v56 = vld [vmem:[%s25487_s13 + $0x18] ss:$12 sps:$4 sm:$0xff]  }
 0xd90   :  { %v9003_v26 = vpop.permute.xlu0 %9002 }
 0xd91   :  { %v9016_v55 = vmul.f32 %v9003_v26, %v8984_v28  ;;  %v8998_v11 = vpop.permute.xlu1 %8997  ;;  %v19987_v28 = vld [vmem:[%s25487_s13 + $0x34] ss:$12 sps:$4 sm:$0xff]   ;;  %v19990_v26 = vld [vmem:[%s25487_s13 + $0x4c] ss:$12 sps:$4 sm:$0xff]  }
 0xd92   :  { %v9015_v38 = vmul.f32 %v8998_v11, %v8983_v34  ;;  %v19985_v34 = vld [vmem:[%s25487_s13 + $0x30] ss:$12 sps:$4 sm:$0xff]   ;;  %v19991_v11 = vld [vmem:[%s25487_s13 + $0x8] ss:$12 sps:$4 sm:$0xff]  }
 0xd93   :  { %v9044_v60 = vmul.f32 %v9031_v21, %v9016_v55  ;;  %v19988_v55 = vld [vmem:[%s25487_s13 + $0x48] ss:$12 sps:$4 sm:$0xff]  }
 0xd94   :  { %v9043_v17 = vmul.f32 %v9026_v6, %v9015_v38  ;;  %v9013_v32 = vpop.permute.xlu0 %9012 }
 0xd95   :  { %v9072_v5 = vadd.f32 %v9059_v7, %v9044_v60  ;;  %v9018_v27 = vmul.f32 %v9013_v32, %v8986_v50  ;;  %v9008_v8 = vpop.permute.xlu1 %9007  ;;  %v19978_v7 = vld [vmem:[%s25487_s13 + $0xb0] ss:$12 sps:$4 sm:$0xff]  }
 0xd96   :  { %v9071_v4 = vadd.f32 %v9054_v40, %v9043_v17  ;;  %v9017_v15 = vmul.f32 %v9008_v8, %v8985_v52  ;;  %v19992_v52 = vld [vmem:[%s25487_s13 + $0x20] ss:$12 sps:$4 sm:$0xff]   ;;  %v19993_v17 = vld [vmem:[%s25487_s13 + $0x38] ss:$12 sps:$4 sm:$0xff]   ;;  %v19994_v32 = vld [vmem:[%s25487_s13 + $0x50] ss:$12 sps:$4 sm:$0xff]  }
 0xd97   :  { %v9076_v18 = vmax.f32 %v9072_v5, 0.0  ;;  %v9046_v49 = vmul.f32 %v9041_v37, %v9018_v27  ;;  %v9090_v37 = vld [vmem:[%s25486_s12 + $0x58] sm:$0xff]  ;;  %v9091_v5 = vld [vmem:[%s25486_s12 + $0x60] sm:$0xff] }
 0xd98   :  { %v9075_v22 = vmax.f32 %v9071_v4, 0.0  ;;  %v9069_v45 = vpop.permute.xlu0 %9068  ;;  %v9045_v57 = vmul.f32 %v9036_v48, %v9017_v15  ;;  %v19981_v48 = vld [vmem:[%s25487_s13 + $0x4] ss:$12 sps:$4 sm:$0xff]   ;;  %v19995_v8 = vld [vmem:[%s25487_s13 + $0xc0] ss:$12 sps:$4 sm:$0xff]  }
 0xd99   :  { %v9074_v30 = vadd.f32 %v9069_v45, %v9046_v49  ;;  %v9064_v54 = vpop.permute.xlu1 %9063  ;;  %v19997_v27 = vld [vmem:[%s25487_s13 + $0xc4] ss:$12 sps:$4 sm:$0xff]   ;;  %v20000_v4 = vld [vmem:[%s25487_s13 + $0xdc] ss:$12 sps:$4 sm:$0xff]  }
 0xd9a   :  { %v19151_v16 = vpack.c.bf16 %v9076_v18, %v9075_v22  ;;  %v9073_v35 = vadd.f32 %v9064_v54, %v9045_v57  ;;  %v19998_v15 = vld [vmem:[%s25487_s13 + $0xd8] ss:$12 sps:$4 sm:$0xff]   ;;  %v20003_v18 = vld [vmem:[%s25487_s13 + $0xf4] ss:$12 sps:$4 sm:$0xff]   ;;  %v20001_v49 = vld [vmem:[%s25487_s13 + $0xf0] ss:$12 sps:$4 sm:$0xff]  }
 0xd9b   :  { %v9078_v51 = vmax.f32 %v9074_v30, 0.0  ;;  %v20006_v22 = vld [vmem:[%s25487_s13 + $0x10c] ss:$12 sps:$4 sm:$0xff]   ;;  %v20004_v45 = vld [vmem:[%s25487_s13 + $0x108] ss:$12 sps:$4 sm:$0xff]  }
 0xd9c   :  { %v9077_v10 = vmax.f32 %v9073_v35, 0.0  ;;  %19152 = vmatpush3.bf16.msra.mxu0 %v19151_v16  ;;  %v20007_v30 = vld [vmem:[%s25487_s13 + $0xc8] ss:$12 sps:$4 sm:$0xff]   ;;  %v20008_v35 = vld [vmem:[%s25487_s13 + $0xe0] ss:$12 sps:$4 sm:$0xff]  }
 0xd9d   :  { %19153 = vmatprep.subr.bf16.mxu0 %v25593_v9 }
 0xd9e   :  { %v19154_v59 = vpack.c.bf16 %v9078_v51, %v9077_v10  ;;  %v20009_v51 = vld [vmem:[%s25487_s13 + $0xf8] ss:$12 sps:$4 sm:$0xff]   ;;  %v20010_v10 = vld [vmem:[%s25487_s13 + $0x110] ss:$12 sps:$4 sm:$0xff]  }
 0xda0   :  { %19155 = vmatpush3.bf16.msra.mxu0 %v19154_v59  ;;  %v9092_v59 = vld [vmem:[%s25486_s12 + $0x68] sm:$0xff] }
 0xda1   :  { %18913 = vmatprep.subr.mxu0 %v25595_v12 }
 0xda3   :  { %18539 = vmatmul.mubr.msk.f32.vlgmr.msra.gmra.mrb[140].mxu0 %vm234_vm2, %v9079_v20  ;;  %v20013_v20 = vld [vmem:[%s25487_s13 + $0x124] ss:$12 sps:$4 sm:$0xff]  }
 0xda4   :  { %18541 = vmatprep.mubr.msk.f32.mxu0 %vm20429_vm8, %v25595_v12 }
 0xda7   :  { %18542 = vmatmul.mubr.msk.f32.gmra.mrb[142].mxu0 %vm234_vm2, %v9080_v31  ;;  %v20011_v31 = vld [vmem:[%s25487_s13 + $0x120] ss:$12 sps:$4 sm:$0xff]  }
 0xda8   :  { %18544 = vmatprep.mubr.msk.f32.mxu0 %vm20429_vm8, %v25595_v12 }
 0xdab   :  { %18545 = vmatmul.mubr.msk.f32.gmra.mrb[144].mxu0 %vm234_vm2, %v9081_v39  ;;  %v20016_v39 = vld [vmem:[%s25487_s13 + $0x13c] ss:$12 sps:$4 sm:$0xff]  }
 0xdac   :  { %18547 = vmatprep.mubr.msk.f32.mxu0 %vm20429_vm8, %v25595_v12 }
 0xdaf   :  { %18548 = vmatmul.mubr.msk.f32.gmra.mrb[146].mxu0 %vm234_vm2, %v9082_v61  ;;  %v20014_v61 = vld [vmem:[%s25487_s13 + $0x138] ss:$12 sps:$4 sm:$0xff]  }
 0xdb0   :  { %18550 = vmatprep.mubr.msk.f32.mxu0 %vm20429_vm8, %v25595_v12 }
 0xdb3   :  { %18551 = vmatmul.mubr.msk.f32.gmra.mrb[148].mxu0 %vm234_vm2, %v9083_v43  ;;  %v20019_v43 = vld [vmem:[%s25487_s13 + $0x154] ss:$12 sps:$4 sm:$0xff]  }
 0xdb4   :  { %18553 = vmatprep.mubr.msk.f32.mxu0 %vm20429_vm8, %v25595_v12 }
 0xdb7   :  { %18554 = vmatmul.mubr.msk.f32.gmra.mrb[150].mxu0 %vm234_vm2, %v9084_v63  ;;  %v20017_v63 = vld [vmem:[%s25487_s13 + $0x150] ss:$12 sps:$4 sm:$0xff]  }
 0xdb8   :  { %18556 = vmatprep.mubr.msk.f32.mxu0 %vm20429_vm8, %v25595_v12 }
 0xdbb   :  { %18557 = vmatmul.mubr.msk.f32.gmra.mrb[152].mxu0 %vm234_vm2, %v9085_v23  ;;  %v20022_v23 = vld [vmem:[%s25487_s13 + $0x16c] ss:$12 sps:$4 sm:$0xff]  }
 0xdbc   :  { %18559 = vmatprep.mubr.msk.f32.mxu0 %vm20429_vm8, %v25595_v12 }
 0xdbf   :  { %18560 = vmatmul.mubr.msk.f32.gmra.mrb[154].mxu0 %vm234_vm2, %v9086_v3  ;;  %v20023_v3 = vld [vmem:[%s25487_s13 + $0x128] ss:$12 sps:$4 sm:$0xff]  }
 0xdc0   :  { %18562 = vmatprep.mubr.msk.f32.mxu0 %vm20429_vm8, %v25595_v12 }
 0xdc3   :  { %18563 = vmatmul.mubr.msk.f32.gmra.mrb[156].mxu0 %vm234_vm2, %v9087_v62 }
 0xdc4   :  { %18565 = vmatprep.mubr.msk.f32.mxu0 %vm20429_vm8, %v25595_v12 }
 0xdc7   :  { %18566 = vmatmul.mubr.msk.f32.gmra.mrb[158].mxu0 %vm234_vm2, %v9088_v42 }
 0xdc8   :  { %18568 = vmatprep.mubr.msk.f32.mxu0 %vm20429_vm8, %v25595_v12 }
 0xdcb   :  { %18569 = vmatmul.mubr.msk.f32.gmra.mrb[160].mxu0 %vm234_vm2, %v9089_v36  ;;  %v20024_v36 = vld [vmem:[%s25487_s13 + $0x140] ss:$12 sps:$4 sm:$0xff]  }
 0xdcc   :  { %18571 = vmatprep.mubr.msk.f32.mxu0 %vm20429_vm8, %v25595_v12 }
 0xdcf   :  { %18572 = vmatmul.mubr.msk.f32.gmra.mrb[162].mxu0 %vm234_vm2, %v9090_v37 }
 0xdd0   :  { %18574 = vmatprep.mubr.msk.f32.mxu0 %vm20429_vm8, %v25595_v12 }
 0xdd3   :  { %18575 = vmatmul.mubr.msk.f32.gmra.mrb[164].mxu0 %vm234_vm2, %v9091_v5 }
 0xdd4   :  { %18577 = vmatprep.mubr.msk.f32.mxu0 %vm20429_vm8, %v25595_v12 }
 0xdd7   :  { %18578 = vmatmul.mubr.msk.f32.gmra.mrb[166].mxu0 %vm234_vm2, %v9092_v59 }
 0xdd8   :  { %18580 = vmatprep.mubr.msk.f32.mxu0 %vm20429_vm8, %v25595_v12 }
 0xe76   :  { %v9245_v46 = vpop.f32.mrb[140].mxu0 }
 0xe77   :  { %v18540_v19 = vpop.f32.mrb[141].mxu0  ;;  %v9369_v50 = vpack.c.bf16 %v9245_v46, %v9245_v46  ;;  %v20025_v46 = vld [vmem:[%s25487_s13 + $0x158] ss:$12 sps:$4 sm:$0xff]  }
 0xe78   :  { %v20026_v19 = vld [vmem:[%s25487_s13 + $0x170] ss:$12 sps:$4 sm:$0xff]  }
 0xe7a   :  { %v9250_v14 = vpop.f32.mrb[142].mxu0 }
 0xe7b   :  { %v9386_v0 = vpack.c.bf16 %v9250_v14, %v9250_v14  ;;  %v18543_v47 = vpop.f32.mrb[143].mxu0  ;;  %v9093_v14 = vld [vmem:[%s25486_s12 + $0x70] sm:$0xff] }
 0xe7c   :  { %18581 = vmatmul.mubr.msk.f32.gmra.mrb[168].mxu0 %vm234_vm2, %v9093_v14  ;;  %v20032_v47 = vld [vmem:[%s25487_s13 + $0x19c] ss:$12 sps:$4 sm:$0xff]  }
 0xe7d   :  { %15553 = vmatmul.mubr.msk.bf16.vlgmr.msra.gmra.mrb[212].mxu1 %vm5490_vm5, %v9386_v0  ;;  %18583 = vmatprep.mubr.msk.f32.mxu0 %vm20429_vm8, %v25595_v12 }
 0xe7e   :  { %18614 = vmatpush3.bf16.msra.mxu1 %v19975_v33  ;;  %18621 = vmatprep.mubr.msk.bf16.mxu1 %vm20429_vm8, %v25595_v12  ;;  %v23581_v53 = vpop.f32.mrb[144].mxu0  ;;  %v20029_v33 = vld [vmem:[%s25487_s13 + $0x184] ss:$12 sps:$4 sm:$0xff]  }
 0xe7f   :  { %18615 = vmatprep.subr.bf16.mxu1 %v25595_v12  ;;  %v18546_v58 = vpop.f32.mrb[145].mxu0  ;;  %v9700_v57 = vpack.c.bf16 %v23581_v53, %v23581_v53  ;;  %v20035_v53 = vld [vmem:[%s25487_s13 + $0x1b4] ss:$12 sps:$4 sm:$0xff]  }
 0xe80   :  { %v20033_v58 = vld [vmem:[%s25487_s13 + $0x1b0] ss:$12 sps:$4 sm:$0xff]  }
 0xe82   :  { %18616 = vmatpush3.bf16.msra.mxu1 %v19976_v41  ;;  %v23587_v21 = vpop.f32.mrb[146].mxu0  ;;  %v20030_v41 = vld [vmem:[%s25487_s13 + $0x198] ss:$12 sps:$4 sm:$0xff]  }
 0xe83   :  { %18617 = vmatprep.subr.bf16.mxu1 %v25595_v12  ;;  %v18549_v6 = vpop.f32.mrb[147].mxu0  ;;  %v9869_v13 = vpack.c.bf16 %v23587_v21, %v23587_v21  ;;  %v20036_v21 = vld [vmem:[%s25487_s13 + $0x1c8] ss:$12 sps:$4 sm:$0xff]  }
 0xe86   :  { %18618 = vmatpush3.bf16.msra.mxu1 %v19977_v2  ;;  %v23593_v40 = vpop.f32.mrb[148].mxu0  ;;  %v20038_v2 = vld [vmem:[%s25487_s13 + $0x1cc] ss:$12 sps:$4 sm:$0xff]  }
 0xe87   :  { %18619 = vmatprep.subr.bf16.mxu1 %v25595_v12  ;;  %v18552_v44 = vpop.f32.mrb[149].mxu0  ;;  %v10038_v6 = vpack.c.bf16 %v23593_v40, %v23593_v40  ;;  %v20041_v40 = vld [vmem:[%s25487_s13 + $0x1b8] ss:$12 sps:$4 sm:$0xff]  }
 0xe88   :  { %v20040_v44 = vld [vmem:[%s25487_s13 + $0x1a0] ss:$12 sps:$4 sm:$0xff]  }
 0xe8a   :  { %18620 = vmatpush3.bf16.msra.mxu1 %v19978_v7  ;;  %v23631_v38 = vpop.f32.mrb[150].mxu0  ;;  %v20039_v7 = vld [vmem:[%s25487_s13 + $0x188] ss:$12 sps:$4 sm:$0xff]  }
 0xe8b   :  { %9619 = vmatprep.subr.bf16.mxu1 %v19981_v48  ;;  %v18555_v60 = vpop.f32.mrb[151].mxu0 }
 0xe8c   :  { %v20052_v60 = vld [vmem:[%s25487_s13 + $0x228] ss:$12 sps:$4 sm:$0xff]  }
 0xe8d   :  { %18622 = vmatmul.mubr.msk.bf16.vlgmr.msra.gmra.mrb[216].mxu1 %vm5490_vm5, %v9386_v0  ;;  %v20027_v0 = vld [vmem:[%s25487_s13 + $0x180] ss:$12 sps:$4 sm:$0xff]  }
 0xe8e   :  { %9620 = vmatpush1.bf16.msra.mxu1 %v19979_v24  ;;  %9651 = vmatprep.mubr.bf16.mxu1 %v25594_v25  ;;  %v23686_v54 = vpop.f32.mrb[152].mxu0  ;;  %v20042_v24 = vld [vmem:[%s25487_s13 + $0x1d0] ss:$12 sps:$4 sm:$0xff]  }
 0xe8f   :  { %9621 = vmatprep.subr.bf16.mxu1 %v19984_v1  ;;  %v18558_v16 = vpop.f32.mrb[153].mxu0  ;;  %v9094_v1 = vld [vmem:[%s25486_s12 + $0x78] sm:$0xff] }
 0xe90   :  { %18584 = vmatmul.mubr.msk.f32.gmra.mrb[170].mxu0 %vm234_vm2, %v9094_v1  ;;  %v20068_v16 = vld [vmem:[%s25487_s13 + $0x288] ss:$12 sps:$4 sm:$0xff]  }
 0xe91   :  { %18586 = vmatprep.mubr.msk.f32.mxu0 %vm20429_vm8, %v25595_v12 }
 0xe92   :  { %9622 = vmatpush1.bf16.msra.mxu1 %v19982_v56  ;;  %v23741_v62 = vpop.f32.mrb[154].mxu0  ;;  %v20045_v56 = vld [vmem:[%s25487_s13 + $0x1e4] ss:$12 sps:$4 sm:$0xff]  }
 0xe93   :  { %9623 = vmatprep.subr.bf16.mxu1 %v19987_v28  ;;  %v18561_v42 = vpop.f32.mrb[155].mxu0  ;;  %v20043_v28 = vld [vmem:[%s25487_s13 + $0x1e0] ss:$12 sps:$4 sm:$0xff]  }
 0xe94   :  { %v20084_v42 = vld [vmem:[%s25487_s13 + $0x2e8] ss:$12 sps:$4 sm:$0xff]  }
 0xe96   :  { %9624 = vmatpush1.bf16.msra.mxu1 %v19985_v34  ;;  %v23796_v37 = vpop.f32.mrb[156].mxu0  ;;  %v20048_v34 = vld [vmem:[%s25487_s13 + $0x1fc] ss:$12 sps:$4 sm:$0xff]  }
 0xe97   :  { %9625 = vmatprep.subr.bf16.mxu1 %v19990_v26  ;;  %v18564_v48 = vpop.f32.mrb[157].mxu0  ;;  %v20046_v26 = vld [vmem:[%s25487_s13 + $0x1f8] ss:$12 sps:$4 sm:$0xff]  }
 0xe98   :  { %v20100_v48 = vld [vmem:[%s25487_s13 + $0x348] ss:$12 sps:$4 sm:$0xff]  }
 0xe9a   :  { %9626 = vmatpush1.bf16.msra.mxu1 %v19988_v55  ;;  %v20051_v55 = vld [vmem:[%s25487_s13 + $0x214] ss:$12 sps:$4 sm:$0xff]  }
 0xe9b   :  { %18625 = vmatprep.subr.bf16.mxu1 %v25595_v12 }
 0xe9d   :  { %15567 = vmatmul.mubr.msk.bf16.vlgmr.msra.gmra.mrb[212].mxu1 %vm5490_vm5, %v9369_v50 }
 0xe9e   :  { %18626 = vmatpush3.bf16.msra.mxu1 %v19991_v11  ;;  %18633 = vmatprep.mubr.msk.bf16.mxu1 %vm20429_vm8, %v25595_v12  ;;  %v20049_v11 = vld [vmem:[%s25487_s13 + $0x210] ss:$12 sps:$4 sm:$0xff]  }
 0xe9f   :  { %18627 = vmatprep.subr.bf16.mxu1 %v25595_v12 }
 0xea2   :  { %18628 = vmatpush3.bf16.msra.mxu1 %v19992_v52  ;;  %v10207_v52 = vpack.c.bf16 %v23631_v38, %v23631_v38  ;;  %v20057_v38 = vld [vmem:[%s25487_s13 + $0x218] ss:$12 sps:$4 sm:$0xff]  }
 0xea3   :  { %18629 = vmatprep.subr.bf16.mxu1 %v25595_v12 }
 0xea6   :  { %18630 = vmatpush3.bf16.msra.mxu1 %v19993_v17  ;;  %v20055_v17 = vld [vmem:[%s25487_s13 + $0x1e8] ss:$12 sps:$4 sm:$0xff]  }
 0xea7   :  { %18631 = vmatprep.subr.bf16.mxu1 %v25595_v12 }
 0xeaa   :  { %18632 = vmatpush3.bf16.msra.mxu1 %v19994_v32  ;;  %v23851_v32 = vpop.f32.mrb[158].mxu0 }
 0xeab   :  { %9785 = vmatprep.subr.bf16.mxu1 %v19997_v27  ;;  %v18567_v5 = vpop.f32.mrb[159].mxu0  ;;  %v20056_v27 = vld [vmem:[%s25487_s13 + $0x200] ss:$12 sps:$4 sm:$0xff]  }
 0xeac   :  { %v20116_v5 = vld [vmem:[%s25487_s13 + $0x3a8] ss:$12 sps:$4 sm:$0xff]  }
 0xead   :  { %18634 = vmatmul.mubr.msk.bf16.vlgmr.msra.gmra.mrb[216].mxu1 %vm5490_vm5, %v9369_v50  ;;  %v20054_v50 = vld [vmem:[%s25487_s13 + $0x22c] ss:$12 sps:$4 sm:$0xff]  }
 0xeae   :  { %9786 = vmatpush1.bf16.msra.mxu1 %v19995_v8  ;;  %9817 = vmatprep.mubr.bf16.mxu1 %v25594_v25  ;;  %v20058_v8 = vld [vmem:[%s25487_s13 + $0x230] ss:$12 sps:$4 sm:$0xff]  }
 0xeaf   :  { %9787 = vmatprep.subr.bf16.mxu1 %v20000_v4  ;;  %v9095_v4 = vld [vmem:[%s25486_s12 + $0x80] sm:$0xff] }
 0xeb0   :  { %18587 = vmatmul.mubr.msk.f32.gmra.mrb[172].mxu0 %vm234_vm2, %v9095_v4 }
 0xeb1   :  { %18589 = vmatprep.mubr.msk.f32.mxu0 %vm20429_vm8, %v25595_v12 }
 0xeb2   :  { %9788 = vmatpush1.bf16.msra.mxu1 %v19998_v15  ;;  %v20061_v15 = vld [vmem:[%s25487_s13 + $0x244] ss:$12 sps:$4 sm:$0xff]  }
 0xeb3   :  { %9789 = vmatprep.subr.bf16.mxu1 %v20003_v18  ;;  %v20059_v18 = vld [vmem:[%s25487_s13 + $0x240] ss:$12 sps:$4 sm:$0xff]  }
 0xeb6   :  { %9790 = vmatpush1.bf16.msra.mxu1 %v20001_v49  ;;  %v20064_v49 = vld [vmem:[%s25487_s13 + $0x25c] ss:$12 sps:$4 sm:$0xff]  }
 0xeb7   :  { %9791 = vmatprep.subr.bf16.mxu1 %v20006_v22  ;;  %v20062_v22 = vld [vmem:[%s25487_s13 + $0x258] ss:$12 sps:$4 sm:$0xff]  }
 0xeba   :  { %9792 = vmatpush1.bf16.msra.mxu1 %v20004_v45  ;;  %v20067_v45 = vld [vmem:[%s25487_s13 + $0x274] ss:$12 sps:$4 sm:$0xff]  }
 0xebb   :  { %18637 = vmatprep.subr.bf16.mxu1 %v25595_v12 }
 0xebd   :  { %15597 = vmatmul.mubr.msk.bf16.vlgmr.msra.gmra.mrb[212].mxu1 %vm5490_vm5, %v9700_v57 }
 0xebe   :  { %18638 = vmatpush3.bf16.msra.mxu1 %v20007_v30  ;;  %18645 = vmatprep.mubr.msk.bf16.mxu1 %vm20429_vm8, %v25595_v12  ;;  %v20070_v30 = vld [vmem:[%s25487_s13 + $0x28c] ss:$12 sps:$4 sm:$0xff]  }
 0xebf   :  { %18639 = vmatprep.subr.bf16.mxu1 %v25595_v12 }
 0xec2   :  { %18640 = vmatpush3.bf16.msra.mxu1 %v20008_v35  ;;  %v10376_v35 = vpack.c.bf16 %v23686_v54, %v23686_v54  ;;  %v20073_v54 = vld [vmem:[%s25487_s13 + $0x278] ss:$12 sps:$4 sm:$0xff]  }
 0xec3   :  { %18641 = vmatprep.subr.bf16.mxu1 %v25595_v12 }
 0xec6   :  { %18642 = vmatpush3.bf16.msra.mxu1 %v20009_v51  ;;  %v20071_v51 = vld [vmem:[%s25487_s13 + $0x248] ss:$12 sps:$4 sm:$0xff]  }
 0xec7   :  { %18643 = vmatprep.subr.bf16.mxu1 %v25595_v12 }
 0xeca   :  { %18644 = vmatpush3.bf16.msra.mxu1 %v20010_v10  ;;  %v23906_v10 = vpop.f32.mrb[160].mxu0 }
 0xecb   :  { %9954 = vmatprep.subr.bf16.mxu1 %v20013_v20  ;;  %v18570_v59 = vpop.f32.mrb[161].mxu0  ;;  %v20072_v20 = vld [vmem:[%s25487_s13 + $0x260] ss:$12 sps:$4 sm:$0xff]  }
 0xecc   :  { %v20132_v59 = vld [vmem:[%s25487_s13 + $0x408] ss:$12 sps:$4 sm:$0xff]  }
 0xecd   :  { %18646 = vmatmul.mubr.msk.bf16.vlgmr.msra.gmra.mrb[216].mxu1 %vm5490_vm5, %v9700_v57  ;;  %v20065_v57 = vld [vmem:[%s25487_s13 + $0x270] ss:$12 sps:$4 sm:$0xff]  }
 0xece   :  { %9955 = vmatpush1.bf16.msra.mxu1 %v20011_v31  ;;  %9986 = vmatprep.mubr.bf16.mxu1 %v25594_v25  ;;  %v20074_v31 = vld [vmem:[%s25487_s13 + $0x290] ss:$12 sps:$4 sm:$0xff]  }
 0xecf   :  { %9956 = vmatprep.subr.bf16.mxu1 %v20016_v39  ;;  %v9096_v39 = vld [vmem:[%s25486_s12 + $0x88] sm:$0xff] }
 0xed0   :  { %18590 = vmatmul.mubr.msk.f32.gmra.mrb[174].mxu0 %vm234_vm2, %v9096_v39 }
 0xed1   :  { %18592 = vmatprep.mubr.msk.f32.mxu0 %vm20429_vm8, %v25595_v12 }
 0xed2   :  { %9957 = vmatpush1.bf16.msra.mxu1 %v20014_v61  ;;  %v20077_v61 = vld [vmem:[%s25487_s13 + $0x2a4] ss:$12 sps:$4 sm:$0xff]  }
 0xed3   :  { %9958 = vmatprep.subr.bf16.mxu1 %v20019_v43  ;;  %v20075_v43 = vld [vmem:[%s25487_s13 + $0x2a0] ss:$12 sps:$4 sm:$0xff]  }
 0xed6   :  { %9959 = vmatpush1.bf16.msra.mxu1 %v20017_v63  ;;  %v20080_v63 = vld [vmem:[%s25487_s13 + $0x2bc] ss:$12 sps:$4 sm:$0xff]  }
 0xed7   :  { %9960 = vmatprep.subr.bf16.mxu1 %v20022_v23  ;;  %v20078_v23 = vld [vmem:[%s25487_s13 + $0x2b8] ss:$12 sps:$4 sm:$0xff]  }
 0xeda   :  { %9961 = vmatpush1.bf16.msra.mxu1 %v20020_v29  ;;  %v20083_v29 = vld [vmem:[%s25487_s13 + $0x2d4] ss:$12 sps:$4 sm:$0xff]  }
 0xedb   :  { %18649 = vmatprep.subr.bf16.mxu1 %v25595_v12 }
 0xedd   :  { %15627 = vmatmul.mubr.msk.bf16.vlgmr.msra.gmra.mrb[212].mxu1 %vm5490_vm5, %v9869_v13 }
 0xede   :  { %18650 = vmatpush3.bf16.msra.mxu1 %v20023_v3  ;;  %18657 = vmatprep.mubr.msk.bf16.mxu1 %vm20429_vm8, %v25595_v12  ;;  %v20086_v3 = vld [vmem:[%s25487_s13 + $0x2ec] ss:$12 sps:$4 sm:$0xff]  }
 0xedf   :  { %18651 = vmatprep.subr.bf16.mxu1 %v25595_v12 }
 0xee2   :  { %18652 = vmatpush3.bf16.msra.mxu1 %v20024_v36  ;;  %v10545_v36 = vpack.c.bf16 %v23741_v62, %v23741_v62  ;;  %v20089_v62 = vld [vmem:[%s25487_s13 + $0x2d8] ss:$12 sps:$4 sm:$0xff]  }
 0xee3   :  { %18653 = vmatprep.subr.bf16.mxu1 %v25595_v12 }
 0xee6   :  { %18654 = vmatpush3.bf16.msra.mxu1 %v20025_v46  ;;  %v20087_v46 = vld [vmem:[%s25487_s13 + $0x2a8] ss:$12 sps:$4 sm:$0xff]  }
 0xee7   :  { %18655 = vmatprep.subr.bf16.mxu1 %v25595_v12 }
 0xeea   :  { %18656 = vmatpush3.bf16.msra.mxu1 %v20026_v19  ;;  %v23961_v19 = vpop.f32.mrb[162].mxu0 }
 0xeeb   :  { %10123 = vmatprep.subr.bf16.mxu1 %v20029_v33  ;;  %v18573_v14 = vpop.f32.mrb[163].mxu0  ;;  %v20088_v33 = vld [vmem:[%s25487_s13 + $0x2c0] ss:$12 sps:$4 sm:$0xff]  }
 0xeec   :  { %v20148_v14 = vld [vmem:[%s25487_s13 + $0x468] ss:$12 sps:$4 sm:$0xff]  }
 0xeed   :  { %18658 = vmatmul.mubr.msk.bf16.vlgmr.msra.gmra.mrb[216].mxu1 %vm5490_vm5, %v9869_v13  ;;  %v20081_v13 = vld [vmem:[%s25487_s13 + $0x2d0] ss:$12 sps:$4 sm:$0xff]  }
 0xeee   :  { %10124 = vmatpush1.bf16.msra.mxu1 %v20027_v0  ;;  %10155 = vmatprep.mubr.bf16.mxu1 %v25594_v25  ;;  %v20090_v0 = vld [vmem:[%s25487_s13 + $0x2f0] ss:$12 sps:$4 sm:$0xff]  }
 0xeef   :  { %10125 = vmatprep.subr.bf16.mxu1 %v20032_v47  ;;  %v9097_v47 = vld [vmem:[%s25486_s12 + $0x90] sm:$0xff] }
 0xef0   :  { %18593 = vmatmul.mubr.msk.f32.gmra.mrb[176].mxu0 %vm234_vm2, %v9097_v47 }
 0xef1   :  { %18595 = vmatprep.mubr.msk.f32.mxu0 %vm20429_vm8, %v25595_v12 }
 0xef2   :  { %10126 = vmatpush1.bf16.msra.mxu1 %v20030_v41  ;;  %v20093_v41 = vld [vmem:[%s25487_s13 + $0x304] ss:$12 sps:$4 sm:$0xff]  }
 0xef3   :  { %10127 = vmatprep.subr.bf16.mxu1 %v20035_v53  ;;  %v20091_v53 = vld [vmem:[%s25487_s13 + $0x300] ss:$12 sps:$4 sm:$0xff]  }
 0xef6   :  { %10128 = vmatpush1.bf16.msra.mxu1 %v20033_v58  ;;  %v20096_v58 = vld [vmem:[%s25487_s13 + $0x31c] ss:$12 sps:$4 sm:$0xff]  }
 0xef7   :  { %10129 = vmatprep.subr.bf16.mxu1 %v20038_v2  ;;  %v20094_v2 = vld [vmem:[%s25487_s13 + $0x318] ss:$12 sps:$4 sm:$0xff]  }
 0xefa   :  { %10130 = vmatpush1.bf16.msra.mxu1 %v20036_v21  ;;  %v20099_v21 = vld [vmem:[%s25487_s13 + $0x334] ss:$12 sps:$4 sm:$0xff]  }
 0xefb   :  { %18661 = vmatprep.subr.bf16.mxu1 %v25595_v12 }
 0xefd   :  { %15657 = vmatmul.mubr.msk.bf16.vlgmr.msra.gmra.mrb[212].mxu1 %vm5490_vm5, %v10038_v6 }
 0xefe   :  { %18662 = vmatpush3.bf16.msra.mxu1 %v20039_v7  ;;  %18669 = vmatprep.mubr.msk.bf16.mxu1 %vm20429_vm8, %v25595_v12  ;;  %v20102_v7 = vld [vmem:[%s25487_s13 + $0x34c] ss:$12 sps:$4 sm:$0xff]  }
 0xeff   :  { %18663 = vmatprep.subr.bf16.mxu1 %v25595_v12 }
 0xf02   :  { %18664 = vmatpush3.bf16.msra.mxu1 %v20040_v44  ;;  %v10714_v44 = vpack.c.bf16 %v23796_v37, %v23796_v37  ;;  %v20105_v37 = vld [vmem:[%s25487_s13 + $0x338] ss:$12 sps:$4 sm:$0xff]  }
 0xf03   :  { %18665 = vmatprep.subr.bf16.mxu1 %v25595_v12 }
 0xf06   :  { %18666 = vmatpush3.bf16.msra.mxu1 %v20041_v40  ;;  %v20103_v40 = vld [vmem:[%s25487_s13 + $0x308] ss:$12 sps:$4 sm:$0xff]  }
 0xf07   :  { %18667 = vmatprep.subr.bf16.mxu1 %v25595_v12 }
 0xf0a   :  { %18668 = vmatpush3.bf16.msra.mxu1 %v20042_v24  ;;  %v24016_v24 = vpop.f32.mrb[164].mxu0 }
 0xf0b   :  { %10292 = vmatprep.subr.bf16.mxu1 %v20045_v56  ;;  %v18576_v1 = vpop.f32.mrb[165].mxu0  ;;  %v20104_v56 = vld [vmem:[%s25487_s13 + $0x320] ss:$12 sps:$4 sm:$0xff]  }
 0xf0c   :  { %v20164_v1 = vld [vmem:[%s25487_s13 + $0x4c8] ss:$12 sps:$4 sm:$0xff]  }
 0xf0d   :  { %18670 = vmatmul.mubr.msk.bf16.vlgmr.msra.gmra.mrb[216].mxu1 %vm5490_vm5, %v10038_v6  ;;  %v20097_v6 = vld [vmem:[%s25487_s13 + $0x330] ss:$12 sps:$4 sm:$0xff]  }
 0xf0e   :  { %10293 = vmatpush1.bf16.msra.mxu1 %v20043_v28  ;;  %10324 = vmatprep.mubr.bf16.mxu1 %v25594_v25  ;;  %v20106_v28 = vld [vmem:[%s25487_s13 + $0x350] ss:$12 sps:$4 sm:$0xff]  }
 0xf0f   :  { %10294 = vmatprep.subr.bf16.mxu1 %v20048_v34  ;;  %v9098_v34 = vld [vmem:[%s25486_s12 + $0x98] sm:$0xff] }
 0xf10   :  { %18596 = vmatmul.mubr.msk.f32.gmra.mrb[178].mxu0 %vm234_vm2, %v9098_v34 }
 0xf11   :  { %18598 = vmatprep.mubr.msk.f32.mxu0 %vm20429_vm8, %v25595_v12 }
 0xf12   :  { %10295 = vmatpush1.bf16.msra.mxu1 %v20046_v26  ;;  %v20109_v26 = vld [vmem:[%s25487_s13 + $0x364] ss:$12 sps:$4 sm:$0xff]  }
 0xf13   :  { %10296 = vmatprep.subr.bf16.mxu1 %v20051_v55  ;;  %v20107_v55 = vld [vmem:[%s25487_s13 + $0x360] ss:$12 sps:$4 sm:$0xff]  }
 0xf16   :  { %10297 = vmatpush1.bf16.msra.mxu1 %v20049_v11  ;;  %v20112_v11 = vld [vmem:[%s25487_s13 + $0x37c] ss:$12 sps:$4 sm:$0xff]  }
 0xf17   :  { %10298 = vmatprep.subr.bf16.mxu1 %v20054_v50  ;;  %v20110_v50 = vld [vmem:[%s25487_s13 + $0x378] ss:$12 sps:$4 sm:$0xff]  }
 0xf1a   :  { %10299 = vmatpush1.bf16.msra.mxu1 %v20052_v60  ;;  %v20115_v60 = vld [vmem:[%s25487_s13 + $0x394] ss:$12 sps:$4 sm:$0xff]  }
 0xf1b   :  { %18673 = vmatprep.subr.bf16.mxu1 %v25595_v12 }
 0xf1d   :  { %15687 = vmatmul.mubr.msk.bf16.vlgmr.msra.gmra.mrb[212].mxu1 %vm5490_vm5, %v10207_v52 }
 0xf1e   :  { %18674 = vmatpush3.bf16.msra.mxu1 %v20055_v17  ;;  %18681 = vmatprep.mubr.msk.bf16.mxu1 %vm20429_vm8, %v25595_v12  ;;  %v20118_v17 = vld [vmem:[%s25487_s13 + $0x3ac] ss:$12 sps:$4 sm:$0xff]  }
 0xf1f   :  { %18675 = vmatprep.subr.bf16.mxu1 %v25595_v12 }
 0xf22   :  { %18676 = vmatpush3.bf16.msra.mxu1 %v20056_v27  ;;  %v10883_v27 = vpack.c.bf16 %v23851_v32, %v23851_v32  ;;  %v20121_v32 = vld [vmem:[%s25487_s13 + $0x398] ss:$12 sps:$4 sm:$0xff]  }
 0xf23   :  { %18677 = vmatprep.subr.bf16.mxu1 %v25595_v12 }
 0xf26   :  { %18678 = vmatpush3.bf16.msra.mxu1 %v20057_v38  ;;  %v20119_v38 = vld [vmem:[%s25487_s13 + $0x368] ss:$12 sps:$4 sm:$0xff]  }
 0xf27   :  { %18679 = vmatprep.subr.bf16.mxu1 %v25595_v12 }
 0xf2a   :  { %18680 = vmatpush3.bf16.msra.mxu1 %v20058_v8  ;;  %v24071_v8 = vpop.f32.mrb[166].mxu0 }
 0xf2b   :  { %10461 = vmatprep.subr.bf16.mxu1 %v20061_v15  ;;  %v18579_v4 = vpop.f32.mrb[167].mxu0  ;;  %v20120_v15 = vld [vmem:[%s25487_s13 + $0x380] ss:$12 sps:$4 sm:$0xff]  }
 0xf2c   :  { %v20180_v4 = vld [vmem:[%s25487_s13 + $0x528] ss:$12 sps:$4 sm:$0xff]  }
 0xf2d   :  { %18682 = vmatmul.mubr.msk.bf16.vlgmr.msra.gmra.mrb[216].mxu1 %vm5490_vm5, %v10207_v52  ;;  %v20113_v52 = vld [vmem:[%s25487_s13 + $0x390] ss:$12 sps:$4 sm:$0xff]  }
 0xf2e   :  { %10462 = vmatpush1.bf16.msra.mxu1 %v20059_v18  ;;  %10493 = vmatprep.mubr.bf16.mxu1 %v25594_v25  ;;  %v20122_v18 = vld [vmem:[%s25487_s13 + $0x3b0] ss:$12 sps:$4 sm:$0xff]  }
 0xf2f   :  { %10463 = vmatprep.subr.bf16.mxu1 %v20064_v49  ;;  %v9099_v49 = vld [vmem:[%s25486_s12 + $0xa0] sm:$0xff] }
 0xf30   :  { %18599 = vmatmul.mubr.msk.f32.gmra.mrb[180].mxu0 %vm234_vm2, %v9099_v49 }
 0xf31   :  { %18601 = vmatprep.mubr.msk.f32.mxu0 %vm20429_vm8, %v25595_v12 }
 0xf32   :  { %10464 = vmatpush1.bf16.msra.mxu1 %v20062_v22  ;;  %v20125_v22 = vld [vmem:[%s25487_s13 + $0x3c4] ss:$12 sps:$4 sm:$0xff]  }
 0xf33   :  { %10465 = vmatprep.subr.bf16.mxu1 %v20067_v45  ;;  %v20123_v45 = vld [vmem:[%s25487_s13 + $0x3c0] ss:$12 sps:$4 sm:$0xff]  }
 0xf36   :  { %10466 = vmatpush1.bf16.msra.mxu1 %v20065_v57  ;;  %v20128_v57 = vld [vmem:[%s25487_s13 + $0x3dc] ss:$12 sps:$4 sm:$0xff]  }
 0xf37   :  { %10467 = vmatprep.subr.bf16.mxu1 %v20070_v30  ;;  %v20126_v30 = vld [vmem:[%s25487_s13 + $0x3d8] ss:$12 sps:$4 sm:$0xff]  }
 0xf3a   :  { %10468 = vmatpush1.bf16.msra.mxu1 %v20068_v16  ;;  %v20131_v16 = vld [vmem:[%s25487_s13 + $0x3f4] ss:$12 sps:$4 sm:$0xff]  }
 0xf3b   :  { %18685 = vmatprep.subr.bf16.mxu1 %v25595_v12 }
 0xf3d   :  { %15717 = vmatmul.mubr.msk.bf16.vlgmr.msra.gmra.mrb[212].mxu1 %vm5490_vm5, %v10376_v35 }
 0xf3e   :  { %18686 = vmatpush3.bf16.msra.mxu1 %v20071_v51  ;;  %18693 = vmatprep.mubr.msk.bf16.mxu1 %vm20429_vm8, %v25595_v12  ;;  %v20134_v51 = vld [vmem:[%s25487_s13 + $0x40c] ss:$12 sps:$4 sm:$0xff]  }
 0xf3f   :  { %18687 = vmatprep.subr.bf16.mxu1 %v25595_v12 }
 0xf42   :  { %18688 = vmatpush3.bf16.msra.mxu1 %v20072_v20  ;;  %v11052_v20 = vpack.c.bf16 %v23906_v10, %v23906_v10  ;;  %v20137_v10 = vld [vmem:[%s25487_s13 + $0x3f8] ss:$12 sps:$4 sm:$0xff]  }
 0xf43   :  { %18689 = vmatprep.subr.bf16.mxu1 %v25595_v12 }
 0xf46   :  { %18690 = vmatpush3.bf16.msra.mxu1 %v20073_v54  ;;  %v20135_v54 = vld [vmem:[%s25487_s13 + $0x3c8] ss:$12 sps:$4 sm:$0xff]  }
 0xf47   :  { %18691 = vmatprep.subr.bf16.mxu1 %v25595_v12 }
 0xf4a   :  { %18692 = vmatpush3.bf16.msra.mxu1 %v20074_v31 }
 0xf4b   :  { %10630 = vmatprep.subr.bf16.mxu1 %v20077_v61  ;;  %v20136_v61 = vld [vmem:[%s25487_s13 + $0x3e0] ss:$12 sps:$4 sm:$0xff]  }
 0xf4d   :  { %18694 = vmatmul.mubr.msk.bf16.vlgmr.msra.gmra.mrb[216].mxu1 %vm5490_vm5, %v10376_v35  ;;  %v20129_v35 = vld [vmem:[%s25487_s13 + $0x3f0] ss:$12 sps:$4 sm:$0xff]  }
 0xf4e   :  { %10631 = vmatpush1.bf16.msra.mxu1 %v20075_v43  ;;  %10662 = vmatprep.mubr.bf16.mxu1 %v25594_v25  ;;  %v20138_v43 = vld [vmem:[%s25487_s13 + $0x410] ss:$12 sps:$4 sm:$0xff]  }
 0xf4f   :  { %10632 = vmatprep.subr.bf16.mxu1 %v20080_v63  ;;  %v24126_v31 = vpop.f32.mrb[168].mxu0  ;;  %v9100_v63 = vld [vmem:[%s25486_s12 + $0xa8] sm:$0xff] }
 0xf50   :  { %v18582_v39 = vpop.f32.mrb[169].mxu0  ;;  %18602 = vmatmul.mubr.msk.f32.gmra.mrb[182].mxu0 %vm234_vm2, %v9100_v63 }
 0xf51   :  { %18604 = vmatprep.mubr.msk.f32.mxu0 %vm20429_vm8, %v25595_v12  ;;  %v20196_v39 = vld [vmem:[%s25487_s13 + $0x588] ss:$12 sps:$4 sm:$0xff]  }
 0xf52   :  { %10633 = vmatpush1.bf16.msra.mxu1 %v20078_v23  ;;  %v20141_v23 = vld [vmem:[%s25487_s13 + $0x424] ss:$12 sps:$4 sm:$0xff]  }
 0xf53   :  { %10634 = vmatprep.subr.bf16.mxu1 %v20083_v29  ;;  %v20139_v29 = vld [vmem:[%s25487_s13 + $0x420] ss:$12 sps:$4 sm:$0xff]  }
 0xf56   :  { %10635 = vmatpush1.bf16.msra.mxu1 %v20081_v13  ;;  %v20144_v13 = vld [vmem:[%s25487_s13 + $0x43c] ss:$12 sps:$4 sm:$0xff]  }
 0xf57   :  { %10636 = vmatprep.subr.bf16.mxu1 %v20086_v3  ;;  %v20142_v3 = vld [vmem:[%s25487_s13 + $0x438] ss:$12 sps:$4 sm:$0xff]  }
 0xf5a   :  { %10637 = vmatpush1.bf16.msra.mxu1 %v20084_v42  ;;  %v20147_v42 = vld [vmem:[%s25487_s13 + $0x454] ss:$12 sps:$4 sm:$0xff]  }
 0xf5b   :  { %18697 = vmatprep.subr.bf16.mxu1 %v25595_v12 }
 0xf5d   :  { %15747 = vmatmul.mubr.msk.bf16.vlgmr.msra.gmra.mrb[212].mxu1 %vm5490_vm5, %v10545_v36 }
 0xf5e   :  { %18698 = vmatpush3.bf16.msra.mxu1 %v20087_v46  ;;  %18705 = vmatprep.mubr.msk.bf16.mxu1 %vm20429_vm8, %v25595_v12  ;;  %v20150_v46 = vld [vmem:[%s25487_s13 + $0x46c] ss:$12 sps:$4 sm:$0xff]  }
 0xf5f   :  { %18699 = vmatprep.subr.bf16.mxu1 %v25595_v12 }
 0xf62   :  { %18700 = vmatpush3.bf16.msra.mxu1 %v20088_v33  ;;  %v11221_v33 = vpack.c.bf16 %v23961_v19, %v23961_v19  ;;  %v20153_v19 = vld [vmem:[%s25487_s13 + $0x458] ss:$12 sps:$4 sm:$0xff]  }
 0xf63   :  { %18701 = vmatprep.subr.bf16.mxu1 %v25595_v12 }
 0xf66   :  { %18702 = vmatpush3.bf16.msra.mxu1 %v20089_v62  ;;  %v20151_v62 = vld [vmem:[%s25487_s13 + $0x428] ss:$12 sps:$4 sm:$0xff]  }
 0xf67   :  { %18703 = vmatprep.subr.bf16.mxu1 %v25595_v12 }
 0xf6a   :  { %18704 = vmatpush3.bf16.msra.mxu1 %v20090_v0  ;;  %v24181_v0 = vpop.f32.mrb[170].mxu0 }
 0xf6b   :  { %10799 = vmatprep.subr.bf16.mxu1 %v20093_v41  ;;  %v18585_v47 = vpop.f32.mrb[171].mxu0  ;;  %v20152_v41 = vld [vmem:[%s25487_s13 + $0x440] ss:$12 sps:$4 sm:$0xff]  }
 0xf6c   :  { %v11897_v47 = vpack.c.bf16 %v24181_v0, %v24181_v0  ;;  %v20217_v0 = vld [vmem:[%s25487_s13 + $0x5d8] ss:$12 sps:$4 sm:$0xff]  }
 0xf6d   :  { %18706 = vmatmul.mubr.msk.bf16.vlgmr.msra.gmra.mrb[216].mxu1 %vm5490_vm5, %v10545_v36  ;;  %v20145_v36 = vld [vmem:[%s25487_s13 + $0x450] ss:$12 sps:$4 sm:$0xff]  }
 0xf6e   :  { %10800 = vmatpush1.bf16.msra.mxu1 %v20091_v53  ;;  %10831 = vmatprep.mubr.bf16.mxu1 %v25594_v25  ;;  %v20154_v53 = vld [vmem:[%s25487_s13 + $0x470] ss:$12 sps:$4 sm:$0xff]  }
 0xf6f   :  { %10801 = vmatprep.subr.bf16.mxu1 %v20096_v58  ;;  %v9101_v58 = vld [vmem:[%s25486_s12 + $0xb0] sm:$0xff] }
 0xf70   :  { %18605 = vmatmul.mubr.msk.f32.gmra.mrb[184].mxu0 %vm234_vm2, %v9101_v58  ;;  %v20216_v58 = vld [vmem:[%s25487_s13 + $0x5c0] ss:$12 sps:$4 sm:$0xff]  }
 0xf71   :  { %18607 = vmatprep.mubr.msk.f32.mxu0 %vm20429_vm8, %v25595_v12 }
 0xf72   :  { %10802 = vmatpush1.bf16.msra.mxu1 %v20094_v2  ;;  %v20157_v2 = vld [vmem:[%s25487_s13 + $0x484] ss:$12 sps:$4 sm:$0xff]  }
 0xf73   :  { %10803 = vmatprep.subr.bf16.mxu1 %v20099_v21  ;;  %v20155_v21 = vld [vmem:[%s25487_s13 + $0x480] ss:$12 sps:$4 sm:$0xff]  }
 0xf76   :  { %10804 = vmatpush1.bf16.msra.mxu1 %v20097_v6  ;;  %v20160_v6 = vld [vmem:[%s25487_s13 + $0x49c] ss:$12 sps:$4 sm:$0xff]  }
 0xf77   :  { %10805 = vmatprep.subr.bf16.mxu1 %v20102_v7  ;;  %v20158_v7 = vld [vmem:[%s25487_s13 + $0x498] ss:$12 sps:$4 sm:$0xff]  }
 0xf7a   :  { %10806 = vmatpush1.bf16.msra.mxu1 %v20100_v48  ;;  %v20163_v48 = vld [vmem:[%s25487_s13 + $0x4b4] ss:$12 sps:$4 sm:$0xff]  }
 0xf7b   :  { %18709 = vmatprep.subr.bf16.mxu1 %v25595_v12 }
 0xf7d   :  { %15777 = vmatmul.mubr.msk.bf16.vlgmr.msra.gmra.mrb[212].mxu1 %vm5490_vm5, %v10714_v44 }
 0xf7e   :  { %18710 = vmatpush3.bf16.msra.mxu1 %v20103_v40  ;;  %18717 = vmatprep.mubr.msk.bf16.mxu1 %vm20429_vm8, %v25595_v12  ;;  %v20166_v40 = vld [vmem:[%s25487_s13 + $0x4cc] ss:$12 sps:$4 sm:$0xff]  }
 0xf7f   :  { %18711 = vmatprep.subr.bf16.mxu1 %v25595_v12 }
 0xf82   :  { %18712 = vmatpush3.bf16.msra.mxu1 %v20104_v56  ;;  %v11390_v56 = vpack.c.bf16 %v24016_v24, %v24016_v24  ;;  %v20169_v24 = vld [vmem:[%s25487_s13 + $0x4b8] ss:$12 sps:$4 sm:$0xff]  }
 0xf83   :  { %18713 = vmatprep.subr.bf16.mxu1 %v25595_v12 }
 0xf86   :  { %18714 = vmatpush3.bf16.msra.mxu1 %v20105_v37  ;;  %v20167_v37 = vld [vmem:[%s25487_s13 + $0x488] ss:$12 sps:$4 sm:$0xff]  }
 0xf87   :  { %18715 = vmatprep.subr.bf16.mxu1 %v25595_v12 }
 0xf8a   :  { %18716 = vmatpush3.bf16.msra.mxu1 %v20106_v28  ;;  %v24236_v28 = vpop.f32.mrb[172].mxu0 }
 0xf8b   :  { %10968 = vmatprep.subr.bf16.mxu1 %v20109_v26  ;;  %v18588_v34 = vpop.f32.mrb[173].mxu0  ;;  %v20168_v26 = vld [vmem:[%s25487_s13 + $0x4a0] ss:$12 sps:$4 sm:$0xff]  }
 0xf8c   :  { %v20231_v34 = vld [vmem:[%s25487_s13 + $0x608] ss:$12 sps:$4 sm:$0xff]  }
 0xf8d   :  { %18718 = vmatmul.mubr.msk.bf16.vlgmr.msra.gmra.mrb[216].mxu1 %vm5490_vm5, %v10714_v44  ;;  %v20161_v44 = vld [vmem:[%s25487_s13 + $0x4b0] ss:$12 sps:$4 sm:$0xff]  }
 0xf8e   :  { %10969 = vmatpush1.bf16.msra.mxu1 %v20107_v55  ;;  %11000 = vmatprep.mubr.bf16.mxu1 %v25594_v25  ;;  %v20170_v55 = vld [vmem:[%s25487_s13 + $0x4d0] ss:$12 sps:$4 sm:$0xff]  }
 0xf8f   :  { %10970 = vmatprep.subr.bf16.mxu1 %v20112_v11  ;;  %v9102_v11 = vld [vmem:[%s25486_s12 + $0xb8] sm:$0xff] }
 0xf90   :  { %18608 = vmatmul.mubr.msk.f32.gmra.mrb[186].mxu0 %vm234_vm2, %v9102_v11  ;;  %v20234_v11 = vld [vmem:[%s25487_s13 + $0x650] ss:$12 sps:$4 sm:$0xff]  }
 0xf91   :  { %18610 = vmatprep.mubr.msk.f32.mxu0 %vm20429_vm8, %v25595_v12 }
 0xf92   :  { %10971 = vmatpush1.bf16.msra.mxu1 %v20110_v50  ;;  %v20173_v50 = vld [vmem:[%s25487_s13 + $0x4e4] ss:$12 sps:$4 sm:$0xff]  }
 0xf93   :  { %10972 = vmatprep.subr.bf16.mxu1 %v20115_v60  ;;  %v20171_v60 = vld [vmem:[%s25487_s13 + $0x4e0] ss:$12 sps:$4 sm:$0xff]  }
 0xf96   :  { %10973 = vmatpush1.bf16.msra.mxu1 %v20113_v52  ;;  %v20176_v52 = vld [vmem:[%s25487_s13 + $0x4fc] ss:$12 sps:$4 sm:$0xff]  }
 0xf97   :  { %10974 = vmatprep.subr.bf16.mxu1 %v20118_v17  ;;  %v20174_v17 = vld [vmem:[%s25487_s13 + $0x4f8] ss:$12 sps:$4 sm:$0xff]  }
 0xf9a   :  { %10975 = vmatpush1.bf16.msra.mxu1 %v20116_v5  ;;  %v20179_v5 = vld [vmem:[%s25487_s13 + $0x514] ss:$12 sps:$4 sm:$0xff]  }
 0xf9b   :  { %18721 = vmatprep.subr.bf16.mxu1 %v25595_v12 }
 0xf9d   :  { %15807 = vmatmul.mubr.msk.bf16.vlgmr.msra.gmra.mrb[212].mxu1 %vm5490_vm5, %v10883_v27 }
 0xf9e   :  { %18722 = vmatpush3.bf16.msra.mxu1 %v20119_v38  ;;  %18729 = vmatprep.mubr.msk.bf16.mxu1 %vm20429_vm8, %v25595_v12  ;;  %v20182_v38 = vld [vmem:[%s25487_s13 + $0x52c] ss:$12 sps:$4 sm:$0xff]  }
 0xf9f   :  { %18723 = vmatprep.subr.bf16.mxu1 %v25595_v12 }
 0xfa2   :  { %18724 = vmatpush3.bf16.msra.mxu1 %v20120_v15  ;;  %v11559_v15 = vpack.c.bf16 %v24071_v8, %v24071_v8  ;;  %v20185_v8 = vld [vmem:[%s25487_s13 + $0x518] ss:$12 sps:$4 sm:$0xff]  }
 0xfa3   :  { %18725 = vmatprep.subr.bf16.mxu1 %v25595_v12 }
 0xfa6   :  { %18726 = vmatpush3.bf16.msra.mxu1 %v20121_v32  ;;  %v20183_v32 = vld [vmem:[%s25487_s13 + $0x4e8] ss:$12 sps:$4 sm:$0xff]  }
 0xfa7   :  { %18727 = vmatprep.subr.bf16.mxu1 %v25595_v12 }
 0xfaa   :  { %18728 = vmatpush3.bf16.msra.mxu1 %v20122_v18  ;;  %v24291_v18 = vpop.f32.mrb[174].mxu0 }
 0xfab   :  { %11137 = vmatprep.subr.bf16.mxu1 %v20125_v22  ;;  %v18591_v49 = vpop.f32.mrb[175].mxu0  ;;  %v20184_v22 = vld [vmem:[%s25487_s13 + $0x500] ss:$12 sps:$4 sm:$0xff]  }
 0xfad   :  { %18730 = vmatmul.mubr.msk.bf16.vlgmr.msra.gmra.mrb[216].mxu1 %vm5490_vm5, %v10883_v27  ;;  %v20177_v27 = vld [vmem:[%s25487_s13 + $0x510] ss:$12 sps:$4 sm:$0xff]  }
 0xfae   :  { %11138 = vmatpush1.bf16.msra.mxu1 %v20123_v45  ;;  %11169 = vmatprep.mubr.bf16.mxu1 %v25594_v25  ;;  %v20186_v45 = vld [vmem:[%s25487_s13 + $0x530] ss:$12 sps:$4 sm:$0xff]  }
 0xfaf   :  { %11139 = vmatprep.subr.bf16.mxu1 %v20128_v57  ;;  %v9103_v57 = vld [vmem:[%s25486_s12 + $0xc0] sm:$0xff] }
 0xfb0   :  { %18611 = vmatmul.mubr.msk.f32.gmra.mrb[188].mxu0 %vm234_vm2, %v9103_v57  ;;  %v20253_v57 = vld [vmem:[%s25487_s13 + $0x6c4] ss:$12 sps:$4 sm:$0xff]  }
 0xfb1   :  { %18915 = vmatprep.mubr.msk.f32.mxu0 %vm20429_vm8, %v25595_v12 }
 0xfb2   :  { %11140 = vmatpush1.bf16.msra.mxu1 %v20126_v30  ;;  %v20189_v30 = vld [vmem:[%s25487_s13 + $0x544] ss:$12 sps:$4 sm:$0xff]  }
 0xfb3   :  { %11141 = vmatprep.subr.bf16.mxu1 %v20131_v16  ;;  %v20187_v16 = vld [vmem:[%s25487_s13 + $0x540] ss:$12 sps:$4 sm:$0xff]  }
 0xfb6   :  { %11142 = vmatpush1.bf16.msra.mxu1 %v20129_v35  ;;  %v20192_v35 = vld [vmem:[%s25487_s13 + $0x55c] ss:$12 sps:$4 sm:$0xff]  }
 0xfb7   :  { %11143 = vmatprep.subr.bf16.mxu1 %v20134_v51  ;;  %v20190_v51 = vld [vmem:[%s25487_s13 + $0x558] ss:$12 sps:$4 sm:$0xff]  }
 0xfba   :  { %11144 = vmatpush1.bf16.msra.mxu1 %v20132_v59  ;;  %v20195_v59 = vld [vmem:[%s25487_s13 + $0x574] ss:$12 sps:$4 sm:$0xff]  }
 0xfbb   :  { %18733 = vmatprep.subr.bf16.mxu1 %v25595_v12 }
 0xfbd   :  { %15837 = vmatmul.mubr.msk.bf16.vlgmr.msra.gmra.mrb[212].mxu1 %vm5490_vm5, %v11052_v20 }
 0xfbe   :  { %18734 = vmatpush3.bf16.msra.mxu1 %v20135_v54  ;;  %18741 = vmatprep.mubr.msk.bf16.mxu1 %vm20429_vm8, %v25595_v12  ;;  %v20198_v54 = vld [vmem:[%s25487_s13 + $0x58c] ss:$12 sps:$4 sm:$0xff]  }
 0xfbf   :  { %18735 = vmatprep.subr.bf16.mxu1 %v25595_v12 }
 0xfc2   :  { %18736 = vmatpush3.bf16.msra.mxu1 %v20136_v61  ;;  %v11728_v61 = vpack.c.bf16 %v24126_v31, %v24126_v31  ;;  %v20201_v31 = vld [vmem:[%s25487_s13 + $0x578] ss:$12 sps:$4 sm:$0xff]  }
 0xfc3   :  { %18737 = vmatprep.subr.bf16.mxu1 %v25595_v12 }
 0xfc6   :  { %18738 = vmatpush3.bf16.msra.mxu1 %v20137_v10  ;;  %v20199_v10 = vld [vmem:[%s25487_s13 + $0x548] ss:$12 sps:$4 sm:$0xff]  }
 0xfc7   :  { %18739 = vmatprep.subr.bf16.mxu1 %v25595_v12 }
 0xfca   :  { %18740 = vmatpush3.bf16.msra.mxu1 %v20138_v43  ;;  %v24346_v43 = vpop.f32.mrb[176].mxu0 }
 0xfcb   :  { %11306 = vmatprep.subr.bf16.mxu1 %v20141_v23  ;;  %v18594_v63 = vpop.f32.mrb[177].mxu0  ;;  %v20200_v23 = vld [vmem:[%s25487_s13 + $0x560] ss:$12 sps:$4 sm:$0xff]  }
 0xfcd   :  { %18742 = vmatmul.mubr.msk.bf16.vlgmr.msra.gmra.mrb[216].mxu1 %vm5490_vm5, %v11052_v20  ;;  %v20193_v20 = vld [vmem:[%s25487_s13 + $0x570] ss:$12 sps:$4 sm:$0xff]  }
 0xfce   :  { %11307 = vmatpush1.bf16.msra.mxu1 %v20139_v29  ;;  %11338 = vmatprep.mubr.bf16.mxu1 %v25594_v25  ;;  %v20202_v29 = vld [vmem:[%s25487_s13 + $0x590] ss:$12 sps:$4 sm:$0xff]  }
 0xfcf   :  { %11308 = vmatprep.subr.bf16.mxu1 %v20144_v13  ;;  %v20205_v13 = vld [vmem:[%s25487_s13 + $0x5a4] ss:$12 sps:$4 sm:$0xff]  }
 0xfd2   :  { %11309 = vmatpush1.bf16.msra.mxu1 %v20142_v3  ;;  %v20203_v3 = vld [vmem:[%s25487_s13 + $0x5a0] ss:$12 sps:$4 sm:$0xff]  }
 0xfd3   :  { %11310 = vmatprep.subr.bf16.mxu1 %v20147_v42  ;;  %v20208_v42 = vld [vmem:[%s25487_s13 + $0x5bc] ss:$12 sps:$4 sm:$0xff]  }
 0xfd6   :  { %11311 = vmatpush1.bf16.msra.mxu1 %v20145_v36  ;;  %v20206_v36 = vld [vmem:[%s25487_s13 + $0x5b8] ss:$12 sps:$4 sm:$0xff]  }
 0xfd7   :  { %11312 = vmatprep.subr.bf16.mxu1 %v20150_v46  ;;  %v20211_v46 = vld [vmem:[%s25487_s13 + $0x5d4] ss:$12 sps:$4 sm:$0xff]  }
 0xfda   :  { %11313 = vmatpush1.bf16.msra.mxu1 %v20148_v14  ;;  %v20209_v14 = vld [vmem:[%s25487_s13 + $0x5d0] ss:$12 sps:$4 sm:$0xff]  }
 0xfdb   :  { %18745 = vmatprep.subr.bf16.mxu1 %v25595_v12 }
 0xfdd   :  { %15867 = vmatmul.mubr.msk.bf16.vlgmr.msra.gmra.mrb[212].mxu1 %vm5490_vm5, %v11221_v33 }
 0xfde   :  { %18746 = vmatpush3.bf16.msra.mxu1 %v20151_v62  ;;  %18753 = vmatprep.mubr.msk.bf16.mxu1 %vm20429_vm8, %v25595_v12  ;;  %v20212_v62 = vld [vmem:[%s25487_s13 + $0x5e8] ss:$12 sps:$4 sm:$0xff]  }
 0xfdf   :  { %18747 = vmatprep.subr.bf16.mxu1 %v25595_v12 }
 0xfe2   :  { %18748 = vmatpush3.bf16.msra.mxu1 %v20152_v41  ;;  %v20215_v41 = vld [vmem:[%s25487_s13 + $0x5a8] ss:$12 sps:$4 sm:$0xff]  }
 0xfe3   :  { %18749 = vmatprep.subr.bf16.mxu1 %v25595_v12 }
 0xfe6   :  { %18750 = vmatpush3.bf16.msra.mxu1 %v20153_v19  ;;  %v24395_v19 = vpop.f32.mrb[178].mxu0 }
 0xfe7   :  { %18751 = vmatprep.subr.bf16.mxu1 %v25595_v12 }
 0xfea   :  { %18752 = vmatpush3.bf16.msra.mxu1 %v20154_v53  ;;  %v18597_v53 = vpop.f32.mrb[179].mxu0 }
 0xfeb   :  { %11475 = vmatprep.subr.bf16.mxu1 %v20157_v2  ;;  %v20218_v2 = vld [vmem:[%s25487_s13 + $0x5f0] ss:$12 sps:$4 sm:$0xff]  }
 0xfed   :  { %18754 = vmatmul.mubr.msk.bf16.vlgmr.msra.gmra.mrb[216].mxu1 %vm5490_vm5, %v11221_v33  ;;  %v20214_v33 = vld [vmem:[%s25487_s13 + $0x5ec] ss:$12 sps:$4 sm:$0xff]  }
 0xfee   :  { %11476 = vmatpush1.bf16.msra.mxu1 %v20155_v21  ;;  %11507 = vmatprep.mubr.bf16.mxu1 %v25594_v25  ;;  %v20221_v21 = vld [vmem:[%s25487_s13 + $0x604] ss:$12 sps:$4 sm:$0xff]  }
 0xfef   :  { %11477 = vmatprep.subr.bf16.mxu1 %v20160_v6  ;;  %v20219_v6 = vld [vmem:[%s25487_s13 + $0x600] ss:$12 sps:$4 sm:$0xff]  }
 0xff2   :  { %11478 = vmatpush1.bf16.msra.mxu1 %v20158_v7  ;;  %v20224_v7 = vld [vmem:[%s25487_s13 + $0x61c] ss:$12 sps:$4 sm:$0xff]  }
 0xff3   :  { %11479 = vmatprep.subr.bf16.mxu1 %v20163_v48  ;;  %v20222_v48 = vld [vmem:[%s25487_s13 + $0x618] ss:$12 sps:$4 sm:$0xff]  }
 0xff6   :  { %11480 = vmatpush1.bf16.msra.mxu1 %v20161_v44  ;;  %v20227_v44 = vld [vmem:[%s25487_s13 + $0x634] ss:$12 sps:$4 sm:$0xff]  }
 0xff7   :  { %11481 = vmatprep.subr.bf16.mxu1 %v20166_v40  ;;  %v20225_v40 = vld [vmem:[%s25487_s13 + $0x630] ss:$12 sps:$4 sm:$0xff]  }
 0xffa   :  { %11482 = vmatpush1.bf16.msra.mxu1 %v20164_v1  ;;  %v20230_v1 = vld [vmem:[%s25487_s13 + $0x64c] ss:$12 sps:$4 sm:$0xff]  }
 0xffb   :  { %18757 = vmatprep.subr.bf16.mxu1 %v25595_v12 }
 0xffd   :  { %15897 = vmatmul.mubr.msk.bf16.vlgmr.msra.gmra.mrb[212].mxu1 %vm5490_vm5, %v11390_v56 }
 0xffe   :  { %18758 = vmatpush3.bf16.msra.mxu1 %v20167_v37  ;;  %18765 = vmatprep.mubr.msk.bf16.mxu1 %vm20429_vm8, %v25595_v12  ;;  %v12066_v37 = vpack.c.bf16 %v24236_v28, %v24236_v28  ;;  %v20233_v28 = vld [vmem:[%s25487_s13 + $0x638] ss:$12 sps:$4 sm:$0xff]  }
 0xfff   :  { %18759 = vmatprep.subr.bf16.mxu1 %v25595_v12 }
0x1002   :  { %18760 = vmatpush3.bf16.msra.mxu1 %v20168_v26 }
0x1003   :  { %18761 = vmatprep.subr.bf16.mxu1 %v25595_v12  ;;  %v24444_v26 = vpop.f32.mrb[180].mxu0 }
0x1006   :  { %18762 = vmatpush3.bf16.msra.mxu1 %v20169_v24  ;;  %v18600_v24 = vpop.f32.mrb[181].mxu0 }
0x1007   :  { %18763 = vmatprep.subr.bf16.mxu1 %v25595_v12 }
0x100a   :  { %18764 = vmatpush3.bf16.msra.mxu1 %v20170_v55  ;;  %v20232_v55 = vld [vmem:[%s25487_s13 + $0x620] ss:$12 sps:$4 sm:$0xff]  }
0x100b   :  { %11644 = vmatprep.subr.bf16.mxu1 %v20173_v50  ;;  %v20237_v50 = vld [vmem:[%s25487_s13 + $0x664] ss:$12 sps:$4 sm:$0xff]  }
0x100d   :  { %18766 = vmatmul.mubr.msk.bf16.vlgmr.msra.gmra.mrb[216].mxu1 %vm5490_vm5, %v11390_v56  ;;  %v20228_v56 = vld [vmem:[%s25487_s13 + $0x648] ss:$12 sps:$4 sm:$0xff]  }
0x100e   :  { %11645 = vmatpush1.bf16.msra.mxu1 %v20171_v60  ;;  %11676 = vmatprep.mubr.bf16.mxu1 %v25594_v25  ;;  %v20235_v60 = vld [vmem:[%s25487_s13 + $0x660] ss:$12 sps:$4 sm:$0xff]  }
0x100f   :  { %11646 = vmatprep.subr.bf16.mxu1 %v20176_v52  ;;  %v20240_v52 = vld [vmem:[%s25487_s13 + $0x67c] ss:$12 sps:$4 sm:$0xff]  }
0x1012   :  { %11647 = vmatpush1.bf16.msra.mxu1 %v20174_v17  ;;  %v20238_v17 = vld [vmem:[%s25487_s13 + $0x678] ss:$12 sps:$4 sm:$0xff]  }
0x1013   :  { %11648 = vmatprep.subr.bf16.mxu1 %v20179_v5  ;;  %v20243_v5 = vld [vmem:[%s25487_s13 + $0x694] ss:$12 sps:$4 sm:$0xff]  }
0x1016   :  { %11649 = vmatpush1.bf16.msra.mxu1 %v20177_v27  ;;  %v20241_v27 = vld [vmem:[%s25487_s13 + $0x690] ss:$12 sps:$4 sm:$0xff]  }
0x1017   :  { %11650 = vmatprep.subr.bf16.mxu1 %v20182_v38  ;;  %v20246_v38 = vld [vmem:[%s25487_s13 + $0x6ac] ss:$12 sps:$4 sm:$0xff]  }
0x101a   :  { %11651 = vmatpush1.bf16.msra.mxu1 %v20180_v4  ;;  %v20244_v4 = vld [vmem:[%s25487_s13 + $0x6a8] ss:$12 sps:$4 sm:$0xff]  }
0x101b   :  { %18769 = vmatprep.subr.bf16.mxu1 %v25595_v12 }
0x101d   :  { %15927 = vmatmul.mubr.msk.bf16.vlgmr.msra.gmra.mrb[212].mxu1 %vm5490_vm5, %v11559_v15 }
0x101e   :  { %18770 = vmatpush3.bf16.msra.mxu1 %v20183_v32  ;;  %18777 = vmatprep.mubr.msk.bf16.mxu1 %vm20429_vm8, %v25595_v12  ;;  %v20247_v32 = vld [vmem:[%s25487_s13 + $0x668] ss:$12 sps:$4 sm:$0xff]  }
0x101f   :  { %18771 = vmatprep.subr.bf16.mxu1 %v25595_v12 }
0x1022   :  { %18772 = vmatpush3.bf16.msra.mxu1 %v20184_v22 }
0x1023   :  { %18773 = vmatprep.subr.bf16.mxu1 %v25595_v12  ;;  %v24493_v49 = vpop.f32.mrb[182].mxu0 }
0x1024   :  { %v18603_v22 = vpop.f32.mrb[183].mxu0 }
0x1025   :  { %v20314_v22 = vld [vmem:[%s25487_s13 + $0x830] ss:$12 sps:$4 sm:$0xff]  }
0x1026   :  { %18774 = vmatpush3.bf16.msra.mxu1 %v20185_v8  ;;  %v20248_v8 = vld [vmem:[%s25487_s13 + $0x680] ss:$12 sps:$4 sm:$0xff]  }
0x1027   :  { %18775 = vmatprep.subr.bf16.mxu1 %v25595_v12 }
0x102a   :  { %18776 = vmatpush3.bf16.msra.mxu1 %v20186_v45  ;;  %v20250_v45 = vld [vmem:[%s25487_s13 + $0x6b0] ss:$12 sps:$4 sm:$0xff]  }
0x102b   :  { %11813 = vmatprep.subr.bf16.mxu1 %v20189_v30  ;;  %v20251_v30 = vld [vmem:[%s25487_s13 + $0x6c0] ss:$12 sps:$4 sm:$0xff]  }
0x102d   :  { %18778 = vmatmul.mubr.msk.bf16.vlgmr.msra.gmra.mrb[216].mxu1 %vm5490_vm5, %v11559_v15  ;;  %v12235_v15 = vpack.c.bf16 %v24291_v18, %v24291_v18  ;;  %v20249_v18 = vld [vmem:[%s25487_s13 + $0x698] ss:$12 sps:$4 sm:$0xff]  }
0x102e   :  { %11814 = vmatpush1.bf16.msra.mxu1 %v20187_v16  ;;  %11845 = vmatprep.mubr.bf16.mxu1 %v25594_v25  ;;  %v20256_v16 = vld [vmem:[%s25487_s13 + $0x6dc] ss:$12 sps:$4 sm:$0xff]  }
0x102f   :  { %11815 = vmatprep.subr.bf16.mxu1 %v20192_v35  ;;  %v20254_v35 = vld [vmem:[%s25487_s13 + $0x6d8] ss:$12 sps:$4 sm:$0xff]  }
0x1032   :  { %11816 = vmatpush1.bf16.msra.mxu1 %v20190_v51  ;;  %v20259_v51 = vld [vmem:[%s25487_s13 + $0x6f4] ss:$12 sps:$4 sm:$0xff]  }
0x1033   :  { %11817 = vmatprep.subr.bf16.mxu1 %v20195_v59  ;;  %v20257_v59 = vld [vmem:[%s25487_s13 + $0x6f0] ss:$12 sps:$4 sm:$0xff]  }
0x1036   :  { %11818 = vmatpush1.bf16.msra.mxu1 %v20193_v20  ;;  %v20262_v20 = vld [vmem:[%s25487_s13 + $0x70c] ss:$12 sps:$4 sm:$0xff]  }
0x1037   :  { %11819 = vmatprep.subr.bf16.mxu1 %v20198_v54  ;;  %v20260_v54 = vld [vmem:[%s25487_s13 + $0x708] ss:$12 sps:$4 sm:$0xff]  }
0x103a   :  { %11820 = vmatpush1.bf16.msra.mxu1 %v20196_v39  ;;  %v12404_v39 = vpack.c.bf16 %v24346_v43, %v24346_v43  ;;  %v20265_v43 = vld [vmem:[%s25487_s13 + $0x6f8] ss:$12 sps:$4 sm:$0xff]  }
0x103b   :  { %18781 = vmatprep.subr.bf16.mxu1 %v25595_v12 }
0x103d   :  { %15957 = vmatmul.mubr.msk.bf16.vlgmr.msra.gmra.mrb[212].mxu1 %vm5490_vm5, %v11728_v61 }
0x103e   :  { %18782 = vmatpush3.bf16.msra.mxu1 %v20199_v10  ;;  %18789 = vmatprep.mubr.msk.bf16.mxu1 %vm20429_vm8, %v25595_v12 }
0x103f   :  { %18783 = vmatprep.subr.bf16.mxu1 %v25595_v12 }
0x1042   :  { %18784 = vmatpush3.bf16.msra.mxu1 %v20200_v23  ;;  %v20264_v23 = vld [vmem:[%s25487_s13 + $0x6e0] ss:$12 sps:$4 sm:$0xff]  }
0x1043   :  { %18785 = vmatprep.subr.bf16.mxu1 %v25595_v12  ;;  %v24542_v10 = vpop.f32.mrb[184].mxu0 }
0x1044   :  { %v18606_v63 = vpop.f32.mrb[185].mxu0 }
0x1045   :  { %v20331_v63 = vld [vmem:[%s25487_s13 + $0x8a0] ss:$12 sps:$4 sm:$0xff]  }
0x1046   :  { %18786 = vmatpush3.bf16.msra.mxu1 %v20201_v31  ;;  %v20266_v31 = vld [vmem:[%s25487_s13 + $0x710] ss:$12 sps:$4 sm:$0xff]  }
0x1047   :  { %18787 = vmatprep.subr.bf16.mxu1 %v25595_v12 }
0x104a   :  { %18788 = vmatpush3.bf16.msra.mxu1 %v20202_v29  ;;  %v20269_v29 = vld [vmem:[%s25487_s13 + $0x724] ss:$12 sps:$4 sm:$0xff]  }
0x104b   :  { %11982 = vmatprep.subr.bf16.mxu1 %v20205_v13  ;;  %v20267_v13 = vld [vmem:[%s25487_s13 + $0x720] ss:$12 sps:$4 sm:$0xff]  }
0x104d   :  { %18790 = vmatmul.mubr.msk.bf16.vlgmr.msra.gmra.mrb[216].mxu1 %vm5490_vm5, %v11728_v61  ;;  %v20263_v61 = vld [vmem:[%s25487_s13 + $0x6c8] ss:$12 sps:$4 sm:$0xff]  }
0x104e   :  { %11983 = vmatpush1.bf16.msra.mxu1 %v20203_v3  ;;  %12014 = vmatprep.mubr.bf16.mxu1 %v25594_v25  ;;  %v20272_v3 = vld [vmem:[%s25487_s13 + $0x73c] ss:$12 sps:$4 sm:$0xff]  }
0x104f   :  { %11984 = vmatprep.subr.bf16.mxu1 %v20208_v42  ;;  %v20270_v42 = vld [vmem:[%s25487_s13 + $0x738] ss:$12 sps:$4 sm:$0xff]  }
0x1052   :  { %11985 = vmatpush1.bf16.msra.mxu1 %v20206_v36  ;;  %v20275_v36 = vld [vmem:[%s25487_s13 + $0x754] ss:$12 sps:$4 sm:$0xff]  }
0x1053   :  { %11986 = vmatprep.subr.bf16.mxu1 %v20211_v46  ;;  %v20273_v46 = vld [vmem:[%s25487_s13 + $0x750] ss:$12 sps:$4 sm:$0xff]  }
0x1056   :  { %11987 = vmatpush1.bf16.msra.mxu1 %v20209_v14  ;;  %v20278_v14 = vld [vmem:[%s25487_s13 + $0x76c] ss:$12 sps:$4 sm:$0xff]  }
0x1057   :  { %11988 = vmatprep.subr.bf16.mxu1 %v20214_v33  ;;  %v20276_v33 = vld [vmem:[%s25487_s13 + $0x768] ss:$12 sps:$4 sm:$0xff]  }
0x105a   :  { %11989 = vmatpush1.bf16.msra.mxu1 %v20212_v62  ;;  %v12573_v62 = vpack.c.bf16 %v24395_v19, %v24395_v19  ;;  %v20281_v19 = vld [vmem:[%s25487_s13 + $0x758] ss:$12 sps:$4 sm:$0xff]  }
0x105b   :  { %18793 = vmatprep.subr.bf16.mxu1 %v25595_v12 }
0x105d   :  { %15987 = vmatmul.mubr.msk.bf16.vlgmr.msra.gmra.mrb[212].mxu1 %vm5490_vm5, %v11897_v47 }
0x105e   :  { %18794 = vmatpush3.bf16.msra.mxu1 %v20215_v41  ;;  %18801 = vmatprep.mubr.msk.bf16.mxu1 %vm20429_vm8, %v25595_v12 }
0x105f   :  { %18795 = vmatprep.subr.bf16.mxu1 %v25595_v12 }
0x1062   :  { %18796 = vmatpush3.bf16.msra.mxu1 %v20216_v58  ;;  %v20280_v58 = vld [vmem:[%s25487_s13 + $0x740] ss:$12 sps:$4 sm:$0xff]  }
0x1063   :  { %18797 = vmatprep.subr.bf16.mxu1 %v25595_v12  ;;  %v24591_v41 = vpop.f32.mrb[186].mxu0 }
0x1064   :  { %v18609_v53 = vpop.f32.mrb[187].mxu0 }
0x1065   :  { %v20350_v53 = vld [vmem:[%s25487_s13 + $0x918] ss:$12 sps:$4 sm:$0xff]  }
0x1066   :  { %18798 = vmatpush3.bf16.msra.mxu1 %v20217_v0  ;;  %v20282_v0 = vld [vmem:[%s25487_s13 + $0x770] ss:$12 sps:$4 sm:$0xff]  }
0x1067   :  { %18799 = vmatprep.subr.bf16.mxu1 %v25595_v12 }
0x106a   :  { %18800 = vmatpush3.bf16.msra.mxu1 %v20218_v2  ;;  %v20285_v2 = vld [vmem:[%s25487_s13 + $0x784] ss:$12 sps:$4 sm:$0xff]  }
0x106b   :  { %12151 = vmatprep.subr.bf16.mxu1 %v20221_v21  ;;  %v20283_v21 = vld [vmem:[%s25487_s13 + $0x780] ss:$12 sps:$4 sm:$0xff]  }
0x106d   :  { %18802 = vmatmul.mubr.msk.bf16.vlgmr.msra.gmra.mrb[216].mxu1 %vm5490_vm5, %v11897_v47  ;;  %v20279_v47 = vld [vmem:[%s25487_s13 + $0x728] ss:$12 sps:$4 sm:$0xff]  }
0x106e   :  { %12152 = vmatpush1.bf16.msra.mxu1 %v20219_v6  ;;  %12183 = vmatprep.mubr.bf16.mxu1 %v25594_v25  ;;  %v20288_v6 = vld [vmem:[%s25487_s13 + $0x79c] ss:$12 sps:$4 sm:$0xff]  }
0x106f   :  { %12153 = vmatprep.subr.bf16.mxu1 %v20224_v7  ;;  %v20286_v7 = vld [vmem:[%s25487_s13 + $0x798] ss:$12 sps:$4 sm:$0xff]  }
0x1072   :  { %12154 = vmatpush1.bf16.msra.mxu1 %v20222_v48  ;;  %v20291_v48 = vld [vmem:[%s25487_s13 + $0x7b4] ss:$12 sps:$4 sm:$0xff]  }
0x1073   :  { %12155 = vmatprep.subr.bf16.mxu1 %v20227_v44  ;;  %v20289_v44 = vld [vmem:[%s25487_s13 + $0x7b0] ss:$12 sps:$4 sm:$0xff]  }
0x1076   :  { %12156 = vmatpush1.bf16.msra.mxu1 %v20225_v40  ;;  %v20294_v40 = vld [vmem:[%s25487_s13 + $0x7cc] ss:$12 sps:$4 sm:$0xff]  }
0x1077   :  { %12157 = vmatprep.subr.bf16.mxu1 %v20230_v1  ;;  %v20292_v1 = vld [vmem:[%s25487_s13 + $0x7c8] ss:$12 sps:$4 sm:$0xff]  }
0x107a   :  { %12158 = vmatpush1.bf16.msra.mxu1 %v20228_v56  ;;  %v12742_v56 = vpack.c.bf16 %v24444_v26, %v24444_v26  ;;  %v20297_v26 = vld [vmem:[%s25487_s13 + $0x7b8] ss:$12 sps:$4 sm:$0xff]  }
0x107b   :  { %18805 = vmatprep.subr.bf16.mxu1 %v25595_v12 }
0x107d   :  { %16017 = vmatmul.mubr.msk.bf16.vlgmr.msra.gmra.mrb[212].mxu1 %vm5490_vm5, %v12066_v37 }
0x107e   :  { %18806 = vmatpush3.bf16.msra.mxu1 %v20231_v34  ;;  %18813 = vmatprep.mubr.msk.bf16.mxu1 %vm20429_vm8, %v25595_v12 }
0x107f   :  { %18807 = vmatprep.subr.bf16.mxu1 %v25595_v12 }
0x1082   :  { %18808 = vmatpush3.bf16.msra.mxu1 %v20232_v55  ;;  %v20296_v55 = vld [vmem:[%s25487_s13 + $0x7a0] ss:$12 sps:$4 sm:$0xff]  }
0x1083   :  { %18809 = vmatprep.subr.bf16.mxu1 %v25595_v12  ;;  %v24640_v34 = vpop.f32.mrb[188].mxu0 }
0x1084   :  { %v18612_v24 = vpop.f32.mrb[189].mxu0 }
0x1086   :  { %18810 = vmatpush3.bf16.msra.mxu1 %v20233_v28  ;;  %v20298_v28 = vld [vmem:[%s25487_s13 + $0x7d0] ss:$12 sps:$4 sm:$0xff]  }
0x1087   :  { %18811 = vmatprep.subr.bf16.mxu1 %v25595_v12 }
0x108a   :  { %18812 = vmatpush3.bf16.msra.mxu1 %v20234_v11  ;;  %v20301_v11 = vld [vmem:[%s25487_s13 + $0x7e4] ss:$12 sps:$4 sm:$0xff]  }
0x108b   :  { %12320 = vmatprep.subr.bf16.mxu1 %v20237_v50  ;;  %v20299_v50 = vld [vmem:[%s25487_s13 + $0x7e0] ss:$12 sps:$4 sm:$0xff]  }
0x108d   :  { %18814 = vmatmul.mubr.msk.bf16.vlgmr.msra.gmra.mrb[216].mxu1 %vm5490_vm5, %v12066_v37  ;;  %v20295_v37 = vld [vmem:[%s25487_s13 + $0x788] ss:$12 sps:$4 sm:$0xff]  }
0x108e   :  { %12321 = vmatpush1.bf16.msra.mxu1 %v20235_v60  ;;  %12352 = vmatprep.mubr.bf16.mxu1 %v25594_v25  ;;  %v20304_v60 = vld [vmem:[%s25487_s13 + $0x7fc] ss:$12 sps:$4 sm:$0xff]  }
0x108f   :  { %12322 = vmatprep.subr.bf16.mxu1 %v20240_v52  ;;  %v20302_v52 = vld [vmem:[%s25487_s13 + $0x7f8] ss:$12 sps:$4 sm:$0xff]  }
0x1092   :  { %12323 = vmatpush1.bf16.msra.mxu1 %v20238_v17  ;;  %v20307_v17 = vld [vmem:[%s25487_s13 + $0x814] ss:$12 sps:$4 sm:$0xff]  }
0x1093   :  { %12324 = vmatprep.subr.bf16.mxu1 %v20243_v5  ;;  %v20305_v5 = vld [vmem:[%s25487_s13 + $0x810] ss:$12 sps:$4 sm:$0xff]  }
0x1096   :  { %12325 = vmatpush1.bf16.msra.mxu1 %v20241_v27  ;;  %v20310_v27 = vld [vmem:[%s25487_s13 + $0x82c] ss:$12 sps:$4 sm:$0xff]  }
0x1097   :  { %12326 = vmatprep.subr.bf16.mxu1 %v20246_v38  ;;  %v20308_v38 = vld [vmem:[%s25487_s13 + $0x828] ss:$12 sps:$4 sm:$0xff]  }
0x109a   :  { %12327 = vmatpush1.bf16.msra.mxu1 %v20244_v4  ;;  %v12911_v4 = vpack.c.bf16 %v24493_v49, %v24493_v49  ;;  %v20313_v49 = vld [vmem:[%s25487_s13 + $0x818] ss:$12 sps:$4 sm:$0xff]  }
0x109b   :  { %18817 = vmatprep.subr.bf16.mxu1 %v25595_v12 }
0x109d   :  { %16047 = vmatmul.mubr.msk.bf16.vlgmr.msra.gmra.mrb[212].mxu1 %vm5490_vm5, %v12235_v15 }
0x109e   :  { %18818 = vmatpush3.bf16.msra.mxu1 %v20247_v32  ;;  %18825 = vmatprep.mubr.msk.bf16.mxu1 %vm20429_vm8, %v25595_v12  ;;  %v20312_v32 = vld [vmem:[%s25487_s13 + $0x800] ss:$12 sps:$4 sm:$0xff]  }
0x109f   :  { %18819 = vmatprep.subr.bf16.mxu1 %v25595_v12 }
0x10a2   :  { %18820 = vmatpush3.bf16.msra.mxu1 %v20248_v8  ;;  %v20317_v8 = vld [vmem:[%s25487_s13 + $0x844] ss:$12 sps:$4 sm:$0xff]  }
0x10a3   :  { %18821 = vmatprep.subr.bf16.mxu1 %v25595_v12 }
0x10a6   :  { %18822 = vmatpush3.bf16.msra.mxu1 %v20249_v18  ;;  %v20315_v18 = vld [vmem:[%s25487_s13 + $0x840] ss:$12 sps:$4 sm:$0xff]  }
0x10a7   :  { %18823 = vmatprep.subr.bf16.mxu1 %v25595_v12 }
0x10aa   :  { %18824 = vmatpush3.bf16.msra.mxu1 %v20250_v45  ;;  %v20320_v45 = vld [vmem:[%s25487_s13 + $0x85c] ss:$12 sps:$4 sm:$0xff]  }
0x10ab   :  { %12489 = vmatprep.subr.bf16.mxu1 %v20253_v57  ;;  %v20318_v57 = vld [vmem:[%s25487_s13 + $0x858] ss:$12 sps:$4 sm:$0xff]  }
0x10ad   :  { %18826 = vmatmul.mubr.msk.bf16.vlgmr.msra.gmra.mrb[216].mxu1 %vm5490_vm5, %v12235_v15  ;;  %v20311_v15 = vld [vmem:[%s25487_s13 + $0x7e8] ss:$12 sps:$4 sm:$0xff]  }
0x10ae   :  { %12490 = vmatpush1.bf16.msra.mxu1 %v20251_v30  ;;  %12521 = vmatprep.mubr.bf16.mxu1 %v25594_v25  ;;  %v20323_v30 = vld [vmem:[%s25487_s13 + $0x874] ss:$12 sps:$4 sm:$0xff]  }
0x10af   :  { %12491 = vmatprep.subr.bf16.mxu1 %v20256_v16  ;;  %v20321_v16 = vld [vmem:[%s25487_s13 + $0x870] ss:$12 sps:$4 sm:$0xff]  }
0x10b2   :  { %12492 = vmatpush1.bf16.msra.mxu1 %v20254_v35  ;;  %v20326_v35 = vld [vmem:[%s25487_s13 + $0x88c] ss:$12 sps:$4 sm:$0xff]  }
0x10b3   :  { %12493 = vmatprep.subr.bf16.mxu1 %v20259_v51  ;;  %v20324_v51 = vld [vmem:[%s25487_s13 + $0x888] ss:$12 sps:$4 sm:$0xff]  }
0x10b6   :  { %12494 = vmatpush1.bf16.msra.mxu1 %v20257_v59  ;;  %v13080_v59 = vpack.c.bf16 %v24542_v10, %v24542_v10  ;;  %v20333_v10 = vld [vmem:[%s25487_s13 + $0x8a4] ss:$12 sps:$4 sm:$0xff]  }
0x10b7   :  { %12495 = vmatprep.subr.bf16.mxu1 %v20262_v20  ;;  %v20327_v20 = vld [vmem:[%s25487_s13 + $0x848] ss:$12 sps:$4 sm:$0xff]  }
0x10ba   :  { %12496 = vmatpush1.bf16.msra.mxu1 %v20260_v54  ;;  %v20328_v54 = vld [vmem:[%s25487_s13 + $0x860] ss:$12 sps:$4 sm:$0xff]  }
0x10bb   :  { %18829 = vmatprep.subr.bf16.mxu1 %v25595_v12 }
0x10bd   :  { %16077 = vmatmul.mubr.msk.bf16.vlgmr.msra.gmra.mrb[212].mxu1 %vm5490_vm5, %v12404_v39 }
0x10be   :  { %18830 = vmatpush3.bf16.msra.mxu1 %v20263_v61  ;;  %18837 = vmatprep.mubr.msk.bf16.mxu1 %vm20429_vm8, %v25595_v12  ;;  %v20330_v61 = vld [vmem:[%s25487_s13 + $0x890] ss:$12 sps:$4 sm:$0xff]  }
0x10bf   :  { %18831 = vmatprep.subr.bf16.mxu1 %v25595_v12 }
0x10c2   :  { %18832 = vmatpush3.bf16.msra.mxu1 %v20264_v23  ;;  %v20336_v23 = vld [vmem:[%s25487_s13 + $0x8bc] ss:$12 sps:$4 sm:$0xff]  }
0x10c3   :  { %18833 = vmatprep.subr.bf16.mxu1 %v25595_v12 }
0x10c6   :  { %18834 = vmatpush3.bf16.msra.mxu1 %v20265_v43  ;;  %v20334_v43 = vld [vmem:[%s25487_s13 + $0x8b8] ss:$12 sps:$4 sm:$0xff]  }
0x10c7   :  { %18835 = vmatprep.subr.bf16.mxu1 %v25595_v12 }
0x10ca   :  { %18836 = vmatpush3.bf16.msra.mxu1 %v20266_v31  ;;  %v20339_v31 = vld [vmem:[%s25487_s13 + $0x8d4] ss:$12 sps:$4 sm:$0xff]  }
0x10cb   :  { %12658 = vmatprep.subr.bf16.mxu1 %v20269_v29  ;;  %v20337_v29 = vld [vmem:[%s25487_s13 + $0x8d0] ss:$12 sps:$4 sm:$0xff]  }
0x10cd   :  { %18838 = vmatmul.mubr.msk.bf16.vlgmr.msra.gmra.mrb[216].mxu1 %vm5490_vm5, %v12404_v39  ;;  %v20329_v39 = vld [vmem:[%s25487_s13 + $0x878] ss:$12 sps:$4 sm:$0xff]  }
0x10ce   :  { %12659 = vmatpush1.bf16.msra.mxu1 %v20267_v13  ;;  %12690 = vmatprep.mubr.bf16.mxu1 %v25594_v25  ;;  %v20342_v13 = vld [vmem:[%s25487_s13 + $0x8ec] ss:$12 sps:$4 sm:$0xff]  }
0x10cf   :  { %12660 = vmatprep.subr.bf16.mxu1 %v20272_v3  ;;  %v20340_v3 = vld [vmem:[%s25487_s13 + $0x8e8] ss:$12 sps:$4 sm:$0xff]  }
0x10d2   :  { %12661 = vmatpush1.bf16.msra.mxu1 %v20270_v42  ;;  %v13249_v42 = vpack.c.bf16 %v24591_v41, %v24591_v41  ;;  %v20352_v41 = vld [vmem:[%s25487_s13 + $0x91c] ss:$12 sps:$4 sm:$0xff]  }
0x10d3   :  { %12662 = vmatprep.subr.bf16.mxu1 %v20275_v36  ;;  %v20343_v36 = vld [vmem:[%s25487_s13 + $0x8a8] ss:$12 sps:$4 sm:$0xff]  }
0x10d6   :  { %12663 = vmatpush1.bf16.msra.mxu1 %v20273_v46  ;;  %v20344_v46 = vld [vmem:[%s25487_s13 + $0x8c0] ss:$12 sps:$4 sm:$0xff]  }
0x10d7   :  { %12664 = vmatprep.subr.bf16.mxu1 %v20278_v14  ;;  %v20345_v14 = vld [vmem:[%s25487_s13 + $0x8d8] ss:$12 sps:$4 sm:$0xff]  }
0x10da   :  { %12665 = vmatpush1.bf16.msra.mxu1 %v20276_v33  ;;  %v20346_v33 = vld [vmem:[%s25487_s13 + $0x8f0] ss:$12 sps:$4 sm:$0xff]  }
0x10db   :  { %18841 = vmatprep.subr.bf16.mxu1 %v25595_v12 }
0x10dd   :  { %16107 = vmatmul.mubr.msk.bf16.vlgmr.msra.gmra.mrb[212].mxu1 %vm5490_vm5, %v12573_v62 }
0x10de   :  { %18842 = vmatpush3.bf16.msra.mxu1 %v20279_v47  ;;  %18849 = vmatprep.mubr.msk.bf16.mxu1 %vm20429_vm8, %v25595_v12  ;;  %v20347_v47 = vld [vmem:[%s25487_s13 + $0x900] ss:$12 sps:$4 sm:$0xff]  }
0x10df   :  { %18843 = vmatprep.subr.bf16.mxu1 %v25595_v12 }
0x10e2   :  { %18844 = vmatpush3.bf16.msra.mxu1 %v20280_v58  ;;  %v20355_v58 = vld [vmem:[%s25487_s13 + $0x934] ss:$12 sps:$4 sm:$0xff]  }
0x10e3   :  { %18845 = vmatprep.subr.bf16.mxu1 %v25595_v12 }
0x10e6   :  { %18846 = vmatpush3.bf16.msra.mxu1 %v20281_v19  ;;  %v20353_v19 = vld [vmem:[%s25487_s13 + $0x930] ss:$12 sps:$4 sm:$0xff]  }
0x10e7   :  { %18847 = vmatprep.subr.bf16.mxu1 %v25595_v12 }
0x10ea   :  { %18848 = vmatpush3.bf16.msra.mxu1 %v20282_v0  ;;  %v20358_v0 = vld [vmem:[%s25487_s13 + $0x94c] ss:$12 sps:$4 sm:$0xff]  }
0x10eb   :  { %12827 = vmatprep.subr.bf16.mxu1 %v20285_v2  ;;  %v13418_v2 = vpack.c.bf16 %v24640_v34, %v24640_v34 }
0x10ed   :  { %18850 = vmatmul.mubr.msk.bf16.vlgmr.msra.gmra.mrb[216].mxu1 %vm5490_vm5, %v12573_v62  ;;  %v20349_v62 = vld [vmem:[%s25487_s13 + $0x904] ss:$12 sps:$4 sm:$0xff]  }
0x10ee   :  { %12828 = vmatpush1.bf16.msra.mxu1 %v20283_v21  ;;  %12859 = vmatprep.mubr.bf16.mxu1 %v25594_v25  ;;  %v20359_v21 = vld [vmem:[%s25487_s13 + $0x908] ss:$12 sps:$4 sm:$0xff]  }
0x10ef   :  { %12829 = vmatprep.subr.bf16.mxu1 %v20288_v6  ;;  %v20360_v6 = vld [vmem:[%s25487_s13 + $0x920] ss:$12 sps:$4 sm:$0xff]  }
0x10f2   :  { %12830 = vmatpush1.bf16.msra.mxu1 %v20286_v7  ;;  %v20361_v7 = vld [vmem:[%s25487_s13 + $0x938] ss:$12 sps:$4 sm:$0xff]  }
0x10f3   :  { %12831 = vmatprep.subr.bf16.mxu1 %v20291_v48  ;;  %v20362_v48 = vld [vmem:[%s25487_s13 + $0x950] ss:$12 sps:$4 sm:$0xff]  }
0x10f6   :  { %12832 = vmatpush1.bf16.msra.mxu1 %v20289_v44 }
0x10f7   :  { %12833 = vmatprep.subr.bf16.mxu1 %v20294_v40 }
0x10fa   :  { %12834 = vmatpush1.bf16.msra.mxu1 %v20292_v1 }
0x10fb   :  { %18853 = vmatprep.subr.bf16.mxu1 %v25595_v12 }
0x10fd   :  { %16137 = vmatmul.mubr.msk.bf16.vlgmr.msra.gmra.mrb[212].mxu1 %vm5490_vm5, %v12742_v56 }
0x10fe   :  { %18854 = vmatpush3.bf16.msra.mxu1 %v20295_v37  ;;  %18861 = vmatprep.mubr.msk.bf16.mxu1 %vm20429_vm8, %v25595_v12 }
0x10ff   :  { %18855 = vmatprep.subr.bf16.mxu1 %v25595_v12 }
0x1102   :  { %18856 = vmatpush3.bf16.msra.mxu1 %v20296_v55 }
0x1103   :  { %18857 = vmatprep.subr.bf16.mxu1 %v25595_v12 }
0x1106   :  { %18858 = vmatpush3.bf16.msra.mxu1 %v20297_v26 }
0x1107   :  { %18859 = vmatprep.subr.bf16.mxu1 %v25595_v12 }
0x110a   :  { %18860 = vmatpush3.bf16.msra.mxu1 %v20298_v28 }
0x110b   :  { %12996 = vmatprep.subr.bf16.mxu1 %v20301_v11 }
0x110d   :  { %18862 = vmatmul.mubr.msk.bf16.vlgmr.msra.gmra.mrb[216].mxu1 %vm5490_vm5, %v12742_v56 }
0x110e   :  { %12997 = vmatpush1.bf16.msra.mxu1 %v20299_v50  ;;  %13028 = vmatprep.mubr.bf16.mxu1 %v25594_v25 }
0x110f   :  { %12998 = vmatprep.subr.bf16.mxu1 %v20304_v60 }
0x1112   :  { %12999 = vmatpush1.bf16.msra.mxu1 %v20302_v52 }
0x1113   :  { %13000 = vmatprep.subr.bf16.mxu1 %v20307_v17 }
0x1116   :  { %13001 = vmatpush1.bf16.msra.mxu1 %v20305_v5 }
0x1117   :  { %13002 = vmatprep.subr.bf16.mxu1 %v20310_v27 }
0x111a   :  { %13003 = vmatpush1.bf16.msra.mxu1 %v20308_v38  ;;  %v13587_v38 = vld [vmem:[%s25490_s16] sm:$0xff] }
0x111b   :  { %18865 = vmatprep.subr.bf16.mxu1 %v25595_v12 }
0x111d   :  { %16167 = vmatmul.mubr.msk.bf16.vlgmr.msra.gmra.mrb[212].mxu1 %vm5490_vm5, %v12911_v4 }
0x111e   :  { %18866 = vmatpush3.bf16.msra.mxu1 %v20311_v15  ;;  %18873 = vmatprep.mubr.msk.bf16.mxu1 %vm20429_vm8, %v25595_v12 }
0x111f   :  { %18867 = vmatprep.subr.bf16.mxu1 %v25595_v12 }
0x1122   :  { %18868 = vmatpush3.bf16.msra.mxu1 %v20312_v32  ;;  %v16277_v32 = vld [vmem:[%s25491_s17 + $0x1c8] sm:$0xff] }
0x1123   :  { %18869 = vmatprep.subr.bf16.mxu1 %v25595_v12 }
0x1126   :  { %18870 = vmatpush3.bf16.msra.mxu1 %v20313_v49  ;;  %v16278_v49 = vld [vmem:[%s25491_s17 + $0x1d0] sm:$0xff] }
0x1127   :  { %18871 = vmatprep.subr.bf16.mxu1 %v25595_v12 }
0x112a   :  { %18872 = vmatpush3.bf16.msra.mxu1 %v20314_v22  ;;  %v19156_v22 = vpack.c.bf16 %v16278_v49, %v16277_v32 }
0x112b   :  { %13165 = vmatprep.subr.bf16.mxu1 %v20317_v8 }
0x112d   :  { %18874 = vmatmul.mubr.msk.bf16.vlgmr.msra.gmra.mrb[216].mxu1 %vm5490_vm5, %v12911_v4 }
0x112e   :  { %13166 = vmatpush1.bf16.msra.mxu1 %v20315_v18  ;;  %13197 = vmatprep.mubr.bf16.mxu1 %v25594_v25  ;;  %v16261_v18 = vld [vmem:[%s25491_s17 + $0x148] sm:$0xff] }
0x112f   :  { %13167 = vmatprep.subr.bf16.mxu1 %v20320_v45  ;;  %v16262_v45 = vld [vmem:[%s25491_s17 + $0x150] sm:$0xff] }
0x1132   :  { %13168 = vmatpush1.bf16.msra.mxu1 %v20318_v57 }
0x1133   :  { %13169 = vmatprep.subr.bf16.mxu1 %v20323_v30 }
0x1136   :  { %13170 = vmatpush1.bf16.msra.mxu1 %v20321_v16  ;;  %v19158_v16 = vpack.c.bf16 %v16262_v45, %v16261_v18 }
0x1137   :  { %13171 = vmatprep.subr.bf16.mxu1 %v20326_v35  ;;  %v16279_v35 = vld [vmem:[%s25491_s17 + $0x1d8] sm:$0xff] }
0x113a   :  { %13172 = vmatpush1.bf16.msra.mxu1 %v20324_v51  ;;  %v16280_v51 = vld [vmem:[%s25491_s17 + $0x1e0] sm:$0xff] }
0x113b   :  { %18877 = vmatprep.subr.bf16.mxu1 %v25595_v12 }
0x113d   :  { %16197 = vmatmul.mubr.msk.bf16.vlgmr.msra.gmra.mrb[212].mxu1 %vm5490_vm5, %v13080_v59 }
0x113e   :  { %18878 = vmatpush3.bf16.msra.mxu1 %v20327_v20  ;;  %18885 = vmatprep.mubr.msk.bf16.mxu1 %vm20429_vm8, %v25595_v12  ;;  %v13777_v20 = vld [vmem:[%s25489_s15] sm:$0xff] }
0x113f   :  { %18879 = vmatprep.subr.bf16.mxu1 %v25595_v12 }
0x1142   :  { %18880 = vmatpush3.bf16.msra.mxu1 %v20328_v54  ;;  %v19160_v54 = vpack.c.bf16 %v16280_v51, %v16279_v35 }
0x1143   :  { %18881 = vmatprep.subr.bf16.mxu1 %v25595_v12 }
0x1146   :  { %18882 = vmatpush3.bf16.msra.mxu1 %v20329_v39  ;;  %v16263_v39 = vld [vmem:[%s25491_s17 + $0x158] sm:$0xff] }
0x1147   :  { %18883 = vmatprep.subr.bf16.mxu1 %v25595_v12 }
0x114a   :  { %18884 = vmatpush3.bf16.msra.mxu1 %v20330_v61  ;;  %v16264_v61 = vld [vmem:[%s25491_s17 + $0x160] sm:$0xff] }
0x114b   :  { %13334 = vmatprep.subr.bf16.mxu1 %v20333_v10 }
0x114d   :  { %18886 = vmatmul.mubr.msk.bf16.vlgmr.msra.gmra.mrb[216].mxu1 %vm5490_vm5, %v13080_v59 }
0x114e   :  { %13335 = vmatpush1.bf16.msra.mxu1 %v20331_v63  ;;  %13366 = vmatprep.mubr.bf16.mxu1 %v25594_v25 }
0x114f   :  { %13336 = vmatprep.subr.bf16.mxu1 %v20336_v23  ;;  %v19162_v23 = vpack.c.bf16 %v16264_v61, %v16263_v39  ;;  %v16294_v39 = vld [vmem:[%s25491_s17 + $0x250] sm:$0xff] }
0x1152   :  { %13337 = vmatpush1.bf16.msra.mxu1 %v20334_v43 }
0x1153   :  { %13338 = vmatprep.subr.bf16.mxu1 %v20339_v31  ;;  %v16281_v31 = vld [vmem:[%s25491_s17 + $0x1e8] sm:$0xff] }
0x1156   :  { %13339 = vmatpush1.bf16.msra.mxu1 %v20337_v29  ;;  %v16282_v29 = vld [vmem:[%s25491_s17 + $0x1f0] sm:$0xff] }
0x1157   :  { %13340 = vmatprep.subr.bf16.mxu1 %v20342_v13  ;;  %v16265_v13 = vld [vmem:[%s25491_s17 + $0x168] sm:$0xff] }
0x115a   :  { %13341 = vmatpush1.bf16.msra.mxu1 %v20340_v3 }
0x115b   :  { %18889 = vmatprep.subr.bf16.mxu1 %v25595_v12 }
0x115d   :  { %16227 = vmatmul.mubr.msk.bf16.vlgmr.msra.gmra.mrb[212].mxu1 %vm5490_vm5, %v13249_v42 }
0x115e   :  { %18890 = vmatpush3.bf16.msra.mxu1 %v20343_v36  ;;  %18897 = vmatprep.mubr.msk.bf16.mxu1 %vm20429_vm8, %v25595_v12  ;;  %v16266_v36 = vld [vmem:[%s25491_s17 + $0x170] sm:$0xff] }
0x115f   :  { %18891 = vmatprep.subr.bf16.mxu1 %v25595_v12 }
0x1162   :  { %18892 = vmatpush3.bf16.msra.mxu1 %v20344_v46  ;;  %v16283_v46 = vld [vmem:[%s25491_s17 + $0x1f8] sm:$0xff] }
0x1163   :  { %18893 = vmatprep.subr.bf16.mxu1 %v25595_v12 }
0x1166   :  { %18894 = vmatpush3.bf16.msra.mxu1 %v20345_v14  ;;  %v16284_v14 = vld [vmem:[%s25491_s17 + $0x200] sm:$0xff] }
0x1167   :  { %18895 = vmatprep.subr.bf16.mxu1 %v25595_v12 }
0x116a   :  { %18896 = vmatpush3.bf16.msra.mxu1 %v20346_v33  ;;  %v19166_v33 = vpack.c.bf16 %v16266_v36, %v16265_v13 }
0x116b   :  { %13503 = vmatprep.subr.bf16.mxu1 %v20349_v62  ;;  %v19168_v62 = vpack.c.bf16 %v16284_v14, %v16283_v46  ;;  %v16299_v46 = vld [vmem:[%s25491_s17 + $0x278] sm:$0xff]  ;;  %v16300_v14 = vld [vmem:[%s25491_s17 + $0x280] sm:$0xff] }
0x116d   :  { %18898 = vmatmul.mubr.msk.bf16.vlgmr.msra.gmra.mrb[216].mxu1 %vm5490_vm5, %v13249_v42  ;;  %v19164_v42 = vpack.c.bf16 %v16282_v29, %v16281_v31 }
0x116e   :  { %13504 = vmatpush1.bf16.msra.mxu1 %v20347_v47  ;;  %13535 = vmatprep.mubr.bf16.mxu1 %v25594_v25  ;;  %v20356_v25 = vld [vmem:[%s25487_s13 + $0x948] ss:$12 sps:$4 sm:$0xff]   ;;  %v16267_v47 = vld [vmem:[%s25491_s17 + $0x178] sm:$0xff] }
0x116f   :  { %13505 = vmatprep.subr.bf16.mxu1 %v20352_v41  ;;  %v16268_v41 = vld [vmem:[%s25491_s17 + $0x180] sm:$0xff] }
0x1172   :  { %13506 = vmatpush1.bf16.msra.mxu1 %v20350_v53 }
0x1173   :  { %13507 = vmatprep.subr.bf16.mxu1 %v20355_v58  ;;  %v16285_v58 = vld [vmem:[%s25491_s17 + $0x208] sm:$0xff] }
0x1176   :  { %13508 = vmatpush1.bf16.msra.mxu1 %v20353_v19  ;;  %v16286_v19 = vld [vmem:[%s25491_s17 + $0x210] sm:$0xff] }
0x1177   :  { %13509 = vmatprep.subr.bf16.mxu1 %v20358_v0  ;;  %v19170_v0 = vpack.c.bf16 %v16268_v41, %v16267_v47  ;;  %v13805_v47 = vld [vmem:[%s25491_s17 + $0x80] sm:$0xff]  ;;  %v13806_v41 = vld [vmem:[%s25491_s17 + $0x88] sm:$0xff] }
0x117a   :  { %13510 = vmatpush1.bf16.msra.mxu1 %v20356_v25  ;;  %v19172_v25 = vpack.c.bf16 %v16286_v19, %v16285_v58  ;;  %v13789_v58 = vld [vmem:[%s25491_s17] sm:$0xff]  ;;  %v13790_v19 = vld [vmem:[%s25491_s17 + $0x8] sm:$0xff] }
0x117b   :  { %18901 = vmatprep.subr.bf16.mxu1 %v25595_v12 }
0x117d   :  { %16257 = vmatmul.mubr.msk.bf16.vlgmr.msra.gmra.mrb[212].mxu1 %vm5490_vm5, %v13418_v2 }
0x117e   :  { %18902 = vmatpush3.bf16.msra.mxu1 %v20359_v21  ;;  %18909 = vmatprep.mubr.msk.bf16.mxu1 %vm20429_vm8, %v25595_v12  ;;  %v16270_v21 = vld [vmem:[%s25491_s17 + $0x190] sm:$0xff] }
0x117f   :  { %18903 = vmatprep.subr.bf16.mxu1 %v25595_v12 }
0x1182   :  { %18904 = vmatpush3.bf16.msra.mxu1 %v20360_v6 }
0x1183   :  { %18905 = vmatprep.subr.bf16.mxu1 %v25595_v12 }
0x1186   :  { %18906 = vmatpush3.bf16.msra.mxu1 %v20361_v7  ;;  %v16287_v7 = vld [vmem:[%s25491_s17 + $0x218] sm:$0xff] }
0x1187   :  { %18907 = vmatprep.subr.bf16.mxu1 %v25595_v12 }
0x118a   :  { %18908 = vmatpush3.bf16.msra.mxu1 %v20362_v48  ;;  %v16288_v48 = vld [vmem:[%s25491_s17 + $0x220] sm:$0xff] }
0x118d   :  { %18910 = vmatmul.mubr.msk.bf16.vlgmr.msra.gmra.mrb[216].mxu1 %vm5490_vm5, %v13418_v2  ;;  %v16269_v2 = vld [vmem:[%s25491_s17 + $0x188] sm:$0xff] }
0x118e   :  { %v19174_v6 = vpack.c.bf16 %v16270_v21, %v16269_v2  ;;  %v16301_v2 = vld [vmem:[%s25491_s17 + $0x288] sm:$0xf]  ;;  %v19200_v21 = vpack.c.bf16 %v13806_v41, %v13805_v47  ;;  %v13827_v47 = vld [vmem:[%s25491_s17 + $0x130] sm:$0xff]  ;;  %v13828_v41 = vld [vmem:[%s25491_s17 + $0x138] sm:$0xff] }
0x1250   :  { %v24847_v44 = vpop.f32.mrb[212].mxu1 }
0x1251   :  { %v13594_v40 = vmul.f32 %v24847_v44, %v24847_v44  ;;  %v24851_v1 = vpop.f32.mrb[213].mxu1 }
0x1252   :  { %v13588_v56 = vadd.f32 %v24851_v1, %v24847_v44  ;;  %v13595_v37 = vmul.f32 %v24851_v1, %v24851_v1  ;;  %v13541_v34 = vpop.f32.mrb[214].mxu1 }
0x1253   :  { %v13542_v24 = vpop.f32.mrb[215].mxu1 }
0x1254   :  { %v13597_v55 = vadd.f32 %v13595_v37, %v13594_v40  ;;  %v19176_v40 = vpack.c.bf16 %v16288_v48, %v16287_v7  ;;  %v16272_v37 = vld [vmem:[%s25491_s17 + $0x1a0] sm:$0xff] }
0x1260   :  { %v24857_v26 = vpop.f32.mrb[216].mxu1 }
0x1261   :  { %v13590_v28 = vsel %vm13589_vm9, %v24857_v26, 0.0  ;;  %v13596_v11 = vmul.f32 %v24857_v26, %v24857_v26  ;;  %v18911_v50 = vpop.f32.mrb[217].mxu1 }
0x1262   :  { %v13581_v60 = vpop.f32.mrb[218].mxu1  ;;  %v13591_v52 = vadd.f32 %v13590_v28, %v13588_v56  ;;  %v16271_v56 = vld [vmem:[%s25491_s17 + $0x198] sm:$0xff]  ;;  %v16289_v28 = vld [vmem:[%s25491_s17 + $0x228] sm:$0xff] }
0x1263   :  { %v18912_v17 = vpop.f32.mrb[219].mxu1  ;;  %v13598_v5 = vsel %vm13589_vm9, %v13596_v11, 0.0  ;;  %v19178_v24 = vpack.c.bf16 %v16272_v37, %v16271_v56  ;;  %v16290_v11 = vld [vmem:[%s25491_s17 + $0x230] sm:$0xff]  ;;  %v16273_v60 = vld [vmem:[%s25491_s17 + $0x1a8] sm:$0xff]  ;;  %v13792_v56 = vld [vmem:[%s25491_s17 + $0x18] sm:$0xff] }
0x1264   :  { %13592 = vadd.xlane.f32.xlu1 %v13591_v52  ;;  %v13599_v27 = vadd.f32 %v13598_v5, %v13597_v55  ;;  %v13768_v55 = vld [vmem:[%s25488_s14] sm:$0xff]  ;;  %v19180_v50 = vpack.c.bf16 %v16290_v11, %v16289_v28  ;;  %v16274_v52 = vld [vmem:[%s25491_s17 + $0x1b0] sm:$0xff]  ;;  %v16291_v5 = vld [vmem:[%s25491_s17 + $0x238] sm:$0xff] }
0x1265   :  { %v19182_v17 = vpack.c.bf16 %v16274_v52, %v16273_v60  ;;  %v13809_v37 = vld [vmem:[%s25491_s17 + $0xa0] sm:$0xff]  ;;  %v13794_v11 = vld [vmem:[%s25491_s17 + $0x28] sm:$0xff]  ;;  %v13812_v60 = vld [vmem:[%s25491_s17 + $0xb8] sm:$0xff] }
0x1266   :  { %13600 = vadd.xlane.f32.xlu0 %v13599_v27  ;;  %v16292_v27 = vld [vmem:[%s25491_s17 + $0x240] sm:$0xff] }
0x1267   :  { %v13793_v28 = vld [vmem:[%s25491_s17 + $0x20] sm:$0xff] }
0x1268   :  { %v19210_v52 = vpack.c.bf16 %v13794_v11, %v13793_v28  ;;  %v16327_v28 = vld [vmem:[%s25491_s17 + $0x338] sm:$0xff] }
0x12f1   :  { %v13593_v4 = vpop.xlane.xlu1 %13592 }
0x12f2   :  { %18914 = vmatpush3.msra.mxu0 %v13593_v4  ;;  %v16275_v4 = vld [vmem:[%s25491_s17 + $0x1b8] sm:$0xff] }
0x12f3   :  { %v13601_v15 = vpop.xlane.xlu0 %13600  ;;  %18916 = vmatmul.mubr.msk.f32.vlgmr.msra.gmra.mrb[190].mxu0 %vm13602_vm10, %v13587_v38  ;;  %18918 = vmatprep.subr.mxu0 %v25595_v12 }
0x12f4   :  { %18919 = vmatpush3.msra.mxu0 %v13601_v15  ;;  %18920 = vmatprep.mubr.msk.f32.mxu0 %vm20429_vm8, %v25595_v12  ;;  %v16276_v15 = vld [vmem:[%s25491_s17 + $0x1c0] sm:$0xff] }
0x12f5   :  { %19157 = vmatprep.subr.bf16.mxu0 %v19156_v22  ;;  %v19186_v32 = vpack.c.bf16 %v16276_v15, %v16275_v4  ;;  %v13814_v4 = vld [vmem:[%s25491_s17 + $0xc8] sm:$0xff] }
0x12f7   :  { %18921 = vmatmul.mubr.msk.f32.vlgmr.msra.gmra.mrb[192].mxu0 %vm13602_vm10, %v13587_v38  ;;  %v19184_v38 = vpack.c.bf16 %v16292_v27, %v16291_v5  ;;  %v13795_v5 = vld [vmem:[%s25491_s17 + $0x30] sm:$0xff]  ;;  %v13796_v27 = vld [vmem:[%s25491_s17 + $0x38] sm:$0xff] }
0x12f8   :  { %19159 = vmatpush3.bf16.msra.mxu0 %v19158_v16  ;;  %v19214_v15 = vpack.c.bf16 %v13796_v27, %v13795_v5  ;;  %v16329_v5 = vld [vmem:[%s25491_s17 + $0x348] sm:$0xff] }
0x12f9   :  { %19161 = vmatprep.subr.bf16.mxu0 %v19160_v54  ;;  %v16293_v54 = vld [vmem:[%s25491_s17 + $0x248] sm:$0xff] }
0x12fc   :  { %19163 = vmatpush3.bf16.msra.mxu0 %v19162_v23  ;;  %v16295_v23 = vld [vmem:[%s25491_s17 + $0x258] sm:$0xff] }
0x12fd   :  { %19165 = vmatprep.subr.bf16.mxu0 %v19164_v42  ;;  %v16298_v42 = vld [vmem:[%s25491_s17 + $0x270] sm:$0xff] }
0x1300   :  { %19167 = vmatpush3.bf16.msra.mxu0 %v19166_v33 }
0x1301   :  { %19169 = vmatprep.subr.bf16.mxu0 %v19168_v62  ;;  %v19198_v62 = vpack.c.bf16 %v16300_v14, %v16299_v46  ;;  %v13825_v14 = vld [vmem:[%s25491_s17 + $0x120] sm:$0xff] }
0x1304   :  { %19171 = vmatpush3.bf16.msra.mxu0 %v19170_v0  ;;  %v13807_v0 = vld [vmem:[%s25491_s17 + $0x90] sm:$0xff] }
0x1305   :  { %19173 = vmatprep.subr.bf16.mxu0 %v19172_v25  ;;  %v13808_v25 = vld [vmem:[%s25491_s17 + $0x98] sm:$0xff] }
0x1306   :  { %v19204_v48 = vpack.c.bf16 %v13808_v25, %v13807_v0  ;;  %v16323_v0 = vld [vmem:[%s25491_s17 + $0x318] sm:$0xff]  ;;  %v16306_v25 = vld [vmem:[%s25491_s17 + $0x290] sm:$0xff] }
0x1308   :  { %19175 = vmatpush3.bf16.msra.mxu0 %v19174_v6  ;;  %v19202_v6 = vpack.c.bf16 %v13790_v19, %v13789_v58  ;;  %v19242_v58 = vpack.c.bf16 %v13828_v41, %v13827_v47  ;;  %v16322_v19 = vld [vmem:[%s25491_s17 + $0x310] sm:$0xff] }
0x1309   :  { %19177 = vmatprep.subr.bf16.mxu0 %v19176_v40  ;;  %v13791_v40 = vld [vmem:[%s25491_s17 + $0x10] sm:$0xff] }
0x130a   :  { %v16342_v41 = vld [vmem:[%s25491_s17 + $0x3b0] sm:$0xff] }
0x130c   :  { %19179 = vmatpush3.bf16.msra.mxu0 %v19178_v24  ;;  %v19206_v24 = vpack.c.bf16 %v13792_v56, %v13791_v40 }
0x130d   :  { %19181 = vmatprep.subr.bf16.mxu0 %v19180_v50  ;;  %v13811_v50 = vld [vmem:[%s25491_s17 + $0xb0] sm:$0xff] }
0x1310   :  { %19183 = vmatpush3.bf16.msra.mxu0 %v19182_v17  ;;  %v19212_v17 = vpack.c.bf16 %v13812_v60, %v13811_v50  ;;  %v16310_v60 = vld [vmem:[%s25491_s17 + $0x2b0] sm:$0xff] }
0x1311   :  { %19185 = vmatprep.subr.bf16.mxu0 %v19184_v38  ;;  %v13813_v38 = vld [vmem:[%s25491_s17 + $0xc0] sm:$0xff] }
0x1314   :  { %19187 = vmatpush3.bf16.msra.mxu0 %v19186_v32  ;;  %v19216_v32 = vpack.c.bf16 %v13814_v4, %v13813_v38  ;;  %v16312_v4 = vld [vmem:[%s25491_s17 + $0x2c0] sm:$0xff] }
0x1315   :  { %19188 = vmatprep.subr.bf16.mxu0 %v25593_v9 }
0x13c6   :  { %v13672_v8 = vpop.f32.mrb[190].mxu0 }
0x13c7   :  { %v13676_v57 = vmul.f32 0.0015432099, %v13672_v8  ;;  %v18917_v30 = vpop.f32.mrb[191].mxu0 }
0x13c9   :  { %13752 = vperm.xlu0 %19837, %v13676_v57   ;;  %v13748_v10 = vmul.f32 %v13676_v57, %v13676_v57 }
0x13ca   :  { %v13743_v59 = vpop.f32.mrb[192].mxu0 }
0x13cb   :  { %v13747_v63 = vmul.f32 0.0015432099, %v13743_v59  ;;  %v18922_v43 = vpop.f32.mrb[193].mxu0 }
0x13cc   :  { %v16296_v43 = vld [vmem:[%s25491_s17 + $0x260] sm:$0xff] }
0x13cd   :  { %v13749_v3 = vsub.f32 %v13747_v63, %v13748_v10  ;;  %13780 = vperm.xlu0 %19837, %v13777_v20   ;;  %v19189_v63 = vpack.c.bf16 %v16294_v39, %v16293_v54  ;;  %v19192_v29 = vpack.c.bf16 %v16296_v43, %v16295_v23  ;;  %v13801_v54 = vld [vmem:[%s25491_s17 + $0x60] sm:$0xff]  ;;  %v13802_v39 = vld [vmem:[%s25491_s17 + $0x68] sm:$0xff]  ;;  %v13803_v43 = vld [vmem:[%s25491_s17 + $0x70] sm:$0xff] }
0x13cf   :  { %v13758_v53 = vadd.f32 1e-05, %v13749_v3  ;;  %v16297_v3 = vld [vmem:[%s25491_s17 + $0x268] sm:$0xff] }
0x13d1   :  { %20395 = vrsqrt.f32 %v13758_v53 }
0x13db   :  { %v20396_v34 = vpop.eup %20395 }
0x13dc   :  { %13762 = vperm.xlu1 %19836, %v20396_v34   ;;  %v13810_v34 = vld [vmem:[%s25491_s17 + $0xa8] sm:$0xff] }
0x13e0   :  { %13771 = vperm.xlu1 %19836, %v13768_v55   ;;  %v19208_v55 = vpack.c.bf16 %v13810_v34, %v13809_v37  ;;  %v16308_v37 = vld [vmem:[%s25491_s17 + $0x2a0] sm:$0xff]  ;;  %v16309_v34 = vld [vmem:[%s25491_s17 + $0x2a8] sm:$0xff] }
0x13e1   :  { %v19250_v11 = vpack.c.bf16 %v16309_v34, %v16308_v37  ;;  %v16346_v37 = vld [vmem:[%s25491_s17 + $0x3d0] sm:$0xf] }
0x1448   :  { %v13753_v49 = vpop.permute.xlu0 %13752 }
0x1449   :  { %v13755_v8 = vsub.f32 %v24847_v44, %v13753_v49  ;;  %v13756_v18 = vsub.f32 %v24851_v1, %v13753_v49  ;;  %v13757_v31 = vsub.f32 %v24857_v26, %v13753_v49  ;;  %v19195_v26 = vpack.c.bf16 %v16298_v42, %v16297_v3  ;;  %v13797_v49 = vld [vmem:[%s25491_s17 + $0x40] sm:$0xff]  ;;  %v13822_v3 = vld [vmem:[%s25491_s17 + $0x108] sm:$0xff] }
0x144c   :  { %v13781_v51 = vpop.permute.xlu0 %13780 }
0x145b   :  { %v13763_v22 = vpop.permute.xlu1 %13762 }
0x145c   :  { %v13765_v45 = vmul.f32 %v13763_v22, %v13755_v8  ;;  %v13766_v57 = vmul.f32 %v13763_v22, %v13756_v18  ;;  %v13767_v13 = vmul.f32 %v13763_v22, %v13757_v31  ;;  %v13798_v22 = vld [vmem:[%s25491_s17 + $0x48] sm:$0xff]  ;;  %v13815_v8 = vld [vmem:[%s25491_s17 + $0xd0] sm:$0xff]  ;;  %v13816_v18 = vld [vmem:[%s25491_s17 + $0xd8] sm:$0xff] }
0x145d   :  { %v13804_v31 = vld [vmem:[%s25491_s17 + $0x78] sm:$0xff] }
0x145f   :  { %v13772_v30 = vpop.permute.xlu1 %13771 }
0x1460   :  { %v13774_v16 = vmul.f32 %v13772_v30, %v13765_v45  ;;  %v13775_v35 = vmul.f32 %v13772_v30, %v13766_v57  ;;  %v13776_v36 = vmul.f32 %v13772_v30, %v13767_v13  ;;  %v19218_v45 = vpack.c.bf16 %v13798_v22, %v13797_v49  ;;  %v13799_v30 = vld [vmem:[%s25491_s17 + $0x50] sm:$0xff]  ;;  %v13821_v13 = vld [vmem:[%s25491_s17 + $0x100] sm:$0xff]  ;;  %v16331_v49 = vld [vmem:[%s25491_s17 + $0x358] sm:$0xff] }
0x1461   :  { %v19220_v57 = vpack.c.bf16 %v13816_v18, %v13815_v8  ;;  %v19233_v42 = vpack.c.bf16 %v13822_v3, %v13821_v13  ;;  %v16314_v18 = vld [vmem:[%s25491_s17 + $0x2d0] sm:$0xff]  ;;  %v16320_v13 = vld [vmem:[%s25491_s17 + $0x300] sm:$0xff]  ;;  %v16321_v3 = vld [vmem:[%s25491_s17 + $0x308] sm:$0xff] }
0x1462   :  { %v13783_v59 = vadd.f32 %v13781_v51, %v13774_v16  ;;  %v13784_v20 = vadd.f32 %v13781_v51, %v13775_v35  ;;  %v13785_v33 = vadd.f32 %v13781_v51, %v13776_v36  ;;  %v13800_v16 = vld [vmem:[%s25491_s17 + $0x58] sm:$0xff]  ;;  %v13817_v35 = vld [vmem:[%s25491_s17 + $0xe0] sm:$0xff]  ;;  %v13818_v51 = vld [vmem:[%s25491_s17 + $0xe8] sm:$0xff] }
0x1463   :  { %v13823_v36 = vld [vmem:[%s25491_s17 + $0x110] sm:$0xff] }
0x1464   :  { %v24981_v61 = vmax.f32 %v13783_v59, 0.0  ;;  %v24983_v44 = vmax.f32 %v13784_v20, 0.0  ;;  %v25017_v53 = vmax.f32 %v13785_v33, 0.0  ;;  %v19222_v59 = vpack.c.bf16 %v13800_v16, %v13799_v30  ;;  %v13826_v33 = vld [vmem:[%s25491_s17 + $0x128] sm:$0xff] }
0x1465   :  { %v19224_v20 = vpack.c.bf16 %v13818_v51, %v13817_v35  ;;  %v16333_v30 = vld [vmem:[%s25491_s17 + $0x368] sm:$0xff]  ;;  %v16316_v51 = vld [vmem:[%s25491_s17 + $0x2e0] sm:$0xff] }
0x1466   :  { %v13876_v1 = vrot.slane %v24983_v44, 2  ;;  %v13875_v10 = vrot.slane %v24981_v61, 2  ;;  %v13877_v7 = vrot.slane %v25017_v53, 2 }
0x1468   :  { %13949 = vmatprep.mubr.f32.mxu0 %v13876_v1  ;;  %v13819_v1 = vld [vmem:[%s25491_s17 + $0xf0] sm:$0xff] }
0x1469   :  { %13950 = vmatmul.mubr.f32.vlgmr.msra.gmra.mrb[194].mxu0 %v13875_v10  ;;  %v13820_v10 = vld [vmem:[%s25491_s17 + $0xf8] sm:$0xff] }
0x146a   :  { %19190 = vmatpush3.bf16.msra.mxu0 %v19189_v63  ;;  %18941 = vmatprep.mubr.msk.f32.mxu0 %vm20429_vm8, %v25595_v12  ;;  %v19226_v63 = vpack.c.bf16 %v13802_v39, %v13801_v54  ;;  %v19228_v23 = vpack.c.bf16 %v13820_v10, %v13819_v1  ;;  %v16335_v54 = vld [vmem:[%s25491_s17 + $0x378] sm:$0xff]  ;;  %v16318_v10 = vld [vmem:[%s25491_s17 + $0x2f0] sm:$0xff] }
0x146b   :  { %19191 = vmatprep.subr.bf16.mxu0 %v25593_v9 }
0x146e   :  { %19193 = vmatpush3.bf16.msra.mxu0 %v19192_v29  ;;  %v19230_v29 = vpack.c.bf16 %v13804_v31, %v13803_v43  ;;  %v16337_v43 = vld [vmem:[%s25491_s17 + $0x388] sm:$0xff] }
0x146f   :  { %19194 = vmatprep.subr.bf16.mxu0 %v25593_v9 }
0x1472   :  { %19196 = vmatpush3.bf16.msra.mxu0 %v19195_v26  ;;  %v13824_v26 = vld [vmem:[%s25491_s17 + $0x118] sm:$0xff] }
0x1473   :  { %19197 = vmatprep.subr.bf16.mxu0 %v25593_v9  ;;  %v19236_v46 = vpack.c.bf16 %v13824_v26, %v13823_v36  ;;  %v16338_v36 = vld [vmem:[%s25491_s17 + $0x390] sm:$0xff]  ;;  %v16339_v26 = vld [vmem:[%s25491_s17 + $0x398] sm:$0xff] }
0x1476   :  { %19199 = vmatpush3.bf16.msra.mxu0 %v19198_v62  ;;  %v19239_v62 = vpack.c.bf16 %v13826_v33, %v13825_v14  ;;  %v14212_v14 = vrot.slane %v24981_v61, 4  ;;  %v16340_v33 = vld [vmem:[%s25491_s17 + $0x3a0] sm:$0xff] }
0x1477   :  { %18939 = vmatprep.subr.mxu0 %v25595_v12 }
0x147a   :  { %18940 = vmatpush3.msk.msra.mxu0 %vm6974_vm6, %v16301_v2  ;;  %v16307_v2 = vld [vmem:[%s25491_s17 + $0x298] sm:$0xff] }
0x147b   :  { %18942 = vmatmul.mubr.msk.f32.vlgmr.msra.gmra.mrb[196].mxu0 %vm13589_vm9, %v13877_v7  ;;  %19201 = vmatprep.subr.bf16.mxu0 %v19200_v21  ;;  %v16324_v21 = vld [vmem:[%s25491_s17 + $0x320] sm:$0xff]  ;;  %v19246_v40 = vpack.c.bf16 %v16307_v2, %v16306_v25  ;;  %v16345_v25 = vld [vmem:[%s25491_s17 + $0x3c8] sm:$0xff] }
0x147c   :  { %19203 = vmatpush3.bf16.msra.mxu0 %v19202_v6  ;;  %14094 = vmatprep.mubr.f32.mxu0 %v24983_v44  ;;  %v16325_v6 = vld [vmem:[%s25491_s17 + $0x328] sm:$0xff]  ;;  %v13829_v7 = vld [vmem:[%s25491_s17 + $0x140] sm:$0xf] }
0x147d   :  { %19205 = vmatprep.subr.bf16.mxu0 %v19204_v48  ;;  %v19244_v48 = vpack.c.bf16 %v16323_v0, %v16322_v19  ;;  %v19248_v56 = vpack.c.bf16 %v16325_v6, %v16324_v21  ;;  %v16344_v0 = vld [vmem:[%s25491_s17 + $0x3c0] sm:$0xff]  ;;  %v16365_v21 = vld [vmem:[%s25491_s17 + $0x458] sm:$0xff] }
0x147e   :  { %v19286_v2 = vpack.c.bf16 %v16345_v25, %v16344_v0  ;;  %v16366_v6 = vld [vmem:[%s25491_s17 + $0x460] sm:$0xff] }
0x147f   :  { %v19288_v34 = vpack.c.bf16 %v16366_v6, %v16365_v21  ;;  %v16386_v25 = vld [vmem:[%s25491_s17 + $0x500] sm:$0xff]  ;;  %v16387_v21 = vld [vmem:[%s25491_s17 + $0x508] sm:$0xff]  ;;  %v16388_v6 = vld [vmem:[%s25491_s17 + $0x510] sm:$0xff] }
0x1480   :  { %19207 = vmatpush3.bf16.msra.mxu0 %v19206_v24  ;;  %v14213_v24 = vrot.slane %v24983_v44, 4 }
0x1481   :  { %19209 = vmatprep.subr.bf16.mxu0 %v19208_v55  ;;  %v16326_v55 = vld [vmem:[%s25491_s17 + $0x330] sm:$0xff] }
0x1482   :  { %v19252_v50 = vpack.c.bf16 %v16327_v28, %v16326_v55  ;;  %v14214_v55 = vrot.slane %v25017_v53, 4 }
0x1484   :  { %19211 = vmatpush3.bf16.msra.mxu0 %v19210_v52  ;;  %v16311_v52 = vld [vmem:[%s25491_s17 + $0x2b8] sm:$0xff] }
0x1485   :  { %19213 = vmatprep.subr.bf16.mxu0 %v19212_v17  ;;  %v16328_v17 = vld [vmem:[%s25491_s17 + $0x340] sm:$0xff]  ;;  %v19254_v27 = vpack.c.bf16 %v16311_v52, %v16310_v60  ;;  %v14406_v60 = vrot.slane %v24983_v44, 6  ;;  %v16369_v52 = vld [vmem:[%s25491_s17 + $0x478] sm:$0xff] }
0x1486   :  { %v19256_v38 = vpack.c.bf16 %v16329_v5, %v16328_v17  ;;  %v16370_v17 = vld [vmem:[%s25491_s17 + $0x480] sm:$0xff]  ;;  %v16353_v44 = vld [vmem:[%s25491_s17 + $0x3f8] sm:$0xff] }
0x1488   :  { %19215 = vmatpush3.bf16.msra.mxu0 %v19214_v15  ;;  %v16313_v15 = vld [vmem:[%s25491_s17 + $0x2c8] sm:$0xff] }
0x1489   :  { %19217 = vmatprep.subr.bf16.mxu0 %v19216_v32  ;;  %v16330_v32 = vld [vmem:[%s25491_s17 + $0x350] sm:$0xff]  ;;  %v19258_v22 = vpack.c.bf16 %v16313_v15, %v16312_v4  ;;  %v16371_v4 = vld [vmem:[%s25491_s17 + $0x488] sm:$0xff] }
0x148a   :  { %v19260_v8 = vpack.c.bf16 %v16331_v49, %v16330_v32  ;;  %v16372_v15 = vld [vmem:[%s25491_s17 + $0x490] sm:$0xff] }
0x148b   :  { %v19300_v49 = vpack.c.bf16 %v16372_v15, %v16371_v4 }
0x148c   :  { %19219 = vmatpush3.bf16.msra.mxu0 %v19218_v45  ;;  %v16315_v45 = vld [vmem:[%s25491_s17 + $0x2d8] sm:$0xff] }
0x148d   :  { %19221 = vmatprep.subr.bf16.mxu0 %v19220_v57  ;;  %v16332_v57 = vld [vmem:[%s25491_s17 + $0x360] sm:$0xff]  ;;  %v19262_v16 = vpack.c.bf16 %v16315_v45, %v16314_v18  ;;  %v16373_v18 = vld [vmem:[%s25491_s17 + $0x498] sm:$0xff] }
0x148e   :  { %v19264_v35 = vpack.c.bf16 %v16333_v30, %v16332_v57  ;;  %v16374_v45 = vld [vmem:[%s25491_s17 + $0x4a0] sm:$0xff] }
0x148f   :  { %v19304_v30 = vpack.c.bf16 %v16374_v45, %v16373_v18 }
0x1490   :  { %19223 = vmatpush3.bf16.msra.mxu0 %v19222_v59  ;;  %v16317_v59 = vld [vmem:[%s25491_s17 + $0x2e8] sm:$0xff] }
0x1491   :  { %19225 = vmatprep.subr.bf16.mxu0 %v19224_v20  ;;  %v16334_v20 = vld [vmem:[%s25491_s17 + $0x370] sm:$0xff]  ;;  %v19266_v39 = vpack.c.bf16 %v16317_v59, %v16316_v51  ;;  %v16375_v51 = vld [vmem:[%s25491_s17 + $0x4a8] sm:$0xff] }
0x1492   :  { %v19268_v1 = vpack.c.bf16 %v16335_v54, %v16334_v20  ;;  %v16376_v59 = vld [vmem:[%s25491_s17 + $0x4b0] sm:$0xff] }
0x1493   :  { %v19308_v54 = vpack.c.bf16 %v16376_v59, %v16375_v51 }
0x1494   :  { %19227 = vmatpush3.bf16.msra.mxu0 %v19226_v63  ;;  %v16319_v63 = vld [vmem:[%s25491_s17 + $0x2f8] sm:$0xff] }
0x1495   :  { %19229 = vmatprep.subr.bf16.mxu0 %v19228_v23  ;;  %v16336_v23 = vld [vmem:[%s25491_s17 + $0x380] sm:$0xff]  ;;  %v19270_v31 = vpack.c.bf16 %v16319_v63, %v16318_v10  ;;  %v16377_v10 = vld [vmem:[%s25491_s17 + $0x4b8] sm:$0xff] }
0x1496   :  { %v16378_v63 = vld [vmem:[%s25491_s17 + $0x4c0] sm:$0xff] }
0x1498   :  { %19231 = vmatpush3.bf16.msra.mxu0 %v19230_v29  ;;  %v19272_v29 = vpack.c.bf16 %v16337_v43, %v16336_v23  ;;  %v19312_v43 = vpack.c.bf16 %v16378_v63, %v16377_v10 }
0x1499   :  { %19232 = vmatprep.subr.bf16.mxu0 %v25593_v9 }
0x149b   :  { %14095 = vmatmul.mubr.f32.vlgmr.msra.gmra.mrb[198].mxu0 %v24981_v61 }
0x149c   :  { %19234 = vmatpush3.bf16.msra.mxu0 %v19233_v42  ;;  %18962 = vmatprep.mubr.msk.f32.mxu0 %vm20429_vm8, %v25595_v12  ;;  %v19274_v42 = vpack.c.bf16 %v16321_v3, %v16320_v13  ;;  %v16379_v13 = vld [vmem:[%s25491_s17 + $0x4c8] sm:$0xff]  ;;  %v16380_v3 = vld [vmem:[%s25491_s17 + $0x4d0] sm:$0xff] }
0x149d   :  { %19235 = vmatprep.subr.bf16.mxu0 %v25593_v9 }
0x14a0   :  { %19237 = vmatpush3.bf16.msra.mxu0 %v19236_v46  ;;  %v19277_v46 = vpack.c.bf16 %v16339_v26, %v16338_v36  ;;  %v19316_v36 = vpack.c.bf16 %v16380_v3, %v16379_v13  ;;  %v16363_v26 = vld [vmem:[%s25491_s17 + $0x448] sm:$0xff]  ;;  %v16393_v13 = vld [vmem:[%s25494_s20] ss:$0 sm:$0xff] }
0x14a1   :  { %19238 = vmatprep.subr.bf16.mxu0 %v25593_v9 }
0x14a4   :  { %19240 = vmatpush3.bf16.msra.mxu0 %v19239_v62  ;;  %v16341_v62 = vld [vmem:[%s25491_s17 + $0x3a8] sm:$0xff] }
0x14a5   :  { %19241 = vmatprep.subr.bf16.mxu0 %v25593_v9  ;;  %v19280_v47 = vpack.c.bf16 %v16341_v62, %v16340_v33  ;;  %v16381_v33 = vld [vmem:[%s25491_s17 + $0x4d8] sm:$0xff]  ;;  %v16382_v62 = vld [vmem:[%s25491_s17 + $0x4e0] sm:$0xff] }
0x14a8   :  { %19243 = vmatpush3.bf16.msra.mxu0 %v19242_v58  ;;  %v16343_v58 = vld [vmem:[%s25491_s17 + $0x3b8] sm:$0xff] }
0x14a9   :  { %18960 = vmatprep.subr.mxu0 %v25595_v12  ;;  %v19283_v19 = vpack.c.bf16 %v16343_v58, %v16342_v41  ;;  %v14405_v41 = vrot.slane %v24981_v61, 6  ;;  %v16383_v58 = vld [vmem:[%s25491_s17 + $0x4e8] sm:$0xff]  ;;  %v16385_v61 = vld [vmem:[%s25491_s17 + $0x4f8] sm:$0xff] }
0x14ac   :  { %18961 = vmatpush3.msk.msra.mxu0 %vm6974_vm6, %v13829_v7  ;;  %v16349_v7 = vld [vmem:[%s25491_s17 + $0x3d8] sm:$0xff] }
0x14ad   :  { %18963 = vmatmul.mubr.msk.f32.vlgmr.msra.gmra.mrb[200].mxu0 %vm13589_vm9, %v25017_v53  ;;  %19245 = vmatprep.subr.bf16.mxu0 %v19244_v48  ;;  %v16350_v48 = vld [vmem:[%s25491_s17 + $0x3e0] sm:$0xff] }
0x14ae   :  { %19247 = vmatpush3.bf16.msra.mxu0 %v19246_v40  ;;  %14286 = vmatprep.mubr.f32.mxu0 %v14213_v24  ;;  %v16367_v40 = vld [vmem:[%s25491_s17 + $0x468] sm:$0xff]  ;;  %v19290_v24 = vpack.c.bf16 %v16350_v48, %v16349_v7  ;;  %v19330_v7 = vpack.c.bf16 %v16388_v6, %v16387_v21  ;;  %v16389_v48 = vld [vmem:[%s25491_s17 + $0x518] sm:$0xf] }
0x14af   :  { %19249 = vmatprep.subr.bf16.mxu0 %v19248_v56  ;;  %v16368_v56 = vld [vmem:[%s25491_s17 + $0x470] sm:$0xff] }
0x14b0   :  { %v19292_v28 = vpack.c.bf16 %v16368_v56, %v16367_v40  ;;  %v14407_v40 = vrot.slane %v25017_v53, 6  ;;  %v14566_v53 = vld [vmem:[%s25493_s19 + $0x8] sm:$0xff] }
0x14b2   :  { %19251 = vmatpush3.bf16.msra.mxu0 %v19250_v11  ;;  %v16351_v11 = vld [vmem:[%s25491_s17 + $0x3e8] sm:$0xff] }
0x14b3   :  { %19253 = vmatprep.subr.bf16.mxu0 %v19252_v50  ;;  %v16352_v50 = vld [vmem:[%s25491_s17 + $0x3f0] sm:$0xff] }
0x14b4   :  { %v19294_v5 = vpack.c.bf16 %v16352_v50, %v16351_v11  ;;  %v14565_v11 = vld [vmem:[%s25493_s19] sm:$0xff]  ;;  %v14567_v50 = vld [vmem:[%s25493_s19 + $0x10] sm:$0xff] }
0x14b6   :  { %19255 = vmatpush3.bf16.msra.mxu0 %v19254_v27  ;;  %v19296_v27 = vpack.c.bf16 %v16370_v17, %v16369_v52  ;;  %v14569_v17 = vld [vmem:[%s25493_s19 + $0x20] sm:$0xff] }
0x14b7   :  { %19257 = vmatprep.subr.bf16.mxu0 %v19256_v38  ;;  %v16354_v38 = vld [vmem:[%s25491_s17 + $0x400] sm:$0xff] }
0x14b8   :  { %v19298_v32 = vpack.c.bf16 %v16354_v38, %v16353_v44  ;;  %v14571_v44 = vld [vmem:[%s25493_s19 + $0x30] sm:$0xff]  ;;  %v14572_v38 = vld [vmem:[%s25493_s19 + $0x38] sm:$0xf] }
0x14b9   :  { %v19342_v4 = vpack.c.bf16 %v14572_v38, %v14571_v44 }
0x14ba   :  { %19259 = vmatpush3.bf16.msra.mxu0 %v19258_v22  ;;  %v16355_v22 = vld [vmem:[%s25491_s17 + $0x408] sm:$0xff] }
0x14bb   :  { %19261 = vmatprep.subr.bf16.mxu0 %v19260_v8  ;;  %v16356_v8 = vld [vmem:[%s25491_s17 + $0x410] sm:$0xff] }
0x14bc   :  { %v19302_v57 = vpack.c.bf16 %v16356_v8, %v16355_v22 }
0x14be   :  { %19263 = vmatpush3.bf16.msra.mxu0 %v19262_v16  ;;  %v16357_v16 = vld [vmem:[%s25491_s17 + $0x418] sm:$0xff] }
0x14bf   :  { %19265 = vmatprep.subr.bf16.mxu0 %v19264_v35  ;;  %v16358_v35 = vld [vmem:[%s25491_s17 + $0x420] sm:$0xff] }
0x14c0   :  { %v19306_v20 = vpack.c.bf16 %v16358_v35, %v16357_v16 }
0x14c2   :  { %19267 = vmatpush3.bf16.msra.mxu0 %v19266_v39  ;;  %v16359_v39 = vld [vmem:[%s25491_s17 + $0x428] sm:$0xff] }
0x14c3   :  { %19269 = vmatprep.subr.bf16.mxu0 %v19268_v1  ;;  %v16360_v1 = vld [vmem:[%s25491_s17 + $0x430] sm:$0xff] }
0x14c4   :  { %v19310_v23 = vpack.c.bf16 %v16360_v1, %v16359_v39 }
0x14c6   :  { %19271 = vmatpush3.bf16.msra.mxu0 %v19270_v31  ;;  %v16361_v31 = vld [vmem:[%s25491_s17 + $0x438] sm:$0xff] }
0x14c7   :  { %19273 = vmatprep.subr.bf16.mxu0 %v19272_v29  ;;  %v16362_v29 = vld [vmem:[%s25491_s17 + $0x440] sm:$0xff] }
0x14ca   :  { %19275 = vmatpush3.bf16.msra.mxu0 %v19274_v42  ;;  %v19314_v42 = vpack.c.bf16 %v16362_v29, %v16361_v31 }
0x14cb   :  { %19276 = vmatprep.subr.bf16.mxu0 %v25593_v9 }
0x14cd   :  { %14287 = vmatmul.mubr.f32.vlgmr.msra.gmra.mrb[202].mxu0 %v14212_v14 }
0x14ce   :  { %19278 = vmatpush3.bf16.msra.mxu0 %v19277_v46  ;;  %18983 = vmatprep.mubr.msk.f32.mxu0 %vm20429_vm8, %v25595_v12  ;;  %v16364_v46 = vld [vmem:[%s25491_s17 + $0x450] sm:$0xff] }
0x14cf   :  { %19279 = vmatprep.subr.bf16.mxu0 %v25593_v9  ;;  %v19318_v14 = vpack.c.bf16 %v16364_v46, %v16363_v26 }
0x14d2   :  { %19281 = vmatpush3.bf16.msra.mxu0 %v19280_v47  ;;  %v19321_v47 = vpack.c.bf16 %v16382_v62, %v16381_v33 }
0x14d3   :  { %19282 = vmatprep.subr.bf16.mxu0 %v25593_v9 }
0x14d6   :  { %19284 = vmatpush3.bf16.msra.mxu0 %v19283_v19  ;;  %v16384_v19 = vld [vmem:[%s25491_s17 + $0x4f0] sm:$0xff] }
0x14d7   :  { %19285 = vmatprep.subr.bf16.mxu0 %v25593_v9  ;;  %v19324_v0 = vpack.c.bf16 %v16384_v19, %v16383_v58 }
0x14da   :  { %19287 = vmatpush3.bf16.msra.mxu0 %v19286_v2  ;;  %v19327_v2 = vpack.c.bf16 %v16386_v25, %v16385_v61 }
0x14db   :  { %18981 = vmatprep.subr.mxu0 %v25595_v12 }
0x14de   :  { %18982 = vmatpush3.msk.msra.mxu0 %vm6974_vm6, %v16346_v37 }
0x14df   :  { %18984 = vmatmul.mubr.msk.f32.vlgmr.msra.gmra.mrb[204].mxu0 %vm13589_vm9, %v14214_v55  ;;  %19289 = vmatprep.subr.bf16.mxu0 %v19288_v34 }
0x14e0   :  { %19291 = vmatpush3.bf16.msra.mxu0 %v19290_v24  ;;  %14479 = vmatprep.mubr.f32.mxu0 %v14406_v60  ;;  %v19333_v60 = vpack.c.bf16 %v14566_v53, %v14565_v11 }
0x14e1   :  { %19293 = vmatprep.subr.bf16.mxu0 %v19292_v28 }
0x14e4   :  { %19295 = vmatpush3.bf16.msra.mxu0 %v19294_v5  ;;  %v14570_v5 = vld [vmem:[%s25493_s19 + $0x28] sm:$0xff] }
0x14e5   :  { %19297 = vmatprep.subr.bf16.mxu0 %v19296_v27  ;;  %v19339_v27 = vpack.c.bf16 %v14570_v5, %v14569_v17 }
0x14e8   :  { %19299 = vmatpush3.bf16.msra.mxu0 %v19298_v32 }
0x14e9   :  { %19301 = vmatprep.subr.bf16.mxu0 %v19300_v49 }
0x14ec   :  { %19303 = vmatpush3.bf16.msra.mxu0 %v19302_v57 }
0x14ed   :  { %19305 = vmatprep.subr.bf16.mxu0 %v19304_v30 }
0x14f0   :  { %19307 = vmatpush3.bf16.msra.mxu0 %v19306_v20 }
0x14f1   :  { %19309 = vmatprep.subr.bf16.mxu0 %v19308_v54 }
0x14f4   :  { %19311 = vmatpush3.bf16.msra.mxu0 %v19310_v23  ;;  %v16392_v23 = vld [vmem:[%s25492_s18] ss:$0 sm:$0xff] }
0x14f5   :  { %19313 = vmatprep.subr.bf16.mxu0 %v19312_v43 }
0x14f8   :  { %19315 = vmatpush3.bf16.msra.mxu0 %v19314_v42 }
0x14f9   :  { %19317 = vmatprep.subr.bf16.mxu0 %v19316_v36 }
0x14fc   :  { %19319 = vmatpush3.bf16.msra.mxu0 %v19318_v14 }
0x14fd   :  { %19320 = vmatprep.subr.bf16.mxu0 %v25593_v9 }
0x14ff   :  { %14480 = vmatmul.mubr.f32.vlgmr.msra.gmra.mrb[206].mxu0 %v14405_v41 }
0x1500   :  { %19322 = vmatpush3.bf16.msra.mxu0 %v19321_v47  ;;  %19004 = vmatprep.mubr.msk.f32.mxu0 %vm20429_vm8, %v25595_v12 }
0x1501   :  { %19323 = vmatprep.subr.bf16.mxu0 %v25593_v9 }
0x1504   :  { %19325 = vmatpush3.bf16.msra.mxu0 %v19324_v0 }
0x1505   :  { %19326 = vmatprep.subr.bf16.mxu0 %v25593_v9 }
0x1508   :  { %19328 = vmatpush3.bf16.msra.mxu0 %v19327_v2 }
0x1509   :  { %19329 = vmatprep.subr.bf16.mxu0 %v25593_v9 }
0x150c   :  { %19331 = vmatpush3.bf16.msra.mxu0 %v19330_v7 }
0x150d   :  { %19002 = vmatprep.subr.mxu0 %v25595_v12 }
0x1510   :  { %19003 = vmatpush3.msk.msra.mxu0 %vm6974_vm6, %v16389_v48 }
0x1511   :  { %19005 = vmatmul.mubr.msk.f32.vlgmr.msra.gmra.mrb[208].mxu0 %vm13589_vm9, %v14407_v40  ;;  %19332 = vmatprep.subr.bf16.mxu0 %v25593_v9 }
0x1512   :  { %19023 = vmatprep.mubr.msk.f32.mxu0 %vm20429_vm8, %v25595_v12  ;;  %v14568_v12 = vld [vmem:[%s25493_s19 + $0x18] sm:$0xff]  ;;  %19334 = vmatpush3.bf16.msra.mxu0 %v19333_v60 }
0x1513   :  { %v19336_v52 = vpack.c.bf16 %v14568_v12, %v14567_v50  ;;  %19335 = vmatprep.subr.bf16.mxu0 %v25593_v9 }
0x1516   :  { %19337 = vmatpush3.bf16.msra.mxu0 %v19336_v52 }
0x1517   :  { %19338 = vmatprep.subr.bf16.mxu0 %v25593_v9 }
0x151a   :  { %19340 = vmatpush3.bf16.msra.mxu0 %v19339_v27 }
0x151b   :  { %19341 = vmatprep.subr.bf16.mxu0 %v25593_v9 }
0x151e   :  { %19344 = vmatpush3.bf16.msk.msra.mxu0 %vm19343_vm12, %v19342_v4 }
0x153c   :  { %v17237_v56 = vpop.f32.mrb[194].mxu0 }
0x153d   :  { %v17238_v37 = vpop.f32.mrb[195].mxu0 }
0x153e   :  { %v17239_v34 = vadd.f32 %v17238_v37, %v17237_v56 }
0x154e   :  { %v14021_v24 = vpop.f32.mrb[196].mxu0 }
0x154f   :  { %v14022_v55 = vadd.f32 %v17239_v34, %v14021_v24  ;;  %v18943_v28 = vpop.f32.mrb[197].mxu0 }
0x156e   :  { %v17282_v15 = vpop.f32.mrb[198].mxu0 }
0x156f   :  { %v17283_v32 = vpop.f32.mrb[199].mxu0 }
0x1570   :  { %v17284_v49 = vadd.f32 %v17283_v32, %v17282_v15 }
0x1572   :  { %v14097_v22 = vadd.f32 %v17284_v49, %v14022_v55 }
0x1580   :  { %v14166_v8 = vpop.f32.mrb[200].mxu0 }
0x1581   :  { %v14167_v18 = vadd.f32 %v14166_v8, %v14097_v22  ;;  %v18964_v9 = vpop.f32.mrb[201].mxu0 }
0x15a0   :  { %v17327_v45 = vpop.f32.mrb[202].mxu0 }
0x15a1   :  { %v17328_v57 = vpop.f32.mrb[203].mxu0 }
0x15a2   :  { %v17329_v30 = vadd.f32 %v17328_v57, %v17327_v45 }
0x15b2   :  { %v14358_v16 = vpop.f32.mrb[204].mxu0 }
0x15b3   :  { %v14359_v35 = vadd.f32 %v17329_v30, %v14358_v16  ;;  %v18985_v51 = vpop.f32.mrb[205].mxu0 }
0x15b5   :  { %v14362_v59 = vadd.f32 %v14359_v35, %v14167_v18 }
0x15d2   :  { %v17372_v20 = vpop.f32.mrb[206].mxu0 }
0x15d3   :  { %v17373_v54 = vpop.f32.mrb[207].mxu0 }
0x15d4   :  { %v17374_v39 = vadd.f32 %v17373_v54, %v17372_v20 }
0x15e4   :  { %v14551_v1 = vpop.f32.mrb[208].mxu0 }
0x15e5   :  { %v14552_v10 = vadd.f32 %v17374_v39, %v14551_v1  ;;  %v19006_v63 = vpop.f32.mrb[209].mxu0 }
0x15e7   :  { %v14555_v43 = vadd.f32 %v14552_v10, %v14362_v59 }
0x15e9   :  { %v14563_v31 = vadd.f32 %v16392_v23, %v14555_v43 }
0x15eb   :  { %v14564_v29 = vmax.f32 %v14563_v31, 0.0 }
0x15ed   :  { %19024 = vmatmul.mubr.msk.f32.vlgmr.msra.gmra.mrb[210].mxu0 %vm14580_vm13, %v14564_v29 }
0x16c0   :  { %v14653_v3 = vpop.f32.mrb[210].mxu0 }
0x16c1   :  { %v14654_v42 = vadd.f32 %v16393_v13, %v14653_v3  ;;  %v19025_v36 = vpop.f32.mrb[211].mxu0 }
0x16c3   :  { %14658 = vst.msk [vmem:[#allocation2] sm:$0x3] %vm14657_vm14, %v14654_v42 }
0x16c4   :  { %20412 = shalt.err (!%p20409_p4)
}
0x16c5   :  { %s20413_s6 = scalar_lea.hbm %s25495_s21, 32 }
0x16c6   :  { %p20414_p5 = scmp.ne.s32.totalorder %s25495_s21, %s20413_s6  ;;  %p20417_p6 = scmp.lt.u32.totalorder %s20413_s6, %s25495_s21 }
0x16c8   :  { %p20419_p7 = pnand %p20417_p6, %p20414_p5 }
0x16ca   :  { %20422 = shalt.err (!%p20419_p7)
}
0x16cb   :  { %14668 = dma.vmem_to_hbm [thread:$0]  %s14666_s26, 32, %s25495_s21, [#allocation3]  }
0x16cc   :  { %20423 = dma.done.wait [#allocation3], 32  }
0x16cd   :  { %20424 = vsyncadd [#allocation3], 4294967264 }
0x16ce   :  { %14672 = vsyncpa [#allocation3], 1 }

</bundles_post_ra>
